<compile_context>
chip_gen: v5e
topology: v5e:2x2
jax: 0.10.0
libtpu: 0.0.40
codegen_flags: <defaults>
</compile_context>

<pallas_src>
import functools

import jax
import jax.numpy as jnp
from jax.experimental import pallas as pl
from jax.experimental.pallas import tpu as pltpu

IN_DIM = 28 * 28        # 784
IN_PAD = 896            # 7 * 128
HID = 1200
HID_PAD = 1280          # 10 * 128
NUM_CLASSES = 10
OUT_PAD = 128


def _round_up(x, m):
    return (x + m - 1) // m * m


def _cdiv(a, b):
    return (a + b - 1) // b


def _teacher_kernel(x_ref, w1_ref, b1_ref, w2_ref, b2_ref, w3_ref, b3_ref,
                    out_ref):
    # x_ref: [TB, IN_PAD] bf16 batch tile; weights bf16, resident across grid.
    x = x_ref[...]

    # fc1 + ReLU  (bf16 MXU matmul, f32 accumulation)
    h1 = jnp.dot(x, w1_ref[...], preferred_element_type=jnp.float32)
    h1 = jnp.maximum(h1 + b1_ref[...], 0.0)

    # dropout(p=0.8) -> identity in eval mode

    # fc2 + ReLU
    h2 = jnp.dot(h1.astype(jnp.bfloat16), w2_ref[...],
                 preferred_element_type=jnp.float32)
    h2 = jnp.maximum(h2 + b2_ref[...], 0.0)

    # dropout(p=0.8) -> identity in eval mode

    # fc3 (logits), padded to 128 lanes for a dense store
    logits = jnp.dot(h2.astype(jnp.bfloat16), w3_ref[...],
                     preferred_element_type=jnp.float32)
    out_ref[...] = (logits + b3_ref[...]).astype(out_ref.dtype)


def prepare_params(params_f32):
    """Pad to lane-aligned shapes and cast weights to bf16 (biases stay f32)."""
    w1, b1, w2, b2, w3, b3 = params_f32

    def pad2(a, rows, cols):
        return jnp.pad(a, ((0, rows - a.shape[0]), (0, cols - a.shape[1])))

    w1p = pad2(w1, IN_PAD, HID_PAD).astype(jnp.bfloat16)
    w2p = pad2(w2, HID_PAD, HID_PAD).astype(jnp.bfloat16)
    w3p = pad2(w3, HID_PAD, OUT_PAD).astype(jnp.bfloat16)
    b1p = pad2(b1, 1, HID_PAD).astype(jnp.float32)
    b2p = pad2(b2, 1, HID_PAD).astype(jnp.float32)
    b3p = pad2(b3, 1, OUT_PAD).astype(jnp.float32)
    return (w1p, b1p, w2p, b2p, w3p, b3p)


@functools.partial(jax.jit, static_argnames=("tb",))
def teacher_net_forward(x_nchw, prepared_params, *, tb=512):
    """x_nchw: [B, 1, 28, 28] float32. Returns logits [B, NUM_CLASSES] f32."""
    w1, b1, w2, b2, w3, b3 = prepared_params
    B = x_nchw.shape[0]

    # Batch tile: multiple of 16 (bf16 sublane packing); aim for >= 2 tiles
    # whenever B allows so both TensorCores get work on v7x.
    b16 = _round_up(B, 16)
    if b16 > 16:
        TB = min(tb, _round_up(_cdiv(b16, 2), 16))
    else:
        TB = 16
    Bp = _round_up(B, TB)

    # Same flattening as torch x.view(-1, 784), then pad features to 896 lanes
    # and batch up to a multiple of the batch tile.
    x2d = x_nchw.reshape(B, IN_DIM).astype(jnp.bfloat16)
    x2d = jnp.pad(x2d, ((0, Bp - B), (0, IN_PAD - IN_DIM)))

    # Resident (never-changing) blocks: single buffer, DMA'd once.
    const = lambda shape: pl.BlockSpec(
        shape, lambda i: (0, 0), pipeline_mode=pl.Buffered(1))

    out = pl.pallas_call(
        _teacher_kernel,
        out_shape=jax.ShapeDtypeStruct((Bp, OUT_PAD), jnp.float32),
        grid=(Bp // TB,),
        in_specs=[
            pl.BlockSpec((TB, IN_PAD), lambda i: (i, 0)),   # x: tiled over batch
            const((IN_PAD, HID_PAD)),                       # W1 (bf16)
            const((1, HID_PAD)),                            # b1 (f32)
            const((HID_PAD, HID_PAD)),                      # W2 (bf16)
            const((1, HID_PAD)),                            # b2 (f32)
            const((HID_PAD, OUT_PAD)),                      # W3 (bf16)
            const((1, OUT_PAD)),                            # b3 (f32)
        ],
        out_specs=pl.BlockSpec((TB, OUT_PAD), lambda i: (i, 0)),
        compiler_params=pltpu.CompilerParams(
            dimension_semantics=("parallel",),
            vmem_limit_bytes=32 << 20,
        ),
    )(x2d, w1, b1, w2, b2, w3, b3)

    return out[:B, :NUM_CLASSES]


def init_params(key):
    """Deterministic synthetic f32 parameters with nn.Linear-like scaling."""
    ks = jax.random.split(key, 6)

    def linear(kw, kb, fan_in, fan_out):
        bound = 1.0 / jnp.sqrt(fan_in)
        w = jax.random.uniform(kw, (fan_in, fan_out), jnp.float32, -bound, bound)
        b = jax.random.uniform(kb, (1, fan_out), jnp.float32, -bound, bound)
        return w, b

    w1, b1 = linear(ks[0], ks[1], IN_DIM, HID)
    w2, b2 = linear(ks[2], ks[3], HID, HID)
    w3, b3 = linear(ks[4], ks[5], HID, NUM_CLASSES)
    return (w1, b1, w2, b2, w3, b3)


def _reference(x_nchw, params_f32):
    w1, b1, w2, b2, w3, b3 = params_f32
    x = x_nchw.reshape(x_nchw.shape[0], IN_DIM)
    h = jnp.maximum(x @ w1 + b1, 0.0)
    h = jnp.maximum(h @ w2 + b2, 0.0)
    return h @ w3 + b3


if __name__ == "__main__":
    key = jax.random.PRNGKey(0)
    k_params, k_x = jax.random.split(key)
    params_f32 = init_params(k_params)
    params = prepare_params(params_f32)

    B = 8
    x = jax.random.normal(k_x, (B, 1, 28, 28), jnp.float32)

    logits = jax.block_until_ready(teacher_net_forward(x, params))
    assert logits.shape == (B, NUM_CLASSES)

    # Also exercise the multi-tile (>= 2 grid steps) path.
    x_big = jax.random.normal(k_x, (48, 1, 28, 28), jnp.float32)
    logits_big = jax.block_until_ready(teacher_net_forward(x_big, params))
    assert logits_big.shape == (48, NUM_CLASSES)

    # bf16 weights/activations with f32 accumulation -> looser tolerance vs
    # the pure-f32 reference.
    ref = _reference(x, params_f32)
    assert jnp.allclose(logits, ref, atol=5e-2, rtol=5e-2), "mismatch vs reference"
    ref_big = _reference(x_big, params_f32)
    assert jnp.allclose(logits_big, ref_big, atol=5e-2, rtol=5e-2), "mismatch (big batch)"

    print("KERNEL_OK")
</pallas_src>

<mosaic_0001>
module attributes {stable_mosaic.version = 11 : i64} {
  func.func @_teacher_kernel(%arg0: i32, %arg1: memref<16x896xbf16, #tpu.memory_space<vmem>>, %arg2: memref<896x1280xbf16, #tpu.memory_space<vmem>>, %arg3: memref<1x1280xf32, #tpu.memory_space<vmem>>, %arg4: memref<1280x1280xbf16, #tpu.memory_space<vmem>>, %arg5: memref<1x1280xf32, #tpu.memory_space<vmem>>, %arg6: memref<1280x128xbf16, #tpu.memory_space<vmem>>, %arg7: memref<1x128xf32, #tpu.memory_space<vmem>>, %arg8: memref<16x128xf32, #tpu.memory_space<vmem>>) attributes {dimension_semantics = [#tpu.dimension_semantics<parallel>], iteration_bounds = array<i64: 1>, scalar_prefetch = 0 : i64, scratch_operands = 0 : i64, tpu.core_type = #tpu.core_type<tc>, window_params = [{transform_indices = @transform_0, window_bounds = array<i64: 16, 896>}, {pipeline_mode = #tpu.pipeline_mode<synchronous>, transform_indices = @transform_1, window_bounds = array<i64: 896, 1280>}, {pipeline_mode = #tpu.pipeline_mode<synchronous>, transform_indices = @transform_2, window_bounds = array<i64: 1, 1280>}, {pipeline_mode = #tpu.pipeline_mode<synchronous>, transform_indices = @transform_3, window_bounds = array<i64: 1280, 1280>}, {pipeline_mode = #tpu.pipeline_mode<synchronous>, transform_indices = @transform_4, window_bounds = array<i64: 1, 1280>}, {pipeline_mode = #tpu.pipeline_mode<synchronous>, transform_indices = @transform_5, window_bounds = array<i64: 1280, 128>}, {pipeline_mode = #tpu.pipeline_mode<synchronous>, transform_indices = @transform_6, window_bounds = array<i64: 1, 128>}, {transform_indices = @transform_7, window_bounds = array<i64: 16, 128>}]} {
    %c0 = arith.constant 0 : index
    %c0_0 = arith.constant 0 : index
    %0 = vector.load %arg1[%c0, %c0_0] : memref<16x896xbf16, #tpu.memory_space<vmem>>, vector<16x896xbf16>
    %c0_1 = arith.constant 0 : index
    %c0_2 = arith.constant 0 : index
    %1 = vector.load %arg2[%c0_1, %c0_2] : memref<896x1280xbf16, #tpu.memory_space<vmem>>, vector<896x1280xbf16>
    %cst = arith.constant dense<0.000000e+00> : vector<16x1280xf32>
    %2 = tpu.matmul %0, %1, %cst {dimension_numbers = #tpu.dot_dimension_numbers<[1], [0], [0], [1], [0, 0, 1, 1], [], []>} : vector<16x896xbf16>, vector<896x1280xbf16>, vector<16x1280xf32> -> vector<16x1280xf32>
    %c0_3 = arith.constant 0 : index
    %c0_4 = arith.constant 0 : index
    %3 = vector.load %arg3[%c0_3, %c0_4] : memref<1x1280xf32, #tpu.memory_space<vmem>>, vector<1x1280xf32>
    %4 = vector.broadcast %3 : vector<1x1280xf32> to vector<16x1280xf32>
    %5 = arith.addf %2, %4 : vector<16x1280xf32>
    %cst_5 = arith.constant 0.000000e+00 : f32
    %6 = vector.broadcast %cst_5 : f32 to vector<16x1280xf32>
    %7 = arith.maximumf %5, %6 : vector<16x1280xf32>
    %8 = arith.truncf %7 : vector<16x1280xf32> to vector<16x1280xbf16>
    %c0_6 = arith.constant 0 : index
    %c0_7 = arith.constant 0 : index
    %9 = vector.load %arg4[%c0_6, %c0_7] : memref<1280x1280xbf16, #tpu.memory_space<vmem>>, vector<1280x1280xbf16>
    %cst_8 = arith.constant dense<0.000000e+00> : vector<16x1280xf32>
    %10 = tpu.matmul %8, %9, %cst_8 {dimension_numbers = #tpu.dot_dimension_numbers<[1], [0], [0], [1], [0, 0, 1, 1], [], []>} : vector<16x1280xbf16>, vector<1280x1280xbf16>, vector<16x1280xf32> -> vector<16x1280xf32>
    %c0_9 = arith.constant 0 : index
    %c0_10 = arith.constant 0 : index
    %11 = vector.load %arg5[%c0_9, %c0_10] : memref<1x1280xf32, #tpu.memory_space<vmem>>, vector<1x1280xf32>
    %12 = vector.broadcast %11 : vector<1x1280xf32> to vector<16x1280xf32>
    %13 = arith.addf %10, %12 : vector<16x1280xf32>
    %cst_11 = arith.constant 0.000000e+00 : f32
    %14 = vector.broadcast %cst_11 : f32 to vector<16x1280xf32>
    %15 = arith.maximumf %13, %14 : vector<16x1280xf32>
    %16 = arith.truncf %15 : vector<16x1280xf32> to vector<16x1280xbf16>
    %c0_12 = arith.constant 0 : index
    %c0_13 = arith.constant 0 : index
    %17 = vector.load %arg6[%c0_12, %c0_13] : memref<1280x128xbf16, #tpu.memory_space<vmem>>, vector<1280x128xbf16>
    %cst_14 = arith.constant dense<0.000000e+00> : vector<16x128xf32>
    %18 = tpu.matmul %16, %17, %cst_14 {dimension_numbers = #tpu.dot_dimension_numbers<[1], [0], [0], [1], [0, 0, 1, 1], [], []>} : vector<16x1280xbf16>, vector<1280x128xbf16>, vector<16x128xf32> -> vector<16x128xf32>
    %c0_15 = arith.constant 0 : index
    %c0_16 = arith.constant 0 : index
    %19 = vector.load %arg7[%c0_15, %c0_16] : memref<1x128xf32, #tpu.memory_space<vmem>>, vector<1x128xf32>
    %20 = vector.broadcast %19 : vector<1x128xf32> to vector<16x128xf32>
    %21 = arith.addf %18, %20 : vector<16x128xf32>
    %c0_17 = arith.constant 0 : index
    %c0_18 = arith.constant 0 : index
    %22 = vector.load %arg8[%c0_17, %c0_18] : memref<16x128xf32, #tpu.memory_space<vmem>>, vector<16x128xf32>
    tpu.vector_store %arg8[%c0_17, %c0_18], %21 {strides = array<i32>} : memref<16x128xf32, #tpu.memory_space<vmem>>, vector<16x128xf32>,
    return
  }
  func.func @transform_0(%arg0: i32) -> (i32, i32) {
    %c0_i32 = arith.constant 0 : i32
    %c0_i32_0 = arith.constant 0 : i32
    return %arg0, %c0_i32 : i32, i32
  }
  func.func @transform_1(%arg0: i32) -> (i32, i32) {
    %c0_i32 = arith.constant 0 : i32
    %c0_i32_0 = arith.constant 0 : i32
    %c0_i32_1 = arith.constant 0 : i32
    return %c0_i32, %c0_i32_0 : i32, i32
  }
  func.func @transform_2(%arg0: i32) -> (i32, i32) {
    %c0_i32 = arith.constant 0 : i32
    %c0_i32_0 = arith.constant 0 : i32
    %c0_i32_1 = arith.constant 0 : i32
    return %c0_i32, %c0_i32_0 : i32, i32
  }
  func.func @transform_3(%arg0: i32) -> (i32, i32) {
    %c0_i32 = arith.constant 0 : i32
    %c0_i32_0 = arith.constant 0 : i32
    %c0_i32_1 = arith.constant 0 : i32
    return %c0_i32, %c0_i32_0 : i32, i32
  }
  func.func @transform_4(%arg0: i32) -> (i32, i32) {
    %c0_i32 = arith.constant 0 : i32
    %c0_i32_0 = arith.constant 0 : i32
    %c0_i32_1 = arith.constant 0 : i32
    return %c0_i32, %c0_i32_0 : i32, i32
  }
  func.func @transform_5(%arg0: i32) -> (i32, i32) {
    %c0_i32 = arith.constant 0 : i32
    %c0_i32_0 = arith.constant 0 : i32
    %c0_i32_1 = arith.constant 0 : i32
    return %c0_i32, %c0_i32_0 : i32, i32
  }
  func.func @transform_6(%arg0: i32) -> (i32, i32) {
    %c0_i32 = arith.constant 0 : i32
    %c0_i32_0 = arith.constant 0 : i32
    %c0_i32_1 = arith.constant 0 : i32
    return %c0_i32, %c0_i32_0 : i32, i32
  }
  func.func @transform_7(%arg0: i32) -> (i32, i32) {
    %c0_i32 = arith.constant 0 : i32
    %c0_i32_0 = arith.constant 0 : i32
    return %arg0, %c0_i32 : i32, i32
  }
}

</mosaic_0001>

<bundles_post_ra>
// kernel: teacher_net_forward.1
= control target key start
LH: loop header
LB: loop body
LE: loop exit
PB: predicated region body
PF: predicated region fallthrough
CT: control target
= control target key end

     0   :  { %12 = vsyncpa [#allocation3], 0  ;;  %s20029_s0 = inlined_call_operand.vmem [shape: bf16[16,896], index: 0, kind: input, shape index: {}]   ;;  %s20030_s1 = inlined_call_operand.hbm [shape: bf16[896,1280], index: 1, kind: input, shape index: {}]   ;;  %s20031_s2 = inlined_call_operand.hbm [shape: f32[1,1280], index: 2, kind: input, shape index: {}]   ;;  %s20032_s3 = inlined_call_operand.hbm [shape: bf16[1280,1280], index: 3, kind: input, shape index: {}]   ;;  %s20033_s4 = inlined_call_operand.hbm [shape: f32[1,1280], index: 4, kind: input, shape index: {}]   ;;  %s20034_s5 = inlined_call_operand.hbm [shape: bf16[1280,128], index: 5, kind: input, shape index: {}]   ;;  %s20035_s6 = inlined_call_operand.hbm [shape: f32[1,128], index: 6, kind: input, shape index: {}]   ;;  %s20036_s7 = inlined_call_operand.vmem [shape: f32[16,128], index: 7, kind: output, shape index: {}]  }
   0x1   :  { %13 = vsyncpa [#allocation5], 0 }
   0x2   :  { %14 = vsyncpa [#allocation8], 0  ;;  %s36_s26 = sshll.u32 %s20031_s2, 4  ;;  %s37_s26 = int_to_ptr.hbm [resolvable:$true] %s36_s26 }
   0x3   :  { %15 = vsyncpa [#allocation11], 0  ;;  %s19003_s27 = smov [#allocation4]   ;;  %s60_s8 = sshll.u32 %s20033_s4, 4  ;;  %s61_s8 = int_to_ptr.hbm [resolvable:$true] %s60_s8 }
   0x4   :  { %s38_s28 = sshll.u32 %s19003_s27, 4  ;;  %s19004_s9 = smov [#allocation7]   ;;  %s39_s28 = int_to_ptr.vmem [resolvable:$true] %s38_s28 }
   0x5   :  { %41 = dma.hbm_to_vmem [thread:$0]  %s37_s26, 160, %s39_s28, [#allocation5]  }
   0x6   :  { %s62_s10 = sshll.u32 %s19004_s9, 4  ;;  %s22_s13 = sshll.u32 %s20030_s1, 4  ;;  %s63_s10 = int_to_ptr.vmem [resolvable:$true] %s62_s10  ;;  %s23_s13 = int_to_ptr.hbm [resolvable:$true] %s22_s13 }
   0x7   :  { %65 = dma.hbm_to_vmem [thread:$0]  %s61_s8, 160, %s63_s10, [#allocation8]  }
   0x8   :  { %s19005_s2 = smov [#allocation2]   ;;  %s46_s17 = sshll.u32 %s20032_s3, 4  ;;  %s47_s17 = int_to_ptr.hbm [resolvable:$true] %s46_s17 }
   0x9   :  { %s24_s14 = sshll.u32 %s19005_s2, 4  ;;  %s19006_s18 = smov 640   ;;  %s25_s14 = int_to_ptr.vmem [resolvable:$true] %s24_s14 }
   0xa   :  { %s19007_s4 = smov 40   ;;  %s19008_s19 = smov [#allocation6]  }
   0xb   :  { %30 = dma.hbm_to_vmem [thread:$0]  %s23_s13, 71680, %s25_s14, [#allocation3], %s19006_s18, %s19006_s18, %s19007_s4  }
   0xc   :  { %s48_s20 = sshll.u32 %s19008_s19, 4  ;;  %s70_s1 = sshll.u32 %s20034_s5, 4  ;;  %s49_s20 = int_to_ptr.vmem [resolvable:$true] %s48_s20  ;;  %s71_s1 = int_to_ptr.hbm [resolvable:$true] %s70_s1 }
   0xd   :  { %54 = dma.hbm_to_vmem [thread:$0]  %s47_s17, 102400, %s49_s20, [#allocation5], %s19006_s18, %s19006_s18, %s19007_s4  }
   0xe   :  { %s19009_s23 = smov [#allocation9]   ;;  %s84_s3 = sshll.u32 %s20035_s6, 4  ;;  %s85_s3 = int_to_ptr.hbm [resolvable:$true] %s84_s3 }
   0xf   :  { %s72_s24 = sshll.u32 %s19009_s23, 4  ;;  %s19010_s27 = smov 64   ;;  %s73_s24 = int_to_ptr.vmem [resolvable:$true] %s72_s24 }
  0x10   :  { %s19011_s28 = smov 4   ;;  %s19012_s29 = smov [#allocation10]  }
  0x11   :  { %78 = dma.hbm_to_vmem [thread:$0]  %s71_s1, 10240, %s73_s24, [#allocation8], %s19010_s27, %s19010_s27, %s19011_s28  }
  0x12   :  { %s86_s30 = sshll.u32 %s19012_s29, 4  ;;  %s87_s30 = int_to_ptr.vmem [resolvable:$true] %s86_s30 }
  0x13   :  { %89 = dma.hbm_to_vmem [thread:$0]  %s85_s3, 16, %s87_s30, [#allocation11]  }
  0x14   :  { %18995 = dma.done.wait [#allocation3], 71680  }
  0x15   :  { %18996 = vsyncadd [#allocation3], 4294895616 }
  0x16   :  { %18997 = dma.done.wait [#allocation5], 102560  }
  0x17   :  { %18998 = vsyncadd [#allocation5], 4294864736 }
  0x18   :  { %18999 = dma.done.wait [#allocation8], 10400  }
  0x19   :  { %19000 = vsyncadd [#allocation8], 4294956896 }
  0x1a   :  { %19001 = dma.done.wait [#allocation11], 16  }
  0x1b   :  { %19002 = vsyncadd [#allocation11], 4294967280  ;;  %v11910_v0 = vld [vmem:[#allocation2 + $0x230] sm:$0xf]  ;;  %v17470_v1 = vld [vmem:[#allocation2 + $0x254] sm:$0xf0] }
  0x1c   :  { %v12230_v2 = vld [vmem:[#allocation2 + $0x4b0] sm:$0xf]  ;;  %v11911_v3 = vor.u32 %v17470_v1, %v11910_v0  ;;  %v17550_v4 = vld [vmem:[#allocation2 + $0x4d4] sm:$0xf0]  ;;  %v11870_v11 = vld [vmem:[#allocation2 + $0x1e0] sm:$0xf] }
  0x1d   :  { %v12550_v5 = vld [vmem:[#allocation2 + $0x730] sm:$0xf]  ;;  %v17630_v6 = vld [vmem:[#allocation2 + $0x754] sm:$0xf0]  ;;  %v12231_v7 = vor.u32 %v17550_v4, %v12230_v2  ;;  %v17460_v13 = vld [vmem:[#allocation2 + $0x204] sm:$0xf0] }
  0x1e   :  { %v12551_v8 = vor.u32 %v17630_v6, %v12550_v5  ;;  %v12870_v9 = vld [vmem:[#allocation2 + $0x9b0] sm:$0xf]  ;;  %v17710_v10 = vld [vmem:[#allocation2 + $0x9d4] sm:$0xf0]  ;;  %3542 = vmatpush.bf16.msra.mxu0 %v11911_v3  ;;  %v12190_v14 = vld [vmem:[#allocation2 + $0x460] sm:$0xf]  ;;  %v11871_v16 = vor.u32 %v17460_v13, %v11870_v11 }
  0x1f   :  { %v12871_v12 = vor.u32 %v17710_v10, %v12870_v9  ;;  %v17540_v15 = vld [vmem:[#allocation2 + $0x484] sm:$0xf0]  ;;  %3556 = vmatpush.bf16.msra.mxu1 %v12231_v7  ;;  %v12510_v18 = vld [vmem:[#allocation2 + $0x6e0] sm:$0xf]  ;;  %v11830_v23 = vld [vmem:[#allocation2 + $0x190] sm:$0xf] }
  0x20   :  { %3570 = vmatpush.bf16.msra.mxu2 %v12551_v8  ;;  %v12191_v17 = vor.u32 %v17540_v15, %v12190_v14  ;;  %v17620_v19 = vld [vmem:[#allocation2 + $0x704] sm:$0xf0]  ;;  %v12830_v20 = vld [vmem:[#allocation2 + $0x960] sm:$0xf]  ;;  %v17450_v24 = vld [vmem:[#allocation2 + $0x1b4] sm:$0xf0] }
  0x21   :  { %3584 = vmatpush.bf16.msra.mxu3 %v12871_v12  ;;  %v12511_v21 = vor.u32 %v17620_v19, %v12510_v18  ;;  %v17700_v22 = vld [vmem:[#allocation2 + $0x984] sm:$0xf0]  ;;  %v12150_v26 = vld [vmem:[#allocation2 + $0x410] sm:$0xf]  ;;  %v17530_v27 = vld [vmem:[#allocation2 + $0x434] sm:$0xf0]  ;;  %v11831_v29 = vor.u32 %v17450_v24, %v11830_v23 }
  0x22   :  { %v12831_v25 = vor.u32 %v17700_v22, %v12830_v20  ;;  %v12470_v28 = vld [vmem:[#allocation2 + $0x690] sm:$0xf]  ;;  %3543 = vmatpush.bf16.msra.mxu0 %v11871_v16  ;;  %v17610_v30 = vld [vmem:[#allocation2 + $0x6b4] sm:$0xf0]  ;;  %v12151_v33 = vor.u32 %v17530_v27, %v12150_v26  ;;  %v11790_v35 = vld [vmem:[#allocation2 + $0x140] sm:$0xf] }
  0x23   :  { %v12790_v31 = vld [vmem:[#allocation2 + $0x910] sm:$0xf]  ;;  %v17690_v32 = vld [vmem:[#allocation2 + $0x934] sm:$0xf0]  ;;  %3557 = vmatpush.bf16.msra.mxu1 %v12191_v17  ;;  %v12471_v34 = vor.u32 %v17610_v30, %v12470_v28  ;;  %v17440_v36 = vld [vmem:[#allocation2 + $0x164] sm:$0xf0] }
  0x24   :  { %3571 = vmatpush.bf16.msra.mxu2 %v12511_v21  ;;  %v12110_v37 = vld [vmem:[#allocation2 + $0x3c0] sm:$0xf]  ;;  %v12791_v38 = vor.u32 %v17690_v32, %v12790_v31  ;;  %v17520_v39 = vld [vmem:[#allocation2 + $0x3e4] sm:$0xf0]  ;;  %v11791_v44 = vor.u32 %v17440_v36, %v11790_v35  ;;  %v11750_v47 = vld [vmem:[#allocation2 + $0xf0] sm:$0xf] }
  0x25   :  { %3585 = vmatpush.bf16.msra.mxu3 %v12831_v25  ;;  %v12430_v40 = vld [vmem:[#allocation2 + $0x640] sm:$0xf]  ;;  %v17600_v41 = vld [vmem:[#allocation2 + $0x664] sm:$0xf0]  ;;  %v12111_v45 = vor.u32 %v17520_v39, %v12110_v37  ;;  %v17430_v48 = vld [vmem:[#allocation2 + $0x114] sm:$0xf0] }
  0x26   :  { %v12750_v42 = vld [vmem:[#allocation2 + $0x8c0] sm:$0xf]  ;;  %v17680_v43 = vld [vmem:[#allocation2 + $0x8e4] sm:$0xf0]  ;;  %3544 = vmatpush.bf16.msra.mxu0 %v11831_v29  ;;  %v12431_v46 = vor.u32 %v17600_v41, %v12430_v40  ;;  %v12070_v49 = vld [vmem:[#allocation2 + $0x370] sm:$0xf]  ;;  %v11751_v56 = vor.u32 %v17430_v48, %v11750_v47 }
  0x27   :  { %3558 = vmatpush.bf16.msra.mxu1 %v12151_v33  ;;  %v12751_v50 = vor.u32 %v17680_v43, %v12750_v42  ;;  %v17510_v51 = vld [vmem:[#allocation2 + $0x394] sm:$0xf0]  ;;  %v12390_v52 = vld [vmem:[#allocation2 + $0x5f0] sm:$0xf]  ;;  %v11710_v59 = vld [vmem:[#allocation2 + $0xa0] sm:$0xf] }
  0x28   :  { %3572 = vmatpush.bf16.msra.mxu2 %v12471_v34  ;;  %v17590_v53 = vld [vmem:[#allocation2 + $0x614] sm:$0xf0]  ;;  %v12710_v54 = vld [vmem:[#allocation2 + $0x870] sm:$0xf]  ;;  %v12071_v57 = vor.u32 %v17510_v51, %v12070_v49  ;;  %v17420_v60 = vld [vmem:[#allocation2 + $0xc4] sm:$0xf0] }
  0x29   :  { %3586 = vmatpush.bf16.msra.mxu3 %v12791_v38  ;;  %v17670_v55 = vld [vmem:[#allocation2 + $0x894] sm:$0xf0]  ;;  %v12391_v58 = vor.u32 %v17590_v53, %v12390_v52  ;;  %v12030_v61 = vld [vmem:[#allocation2 + $0x320] sm:$0xf]  ;;  %v17500_v63 = vld [vmem:[#allocation2 + $0x344] sm:$0xf0]  ;;  %v11711_v4 = vor.u32 %v17420_v60, %v11710_v59 }
  0x2a   :  { %3545 = vmatpush.bf16.msra.mxu0 %v11791_v44  ;;  %v12711_v62 = vor.u32 %v17670_v55, %v12710_v54  ;;  %v12350_v0 = vld [vmem:[#allocation2 + $0x5a0] sm:$0xf]  ;;  %v17580_v1 = vld [vmem:[#allocation2 + $0x5c4] sm:$0xf0]  ;;  %v12031_v5 = vor.u32 %v17500_v63, %v12030_v61  ;;  %v11670_v7 = vld [vmem:[#allocation2 + $0x50] sm:$0xf] }
  0x2b   :  { %3559 = vmatpush.bf16.msra.mxu1 %v12111_v45  ;;  %v12670_v2 = vld [vmem:[#allocation2 + $0x820] sm:$0xf]  ;;  %v17660_v3 = vld [vmem:[#allocation2 + $0x844] sm:$0xf0]  ;;  %v12351_v6 = vor.u32 %v17580_v1, %v12350_v0  ;;  %v17410_v8 = vld [vmem:[#allocation2 + $0x74] sm:$0xf0] }
  0x2c   :  { %3573 = vmatpush.bf16.msra.mxu2 %v12431_v46  ;;  %v11990_v9 = vld [vmem:[#allocation2 + $0x2d0] sm:$0xf]  ;;  %v12671_v10 = vor.u32 %v17660_v3, %v12670_v2  ;;  %v17490_v11 = vld [vmem:[#allocation2 + $0x2f4] sm:$0xf0]  ;;  %v11671_v16 = vor.u32 %v17410_v8, %v11670_v7  ;;  %v11630_v17 = vld [vmem:[#allocation2] sm:$0xf] }
  0x2d   :  { %3587 = vmatpush.bf16.msra.mxu3 %v12751_v50  ;;  %v12310_v12 = vld [vmem:[#allocation2 + $0x550] sm:$0xf]  ;;  %v17570_v13 = vld [vmem:[#allocation2 + $0x574] sm:$0xf0]  ;;  %v17400_v18 = vld [vmem:[#allocation2 + $0x24] sm:$0xf0]  ;;  %v11991_v19 = vor.u32 %v17490_v11, %v11990_v9 }
  0x2e   :  { %3546 = vmatpush.bf16.msra.mxu0 %v11751_v56  ;;  %v12630_v14 = vld [vmem:[#allocation2 + $0x7d0] sm:$0xf]  ;;  %v17650_v15 = vld [vmem:[#allocation2 + $0x7f4] sm:$0xf0]  ;;  %v12311_v20 = vor.u32 %v17570_v13, %v12310_v12  ;;  %v11950_v21 = vld [vmem:[#allocation2 + $0x280] sm:$0xf]  ;;  %v11631_v31 = vor.u32 %v17400_v18, %v11630_v17 }
  0x2f   :  { %3560 = vmatpush.bf16.msra.mxu1 %v12071_v57  ;;  %v17480_v22 = vld [vmem:[#allocation2 + $0x2a4] sm:$0xf0]  ;;  %v12270_v23 = vld [vmem:[#allocation2 + $0x500] sm:$0xf]  ;;  %v12631_v24 = vor.u32 %v17650_v15, %v12630_v14  ;;  %v13190_v28 = vld [vmem:[#allocation2 + $0xc30] sm:$0xf] }
  0x30   :  { %3574 = vmatpush.bf16.msra.mxu2 %v12391_v58  ;;  %v17560_v25 = vld [vmem:[#allocation2 + $0x524] sm:$0xf0]  ;;  %v12590_v26 = vld [vmem:[#allocation2 + $0x780] sm:$0xf]  ;;  %v17790_v29 = vld [vmem:[#allocation2 + $0xc54] sm:$0xf0]  ;;  %v11951_v35 = vor.u32 %v17480_v22, %v11950_v21 }
  0x31   :  { %3588 = vmatpush.bf16.msra.mxu3 %v12711_v62  ;;  %v17640_v27 = vld [vmem:[#allocation2 + $0x7a4] sm:$0xf0]  ;;  %v13510_v30 = vld [vmem:[#allocation2 + $0xeb0] sm:$0xf]  ;;  %v17870_v32 = vld [vmem:[#allocation2 + $0xed4] sm:$0xf0]  ;;  %v12271_v36 = vor.u32 %v17560_v25, %v12270_v23  ;;  %v13191_v40 = vor.u32 %v17790_v29, %v13190_v28 }
  0x32   :  { %3547 = vmatpush.bf16.msra.mxu0 %v11711_v4  ;;  %v13830_v33 = vld [vmem:[#allocation2 + $0x1130] sm:$0xf]  ;;  %v17950_v34 = vld [vmem:[#allocation2 + $0x1154] sm:$0xf0]  ;;  %v17465_v37 = vld [vmem:[#allocation2 + $0x234] sm:$0xf]  ;;  %v12591_v39 = vor.u32 %v17640_v27, %v12590_v26  ;;  %v13511_v43 = vor.u32 %v17870_v32, %v13510_v30 }
  0x33   :  { %3561 = vmatpush.bf16.msra.mxu1 %v12031_v5  ;;  %v11912_v38 = vld [vmem:[#allocation2 + $0x258] sm:$0xf0]  ;;  %v13150_v41 = vld [vmem:[#allocation2 + $0xbe0] sm:$0xf]  ;;  %v17780_v42 = vld [vmem:[#allocation2 + $0xc04] sm:$0xf0]  ;;  %v13831_v44 = vor.u32 %v17950_v34, %v13830_v33 }
  0x34   :  { %3575 = vmatpush.bf16.msra.mxu2 %v12351_v6  ;;  %v13470_v45 = vld [vmem:[#allocation2 + $0xe60] sm:$0xf]  ;;  %v17860_v46 = vld [vmem:[#allocation2 + $0xe84] sm:$0xf0]  ;;  %v11915_v48 = vor.u32 %v17465_v37, %v11912_v38  ;;  %v17455_v50 = vld [vmem:[#allocation2 + $0x1e4] sm:$0xf]  ;;  %v13151_v55 = vor.u32 %v17780_v42, %v13150_v41 }
  0x35   :  { %3589 = vmatpush.bf16.msra.mxu3 %v12671_v10  ;;  %v13790_v47 = vld [vmem:[#allocation2 + $0x10e0] sm:$0xf]  ;;  %v17940_v49 = vld [vmem:[#allocation2 + $0x1104] sm:$0xf0]  ;;  %v11872_v51 = vld [vmem:[#allocation2 + $0x208] sm:$0xf0]  ;;  %v13471_v59 = vor.u32 %v17860_v46, %v13470_v45 }
  0x36   :  { %3548 = vmatpush.bf16.msra.mxu0 %v11671_v16  ;;  %v11602_v52 = vld [vmem:[%s20029_s0] sm:$0xf]  ;;  %v17391_v53 = vld [vmem:[%s20029_s0 + $0x18] sm:$0xf0]  ;;  %v11610_v54 = vld [vmem:[%s20029_s0 + $0x8] sm:$0xf]  ;;  %v13791_v60 = vor.u32 %v17940_v49, %v13790_v47  ;;  %v11875_v1 = vor.u32 %v17455_v50, %v11872_v51 }
  0x37   :  { %3562 = vmatpush.bf16.msra.mxu1 %v11991_v19  ;;  %v13110_v56 = vld [vmem:[#allocation2 + $0xb90] sm:$0xf]  ;;  %v19080_v57 = vor.u32 %v17391_v53, %v11602_v52  ;;  %v17392_v58 = vld [vmem:[%s20029_s0 + $0x20] sm:$0xf0]  ;;  %v17770_v61 = vld [vmem:[#allocation2 + $0xbb4] sm:$0xf0] }
  0x38   :  { %3576 = vmatpush.bf16.msra.mxu2 %v12311_v20  ;;  %v13430_v62 = vld [vmem:[#allocation2 + $0xe10] sm:$0xf]  ;;  %v17850_v63 = vld [vmem:[#allocation2 + $0xe34] sm:$0xf0]  ;;  %v19085_v0 = vor.u32 %v17392_v58, %v11610_v54  ;;  %v17445_v4 = vld [vmem:[#allocation2 + $0x194] sm:$0xf]  ;;  %v13111_v8 = vor.u32 %v17770_v61, %v13110_v56 }
  0x39   :  { %3590 = vmatpush.bf16.msra.mxu3 %v12631_v24  ;;  %v13750_v2 = vld [vmem:[#allocation2 + $0x1090] sm:$0xf]  ;;  %v17930_v3 = vld [vmem:[#allocation2 + $0x10b4] sm:$0xf0]  ;;  %v11832_v5 = vld [vmem:[#allocation2 + $0x1b8] sm:$0xf0]  ;;  %v13431_v12 = vor.u32 %v17850_v63, %v13430_v62 }
  0x3a   :  { %3549 = vmatpush.bf16.msra.mxu0 %v11631_v31  ;;  %v17388_v6 = vld [vmem:[%s20029_s0 + $0x4] sm:$0xf]  ;;  %v11604_v7 = vld [vmem:[%s20029_s0 + $0x1c] sm:$0xf0]  ;;  %v17760_v10 = vld [vmem:[#allocation2 + $0xb64] sm:$0xf0]  ;;  %v13751_v13 = vor.u32 %v17930_v3, %v13750_v2  ;;  %v11835_v17 = vor.u32 %v17445_v4, %v11832_v5 }
  0x3b   :  { %3563 = vmatpush.bf16.msra.mxu1 %v11951_v35  ;;  %v13070_v9 = vld [vmem:[#allocation2 + $0xb40] sm:$0xf]  ;;  %v19095_v11 = vor.u32 %v17388_v6, %v11604_v7  ;;  %v17840_v15 = vld [vmem:[#allocation2 + $0xde4] sm:$0xf0]  ;;  %v17389_v19 = vld [vmem:[%s20029_s0 + $0xc] sm:$0xf] }
  0x3c   :  { %3577 = vmatpush.bf16.msra.mxu2 %v12271_v36  ;;  %v13390_v14 = vld [vmem:[#allocation2 + $0xdc0] sm:$0xf]  ;;  %v17920_v18 = vld [vmem:[#allocation2 + $0x1064] sm:$0xf0]  ;;  %v17435_v21 = vld [vmem:[#allocation2 + $0x144] sm:$0xf]  ;;  %v13071_v24 = vor.u32 %v17760_v10, %v13070_v9 }
  0x3d   :  { %3591 = vmatpush.bf16.msra.mxu3 %v12591_v39  ;;  %3550 = vmatmul.bf16.vlgmr.msra.gmra.mxu0 %v19080_v57  ;;  %v13710_v16 = vld [vmem:[#allocation2 + $0x1040] sm:$0xf]  ;;  %v11612_v20 = vld [vmem:[%s20029_s0 + $0x24] sm:$0xf0]  ;;  %v11792_v22 = vld [vmem:[#allocation2 + $0x168] sm:$0xf0]  ;;  %v13391_v25 = vor.u32 %v17840_v15, %v13390_v14 }
  0x3e   :  { %3598 = vmatpush.bf16.msrb.mxu0 %v13191_v40  ;;  %3564 = vmatmul.bf16.vlgmr.msra.gmra.mxu1 %v19095_v11  ;;  %v19104_v23 = vor.u32 %v17389_v19, %v11612_v20  ;;  %v13711_v26 = vor.u32 %v17920_v18, %v13710_v16  ;;  %v13030_v27 = vld [vmem:[#allocation2 + $0xaf0] sm:$0xf]  ;;  %v17750_v28 = vld [vmem:[#allocation2 + $0xb14] sm:$0xf0]  ;;  %v11795_v30 = vor.u32 %v17435_v21, %v11792_v22  ;;  %v17425_v34 = vld [vmem:[#allocation2 + $0xf4] sm:$0xf] }
  0x3f   :  { %3612 = vmatpush.bf16.msrb.mxu1 %v13511_v43  ;;  %3578 = vmatmul.bf16.vlgmr.msra.gmra.mxu2 %v19085_v0  ;;  %v13350_v29 = vld [vmem:[#allocation2 + $0xd70] sm:$0xf]  ;;  %v17830_v31 = vld [vmem:[#allocation2 + $0xd94] sm:$0xf0]  ;;  %v11752_v35 = vld [vmem:[#allocation2 + $0x118] sm:$0xf0]  ;;  %v13031_v36 = vor.u32 %v17750_v28, %v13030_v27 }
  0x40   :  { %3626 = vmatpush.bf16.msrb.mxu2 %v13831_v44  ;;  %v13670_v32 = vld [vmem:[#allocation2 + $0xff0] sm:$0xf]  ;;  %v17910_v33 = vld [vmem:[#allocation2 + $0x1014] sm:$0xf0]  ;;  %3592 = vmatmul.bf16.vlgmr.msra.gmra.mxu3 %v19104_v23  ;;  %v13351_v37 = vor.u32 %v17830_v31, %v13350_v29  ;;  %v12990_v39 = vld [vmem:[#allocation2 + $0xaa0] sm:$0xf]  ;;  %v11755_v42 = vor.u32 %v17425_v34, %v11752_v35 }
  0x41   :  { %3640 = vmatpush.bf16.msrb.mxu3 %v11915_v48  ;;  %v13671_v38 = vor.u32 %v17910_v33, %v13670_v32  ;;  %v17740_v40 = vld [vmem:[#allocation2 + $0xac4] sm:$0xf0]  ;;  %v13310_v41 = vld [vmem:[#allocation2 + $0xd20] sm:$0xf]  ;;  %v17415_v46 = vld [vmem:[#allocation2 + $0xa4] sm:$0xf] }
  0x42   :  { %3599 = vmatpush.bf16.msrb.mxu0 %v13151_v55  ;;  %v17820_v43 = vld [vmem:[#allocation2 + $0xd44] sm:$0xf0]  ;;  %v13630_v44 = vld [vmem:[#allocation2 + $0xfa0] sm:$0xf]  ;;  %v11712_v47 = vld [vmem:[#allocation2 + $0xc8] sm:$0xf0]  ;;  %v12991_v48 = vor.u32 %v17740_v40, %v12990_v39 }
  0x43   :  { %3613 = vmatpush.bf16.msrb.mxu1 %v13471_v59  ;;  %v17900_v45 = vld [vmem:[#allocation2 + $0xfc4] sm:$0xf0]  ;;  %v13311_v49 = vor.u32 %v17820_v43, %v13310_v41  ;;  %v12950_v51 = vld [vmem:[#allocation2 + $0xa50] sm:$0xf]  ;;  %v17730_v52 = vld [vmem:[#allocation2 + $0xa74] sm:$0xf0]  ;;  %v11715_v54 = vor.u32 %v17415_v46, %v11712_v47 }
  0x44   :  { %3627 = vmatpush.bf16.msrb.mxu2 %v13791_v60  ;;  %v13631_v50 = vor.u32 %v17900_v45, %v13630_v44  ;;  %v13270_v53 = vld [vmem:[#allocation2 + $0xcd0] sm:$0xf]  ;;  %v17810_v55 = vld [vmem:[#allocation2 + $0xcf4] sm:$0xf0]  ;;  %v17405_v59 = vld [vmem:[#allocation2 + $0x54] sm:$0xf]  ;;  %v12951_v62 = vor.u32 %v17730_v52, %v12950_v51 }
  0x45   :  { %3641 = vmatpush.bf16.msrb.mxu3 %v11875_v1  ;;  %v13590_v56 = vld [vmem:[#allocation2 + $0xf50] sm:$0xf]  ;;  %v17890_v58 = vld [vmem:[#allocation2 + $0xf74] sm:$0xf0]  ;;  %v11672_v60 = vld [vmem:[#allocation2 + $0x78] sm:$0xf0]  ;;  %v13271_v3 = vor.u32 %v17810_v55, %v13270_v53 }
  0x46   :  { %3600 = vmatpush.bf16.msrb.mxu0 %v13111_v8  ;;  %v12910_v61 = vld [vmem:[#allocation2 + $0xa00] sm:$0xf]  ;;  %v17720_v63 = vld [vmem:[#allocation2 + $0xa24] sm:$0xf0]  ;;  %v13591_v4 = vor.u32 %v17890_v58, %v13590_v56  ;;  %v17395_v7 = vld [vmem:[#allocation2 + $0x4] sm:$0xf]  ;;  %v11675_v8 = vor.u32 %v17405_v59, %v11672_v60 }
  0x47   :  { %3614 = vmatpush.bf16.msrb.mxu1 %v13431_v12  ;;  %v13230_v1 = vld [vmem:[#allocation2 + $0xc80] sm:$0xf]  ;;  %v17800_v2 = vld [vmem:[#allocation2 + $0xca4] sm:$0xf0]  ;;  %v11632_v9 = vld [vmem:[#allocation2 + $0x28] sm:$0xf0]  ;;  %v12911_v16 = vor.u32 %v17720_v63, %v12910_v61 }
  0x48   :  { %3628 = vmatpush.bf16.msrb.mxu2 %v13751_v13  ;;  %v13550_v5 = vld [vmem:[#allocation2 + $0xf00] sm:$0xf]  ;;  %v17880_v6 = vld [vmem:[#allocation2 + $0xf24] sm:$0xf0]  ;;  %v17545_v10 = vld [vmem:[#allocation2 + $0x4b4] sm:$0xf]  ;;  %v13231_v20 = vor.u32 %v17800_v2, %v13230_v1 }
  0x49   :  { %3642 = vmatpush.bf16.msrb.mxu3 %v11835_v17  ;;  %v12232_v12 = vld [vmem:[#allocation2 + $0x4d8] sm:$0xf0]  ;;  %v17625_v13 = vld [vmem:[#allocation2 + $0x734] sm:$0xf]  ;;  %v13551_v21 = vor.u32 %v17880_v6, %v13550_v5  ;;  %v11618_v22 = vld [vmem:[%s20029_s0 + $0x10] sm:$0xf] }
  0x4a   :  { %3601 = vmatpush.bf16.msrb.mxu0 %v13071_v24  ;;  %v12552_v14 = vld [vmem:[#allocation2 + $0x758] sm:$0xf0]  ;;  %v17705_v15 = vld [vmem:[#allocation2 + $0x9b4] sm:$0xf]  ;;  %v17393_v24 = vld [vmem:[%s20029_s0 + $0x28] sm:$0xf0]  ;;  %v12235_v27 = vor.u32 %v17545_v10, %v12232_v12 }
  0x4b   :  { %3615 = vmatpush.bf16.msrb.mxu1 %v13391_v25  ;;  %v12872_v17 = vld [vmem:[#allocation2 + $0x9d8] sm:$0xf0]  ;;  %v17785_v18 = vld [vmem:[#allocation2 + $0xc34] sm:$0xf]  ;;  %v11626_v25 = vld [vmem:[%s20029_s0 + $0x18] sm:$0xf]  ;;  %v12555_v31 = vor.u32 %v17625_v13, %v12552_v14 }
  0x4c   :  { %3629 = vmatpush.bf16.msrb.mxu2 %v13711_v26  ;;  %v13192_v19 = vld [vmem:[#allocation2 + $0xc58] sm:$0xf0]  ;;  %v11635_v26 = vor.u32 %v17395_v7, %v11632_v9  ;;  %v17394_v28 = vld [vmem:[%s20029_s0 + $0x30] sm:$0xf0]  ;;  %v12875_v32 = vor.u32 %v17705_v15, %v12872_v17  ;;  %v17535_v33 = vld [vmem:[#allocation2 + $0x464] sm:$0xf] }
  0x4d   :  { %3643 = vmatpush.bf16.msrb.mxu3 %v11795_v30  ;;  %v17390_v29 = vld [vmem:[%s20029_s0 + $0x14] sm:$0xf]  ;;  %v11620_v30 = vld [vmem:[%s20029_s0 + $0x2c] sm:$0xf0]  ;;  %v12192_v34 = vld [vmem:[#allocation2 + $0x488] sm:$0xf0]  ;;  %v19127_v41 = vor.u32 %v17394_v28, %v11626_v25 }
  0x4e   :  { %3602 = vmatpush.bf16.msrb.mxu0 %v13031_v36  ;;  %v17615_v35 = vld [vmem:[#allocation2 + $0x6e4] sm:$0xf]  ;;  %v13195_v36 = vor.u32 %v17785_v18, %v13192_v19  ;;  %v12832_v40 = vld [vmem:[#allocation2 + $0x988] sm:$0xf0]  ;;  %v12195_v45 = vor.u32 %v17535_v33, %v12192_v34  ;;  %v12472_v52 = vld [vmem:[#allocation2 + $0x6b8] sm:$0xf0] }
  0x4f   :  { %3616 = vmatpush.bf16.msrb.mxu1 %v13351_v37  ;;  %v19125_v37 = vor.u32 %v17393_v24, %v11618_v22  ;;  %v17695_v39 = vld [vmem:[#allocation2 + $0x964] sm:$0xf]  ;;  %v13152_v44 = vld [vmem:[#allocation2 + $0xc08] sm:$0xf0]  ;;  %v17685_v53 = vld [vmem:[#allocation2 + $0x914] sm:$0xf] }
  0x50   :  { %3630 = vmatpush.bf16.msrb.mxu2 %v13671_v38  ;;  %v12512_v38 = vld [vmem:[#allocation2 + $0x708] sm:$0xf0]  ;;  %v17775_v43 = vld [vmem:[#allocation2 + $0xbe4] sm:$0xf]  ;;  %v12835_v47 = vor.u32 %v17695_v39, %v12832_v40  ;;  %v17765_v55 = vld [vmem:[#allocation2 + $0xb94] sm:$0xf] }
  0x51   :  { %3644 = vmatpush.bf16.msrb.mxu3 %v11755_v42  ;;  %v19129_v42 = vor.u32 %v17390_v29, %v11620_v30  ;;  %v12515_v46 = vor.u32 %v17615_v35, %v12512_v38  ;;  %v13155_v51 = vor.u32 %v17775_v43, %v13152_v44  ;;  %v13112_v56 = vld [vmem:[#allocation2 + $0xbb8] sm:$0xf0]  ;;  %v17515_v61 = vld [vmem:[#allocation2 + $0x3c4] sm:$0xf]  ;;  %v12432_v2 = vld [vmem:[#allocation2 + $0x668] sm:$0xf0] }
  0x52   :  { %3603 = vmatpush.bf16.msrb.mxu0 %v12991_v48  ;;  %v17525_v48 = vld [vmem:[#allocation2 + $0x414] sm:$0xf]  ;;  %v17595_v63 = vld [vmem:[#allocation2 + $0x644] sm:$0xf]  ;;  %v13115_v1 = vor.u32 %v17765_v55, %v13112_v56  ;;  %v13072_v6 = vld [vmem:[#allocation2 + $0xb68] sm:$0xf0] }
  0x53   :  { %3617 = vmatpush.bf16.msrb.mxu1 %v13311_v49  ;;  %v12152_v49 = vld [vmem:[#allocation2 + $0x438] sm:$0xf0]  ;;  %v17755_v5 = vld [vmem:[#allocation2 + $0xb44] sm:$0xf]  ;;  %v17505_v10 = vld [vmem:[#allocation2 + $0x374] sm:$0xf] }
  0x54   :  { %3631 = vmatpush.bf16.msrb.mxu2 %v13631_v50  ;;  %v17605_v50 = vld [vmem:[#allocation2 + $0x694] sm:$0xf]  ;;  %v12155_v58 = vor.u32 %v17525_v48, %v12152_v49  ;;  %v12072_v12 = vld [vmem:[#allocation2 + $0x398] sm:$0xf0]  ;;  %v13075_v14 = vor.u32 %v17755_v5, %v13072_v6  ;;  %v17495_v24 = vld [vmem:[#allocation2 + $0x324] sm:$0xf] }
  0x55   :  { %3645 = vmatpush.bf16.msrb.mxu3 %v11715_v54  ;;  %v12792_v54 = vld [vmem:[#allocation2 + $0x938] sm:$0xf0]  ;;  %v12475_v59 = vor.u32 %v17605_v50, %v12472_v52  ;;  %v17585_v13 = vld [vmem:[#allocation2 + $0x5f4] sm:$0xf]  ;;  %v12032_v25 = vld [vmem:[#allocation2 + $0x348] sm:$0xf0] }
  0x56   :  { %3604 = vmatpush.bf16.msrb.mxu0 %v12951_v62  ;;  %v12795_v60 = vor.u32 %v17685_v53, %v12792_v54  ;;  %v12112_v62 = vld [vmem:[#allocation2 + $0x3e8] sm:$0xf0]  ;;  %v12392_v15 = vld [vmem:[#allocation2 + $0x618] sm:$0xf0]  ;;  %v17745_v18 = vld [vmem:[#allocation2 + $0xaf4] sm:$0xf]  ;;  %v12035_v33 = vor.u32 %v17495_v24, %v12032_v25 }
  0x57   :  { %3618 = vmatpush.bf16.msrb.mxu1 %v13271_v3  ;;  %v17675_v3 = vld [vmem:[#allocation2 + $0x8c4] sm:$0xf]  ;;  %v12115_v7 = vor.u32 %v17515_v61, %v12112_v62  ;;  %v12712_v17 = vld [vmem:[#allocation2 + $0x898] sm:$0xf0]  ;;  %v12352_v28 = vld [vmem:[#allocation2 + $0x5c8] sm:$0xf0] }
  0x58   :  { %3632 = vmatpush.bf16.msrb.mxu2 %v13591_v4  ;;  %v12752_v4 = vld [vmem:[#allocation2 + $0x8e8] sm:$0xf0]  ;;  %v13032_v19 = vld [vmem:[#allocation2 + $0xb18] sm:$0xf0]  ;;  %v17655_v29 = vld [vmem:[#allocation2 + $0x824] sm:$0xf] }
  0x59   :  { %3646 = vmatpush.bf16.msrb.mxu3 %v11675_v8  ;;  %v12435_v8 = vor.u32 %v17595_v63, %v12432_v2  ;;  %v12755_v9 = vor.u32 %v17675_v3, %v12752_v4  ;;  %v12672_v30 = vld [vmem:[#allocation2 + $0x848] sm:$0xf0]  ;;  %v11992_v38 = vld [vmem:[#allocation2 + $0x2f8] sm:$0xf0]  ;;  %v17565_v39 = vld [vmem:[#allocation2 + $0x554] sm:$0xf] }
  0x5a   :  { %3605 = vmatpush.bf16.msrb.mxu0 %v12911_v16  ;;  %v17665_v16 = vld [vmem:[#allocation2 + $0x874] sm:$0xf]  ;;  %v12675_v35 = vor.u32 %v17655_v29, %v12672_v30  ;;  %v12312_v43 = vld [vmem:[#allocation2 + $0x578] sm:$0xf0]  ;;  %v17475_v49 = vld [vmem:[#allocation2 + $0x284] sm:$0xf] }
  0x5b   :  { %3619 = vmatpush.bf16.msrb.mxu1 %v13231_v20  ;;  %v12075_v20 = vor.u32 %v17505_v10, %v12072_v12  ;;  %v12715_v22 = vor.u32 %v17665_v16, %v12712_v17  ;;  %v17645_v44 = vld [vmem:[#allocation2 + $0x7d4] sm:$0xf]  ;;  %v11952_v50 = vld [vmem:[#allocation2 + $0x2a8] sm:$0xf0]  ;;  %v17555_v53 = vld [vmem:[#allocation2 + $0x504] sm:$0xf] }
  0x5c   :  { %3633 = vmatpush.bf16.msrb.mxu2 %v13551_v21  ;;  %v12395_v21 = vor.u32 %v17585_v13, %v12392_v15  ;;  %v12272_v54 = vld [vmem:[#allocation2 + $0x528] sm:$0xf0]  ;;  %v17635_v55 = vld [vmem:[#allocation2 + $0x784] sm:$0xf]  ;;  %v17865_v61 = vld [vmem:[#allocation2 + $0xeb4] sm:$0xf] }
  0x5d   :  { %3647 = vmatpush.bf16.msrb.mxu3 %v11635_v26  ;;  %3606 = vmatmul.bf16.vlgmr.msrb.gmra.mxu0 %v19125_v37  ;;  %v17575_v26 = vld [vmem:[#allocation2 + $0x5a4] sm:$0xf]  ;;  %v13512_v62 = vld [vmem:[#allocation2 + $0xed8] sm:$0xf0]  ;;  %v17945_v63 = vld [vmem:[#allocation2 + $0x1134] sm:$0xf]  ;;  %v12275_v5 = vor.u32 %v17555_v53, %v12272_v54 }
  0x5e   :  { %3654 = vmatpush.bf16.msra.mxu0 %v12235_v27  ;;  %3620 = vmatmul.bf16.vlgmr.msrb.gmra.mxu1 %v19129_v42  ;;  %v13035_v27 = vor.u32 %v17745_v18, %v13032_v19  ;;  %v12355_v34 = vor.u32 %v17575_v26, %v12352_v28  ;;  %v13832_v2 = vld [vmem:[#allocation2 + $0x1158] sm:$0xf0]  ;;  %v11918_v3 = vld [vmem:[#allocation2 + $0x238] sm:$0xf]  ;;  %v17471_v4 = vld [vmem:[#allocation2 + $0x25c] sm:$0xf0]  ;;  %v13515_v10 = vor.u32 %v17865_v61, %v13512_v62 }
  0x5f   :  { %3668 = vmatpush.bf16.msra.mxu1 %v12555_v31  ;;  %3634 = vmatmul.bf16.vlgmr.msrb.gmra.mxu2 %v19127_v41  ;;  %v17735_v31 = vld [vmem:[#allocation2 + $0xaa4] sm:$0xf]  ;;  %v13835_v12 = vor.u32 %v17945_v63, %v13832_v2  ;;  %v11919_v13 = vor.u32 %v17471_v4, %v11918_v3  ;;  %v13472_v15 = vld [vmem:[#allocation2 + $0xe88] sm:$0xf0]  ;;  %v11878_v19 = vld [vmem:[#allocation2 + $0x1e8] sm:$0xf] }
  0x60   :  { %3682 = vmatpush.bf16.msra.mxu2 %v12875_v32  ;;  %3648 = vmatmul.bf16.vlgmr.msrb.gmra.mxu3 %v19080_v57  ;;  %v12992_v32 = vld [vmem:[#allocation2 + $0xac8] sm:$0xf0]  ;;  %v17935_v16 = vld [vmem:[#allocation2 + $0x10e4] sm:$0xf]  ;;  %v13432_v28 = vld [vmem:[#allocation2 + $0xe38] sm:$0xf0] }
  0x61   :  { %3696 = vmatpush.bf16.msra.mxu3 %v13195_v36  ;;  %v17485_v36 = vld [vmem:[#allocation2 + $0x2d4] sm:$0xf]  ;;  %v12995_v40 = vor.u32 %v17735_v31, %v12992_v32  ;;  %v13792_v18 = vld [vmem:[#allocation2 + $0x1108] sm:$0xf0]  ;;  %v13752_v31 = vld [vmem:[#allocation2 + $0x10b8] sm:$0xf0] }
  0x62   :  { %3655 = vmatpush.bf16.msra.mxu0 %v12195_v45  ;;  %v12632_v45 = vld [vmem:[#allocation2 + $0x7f8] sm:$0xf0]  ;;  %v11995_v48 = vor.u32 %v17485_v36, %v11992_v38  ;;  %v13795_v25 = vor.u32 %v17935_v16, %v13792_v18  ;;  %v17925_v29 = vld [vmem:[#allocation2 + $0x1094] sm:$0xf]  ;;  %v11838_v32 = vld [vmem:[#allocation2 + $0x198] sm:$0xf] }
  0x63   :  { %3669 = vmatpush.bf16.msra.mxu1 %v12515_v46  ;;  %v17725_v46 = vld [vmem:[#allocation2 + $0xa54] sm:$0xf]  ;;  %v12635_v52 = vor.u32 %v17645_v44, %v12632_v45  ;;  %v13755_v38 = vor.u32 %v17925_v29, %v13752_v31  ;;  %v17915_v44 = vld [vmem:[#allocation2 + $0x1044] sm:$0xf]  ;;  %v17431_v61 = vld [vmem:[#allocation2 + $0x11c] sm:$0xf0] }
  0x64   :  { %3683 = vmatpush.bf16.msra.mxu2 %v12835_v47  ;;  %v12952_v47 = vld [vmem:[#allocation2 + $0xa78] sm:$0xf0]  ;;  %v17825_v54 = vld [vmem:[#allocation2 + $0xd74] sm:$0xf]  ;;  %v12078_v62 = vld [vmem:[#allocation2 + $0x378] sm:$0xf] }
  0x65   :  { %3697 = vmatpush.bf16.msra.mxu3 %v13155_v51  ;;  %v12315_v51 = vor.u32 %v17565_v39, %v12312_v43  ;;  %v12955_v56 = vor.u32 %v17725_v46, %v12952_v47  ;;  %v13392_v43 = vld [vmem:[#allocation2 + $0xde8] sm:$0xf0]  ;;  %v11798_v47 = vld [vmem:[#allocation2 + $0x148] sm:$0xf]  ;;  %v17511_v63 = vld [vmem:[#allocation2 + $0x39c] sm:$0xf0] }
  0x66   :  { %3656 = vmatpush.bf16.msra.mxu0 %v12155_v58  ;;  %v12592_v58 = vld [vmem:[#allocation2 + $0x7a8] sm:$0xf0]  ;;  %v17815_v4 = vld [vmem:[#allocation2 + $0xd24] sm:$0xf]  ;;  %v13272_v18 = vld [vmem:[#allocation2 + $0xcf8] sm:$0xf0] }
  0x67   :  { %3670 = vmatpush.bf16.msra.mxu1 %v12475_v59  ;;  %v17715_v59 = vld [vmem:[#allocation2 + $0xa04] sm:$0xf]  ;;  %v12595_v6 = vor.u32 %v17635_v55, %v12592_v58  ;;  %v13712_v46 = vld [vmem:[#allocation2 + $0x1068] sm:$0xf0]  ;;  %v13352_v55 = vld [vmem:[#allocation2 + $0xd98] sm:$0xf0] }
  0x68   :  { %3684 = vmatpush.bf16.msra.mxu2 %v12795_v60  ;;  %v12912_v60 = vld [vmem:[#allocation2 + $0xa28] sm:$0xf0] }
  0x69   :  { %3698 = vmatpush.bf16.msra.mxu3 %v13115_v1  ;;  %v11955_v1 = vor.u32 %v17475_v49, %v11952_v50  ;;  %v12118_v49 = vld [vmem:[#allocation2 + $0x3c8] sm:$0xf]  ;;  %v17521_v50 = vld [vmem:[#allocation2 + $0x3ec] sm:$0xf0]  ;;  %v13232_v29 = vld [vmem:[#allocation2 + $0xca8] sm:$0xf0] }
  0x6a   :  { %3657 = vmatpush.bf16.msra.mxu0 %v12115_v7  ;;  %v12238_v7 = vld [vmem:[#allocation2 + $0x4b8] sm:$0xf]  ;;  %v12119_v58 = vor.u32 %v17521_v50, %v12118_v49 }
  0x6b   :  { %3671 = vmatpush.bf16.msra.mxu1 %v12435_v8  ;;  %v17551_v8 = vld [vmem:[#allocation2 + $0x4dc] sm:$0xf0] }
  0x6c   :  { %3685 = vmatpush.bf16.msra.mxu2 %v12755_v9  ;;  %v12915_v9 = vor.u32 %v17715_v59, %v12912_v60  ;;  %v12239_v17 = vor.u32 %v17551_v8, %v12238_v7  ;;  %v13672_v59 = vld [vmem:[#allocation2 + $0x1018] sm:$0xf0]  ;;  %v11758_v60 = vld [vmem:[#allocation2 + $0xf8] sm:$0xf]  ;;  %v12079_v7 = vor.u32 %v17511_v63, %v12078_v62  ;;  %v13632_v8 = vld [vmem:[#allocation2 + $0xfc8] sm:$0xf0] }
  0x6d   :  { %3699 = vmatpush.bf16.msra.mxu3 %v13075_v14  ;;  %v17855_v14 = vld [vmem:[#allocation2 + $0xe64] sm:$0xf]  ;;  %v11759_v3 = vor.u32 %v17431_v61, %v11758_v60  ;;  %v12838_v60 = vld [vmem:[#allocation2 + $0x968] sm:$0xf]  ;;  %v17701_v62 = vld [vmem:[#allocation2 + $0x98c] sm:$0xf0] }
  0x6e   :  { %3658 = vmatpush.bf16.msra.mxu0 %v12075_v20  ;;  %v17461_v20 = vld [vmem:[#allocation2 + $0x20c] sm:$0xf0]  ;;  %v13475_v24 = vor.u32 %v17855_v14, %v13472_v15  ;;  %v13158_v63 = vld [vmem:[#allocation2 + $0xbe8] sm:$0xf] }
  0x6f   :  { %3672 = vmatpush.bf16.msra.mxu1 %v12395_v21  ;;  %v12198_v21 = vld [vmem:[#allocation2 + $0x468] sm:$0xf]  ;;  %v11879_v26 = vor.u32 %v17461_v20, %v11878_v19  ;;  %v17885_v19 = vld [vmem:[#allocation2 + $0xf54] sm:$0xf] }
  0x70   :  { %3686 = vmatpush.bf16.msra.mxu2 %v12715_v22  ;;  %v17541_v22 = vld [vmem:[#allocation2 + $0x48c] sm:$0xf0] }
  0x71   :  { %3700 = vmatpush.bf16.msra.mxu3 %v13035_v27  ;;  %v17845_v27 = vld [vmem:[#allocation2 + $0xe14] sm:$0xf]  ;;  %v12199_v30 = vor.u32 %v17541_v22, %v12198_v21  ;;  %v13592_v21 = vld [vmem:[#allocation2 + $0xf78] sm:$0xf0]  ;;  %v11678_v22 = vld [vmem:[#allocation2 + $0x58] sm:$0xf] }
  0x72   :  { %3659 = vmatpush.bf16.msra.mxu0 %v12035_v33  ;;  %v17451_v33 = vld [vmem:[#allocation2 + $0x1bc] sm:$0xf0]  ;;  %v13435_v36 = vor.u32 %v17845_v27, %v13432_v28  ;;  %v17795_v28 = vld [vmem:[#allocation2 + $0xc84] sm:$0xf] }
  0x73   :  { %3673 = vmatpush.bf16.msra.mxu1 %v12355_v34  ;;  %v12158_v34 = vld [vmem:[#allocation2 + $0x418] sm:$0xf]  ;;  %v11839_v39 = vor.u32 %v17451_v33, %v11838_v32  ;;  %v17875_v32 = vld [vmem:[#allocation2 + $0xf04] sm:$0xf]  ;;  %v13552_v33 = vld [vmem:[#allocation2 + $0xf28] sm:$0xf0] }
  0x74   :  { %3687 = vmatpush.bf16.msra.mxu2 %v12675_v35  ;;  %v17531_v35 = vld [vmem:[#allocation2 + $0x43c] sm:$0xf0]  ;;  %v13555_v49 = vor.u32 %v17875_v32, %v13552_v33  ;;  %v12398_v33 = vld [vmem:[#allocation2 + $0x5f8] sm:$0xf] }
  0x75   :  { %3701 = vmatpush.bf16.msra.mxu3 %v12995_v40  ;;  %v17835_v40 = vld [vmem:[#allocation2 + $0xdc4] sm:$0xf]  ;;  %v12159_v45 = vor.u32 %v17531_v35, %v12158_v34  ;;  %v11638_v34 = vld [vmem:[#allocation2 + $0x8] sm:$0xf] }
  0x76   :  { %3660 = vmatpush.bf16.msra.mxu0 %v11995_v48  ;;  %v17441_v48 = vld [vmem:[#allocation2 + $0x16c] sm:$0xf0] }
  0x77   :  { %3674 = vmatpush.bf16.msra.mxu1 %v12315_v51  ;;  %v13395_v51 = vor.u32 %v17835_v40, %v13392_v43  ;;  %v11799_v53 = vor.u32 %v17441_v48, %v11798_v47  ;;  %v12558_v40 = vld [vmem:[#allocation2 + $0x738] sm:$0xf]  ;;  %v17631_v43 = vld [vmem:[#allocation2 + $0x75c] sm:$0xf0] }
  0x78   :  { %3688 = vmatpush.bf16.msra.mxu2 %v12635_v52  ;;  %v13715_v52 = vor.u32 %v17915_v44, %v13712_v46  ;;  %v12878_v44 = vld [vmem:[#allocation2 + $0x9b8] sm:$0xf]  ;;  %v17711_v46 = vld [vmem:[#allocation2 + $0x9dc] sm:$0xf0] }
  0x79   :  { %3702 = vmatpush.bf16.msra.mxu3 %v12955_v56  ;;  %v17905_v56 = vld [vmem:[#allocation2 + $0xff4] sm:$0xf]  ;;  %v13198_v47 = vld [vmem:[#allocation2 + $0xc38] sm:$0xf]  ;;  %v17791_v48 = vld [vmem:[#allocation2 + $0xc5c] sm:$0xf0] }
  0x7a   :  { %3661 = vmatpush.bf16.msra.mxu0 %v11955_v1  ;;  %v13355_v1 = vor.u32 %v17825_v54, %v13352_v55  ;;  %v13675_v2 = vor.u32 %v17905_v56, %v13672_v59  ;;  %v12559_v54 = vor.u32 %v17631_v43, %v12558_v40  ;;  %v12879_v55 = vor.u32 %v17711_v46, %v12878_v44  ;;  %v17621_v59 = vld [vmem:[#allocation2 + $0x70c] sm:$0xf0]  ;;  %v17751_v40 = vld [vmem:[#allocation2 + $0xb1c] sm:$0xf0]  ;;  %v13358_v43 = vld [vmem:[#allocation2 + $0xd78] sm:$0xf] }
  0x7b   :  { %3675 = vmatpush.bf16.msra.mxu1 %v12275_v5  ;;  %v13312_v5 = vld [vmem:[#allocation2 + $0xd48] sm:$0xf0]  ;;  %v13199_v56 = vor.u32 %v17791_v48, %v13198_v47  ;;  %v17831_v44 = vld [vmem:[#allocation2 + $0xd9c] sm:$0xf0]  ;;  %v12358_v48 = vld [vmem:[#allocation2 + $0x5a8] sm:$0xf] }
  0x7c   :  { %3689 = vmatpush.bf16.msra.mxu2 %v12595_v6  ;;  %v17895_v6 = vld [vmem:[#allocation2 + $0xfa4] sm:$0xf]  ;;  %v13315_v14 = vor.u32 %v17815_v4, %v13312_v5  ;;  %v12839_v5 = vor.u32 %v17701_v62, %v12838_v60  ;;  %v17571_v62 = vld [vmem:[#allocation2 + $0x57c] sm:$0xf0] }
  0x7d   :  { %3703 = vmatpush.bf16.msra.mxu3 %v12915_v9  ;;  %3662 = vmatmul.bf16.vlgmr.msra.gmra.mxu0 %v19095_v11  ;;  %v11718_v9 = vld [vmem:[#allocation2 + $0xa8] sm:$0xf]  ;;  %v13635_v15 = vor.u32 %v17895_v6, %v13632_v8  ;;  %v17611_v8 = vld [vmem:[#allocation2 + $0x6bc] sm:$0xf0] }
  0x7e   :  { %3710 = vmatpush.bf16.msrb.mxu0 %v13515_v10  ;;  %3676 = vmatmul.bf16.vlgmr.msra.gmra.mxu1 %v19085_v0  ;;  %v17421_v10 = vld [vmem:[#allocation2 + $0xcc] sm:$0xf0] }
  0x7f   :  { %3724 = vmatpush.bf16.msrb.mxu1 %v13835_v12  ;;  %3690 = vmatmul.bf16.vlgmr.msra.gmra.mxu2 %v19104_v23  ;;  %v12038_v12 = vld [vmem:[#allocation2 + $0x328] sm:$0xf]  ;;  %v11719_v16 = vor.u32 %v17421_v10, %v11718_v9  ;;  %v12798_v9 = vld [vmem:[#allocation2 + $0x918] sm:$0xf] }
  0x80   :  { %3738 = vmatpush.bf16.msrb.mxu2 %v11919_v13  ;;  %3704 = vmatmul.bf16.vlgmr.msra.gmra.mxu3 %v19125_v37  ;;  %v17501_v13 = vld [vmem:[#allocation2 + $0x34c] sm:$0xf0] }
  0x81   :  { %3752 = vmatpush.bf16.msrb.mxu3 %v12239_v17  ;;  %v17805_v17 = vld [vmem:[#allocation2 + $0xcd4] sm:$0xf]  ;;  %v12039_v20 = vor.u32 %v17501_v13, %v12038_v12  ;;  %v17691_v12 = vld [vmem:[#allocation2 + $0x93c] sm:$0xf0]  ;;  %v13118_v13 = vld [vmem:[#allocation2 + $0xb98] sm:$0xf] }
  0x82   :  { %3711 = vmatpush.bf16.msrb.mxu0 %v13475_v24  ;;  %v17411_v24 = vld [vmem:[#allocation2 + $0x7c] sm:$0xf0]  ;;  %v13275_v27 = vor.u32 %v17805_v17, %v13272_v18  ;;  %v12799_v18 = vor.u32 %v17691_v12, %v12798_v9  ;;  %v17561_v9 = vld [vmem:[#allocation2 + $0x52c] sm:$0xf0] }
  0x83   :  { %3725 = vmatpush.bf16.msrb.mxu1 %v13795_v25  ;;  %v11998_v25 = vld [vmem:[#allocation2 + $0x2d8] sm:$0xf]  ;;  %v11679_v31 = vor.u32 %v17411_v24, %v11678_v22  ;;  %v12758_v22 = vld [vmem:[#allocation2 + $0x8c8] sm:$0xf] }
  0x84   :  { %3739 = vmatpush.bf16.msrb.mxu2 %v11879_v26  ;;  %v17491_v26 = vld [vmem:[#allocation2 + $0x2fc] sm:$0xf0] }
  0x85   :  { %3753 = vmatpush.bf16.msrb.mxu3 %v12199_v30  ;;  %v13595_v30 = vor.u32 %v17885_v19, %v13592_v21  ;;  %v11999_v35 = vor.u32 %v17491_v26, %v11998_v25  ;;  %v17601_v21 = vld [vmem:[#allocation2 + $0x66c] sm:$0xf0]  ;;  %v13078_v26 = vld [vmem:[#allocation2 + $0xb48] sm:$0xf] }
  0x86   :  { %3712 = vmatpush.bf16.msrb.mxu0 %v13435_v36  ;;  %v17401_v36 = vld [vmem:[#allocation2 + $0x2c] sm:$0xf0] }
  0x87   :  { %3726 = vmatpush.bf16.msrb.mxu1 %v13755_v38  ;;  %v11958_v38 = vld [vmem:[#allocation2 + $0x288] sm:$0xf]  ;;  %v11639_v50 = vor.u32 %v17401_v36, %v11638_v34  ;;  %v17681_v25 = vld [vmem:[#allocation2 + $0x8ec] sm:$0xf0]  ;;  %v17591_v34 = vld [vmem:[#allocation2 + $0x61c] sm:$0xf0] }
  0x88   :  { %3740 = vmatpush.bf16.msrb.mxu2 %v11839_v39  ;;  %v17481_v39 = vld [vmem:[#allocation2 + $0x2ac] sm:$0xf0] }
  0x89   :  { %3754 = vmatpush.bf16.msrb.mxu3 %v12159_v45  ;;  %v13235_v45 = vor.u32 %v17795_v28, %v13232_v29  ;;  %v13398_v28 = vld [vmem:[#allocation2 + $0xdc8] sm:$0xf]  ;;  %v17841_v29 = vld [vmem:[#allocation2 + $0xdec] sm:$0xf0] }
  0x8a   :  { %3713 = vmatpush.bf16.msrb.mxu0 %v13395_v51  ;;  %v13518_v51 = vld [vmem:[#allocation2 + $0xeb8] sm:$0xf]  ;;  %v13399_v36 = vor.u32 %v17841_v29, %v13398_v28 }
  0x8b   :  { %3727 = vmatpush.bf16.msrb.mxu1 %v13715_v52  ;;  %v17871_v52 = vld [vmem:[#allocation2 + $0xedc] sm:$0xf0] }
  0x8c   :  { %3741 = vmatpush.bf16.msrb.mxu2 %v11799_v53  ;;  %v11959_v53 = vor.u32 %v17481_v39, %v11958_v38  ;;  %v13519_v61 = vor.u32 %v17871_v52, %v13518_v51  ;;  %v17671_v38 = vld [vmem:[#allocation2 + $0x89c] sm:$0xf0]  ;;  %v13038_v39 = vld [vmem:[#allocation2 + $0xaf8] sm:$0xf]  ;;  %v13359_v51 = vor.u32 %v17831_v44, %v13358_v43  ;;  %v17661_v52 = vld [vmem:[#allocation2 + $0x84c] sm:$0xf0] }
  0x8d   :  { %3755 = vmatpush.bf16.msrb.mxu3 %v12119_v58  ;;  %v12518_v58 = vld [vmem:[#allocation2 + $0x6e8] sm:$0xf]  ;;  %v13039_v47 = vor.u32 %v17751_v40, %v13038_v39  ;;  %v17456_v39 = vld [vmem:[#allocation2 + $0x1ec] sm:$0xf]  ;;  %v11880_v43 = vld [vmem:[#allocation2 + $0x210] sm:$0xf0] }
  0x8e   :  { %3714 = vmatpush.bf16.msrb.mxu0 %v13355_v1  ;;  %v17781_v1 = vld [vmem:[#allocation2 + $0xc0c] sm:$0xf0]  ;;  %v12519_v4 = vor.u32 %v17621_v59, %v12518_v58  ;;  %v17536_v44 = vld [vmem:[#allocation2 + $0x46c] sm:$0xf] }
  0x8f   :  { %3728 = vmatpush.bf16.msrb.mxu1 %v13675_v2  ;;  %v13478_v2 = vld [vmem:[#allocation2 + $0xe68] sm:$0xf]  ;;  %v13159_v6 = vor.u32 %v17781_v1, %v13158_v63  ;;  %v12638_v63 = vld [vmem:[#allocation2 + $0x7d8] sm:$0xf] }
  0x90   :  { %3742 = vmatpush.bf16.msrb.mxu2 %v11759_v3  ;;  %v17861_v3 = vld [vmem:[#allocation2 + $0xe8c] sm:$0xf0] }
  0x91   :  { %3756 = vmatpush.bf16.msrb.mxu3 %v12079_v7  ;;  %v12478_v7 = vld [vmem:[#allocation2 + $0x698] sm:$0xf]  ;;  %v13479_v10 = vor.u32 %v17861_v3, %v13478_v2  ;;  %v17651_v2 = vld [vmem:[#allocation2 + $0x7fc] sm:$0xf0] }
  0x92   :  { %3715 = vmatpush.bf16.msrb.mxu0 %v13315_v14  ;;  %v17771_v14 = vld [vmem:[#allocation2 + $0xbbc] sm:$0xf0]  ;;  %v12479_v17 = vor.u32 %v17611_v8, %v12478_v7  ;;  %v12958_v3 = vld [vmem:[#allocation2 + $0xa58] sm:$0xf]  ;;  %v12278_v8 = vld [vmem:[#allocation2 + $0x508] sm:$0xf] }
  0x93   :  { %3729 = vmatpush.bf16.msrb.mxu1 %v13635_v15  ;;  %v13438_v15 = vld [vmem:[#allocation2 + $0xe18] sm:$0xf]  ;;  %v13119_v19 = vor.u32 %v17771_v14, %v13118_v13  ;;  %v12598_v13 = vld [vmem:[#allocation2 + $0x788] sm:$0xf]  ;;  %v17641_v14 = vld [vmem:[#allocation2 + $0x7ac] sm:$0xf0] }
  0x94   :  { %3743 = vmatpush.bf16.msrb.mxu2 %v11719_v16  ;;  %v17851_v16 = vld [vmem:[#allocation2 + $0xe3c] sm:$0xf0]  ;;  %v12599_v28 = vor.u32 %v17641_v14, %v12598_v13 }
  0x95   :  { %3757 = vmatpush.bf16.msrb.mxu3 %v12039_v20  ;;  %v12438_v20 = vld [vmem:[#allocation2 + $0x648] sm:$0xf]  ;;  %v13439_v24 = vor.u32 %v17851_v16, %v13438_v15 }
  0x96   :  { %3716 = vmatpush.bf16.msrb.mxu0 %v13275_v27  ;;  %v17761_v27 = vld [vmem:[#allocation2 + $0xb6c] sm:$0xf0]  ;;  %v12918_v15 = vld [vmem:[#allocation2 + $0xa08] sm:$0xf] }
  0x97   :  { %3730 = vmatpush.bf16.msrb.mxu1 %v13595_v30  ;;  %v12439_v30 = vor.u32 %v17601_v21, %v12438_v20  ;;  %v13079_v32 = vor.u32 %v17761_v27, %v13078_v26  ;;  %v13838_v20 = vld [vmem:[#allocation2 + $0x1138] sm:$0xf]  ;;  %v17951_v21 = vld [vmem:[#allocation2 + $0x115c] sm:$0xf0]  ;;  %v17546_v26 = vld [vmem:[#allocation2 + $0x4bc] sm:$0xf] }
  0x98   :  { %3744 = vmatpush.bf16.msrb.mxu2 %v11679_v31  ;;  %v12759_v31 = vor.u32 %v17681_v25, %v12758_v22  ;;  %v17466_v22 = vld [vmem:[#allocation2 + $0x23c] sm:$0xf]  ;;  %v11920_v25 = vld [vmem:[#allocation2 + $0x260] sm:$0xf0] }
  0x99   :  { %3758 = vmatpush.bf16.msrb.mxu3 %v11999_v35  ;;  %v12718_v35 = vld [vmem:[#allocation2 + $0x878] sm:$0xf]  ;;  %v12240_v27 = vld [vmem:[#allocation2 + $0x4e0] sm:$0xf0] }
  0x9a   :  { %3717 = vmatpush.bf16.msrb.mxu0 %v13235_v45  ;;  %v12399_v45 = vor.u32 %v17591_v34, %v12398_v33  ;;  %v12719_v46 = vor.u32 %v17671_v38, %v12718_v35  ;;  %v13839_v33 = vor.u32 %v17951_v21, %v13838_v20  ;;  %v11923_v34 = vor.u32 %v17466_v22, %v11920_v25  ;;  %v17941_v38 = vld [vmem:[#allocation2 + $0x110c] sm:$0xf0]  ;;  %v17426_v20 = vld [vmem:[#allocation2 + $0xfc] sm:$0xf]  ;;  %v11760_v22 = vld [vmem:[#allocation2 + $0x120] sm:$0xf0] }
  0x9b   :  { %3731 = vmatpush.bf16.msrb.mxu1 %v13555_v49  ;;  %v17581_v49 = vld [vmem:[#allocation2 + $0x5cc] sm:$0xf0]  ;;  %v12243_v35 = vor.u32 %v17546_v26, %v12240_v27  ;;  %v12080_v25 = vld [vmem:[#allocation2 + $0x3a0] sm:$0xf0]  ;;  %v17586_v26 = vld [vmem:[#allocation2 + $0x5fc] sm:$0xf] }
  0x9c   :  { %3745 = vmatpush.bf16.msrb.mxu2 %v11639_v50  ;;  %v12678_v50 = vld [vmem:[#allocation2 + $0x828] sm:$0xf]  ;;  %v12359_v58 = vor.u32 %v17581_v49, %v12358_v48  ;;  %v13758_v49 = vld [vmem:[#allocation2 + $0x1098] sm:$0xf]  ;;  %v12400_v27 = vld [vmem:[#allocation2 + $0x620] sm:$0xf0] }
  0x9d   :  { %3759 = vmatpush.bf16.msrb.mxu3 %v11959_v53  ;;  %3718 = vmatmul.bf16.vlgmr.msrb.gmra.mxu0 %v19129_v42  ;;  %v12998_v53 = vld [vmem:[#allocation2 + $0xaa8] sm:$0xf]  ;;  %v12679_v59 = vor.u32 %v17661_v52, %v12678_v50  ;;  %v11883_v50 = vor.u32 %v17456_v39, %v11880_v43  ;;  %v17931_v52 = vld [vmem:[#allocation2 + $0x10bc] sm:$0xf0]  ;;  %v17496_v39 = vld [vmem:[#allocation2 + $0x32c] sm:$0xf] }
  0x9e   :  { %3766 = vmatpush.bf16.msra.mxu0 %v12559_v54  ;;  %3732 = vmatmul.bf16.vlgmr.msrb.gmra.mxu1 %v19127_v41  ;;  %v17741_v54 = vld [vmem:[#allocation2 + $0xacc] sm:$0xf0] }
  0x9f   :  { %3780 = vmatpush.bf16.msra.mxu1 %v12879_v55  ;;  %3746 = vmatmul.bf16.vlgmr.msrb.gmra.mxu2 %v19080_v57  ;;  %v13318_v55 = vld [vmem:[#allocation2 + $0xd28] sm:$0xf]  ;;  %v12999_v60 = vor.u32 %v17741_v54, %v12998_v53  ;;  %v17446_v53 = vld [vmem:[#allocation2 + $0x19c] sm:$0xf]  ;;  %v19143_v54 = vld [vmem:[#allocation4] sm:$0xff] }
  0xa0   :  { %3794 = vmatpush.bf16.msra.mxu2 %v13199_v56  ;;  %3760 = vmatmul.bf16.vlgmr.msrb.gmra.mxu3 %v19095_v11  ;;  %v17821_v56 = vld [vmem:[#allocation2 + $0xd4c] sm:$0xf0] }
  0xa1   :  { %3808 = vmatpush.bf16.msra.mxu3 %v13519_v61  ;;  %v12318_v61 = vld [vmem:[#allocation2 + $0x558] sm:$0xf]  ;;  %v13319_v1 = vor.u32 %v17821_v56, %v13318_v55  ;;  %v11840_v56 = vld [vmem:[#allocation2 + $0x1c0] sm:$0xf0] }
  0xa2   :  { %3767 = vmatpush.bf16.msra.mxu0 %v12519_v4  ;;  %v17731_v4 = vld [vmem:[#allocation2 + $0xa7c] sm:$0xf0]  ;;  %v12319_v7 = vor.u32 %v17571_v62, %v12318_v61  ;;  %v12480_v61 = vld [vmem:[#allocation2 + $0x6c0] sm:$0xf0]  ;;  %v13759_v62 = vor.u32 %v17931_v52, %v13758_v49  ;;  %v17406_v52 = vld [vmem:[#allocation2 + $0x5c] sm:$0xf] }
  0xa3   :  { %3781 = vmatpush.bf16.msra.mxu1 %v12839_v5  ;;  %v13278_v5 = vld [vmem:[#allocation2 + $0xcd8] sm:$0xf]  ;;  %v12959_v12 = vor.u32 %v17731_v4, %v12958_v3  ;;  %v13718_v3 = vld [vmem:[#allocation2 + $0x1048] sm:$0xf]  ;;  %v17921_v4 = vld [vmem:[#allocation2 + $0x106c] sm:$0xf0] }
  0xa4   :  { %3795 = vmatpush.bf16.msra.mxu2 %v13159_v6  ;;  %v17811_v6 = vld [vmem:[#allocation2 + $0xcfc] sm:$0xf0]  ;;  %v13719_v14 = vor.u32 %v17921_v4, %v13718_v3  ;;  %v17396_v4 = vld [vmem:[#allocation2 + $0xc] sm:$0xf] }
  0xa5   :  { %3809 = vmatpush.bf16.msra.mxu3 %v13479_v10  ;;  %v12639_v10 = vor.u32 %v17651_v2, %v12638_v63  ;;  %v13279_v16 = vor.u32 %v17811_v6, %v13278_v5  ;;  %v20040_v63 = vperm.slane %v19143_v54, 0  ;;  %v17436_v5 = vld [vmem:[#allocation2 + $0x14c] sm:$0xf] }
  0xa6   :  { %3768 = vmatpush.bf16.msra.mxu0 %v12479_v17  ;;  %v17721_v17 = vld [vmem:[#allocation2 + $0xa2c] sm:$0xf0] }
  0xa7   :  { %3782 = vmatpush.bf16.msra.mxu1 %v12799_v18  ;;  %v13238_v18 = vld [vmem:[#allocation2 + $0xc88] sm:$0xf]  ;;  %v12919_v29 = vor.u32 %v17721_v17, %v12918_v15 }
  0xa8   :  { %3796 = vmatpush.bf16.msra.mxu2 %v13119_v19  ;;  %v17801_v19 = vld [vmem:[#allocation2 + $0xcac] sm:$0xf0] }
  0xa9   :  { %3810 = vmatpush.bf16.msra.mxu3 %v13439_v24  ;;  %v12279_v24 = vor.u32 %v17561_v9, %v12278_v8  ;;  %v17516_v8 = vld [vmem:[#allocation2 + $0x3cc] sm:$0xf]  ;;  %v12120_v9 = vld [vmem:[#allocation2 + $0x3f0] sm:$0xf0] }
  0xaa   :  { %3769 = vmatpush.bf16.msra.mxu0 %v12439_v30  ;;  %v17626_v30 = vld [vmem:[#allocation2 + $0x73c] sm:$0xf]  ;;  %v12123_v17 = vor.u32 %v17516_v8, %v12120_v9  ;;  %v11960_v8 = vld [vmem:[#allocation2 + $0x2b0] sm:$0xf0]  ;;  %v17556_v9 = vld [vmem:[#allocation2 + $0x50c] sm:$0xf] }
  0xab   :  { %3783 = vmatpush.bf16.msra.mxu1 %v12759_v31  ;;  %v12560_v31 = vld [vmem:[#allocation2 + $0x760] sm:$0xf0] }
  0xac   :  { %3797 = vmatpush.bf16.msra.mxu2 %v13079_v32  ;;  %v13239_v32 = vor.u32 %v17801_v19, %v13238_v18  ;;  %v12563_v40 = vor.u32 %v17626_v30, %v12560_v31  ;;  %v13678_v18 = vld [vmem:[#allocation2 + $0xff8] sm:$0xf]  ;;  %v17911_v19 = vld [vmem:[#allocation2 + $0x101c] sm:$0xf0]  ;;  %v11763_v31 = vor.u32 %v17426_v20, %v11760_v22  ;;  %v13520_v20 = vld [vmem:[#allocation2 + $0xee0] sm:$0xf0] }
  0xad   :  { %3811 = vmatpush.bf16.msra.mxu3 %v13399_v36  ;;  %v13798_v36 = vld [vmem:[#allocation2 + $0x10e8] sm:$0xf] }
  0xae   :  { %3770 = vmatpush.bf16.msra.mxu0 %v12399_v45  ;;  %v12200_v45 = vld [vmem:[#allocation2 + $0x490] sm:$0xf0]  ;;  %v13799_v48 = vor.u32 %v17941_v38, %v13798_v36  ;;  %v12403_v36 = vor.u32 %v17586_v26, %v12400_v27 }
  0xaf   :  { %3784 = vmatpush.bf16.msra.mxu1 %v12719_v46  ;;  %v17616_v46 = vld [vmem:[#allocation2 + $0x6ec] sm:$0xf]  ;;  %v11720_v38 = vld [vmem:[#allocation2 + $0xd0] sm:$0xf0] }
  0xb0   :  { %3798 = vmatpush.bf16.msra.mxu2 %v13039_v47  ;;  %v12520_v47 = vld [vmem:[#allocation2 + $0x710] sm:$0xf0] }
  0xb1   :  { %3812 = vmatpush.bf16.msra.mxu3 %v13359_v51  ;;  %v12203_v51 = vor.u32 %v17536_v44, %v12200_v45  ;;  %v12523_v55 = vor.u32 %v17616_v46, %v12520_v47  ;;  %v17576_v44 = vld [vmem:[#allocation2 + $0x5ac] sm:$0xf]  ;;  %v12360_v45 = vld [vmem:[#allocation2 + $0x5d0] sm:$0xf0] }
  0xb2   :  { %3771 = vmatpush.bf16.msra.mxu0 %v12359_v58  ;;  %v17526_v58 = vld [vmem:[#allocation2 + $0x41c] sm:$0xf] }
  0xb3   :  { %3785 = vmatpush.bf16.msra.mxu1 %v12679_v59  ;;  %v12160_v59 = vld [vmem:[#allocation2 + $0x440] sm:$0xf0] }
  0xb4   :  { %3799 = vmatpush.bf16.msra.mxu2 %v12999_v60  ;;  %v17606_v60 = vld [vmem:[#allocation2 + $0x69c] sm:$0xf]  ;;  %v12163_v2 = vor.u32 %v17526_v58, %v12160_v59  ;;  %v12000_v58 = vld [vmem:[#allocation2 + $0x300] sm:$0xf0] }
  0xb5   :  { %3813 = vmatpush.bf16.msra.mxu3 %v13319_v1  ;;  %v11843_v1 = vor.u32 %v17446_v53, %v11840_v56  ;;  %v12483_v6 = vor.u32 %v17606_v60, %v12480_v61  ;;  %v12363_v53 = vor.u32 %v17576_v44, %v12360_v45  ;;  %v17486_v56 = vld [vmem:[#allocation2 + $0x2dc] sm:$0xf]  ;;  %v12320_v60 = vld [vmem:[#allocation2 + $0x580] sm:$0xf0] }
  0xb6   :  { %3772 = vmatpush.bf16.msra.mxu0 %v12319_v7  ;;  %v11800_v7 = vld [vmem:[#allocation2 + $0x170] sm:$0xf0]  ;;  %v17566_v59 = vld [vmem:[#allocation2 + $0x55c] sm:$0xf]  ;;  %v12003_v3 = vor.u32 %v17486_v56, %v12000_v58  ;;  %v13760_v56 = vld [vmem:[#allocation2 + $0x10c0] sm:$0xf0] }
  0xb7   :  { %3786 = vmatpush.bf16.msra.mxu1 %v12639_v10  ;;  %v17596_v10 = vld [vmem:[#allocation2 + $0x64c] sm:$0xf] }
  0xb8   :  { %3800 = vmatpush.bf16.msra.mxu2 %v12959_v12  ;;  %v12440_v12 = vld [vmem:[#allocation2 + $0x670] sm:$0xf0] }
  0xb9   :  { %3814 = vmatpush.bf16.msra.mxu3 %v13279_v16  ;;  %v11803_v16 = vor.u32 %v17436_v5, %v11800_v7  ;;  %v12443_v21 = vor.u32 %v17596_v10, %v12440_v12  ;;  %v11640_v5 = vld [vmem:[#allocation2 + $0x30] sm:$0xf0]  ;;  %v12323_v7 = vor.u32 %v17566_v59, %v12320_v60 }
  0xba   :  { %3773 = vmatpush.bf16.msra.mxu0 %v12279_v24  ;;  %v3551_v13 = vpop.f32.mrf.mxu0  ;;  %v17506_v24 = vld [vmem:[#allocation2 + $0x37c] sm:$0xf]  ;;  %v12280_v10 = vld [vmem:[#allocation2 + $0x530] sm:$0xf0] }
  0xbb   :  { %3787 = vmatpush.bf16.msra.mxu1 %v12599_v28  ;;  %v3552_v15 = vadd.f32 %v3551_v13, %v20040_v63  ;;  %v3565_v28 = vpop.f32.mrf.mxu1  ;;  %v17706_v13 = vld [vmem:[#allocation2 + $0x9bc] sm:$0xf]  ;;  %v12283_v26 = vor.u32 %v17556_v9, %v12280_v10  ;;  %v13720_v9 = vld [vmem:[#allocation2 + $0x1070] sm:$0xf0]  ;;  %v17783_v63 = vld [vmem:[#allocation2 + $0xc1c] sm:$0xf0] }
  0xbc   :  { %3801 = vmatpush.bf16.msra.mxu2 %v12919_v29  ;;  %v13679_v29 = vor.u32 %v17911_v19, %v13678_v18  ;;  %v13200_v18 = vld [vmem:[#allocation2 + $0xc60] sm:$0xf0]  ;;  %v17866_v19 = vld [vmem:[#allocation2 + $0xebc] sm:$0xf] }
  0xbd   :  { %3815 = vmatpush.bf16.msra.mxu3 %v13239_v32  ;;  %3774 = vmatmul.bf16.vlgmr.msra.gmra.mxu0 %v19085_v0  ;;  %v3566_v30 = vadd.f32 %v3565_v28, %v3552_v15  ;;  %v12083_v32 = vor.u32 %v17506_v24, %v12080_v25  ;;  %v17786_v15 = vld [vmem:[#allocation2 + $0xc3c] sm:$0xf]  ;;  %v13840_v25 = vld [vmem:[#allocation2 + $0x1160] sm:$0xf0] }
  0xbe   :  { %3822 = vmatpush.bf16.msrb.mxu0 %v13839_v33  ;;  %3788 = vmatmul.bf16.vlgmr.msra.gmra.mxu1 %v19104_v23  ;;  %v13638_v33 = vld [vmem:[#allocation2 + $0xfa8] sm:$0xf]  ;;  %v17946_v24 = vld [vmem:[#allocation2 + $0x113c] sm:$0xf]  ;;  %v13203_v28 = vor.u32 %v17786_v15, %v13200_v18  ;;  %v12720_v18 = vld [vmem:[#allocation2 + $0x8a0] sm:$0xf0] }
  0xbf   :  { %3836 = vmatpush.bf16.msrb.mxu1 %v11923_v34  ;;  %3802 = vmatmul.bf16.vlgmr.msra.gmra.mxu2 %v19125_v37  ;;  %v17901_v34 = vld [vmem:[#allocation2 + $0xfcc] sm:$0xf0] }
  0xc0   :  { %3850 = vmatpush.bf16.msrb.mxu2 %v12243_v35  ;;  %3816 = vmatmul.bf16.vlgmr.msra.gmra.mxu3 %v19129_v42  ;;  %v17416_v35 = vld [vmem:[#allocation2 + $0xac] sm:$0xf]  ;;  %v13639_v47 = vor.u32 %v17901_v34, %v13638_v33  ;;  %v13843_v34 = vor.u32 %v17946_v24, %v13840_v25  ;;  %v17826_v24 = vld [vmem:[#allocation2 + $0xd7c] sm:$0xf]  ;;  %v13360_v25 = vld [vmem:[#allocation2 + $0xda0] sm:$0xf0] }
  0xc1   :  { %3864 = vmatpush.bf16.msrb.mxu3 %v12563_v40  ;;  %v12040_v40 = vld [vmem:[#allocation2 + $0x350] sm:$0xf0]  ;;  %v17776_v33 = vld [vmem:[#allocation2 + $0xbec] sm:$0xf] }
  0xc2   :  { %3823 = vmatpush.bf16.msrb.mxu0 %v13799_v48  ;;  %v3579_v43 = vpop.f32.mrf.mxu2  ;;  %v11723_v48 = vor.u32 %v17416_v35, %v11720_v38  ;;  %v12043_v49 = vor.u32 %v17496_v39, %v12040_v40  ;;  %v13160_v35 = vld [vmem:[#allocation2 + $0xc10] sm:$0xf0]  ;;  %v17936_v39 = vld [vmem:[#allocation2 + $0x10ec] sm:$0xf] }
  0xc3   :  { %3837 = vmatpush.bf16.msrb.mxu1 %v11883_v50  ;;  %v3580_v46 = vadd.f32 %v3579_v43, %v3566_v30  ;;  %v13598_v50 = vld [vmem:[#allocation2 + $0xf58] sm:$0xf]  ;;  %v3593_v12 = vpop.f32.mrf.mxu3  ;;  %v19154_v30 = vpop.f32.mrf.mxu0  ;;  %v13480_v38 = vld [vmem:[#allocation2 + $0xe90] sm:$0xf0]  ;;  %v13163_v45 = vor.u32 %v17776_v33, %v13160_v35  ;;  %v17736_v33 = vld [vmem:[#allocation2 + $0xaac] sm:$0xf] }
  0xc4   :  { %3851 = vmatpush.bf16.msrb.mxu2 %v12203_v51  ;;  %v17891_v51 = vld [vmem:[#allocation2 + $0xf7c] sm:$0xf0]  ;;  %v13800_v40 = vld [vmem:[#allocation2 + $0x1110] sm:$0xf0]  ;;  %v19156_v43 = vpop.f32.mrf.mxu1 }
  0xc5   :  { %3865 = vmatpush.bf16.msrb.mxu3 %v12523_v55  ;;  %v11680_v55 = vld [vmem:[#allocation2 + $0x80] sm:$0xf0]  ;;  %v13599_v61 = vor.u32 %v17891_v51, %v13598_v50  ;;  %v13803_v50 = vor.u32 %v17936_v39, %v13800_v40  ;;  %v13320_v39 = vld [vmem:[#allocation2 + $0xd50] sm:$0xf0] }
  0xc6   :  { %3824 = vmatpush.bf16.msrb.mxu0 %v13759_v62  ;;  %v13558_v62 = vld [vmem:[#allocation2 + $0xf08] sm:$0xf]  ;;  %v13120_v51 = vld [vmem:[#allocation2 + $0xbc0] sm:$0xf0] }
  0xc7   :  { %3838 = vmatpush.bf16.msrb.mxu1 %v11843_v1  ;;  %v17881_v1 = vld [vmem:[#allocation2 + $0xf2c] sm:$0xf0] }
  0xc8   :  { %3852 = vmatpush.bf16.msrb.mxu2 %v12163_v2  ;;  %v11683_v2 = vor.u32 %v17406_v52, %v11680_v55  ;;  %v17846_v52 = vld [vmem:[#allocation2 + $0xe1c] sm:$0xf] }
  0xc9   :  { %3866 = vmatpush.bf16.msrb.mxu3 %v12483_v6  ;;  %v17476_v6 = vld [vmem:[#allocation2 + $0x28c] sm:$0xf]  ;;  %v17926_v55 = vld [vmem:[#allocation2 + $0x109c] sm:$0xf] }
  0xca   :  { %3825 = vmatpush.bf16.msrb.mxu0 %v13719_v14  ;;  %v12880_v14 = vld [vmem:[#allocation2 + $0x9e0] sm:$0xf0]  ;;  %v11963_v22 = vor.u32 %v17476_v6, %v11960_v8  ;;  %v19161_v59 = vpop.f32.mrf.mxu2  ;;  %v13400_v6 = vld [vmem:[#allocation2 + $0xdf0] sm:$0xf0]  ;;  %v17916_v8 = vld [vmem:[#allocation2 + $0x104c] sm:$0xf] }
  0xcb   :  { %3839 = vmatpush.bf16.msrb.mxu1 %v11803_v16  ;;  %v19152_v16 = vadd.f32 %v3593_v12, %v3580_v46  ;;  %v12883_v27 = vor.u32 %v17706_v13, %v12880_v14 }
  0xcc   :  { %3853 = vmatpush.bf16.msrb.mxu2 %v12123_v17  ;;  %v13559_v17 = vor.u32 %v17881_v1, %v13558_v62  ;;  %v17676_v62 = vld [vmem:[#allocation2 + $0x8cc] sm:$0xf]  ;;  %v12760_v1 = vld [vmem:[#allocation2 + $0x8f0] sm:$0xf0] }
  0xcd   :  { %3867 = vmatpush.bf16.msrb.mxu3 %v12443_v21  ;;  %v11643_v21 = vor.u32 %v17396_v4, %v11640_v5  ;;  %v13080_v4 = vld [vmem:[#allocation2 + $0xb70] sm:$0xf0]  ;;  %v17836_v5 = vld [vmem:[#allocation2 + $0xdcc] sm:$0xf]  ;;  %v12763_v12 = vor.u32 %v17676_v62, %v12760_v1 }
  0xce   :  { %3826 = vmatpush.bf16.msrb.mxu0 %v13679_v29  ;;  %v13523_v29 = vor.u32 %v17866_v19, %v13520_v20  ;;  %v13403_v14 = vor.u32 %v17836_v5, %v13400_v6  ;;  %v17746_v19 = vld [vmem:[#allocation2 + $0xafc] sm:$0xf]  ;;  %v13723_v20 = vor.u32 %v17916_v8, %v13720_v9  ;;  %v17636_v1 = vld [vmem:[#allocation2 + $0x78c] sm:$0xf]  ;;  %v12920_v6 = vld [vmem:[#allocation2 + $0xa30] sm:$0xf0] }
  0xcf   :  { %3840 = vmatpush.bf16.msrb.mxu1 %v11763_v31  ;;  %v17696_v31 = vld [vmem:[#allocation2 + $0x96c] sm:$0xf]  ;;  %v13240_v9 = vld [vmem:[#allocation2 + $0xcb0] sm:$0xf0] }
  0xd0   :  { %3854 = vmatpush.bf16.msrb.mxu2 %v12083_v32  ;;  %v12840_v32 = vld [vmem:[#allocation2 + $0x990] sm:$0xf0]  ;;  %v17716_v5 = vld [vmem:[#allocation2 + $0xa0c] sm:$0xf] }
  0xd1   :  { %3868 = vmatpush.bf16.msrb.mxu3 %v12403_v36  ;;  %v17856_v36 = vld [vmem:[#allocation2 + $0xe6c] sm:$0xf]  ;;  %v12843_v44 = vor.u32 %v17696_v31, %v12840_v32  ;;  %v12680_v32 = vld [vmem:[#allocation2 + $0x850] sm:$0xf0] }
  0xd2   :  { %3827 = vmatpush.bf16.msrb.mxu0 %v13639_v47  ;;  %v13483_v46 = vor.u32 %v17856_v36, %v13480_v38  ;;  %v17686_v47 = vld [vmem:[#allocation2 + $0x91c] sm:$0xf]  ;;  %v17656_v31 = vld [vmem:[#allocation2 + $0x82c] sm:$0xf]  ;;  %v13000_v36 = vld [vmem:[#allocation2 + $0xad0] sm:$0xf0] }
  0xd3   :  { %3841 = vmatpush.bf16.msrb.mxu1 %v11723_v48  ;;  %v12800_v48 = vld [vmem:[#allocation2 + $0x940] sm:$0xf0]  ;;  %v17816_v38 = vld [vmem:[#allocation2 + $0xd2c] sm:$0xf] }
  0xd4   :  { %3855 = vmatpush.bf16.msrb.mxu2 %v12043_v49  ;;  %v17766_v49 = vld [vmem:[#allocation2 + $0xb9c] sm:$0xf]  ;;  %v12803_v58 = vor.u32 %v17686_v47, %v12800_v48  ;;  %v13003_v47 = vor.u32 %v17736_v33, %v13000_v36  ;;  %v13323_v48 = vor.u32 %v17816_v38, %v13320_v39  ;;  %v12206_v33 = vld [vmem:[#allocation2 + $0x470] sm:$0xf]  ;;  %v17622_v38 = vld [vmem:[#allocation2 + $0x714] sm:$0xf0] }
  0xd5   :  { %3869 = vmatpush.bf16.msrb.mxu3 %v12363_v53  ;;  %v13440_v53 = vld [vmem:[#allocation2 + $0xe40] sm:$0xf0]  ;;  %v13123_v60 = vor.u32 %v17766_v49, %v13120_v51  ;;  %v17646_v49 = vld [vmem:[#allocation2 + $0x7dc] sm:$0xf]  ;;  %v12526_v36 = vld [vmem:[#allocation2 + $0x6f0] sm:$0xf] }
  0xd6   :  { %3828 = vmatpush.bf16.msrb.mxu0 %v13599_v61  ;;  %v13443_v61 = vor.u32 %v17846_v52, %v13440_v53  ;;  %v17726_v51 = vld [vmem:[#allocation2 + $0xa5c] sm:$0xf]  ;;  %v19167_v52 = vpop.f32.mrf.mxu3 }
  0xd7   :  { %3842 = vmatpush.bf16.msrb.mxu1 %v11683_v2  ;;  %v17756_v2 = vld [vmem:[#allocation2 + $0xb4c] sm:$0xf] }
  0xd8   :  { %3856 = vmatpush.bf16.msrb.mxu2 %v12003_v3  ;;  %v13763_v3 = vor.u32 %v17926_v55, %v13760_v56  ;;  %v13083_v13 = vor.u32 %v17756_v2, %v13080_v4  ;;  %v12960_v55 = vld [vmem:[#allocation2 + $0xa80] sm:$0xf0]  ;;  %v17806_v56 = vld [vmem:[#allocation2 + $0xcdc] sm:$0xf]  ;;  %v12600_v2 = vld [vmem:[#allocation2 + $0x7b0] sm:$0xf0] }
  0xd9   :  { %3870 = vmatpush.bf16.msrb.mxu3 %v12323_v7 }
  0xda   :  { %3829 = vmatpush.bf16.msrb.mxu0 %v13559_v17  ;;  %v3607_v7 = vpop.f32.mrf.mxu0  ;;  %v17666_v17 = vld [vmem:[#allocation2 + $0x87c] sm:$0xf] }
  0xdb   :  { %3843 = vmatpush.bf16.msrb.mxu1 %v11643_v21  ;;  %v3608_v10 = vadd.f32 %v3607_v7, %v19152_v16  ;;  %v3621_v15 = vpop.f32.mrf.mxu1  ;;  %v17796_v7 = vld [vmem:[#allocation2 + $0xc8c] sm:$0xf] }
  0xdc   :  { %3857 = vmatpush.bf16.msrb.mxu2 %v11963_v22  ;;  %v13040_v22 = vld [vmem:[#allocation2 + $0xb20] sm:$0xf0] }
  0xdd   :  { %3871 = vmatpush.bf16.msrb.mxu3 %v12283_v26  ;;  %3830 = vmatmul.bf16.vlgmr.msrb.gmra.mxu0 %v19127_v41  ;;  %v3622_v21 = vadd.f32 %v3621_v15, %v3608_v10  ;;  %v17906_v26 = vld [vmem:[#allocation2 + $0xffc] sm:$0xf]  ;;  %v13043_v16 = vor.u32 %v17746_v19, %v13040_v22  ;;  %v17876_v10 = vld [vmem:[#allocation2 + $0xf0c] sm:$0xf]  ;;  %v12246_v15 = vld [vmem:[#allocation2 + $0x4c0] sm:$0xf]  ;;  %v13243_v22 = vor.u32 %v17796_v7, %v13240_v9 }
  0xde   :  { %3878 = vmatpush.bf16.msra.mxu0 %v12883_v27  ;;  %3844 = vmatmul.bf16.vlgmr.msrb.gmra.mxu1 %v19080_v57  ;;  %v13680_v27 = vld [vmem:[#allocation2 + $0x1020] sm:$0xf0]  ;;  %v12566_v19 = vld [vmem:[#allocation2 + $0x740] sm:$0xf]  ;;  %v17442_v7 = vld [vmem:[#allocation2 + $0x174] sm:$0xf0] }
  0xdf   :  { %3892 = vmatpush.bf16.msra.mxu1 %v13203_v28  ;;  %3858 = vmatmul.bf16.vlgmr.msrb.gmra.mxu2 %v19095_v11  ;;  %v12723_v28 = vor.u32 %v17666_v17, %v12720_v18  ;;  %v12603_v17 = vor.u32 %v17636_v1, %v12600_v2  ;;  %v17552_v18 = vld [vmem:[#allocation2 + $0x4e4] sm:$0xf0] }
  0xe0   :  { %3906 = vmatpush.bf16.msra.mxu2 %v13523_v29  ;;  %3872 = vmatmul.bf16.vlgmr.msrb.gmra.mxu3 %v19085_v0  ;;  %v13363_v29 = vor.u32 %v17826_v24, %v13360_v25  ;;  %v12886_v24 = vld [vmem:[#allocation2 + $0x9c0] sm:$0xf]  ;;  %v17712_v25 = vld [vmem:[#allocation2 + $0x9e4] sm:$0xf0] }
  0xe1   :  { %3920 = vmatpush.bf16.msra.mxu3 %v13843_v34  ;;  %v13683_v34 = vor.u32 %v17906_v26, %v13680_v27  ;;  %v17692_v1 = vld [vmem:[#allocation2 + $0x944] sm:$0xf0] }
  0xe2   :  { %3879 = vmatpush.bf16.msra.mxu0 %v12843_v44  ;;  %v3635_v35 = vpop.f32.mrf.mxu2  ;;  %v17896_v44 = vld [vmem:[#allocation2 + $0xfac] sm:$0xf]  ;;  %v19169_v39 = vpop.f32.mrf.mxu0 }
  0xe3   :  { %3893 = vmatpush.bf16.msra.mxu1 %v13163_v45  ;;  %v19165_v40 = vadd.f32 %v3635_v35, %v3622_v21  ;;  %v13640_v45 = vld [vmem:[#allocation2 + $0xfd0] sm:$0xf0]  ;;  %v12923_v21 = vor.u32 %v17716_v5, %v12920_v6  ;;  %v17542_v35 = vld [vmem:[#allocation2 + $0x494] sm:$0xf0]  ;;  %v11806_v6 = vld [vmem:[#allocation2 + $0x150] sm:$0xf] }
  0xe4   :  { %3907 = vmatpush.bf16.msra.mxu2 %v13483_v46  ;;  %v12683_v46 = vor.u32 %v17656_v31, %v12680_v32  ;;  %v13643_v53 = vor.u32 %v17896_v44, %v13640_v45  ;;  %v11886_v31 = vld [vmem:[#allocation2 + $0x1f0] sm:$0xf]  ;;  %v17462_v32 = vld [vmem:[#allocation2 + $0x214] sm:$0xf0] }
  0xe5   :  { %3921 = vmatpush.bf16.msra.mxu3 %v13803_v50  ;;  %v12640_v50 = vld [vmem:[#allocation2 + $0x800] sm:$0xf0]  ;;  %v12846_v44 = vld [vmem:[#allocation2 + $0x970] sm:$0xf]  ;;  %v17702_v45 = vld [vmem:[#allocation2 + $0x994] sm:$0xf0] }
  0xe6   :  { %3880 = vmatpush.bf16.msra.mxu0 %v12803_v58  ;;  %v13280_v58 = vld [vmem:[#allocation2 + $0xd00] sm:$0xf0]  ;;  %v12643_v62 = vor.u32 %v17646_v49, %v12640_v50  ;;  %v12207_v49 = vor.u32 %v17542_v35, %v12206_v33  ;;  %v12527_v50 = vor.u32 %v17622_v38, %v12526_v36  ;;  %v17672_v35 = vld [vmem:[#allocation2 + $0x8a4] sm:$0xf0] }
  0xe7   :  { %3894 = vmatpush.bf16.msra.mxu1 %v13123_v60  ;;  %v17886_v60 = vld [vmem:[#allocation2 + $0xf5c] sm:$0xf]  ;;  %v13283_v4 = vor.u32 %v17806_v56, %v13280_v58  ;;  %v12847_v56 = vor.u32 %v17702_v45, %v12846_v44  ;;  %v17532_v58 = vld [vmem:[#allocation2 + $0x444] sm:$0xf0]  ;;  %v11726_v45 = vld [vmem:[#allocation2 + $0xb0] sm:$0xf] }
  0xe8   :  { %3908 = vmatpush.bf16.msra.mxu2 %v13443_v61  ;;  %v13600_v61 = vld [vmem:[#allocation2 + $0xf80] sm:$0xf0] }
  0xe9   :  { %3922 = vmatpush.bf16.msra.mxu3 %v13763_v3  ;;  %v12963_v3 = vor.u32 %v17726_v51, %v12960_v55  ;;  %v13603_v8 = vor.u32 %v17886_v60, %v13600_v61  ;;  %v11846_v51 = vld [vmem:[#allocation2 + $0x1a0] sm:$0xf]  ;;  %v17612_v61 = vld [vmem:[#allocation2 + $0x6c4] sm:$0xf0] }
  0xea   :  { %3881 = vmatpush.bf16.msra.mxu0 %v12763_v12  ;;  %v13560_v12 = vld [vmem:[#allocation2 + $0xf30] sm:$0xf0]  ;;  %v12166_v55 = vld [vmem:[#allocation2 + $0x420] sm:$0xf]  ;;  %v19180_v9 = vpop.f32.mrf.mxu2 }
  0xeb   :  { %3895 = vmatpush.bf16.msra.mxu1 %v13083_v13  ;;  %v11926_v13 = vld [vmem:[#allocation2 + $0x240] sm:$0xf]  ;;  %v13563_v26 = vor.u32 %v17876_v10, %v13560_v12  ;;  %v17522_v12 = vld [vmem:[#allocation2 + $0x3f4] sm:$0xf0] }
  0xec   :  { %3909 = vmatpush.bf16.msra.mxu2 %v13403_v14  ;;  %v17472_v14 = vld [vmem:[#allocation2 + $0x264] sm:$0xf0]  ;;  %v12486_v60 = vld [vmem:[#allocation2 + $0x6a0] sm:$0xf] }
  0xed   :  { %3923 = vmatpush.bf16.msra.mxu3 %v13723_v20  ;;  %v17632_v20 = vld [vmem:[#allocation2 + $0x764] sm:$0xf0]  ;;  %v11927_v27 = vor.u32 %v17472_v14, %v11926_v13  ;;  %v12487_v5 = vor.u32 %v17612_v61, %v12486_v60  ;;  %v12446_v13 = vld [vmem:[#allocation2 + $0x650] sm:$0xf]  ;;  %v17602_v14 = vld [vmem:[#allocation2 + $0x674] sm:$0xf0] }
  0xee   :  { %3882 = vmatpush.bf16.msra.mxu0 %v12723_v28  ;;  %v3649_v28 = vpop.f32.mrf.mxu3  ;;  %v17662_v60 = vld [vmem:[#allocation2 + $0x854] sm:$0xf0] }
  0xef   :  { %3896 = vmatpush.bf16.msra.mxu1 %v13043_v16  ;;  %v12247_v16 = vor.u32 %v17552_v18, %v12246_v15  ;;  %v17682_v18 = vld [vmem:[#allocation2 + $0x8f4] sm:$0xf0] }
  0xf0   :  { %3910 = vmatpush.bf16.msra.mxu2 %v13363_v29  ;;  %v12567_v29 = vor.u32 %v17632_v20, %v12566_v19  ;;  %v11807_v20 = vor.u32 %v17442_v7, %v11806_v6  ;;  %v12006_v6 = vld [vmem:[#allocation2 + $0x2e0] sm:$0xf] }
  0xf1   :  { %3924 = vmatpush.bf16.msra.mxu3 %v13683_v34  ;;  %v12887_v34 = vor.u32 %v17712_v25, %v12886_v24  ;;  %v12447_v24 = vor.u32 %v17602_v14, %v12446_v13  ;;  %v11766_v25 = vld [vmem:[#allocation2 + $0x100] sm:$0xf]  ;;  %v17572_v13 = vld [vmem:[#allocation2 + $0x584] sm:$0xf0] }
  0xf2   :  { %3883 = vmatpush.bf16.msra.mxu0 %v12683_v46  ;;  %v11887_v46 = vor.u32 %v17462_v32, %v11886_v31  ;;  %v12406_v31 = vld [vmem:[#allocation2 + $0x600] sm:$0xf]  ;;  %v17592_v32 = vld [vmem:[#allocation2 + $0x624] sm:$0xf0] }
  0xf3   :  { %3897 = vmatpush.bf16.msra.mxu1 %v13003_v47  ;;  %v20039_v47 = vperm.slane %v19143_v54, 1  ;;  %v12407_v44 = vor.u32 %v17592_v32, %v12406_v31  ;;  %v12646_v14 = vld [vmem:[#allocation2 + $0x7e0] sm:$0xf]  ;;  %v17792_v32 = vld [vmem:[#allocation2 + $0xc64] sm:$0xf0] }
  0xf4   :  { %3911 = vmatpush.bf16.msra.mxu2 %v13323_v48  ;;  %v19172_v48 = vpop.f32.mrf.mxu1  ;;  %v13206_v31 = vld [vmem:[#allocation2 + $0xc40] sm:$0xf] }
  0xf5   :  { %3925 = vmatpush.bf16.msra.mxu3 %v13643_v53  ;;  %v17452_v53 = vld [vmem:[#allocation2 + $0x1c4] sm:$0xf0] }
  0xf6   :  { %3884 = vmatpush.bf16.msra.mxu0 %v12643_v62  ;;  %v12806_v62 = vld [vmem:[#allocation2 + $0x920] sm:$0xf]  ;;  %v11847_v2 = vor.u32 %v17452_v53, %v11846_v51  ;;  %v19182_v15 = vpop.f32.mrf.mxu3  ;;  %v17502_v51 = vld [vmem:[#allocation2 + $0x354] sm:$0xf0]  ;;  %v12366_v53 = vld [vmem:[#allocation2 + $0x5b0] sm:$0xf] }
  0xf7   :  { %3898 = vmatpush.bf16.msra.mxu1 %v12963_v3  ;;  %v3650_v3 = vadd.f32 %v3649_v28, %v20039_v47  ;;  %v12807_v10 = vor.u32 %v17692_v1, %v12806_v62  ;;  %v12854_v47 = vld [vmem:[#allocation2 + $0x978] sm:$0xf] }
  0xf8   :  { %3912 = vmatpush.bf16.msra.mxu2 %v13283_v4  ;;  %v12167_v4 = vor.u32 %v17532_v58, %v12166_v55  ;;  %v17582_v55 = vld [vmem:[#allocation2 + $0x5d4] sm:$0xf0]  ;;  %v12686_v58 = vld [vmem:[#allocation2 + $0x830] sm:$0xf] }
  0xf9   :  { %3926 = vmatpush.bf16.msra.mxu3 %v13603_v8  ;;  %v12126_v8 = vld [vmem:[#allocation2 + $0x3d0] sm:$0xf] }
  0xfa   :  { %3885 = vmatpush.bf16.msra.mxu0 %v12603_v17  ;;  %v12766_v17 = vld [vmem:[#allocation2 + $0x8d0] sm:$0xf]  ;;  %v3663_v19 = vpop.f32.mrf.mxu0 }
  0xfb   :  { %3899 = vmatpush.bf16.msra.mxu1 %v12923_v21  ;;  %v3664_v21 = vadd.f32 %v3663_v19, %v3650_v3  ;;  %v12367_v3 = vor.u32 %v17582_v55, %v12366_v53  ;;  %v11646_v19 = vld [vmem:[#allocation2 + $0x10] sm:$0xf] }
  0xfc   :  { %3913 = vmatpush.bf16.msra.mxu2 %v13243_v22  ;;  %v12127_v22 = vor.u32 %v17522_v12, %v12126_v8  ;;  %v3677_v28 = vpop.f32.mrf.mxu1  ;;  %v12687_v8 = vor.u32 %v17662_v60, %v12686_v58  ;;  %v12326_v12 = vld [vmem:[#allocation2 + $0x560] sm:$0xf]  ;;  %v13166_v58 = vld [vmem:[#allocation2 + $0xbf0] sm:$0xf]  ;;  %v17782_v60 = vld [vmem:[#allocation2 + $0xc14] sm:$0xf0] }
  0xfd   :  { %3927 = vmatpush.bf16.msra.mxu3 %v13563_v26  ;;  %3886 = vmatmul.bf16.vlgmr.msra.gmra.mxu0 %v19104_v23  ;;  %v17432_v26 = vld [vmem:[#allocation2 + $0x124] sm:$0xf0]  ;;  %v3678_v33 = vadd.f32 %v3677_v28, %v3664_v21  ;;  %v17562_v28 = vld [vmem:[#allocation2 + $0x534] sm:$0xf0] }
  0xfe   :  { %3934 = vmatpush.bf16.msrb.mxu0 %v11927_v27  ;;  %3900 = vmatmul.bf16.vlgmr.msra.gmra.mxu1 %v19125_v37  ;;  %v12086_v27 = vld [vmem:[#allocation2 + $0x380] sm:$0xf]  ;;  %v11767_v36 = vor.u32 %v17432_v26, %v11766_v25  ;;  %v17482_v25 = vld [vmem:[#allocation2 + $0x2b4] sm:$0xf0]  ;;  %v12286_v26 = vld [vmem:[#allocation2 + $0x510] sm:$0xf] }
  0xff   :  { %3948 = vmatpush.bf16.msrb.mxu1 %v12247_v16  ;;  %3914 = vmatmul.bf16.vlgmr.msra.gmra.mxu2 %v19129_v42  ;;  %v12767_v16 = vor.u32 %v17682_v18, %v12766_v17  ;;  %v17652_v17 = vld [vmem:[#allocation2 + $0x804] sm:$0xf0] }
 0x100   :  { %3962 = vmatpush.bf16.msrb.mxu2 %v12567_v29  ;;  %3928 = vmatmul.bf16.vlgmr.msra.gmra.mxu3 %v19127_v41  ;;  %v17512_v29 = vld [vmem:[#allocation2 + $0x3a4] sm:$0xf0] }
 0x101   :  { %3976 = vmatpush.bf16.msrb.mxu3 %v12887_v34  ;;  %v12726_v34 = vld [vmem:[#allocation2 + $0x880] sm:$0xf]  ;;  %v12087_v38 = vor.u32 %v17512_v29, %v12086_v27  ;;  %v12647_v27 = vor.u32 %v17652_v17, %v12646_v14  ;;  %v17642_v29 = vld [vmem:[#allocation2 + $0x7b4] sm:$0xf0]  ;;  %v17772_v14 = vld [vmem:[#allocation2 + $0xbc4] sm:$0xf0] }
 0x102   :  { %3935 = vmatpush.bf16.msrb.mxu0 %v11887_v46  ;;  %v17422_v46 = vld [vmem:[#allocation2 + $0xd4] sm:$0xf0]  ;;  %v13446_v17 = vld [vmem:[#allocation2 + $0xe20] sm:$0xf] }
 0x103   :  { %3949 = vmatpush.bf16.msrb.mxu1 %v12207_v49  ;;  %v12046_v49 = vld [vmem:[#allocation2 + $0x330] sm:$0xf]  ;;  %v11727_v62 = vor.u32 %v17422_v46, %v11726_v45  ;;  %v3705_v1 = vpop.f32.mrf.mxu3  ;;  %v12287_v45 = vor.u32 %v17562_v28, %v12286_v26  ;;  %v17467_v46 = vld [vmem:[#allocation2 + $0x244] sm:$0xf] }
 0x104   :  { %3963 = vmatpush.bf16.msrb.mxu2 %v12527_v50  ;;  %v12727_v50 = vor.u32 %v17672_v35, %v12726_v34  ;;  %v17872_v35 = vld [vmem:[#allocation2 + $0xee4] sm:$0xf0]  ;;  %v13086_v28 = vld [vmem:[#allocation2 + $0xb50] sm:$0xf] }
 0x105   :  { %3977 = vmatpush.bf16.msrb.mxu3 %v12847_v56  ;;  %v3691_v56 = vpop.f32.mrf.mxu2 }
 0x106   :  { %3936 = vmatpush.bf16.msrb.mxu0 %v11847_v2  ;;  %v3692_v61 = vadd.f32 %v3691_v56, %v3678_v33  ;;  %v12047_v2 = vor.u32 %v17502_v51, %v12046_v49  ;;  %v13526_v33 = vld [vmem:[#allocation2 + $0xec0] sm:$0xf]  ;;  %v11928_v49 = vld [vmem:[#allocation2 + $0x268] sm:$0xf0]  ;;  %v13207_v51 = vor.u32 %v17792_v32, %v13206_v31  ;;  %v19186_v56 = vpop.f32.mrf.mxu0  ;;  %v17842_v32 = vld [vmem:[#allocation2 + $0xdf4] sm:$0xf0] }
 0x107   :  { %3950 = vmatpush.bf16.msrb.mxu1 %v12167_v4  ;;  %v11686_v4 = vld [vmem:[#allocation2 + $0x60] sm:$0xf]  ;;  %v13527_v53 = vor.u32 %v17872_v35, %v13526_v33  ;;  %v13726_v33 = vld [vmem:[#allocation2 + $0x1050] sm:$0xf] }
 0x108   :  { %3964 = vmatpush.bf16.msrb.mxu2 %v12487_v5  ;;  %v17412_v5 = vld [vmem:[#allocation2 + $0x84] sm:$0xf0]  ;;  %v19184_v7 = vadd.f32 %v3705_v1, %v3692_v61  ;;  %v13486_v61 = vld [vmem:[#allocation2 + $0xe70] sm:$0xf]  ;;  %v17862_v1 = vld [vmem:[#allocation2 + $0xe94] sm:$0xf0] }
 0x109   :  { %3978 = vmatpush.bf16.msrb.mxu3 %v12807_v10  ;;  %v17492_v10 = vld [vmem:[#allocation2 + $0x304] sm:$0xf0]  ;;  %v11687_v18 = vor.u32 %v17412_v5, %v11686_v4  ;;  %v17457_v4 = vld [vmem:[#allocation2 + $0x1f4] sm:$0xf]  ;;  %v11888_v5 = vld [vmem:[#allocation2 + $0x218] sm:$0xf0] }
 0x10a   :  { %3937 = vmatpush.bf16.msrb.mxu0 %v11807_v20  ;;  %v17402_v20 = vld [vmem:[#allocation2 + $0x34] sm:$0xf0]  ;;  %v12007_v21 = vor.u32 %v17492_v10, %v12006_v6  ;;  %v19188_v6 = vpop.f32.mrf.mxu1  ;;  %v13487_v10 = vor.u32 %v17862_v1, %v13486_v61  ;;  %v13686_v1 = vld [vmem:[#allocation2 + $0x1000] sm:$0xf] }
 0x10b   :  { %3951 = vmatpush.bf16.msrb.mxu1 %v12127_v22  ;;  %v12327_v22 = vor.u32 %v17572_v13, %v12326_v12  ;;  %v11647_v34 = vor.u32 %v17402_v20, %v11646_v19  ;;  %v13126_v13 = vld [vmem:[#allocation2 + $0xba0] sm:$0xf]  ;;  %v17852_v19 = vld [vmem:[#allocation2 + $0xe44] sm:$0xf0] }
 0x10c   :  { %3965 = vmatpush.bf16.msrb.mxu2 %v12447_v24  ;;  %v11966_v24 = vld [vmem:[#allocation2 + $0x290] sm:$0xf]  ;;  %v13766_v20 = vld [vmem:[#allocation2 + $0x10a0] sm:$0xf]  ;;  %v13447_v26 = vor.u32 %v17852_v19, %v13446_v17 }
 0x10d   :  { %3979 = vmatpush.bf16.msrb.mxu3 %v12767_v16  ;;  %v12606_v16 = vld [vmem:[#allocation2 + $0x790] sm:$0xf] }
 0x10e   :  { %3938 = vmatpush.bf16.msrb.mxu0 %v11767_v36  ;;  %v13846_v36 = vld [vmem:[#allocation2 + $0x1140] sm:$0xf]  ;;  %v13646_v19 = vld [vmem:[#allocation2 + $0xfb0] sm:$0xf] }
 0x10f   :  { %3952 = vmatpush.bf16.msrb.mxu1 %v12087_v38  ;;  %v17952_v38 = vld [vmem:[#allocation2 + $0x1164] sm:$0xf0] }
 0x110   :  { %3966 = vmatpush.bf16.msrb.mxu2 %v12407_v44  ;;  %v11967_v44 = vor.u32 %v17482_v25, %v11966_v24  ;;  %v13847_v55 = vor.u32 %v17952_v38, %v13846_v36  ;;  %v11848_v24 = vld [vmem:[#allocation2 + $0x1c8] sm:$0xf0]  ;;  %v13127_v25 = vor.u32 %v17772_v14, %v13126_v13  ;;  %v17437_v36 = vld [vmem:[#allocation2 + $0x154] sm:$0xf]  ;;  %v11808_v38 = vld [vmem:[#allocation2 + $0x178] sm:$0xf0] }
 0x111   :  { %3980 = vmatpush.bf16.msrb.mxu3 %v12727_v50  ;;  %v12607_v50 = vor.u32 %v17642_v29, %v12606_v16  ;;  %v17762_v16 = vld [vmem:[#allocation2 + $0xb74] sm:$0xf0]  ;;  %v13406_v29 = vld [vmem:[#allocation2 + $0xdd0] sm:$0xf] }
 0x112   :  { %3939 = vmatpush.bf16.msrb.mxu0 %v11727_v62  ;;  %v11931_v62 = vor.u32 %v17467_v46, %v11928_v49  ;;  %v13407_v46 = vor.u32 %v17842_v32, %v13406_v29  ;;  %v17742_v13 = vld [vmem:[#allocation2 + $0xad4] sm:$0xf0]  ;;  %v13326_v14 = vld [vmem:[#allocation2 + $0xd30] sm:$0xf]  ;;  %v13286_v29 = vld [vmem:[#allocation2 + $0xce0] sm:$0xf] }
 0x113   :  { %3953 = vmatpush.bf16.msrb.mxu1 %v12047_v2  ;;  %v13806_v2 = vld [vmem:[#allocation2 + $0x10f0] sm:$0xf] }
 0x114   :  { %3967 = vmatpush.bf16.msrb.mxu2 %v12367_v3  ;;  %v17942_v3 = vld [vmem:[#allocation2 + $0x1114] sm:$0xf0] }
 0x115   :  { %3981 = vmatpush.bf16.msrb.mxu3 %v12687_v8  ;;  %v13167_v8 = vor.u32 %v17782_v60, %v13166_v58  ;;  %v13807_v12 = vor.u32 %v17942_v3, %v13806_v2  ;;  %v13366_v58 = vld [vmem:[#allocation2 + $0xd80] sm:$0xf]  ;;  %v11811_v60 = vor.u32 %v17437_v36, %v11808_v38  ;;  %v17912_v2 = vld [vmem:[#allocation2 + $0x1024] sm:$0xf0]  ;;  %v19199_v3 = vpop.f32.mrf.mxu3  ;;  %v17407_v38 = vld [vmem:[#allocation2 + $0x64] sm:$0xf] }
 0x116   :  { %3940 = vmatpush.bf16.msrb.mxu0 %v11687_v18  ;;  %v11891_v18 = vor.u32 %v17457_v4, %v11888_v5  ;;  %v11768_v4 = vld [vmem:[#allocation2 + $0x128] sm:$0xf0] }
 0x117   :  { %3954 = vmatpush.bf16.msrb.mxu1 %v12007_v21  ;;  %v17932_v21 = vld [vmem:[#allocation2 + $0x10c4] sm:$0xf0] }
 0x118   :  { %3968 = vmatpush.bf16.msrb.mxu2 %v12327_v22  ;;  %v17447_v22 = vld [vmem:[#allocation2 + $0x1a4] sm:$0xf] }
 0x119   :  { %3982 = vmatpush.bf16.msrb.mxu3 %v12647_v27  ;;  %v13767_v27 = vor.u32 %v17932_v21, %v13766_v20  ;;  %v11851_v31 = vor.u32 %v17447_v22, %v11848_v24  ;;  %v17902_v20 = vld [vmem:[#allocation2 + $0xfd4] sm:$0xf0]  ;;  %v17417_v21 = vld [vmem:[#allocation2 + $0xb4] sm:$0xf]  ;;  %v11728_v22 = vld [vmem:[#allocation2 + $0xd8] sm:$0xf0] }
 0x11a   :  { %3941 = vmatpush.bf16.msrb.mxu0 %v11647_v34  ;;  %v17922_v34 = vld [vmem:[#allocation2 + $0x1074] sm:$0xf0]  ;;  %v3719_v35 = vpop.f32.mrf.mxu0  ;;  %v11731_v32 = vor.u32 %v17417_v21, %v11728_v22  ;;  %v17787_v21 = vld [vmem:[#allocation2 + $0xc44] sm:$0xf]  ;;  %v13208_v22 = vld [vmem:[#allocation2 + $0xc68] sm:$0xf0] }
 0x11b   :  { %3955 = vmatpush.bf16.msrb.mxu1 %v11967_v44  ;;  %v3720_v44 = vadd.f32 %v3719_v35, %v19184_v7  ;;  %v13727_v49 = vor.u32 %v17922_v34, %v13726_v33  ;;  %v17427_v7 = vld [vmem:[#allocation2 + $0x104] sm:$0xf]  ;;  %v17812_v33 = vld [vmem:[#allocation2 + $0xd04] sm:$0xf0]  ;;  %v13606_v34 = vld [vmem:[#allocation2 + $0xf60] sm:$0xf] }
 0x11c   :  { %3969 = vmatpush.bf16.msrb.mxu2 %v12287_v45  ;;  %v13087_v45 = vor.u32 %v17762_v16, %v13086_v28  ;;  %v11771_v17 = vor.u32 %v17427_v7, %v11768_v4  ;;  %v12966_v28 = vld [vmem:[#allocation2 + $0xa60] sm:$0xf]  ;;  %v17732_v16 = vld [vmem:[#allocation2 + $0xa84] sm:$0xf0]  ;;  %v17882_v7 = vld [vmem:[#allocation2 + $0xf34] sm:$0xf0] }
 0x11d   :  { %3983 = vmatpush.bf16.msrb.mxu3 %v12607_v50  ;;  %3942 = vmatmul.bf16.vlgmr.msrb.gmra.mxu0 %v19080_v57  ;;  %v19195_v50 = vpop.f32.mrf.mxu2  ;;  %v17892_v35 = vld [vmem:[#allocation2 + $0xf84] sm:$0xf0]  ;;  %v17397_v4 = vld [vmem:[#allocation2 + $0x14] sm:$0xf] }
 0x11e   :  { %3990 = vmatpush.bf16.msra.mxu0 %v13207_v51  ;;  %3956 = vmatmul.bf16.vlgmr.msrb.gmra.mxu1 %v19095_v11  ;;  %v3733_v51 = vpop.f32.mrf.mxu1 }
 0x11f   :  { %4004 = vmatpush.bf16.msra.mxu1 %v13527_v53  ;;  %3970 = vmatmul.bf16.vlgmr.msrb.gmra.mxu2 %v19085_v0  ;;  %v13046_v53 = vld [vmem:[#allocation2 + $0xb00] sm:$0xf]  ;;  %v19197_v61 = vadd.f32 %v3733_v51, %v3720_v44  ;;  %v11688_v44 = vld [vmem:[#allocation2 + $0x88] sm:$0xf0]  ;;  %v17722_v51 = vld [vmem:[#allocation2 + $0xa34] sm:$0xf0] }
 0x120   :  { %4018 = vmatpush.bf16.msra.mxu2 %v13847_v55  ;;  %3984 = vmatmul.bf16.vlgmr.msrb.gmra.mxu3 %v19104_v23  ;;  %v17752_v55 = vld [vmem:[#allocation2 + $0xb24] sm:$0xf0] }
 0x121   :  { %4032 = vmatpush.bf16.msra.mxu3 %v11931_v62  ;;  %v17832_v62 = vld [vmem:[#allocation2 + $0xda4] sm:$0xf0]  ;;  %v13047_v5 = vor.u32 %v17752_v55, %v13046_v53  ;;  %v13287_v55 = vor.u32 %v17812_v33, %v13286_v29  ;;  %v12208_v29 = vld [vmem:[#allocation2 + $0x498] sm:$0xf0] }
 0x122   :  { %3991 = vmatpush.bf16.msra.mxu0 %v13167_v8  ;;  %v13367_v8 = vor.u32 %v17832_v62, %v13366_v58  ;;  %v13607_v58 = vor.u32 %v17892_v35, %v13606_v34  ;;  %v17802_v62 = vld [vmem:[#allocation2 + $0xcb4] sm:$0xf0]  ;;  %v12528_v33 = vld [vmem:[#allocation2 + $0x718] sm:$0xf0]  ;;  %v17697_v34 = vld [vmem:[#allocation2 + $0x974] sm:$0xf] }
 0x123   :  { %4005 = vmatpush.bf16.msra.mxu1 %v13487_v10  ;;  %v13687_v10 = vor.u32 %v17912_v2, %v13686_v1  ;;  %v13566_v1 = vld [vmem:[#allocation2 + $0xf10] sm:$0xf]  ;;  %v11691_v2 = vor.u32 %v17407_v38, %v11688_v44  ;;  %v12848_v35 = vld [vmem:[#allocation2 + $0x998] sm:$0xf0]  ;;  %v17777_v38 = vld [vmem:[#allocation2 + $0xbf4] sm:$0xf] }
 0x124   :  { %4019 = vmatpush.bf16.msra.mxu2 %v13807_v12  ;;  %v13006_v12 = vld [vmem:[#allocation2 + $0xab0] sm:$0xf]  ;;  %v13168_v44 = vld [vmem:[#allocation2 + $0xc18] sm:$0xf0] }
 0x125   :  { %4033 = vmatpush.bf16.msra.mxu3 %v11891_v18  ;;  %v17822_v18 = vld [vmem:[#allocation2 + $0xd54] sm:$0xf0]  ;;  %v13007_v24 = vor.u32 %v17742_v13, %v13006_v12  ;;  %v17627_v12 = vld [vmem:[#allocation2 + $0x744] sm:$0xf] }
 0x126   :  { %3992 = vmatpush.bf16.msra.mxu0 %v13127_v25  ;;  %v20038_v25 = vperm.slane %v19143_v54, 2 }
 0x127   :  { %4006 = vmatpush.bf16.msra.mxu1 %v13447_v26  ;;  %v13327_v26 = vor.u32 %v17822_v18, %v13326_v14  ;;  %v12568_v14 = vld [vmem:[#allocation2 + $0x768] sm:$0xf0] }
 0x128   :  { %4020 = vmatpush.bf16.msra.mxu2 %v13767_v27  ;;  %v13647_v27 = vor.u32 %v17902_v20, %v13646_v19  ;;  %v12888_v18 = vld [vmem:[#allocation2 + $0x9e8] sm:$0xf0]  ;;  %v13567_v20 = vor.u32 %v17882_v7, %v13566_v1 }
 0x129   :  { %4034 = vmatpush.bf16.msra.mxu3 %v11851_v31  ;;  %v3747_v31 = vpop.f32.mrf.mxu2  ;;  %v12488_v1 = vld [vmem:[#allocation2 + $0x6c8] sm:$0xf0] }
 0x12a   :  { %3993 = vmatpush.bf16.msra.mxu0 %v13087_v45  ;;  %v3748_v36 = vadd.f32 %v3747_v31, %v20038_v25  ;;  %v3761_v45 = vpop.f32.mrf.mxu3  ;;  %v17617_v31 = vld [vmem:[#allocation2 + $0x6f4] sm:$0xf]  ;;  %v12808_v7 = vld [vmem:[#allocation2 + $0x948] sm:$0xf0]  ;;  %v17623_v25 = vld [vmem:[#allocation2 + $0x71c] sm:$0xf0] }
 0x12b   :  { %4007 = vmatpush.bf16.msra.mxu1 %v13407_v46  ;;  %v12967_v46 = vor.u32 %v17732_v16, %v12966_v28  ;;  %v17537_v16 = vld [vmem:[#allocation2 + $0x474] sm:$0xf] }
 0x12c   :  { %4021 = vmatpush.bf16.msra.mxu2 %v13727_v49  ;;  %v12926_v49 = vld [vmem:[#allocation2 + $0xa10] sm:$0xf]  ;;  %v19204_v53 = vadd.f32 %v3761_v45, %v3748_v36  ;;  %v19206_v36 = vpop.f32.mrf.mxu0  ;;  %v12211_v45 = vor.u32 %v17537_v16, %v12208_v29 }
 0x12d   :  { %4035 = vmatpush.bf16.msra.mxu3 %v11811_v60  ;;  %v13246_v60 = vld [vmem:[#allocation2 + $0xc90] sm:$0xf]  ;;  %v12927_v13 = vor.u32 %v17722_v51, %v12926_v49  ;;  %v12531_v49 = vor.u32 %v17617_v31, %v12528_v33  ;;  %v12851_v51 = vor.u32 %v17697_v34, %v12848_v35  ;;  %v17507_v33 = vld [vmem:[#allocation2 + $0x384] sm:$0xf]  ;;  %v12088_v34 = vld [vmem:[#allocation2 + $0x3a8] sm:$0xf0] }
 0x12e   :  { %3994 = vmatpush.bf16.msra.mxu0 %v13047_v5  ;;  %v11648_v5 = vld [vmem:[#allocation2 + $0x38] sm:$0xf0]  ;;  %v13247_v19 = vor.u32 %v17802_v62, %v13246_v60  ;;  %v17607_v60 = vld [vmem:[#allocation2 + $0x6a4] sm:$0xf]  ;;  %v13171_v62 = vor.u32 %v17777_v38, %v13168_v44 }
 0x12f   :  { %4008 = vmatpush.bf16.msra.mxu1 %v13367_v8  ;;  %v17547_v8 = vld [vmem:[#allocation2 + $0x4c4] sm:$0xf] }
 0x130   :  { %4022 = vmatpush.bf16.msra.mxu2 %v13687_v10  ;;  %v12248_v10 = vld [vmem:[#allocation2 + $0x4e8] sm:$0xf0]  ;;  %v17587_v35 = vld [vmem:[#allocation2 + $0x604] sm:$0xf] }
 0x131   :  { %4036 = vmatpush.bf16.msra.mxu3 %v11771_v17  ;;  %v17707_v17 = vld [vmem:[#allocation2 + $0x9c4] sm:$0xf] }
 0x132   :  { %3995 = vmatpush.bf16.msra.mxu0 %v13007_v24  ;;  %v11651_v24 = vor.u32 %v17397_v4, %v11648_v5  ;;  %v12891_v28 = vor.u32 %v17707_v17, %v12888_v18  ;;  %v17767_v4 = vld [vmem:[#allocation2 + $0xba4] sm:$0xf]  ;;  %v13128_v5 = vld [vmem:[#allocation2 + $0xbc8] sm:$0xf0]  ;;  %v12128_v17 = vld [vmem:[#allocation2 + $0x3f8] sm:$0xf0] }
 0x133   :  { %4009 = vmatpush.bf16.msra.mxu1 %v13327_v26  ;;  %v12251_v26 = vor.u32 %v17547_v8, %v12248_v10  ;;  %v19213_v10 = vpop.f32.mrf.mxu2  ;;  %v17597_v18 = vld [vmem:[#allocation2 + $0x654] sm:$0xf] }
 0x134   :  { %4023 = vmatpush.bf16.msra.mxu2 %v13647_v27  ;;  %v12571_v27 = vor.u32 %v17627_v12, %v12568_v14  ;;  %v12491_v12 = vor.u32 %v17607_v60, %v12488_v1  ;;  %v17517_v14 = vld [vmem:[#allocation2 + $0x3d4] sm:$0xf]  ;;  %v13048_v60 = vld [vmem:[#allocation2 + $0xb28] sm:$0xf0] }
 0x135   :  { %4037 = vmatpush.bf16.msra.mxu3 %v11731_v32  ;;  %v13211_v32 = vor.u32 %v17787_v21, %v13208_v22  ;;  %v17677_v21 = vld [vmem:[#allocation2 + $0x8d4] sm:$0xf]  ;;  %v12768_v22 = vld [vmem:[#allocation2 + $0x8f8] sm:$0xf0]  ;;  %v12131_v16 = vor.u32 %v17517_v14, %v12128_v17 }
 0x136   :  { %3996 = vmatpush.bf16.msra.mxu0 %v12967_v46  ;;  %v19208_v46 = vpop.f32.mrf.mxu1  ;;  %v17737_v17 = vld [vmem:[#allocation2 + $0xab4] sm:$0xf] }
 0x137   :  { %4010 = vmatpush.bf16.msra.mxu1 %v13287_v55  ;;  %v17527_v55 = vld [vmem:[#allocation2 + $0x424] sm:$0xf] }
 0x138   :  { %4024 = vmatpush.bf16.msra.mxu2 %v13607_v58  ;;  %v12168_v58 = vld [vmem:[#allocation2 + $0x448] sm:$0xf0] }
 0x139   :  { %4038 = vmatpush.bf16.msra.mxu3 %v11691_v2  ;;  %v17687_v2 = vld [vmem:[#allocation2 + $0x924] sm:$0xf]  ;;  %v12171_v8 = vor.u32 %v17527_v55, %v12168_v58 }
 0x13a   :  { %3997 = vmatpush.bf16.msra.mxu0 %v12927_v13  ;;  %v12811_v13 = vor.u32 %v17687_v2, %v12808_v7  ;;  %v17747_v58 = vld [vmem:[#allocation2 + $0xb04] sm:$0xf]  ;;  %v17497_v2 = vld [vmem:[#allocation2 + $0x334] sm:$0xf]  ;;  %v12048_v7 = vld [vmem:[#allocation2 + $0x358] sm:$0xf0] }
 0x13b   :  { %4011 = vmatpush.bf16.msra.mxu1 %v13247_v19  ;;  %v13131_v19 = vor.u32 %v17767_v4, %v13128_v5  ;;  %v17577_v4 = vld [vmem:[#allocation2 + $0x5b4] sm:$0xf]  ;;  %v13051_v5 = vor.u32 %v17747_v58, %v13048_v60  ;;  %v12288_v60 = vld [vmem:[#allocation2 + $0x538] sm:$0xf0] }
 0x13c   :  { %4025 = vmatpush.bf16.msra.mxu2 %v13567_v20  ;;  %v12448_v20 = vld [vmem:[#allocation2 + $0x678] sm:$0xf0]  ;;  %v17557_v58 = vld [vmem:[#allocation2 + $0x514] sm:$0xf] }
 0x13d   :  { %4039 = vmatpush.bf16.msra.mxu3 %v11651_v24  ;;  %3998 = vmatmul.bf16.vlgmr.msra.gmra.mxu0 %v19125_v37  ;;  %v19216_v24 = vpop.f32.mrf.mxu3  ;;  %v12451_v31 = vor.u32 %v17597_v18, %v12448_v20  ;;  %v13008_v18 = vld [vmem:[#allocation2 + $0xad8] sm:$0xf0]  ;;  %v12051_v20 = vor.u32 %v17497_v2, %v12048_v7  ;;  %v17717_v2 = vld [vmem:[#allocation2 + $0xa14] sm:$0xf] }
 0x13e   :  { %4046 = vmatpush.bf16.msrb.mxu0 %v12251_v26  ;;  %4012 = vmatmul.bf16.vlgmr.msra.gmra.mxu1 %v19129_v42  ;;  %v17757_v26 = vld [vmem:[#allocation2 + $0xb54] sm:$0xf]  ;;  %v3789_v38 = vpop.f32.mrf.mxu1  ;;  %v12928_v7 = vld [vmem:[#allocation2 + $0xa38] sm:$0xf0] }
 0x13f   :  { %4060 = vmatpush.bf16.msrb.mxu1 %v12571_v27  ;;  %4026 = vmatmul.bf16.vlgmr.msra.gmra.mxu2 %v19127_v41  ;;  %v13088_v27 = vld [vmem:[#allocation2 + $0xb78] sm:$0xf0] }
 0x140   :  { %4074 = vmatpush.bf16.msrb.mxu2 %v12891_v28  ;;  %4040 = vmatmul.bf16.vlgmr.msra.gmra.mxu3 %v19080_v57  ;;  %v3775_v28 = vpop.f32.mrf.mxu0  ;;  %v13091_v44 = vor.u32 %v17757_v26, %v13088_v27  ;;  %v17487_v27 = vld [vmem:[#allocation2 + $0x2e4] sm:$0xf] }
 0x141   :  { %4088 = vmatpush.bf16.msrb.mxu3 %v13211_v32  ;;  %v3776_v29 = vadd.f32 %v3775_v28, %v19204_v53  ;;  %v12771_v32 = vor.u32 %v17677_v21, %v12768_v22  ;;  %v12008_v28 = vld [vmem:[#allocation2 + $0x308] sm:$0xf0] }
 0x142   :  { %4047 = vmatpush.bf16.msrb.mxu0 %v12211_v45  ;;  %v12408_v45 = vld [vmem:[#allocation2 + $0x628] sm:$0xf0]  ;;  %v3803_v14 = vpop.f32.mrf.mxu2 }
 0x143   :  { %4061 = vmatpush.bf16.msrb.mxu1 %v12531_v49  ;;  %v17667_v49 = vld [vmem:[#allocation2 + $0x884] sm:$0xf]  ;;  %v3790_v55 = vadd.f32 %v3789_v38, %v3776_v29  ;;  %v12411_v53 = vor.u32 %v17587_v35, %v12408_v45  ;;  %v12968_v38 = vld [vmem:[#allocation2 + $0xa88] sm:$0xf0]  ;;  %v17477_v45 = vld [vmem:[#allocation2 + $0x294] sm:$0xf] }
 0x144   :  { %4075 = vmatpush.bf16.msrb.mxu2 %v12851_v51  ;;  %v12728_v51 = vld [vmem:[#allocation2 + $0x8a8] sm:$0xf0]  ;;  %v17727_v35 = vld [vmem:[#allocation2 + $0xa64] sm:$0xf] }
 0x145   :  { %4089 = vmatpush.bf16.msrb.mxu3 %v13171_v62  ;;  %v12091_v62 = vor.u32 %v17507_v33, %v12088_v34  ;;  %v12731_v1 = vor.u32 %v17667_v49, %v12728_v51  ;;  %v3817_v21 = vpop.f32.mrf.mxu3  ;;  %v17647_v33 = vld [vmem:[#allocation2 + $0x7e4] sm:$0xf]  ;;  %v12648_v34 = vld [vmem:[#allocation2 + $0x808] sm:$0xf0]  ;;  %v11968_v49 = vld [vmem:[#allocation2 + $0x2b8] sm:$0xf0] }
 0x146   :  { %4048 = vmatpush.bf16.msrb.mxu0 %v12171_v8  ;;  %v12368_v8 = vld [vmem:[#allocation2 + $0x5d8] sm:$0xf0] }
 0x147   :  { %4062 = vmatpush.bf16.msrb.mxu1 %v12491_v12  ;;  %v17657_v12 = vld [vmem:[#allocation2 + $0x834] sm:$0xf]  ;;  %v12371_v22 = vor.u32 %v17577_v4, %v12368_v8  ;;  %v17867_v4 = vld [vmem:[#allocation2 + $0xec4] sm:$0xf] }
 0x148   :  { %4076 = vmatpush.bf16.msrb.mxu2 %v12811_v13  ;;  %v12688_v13 = vld [vmem:[#allocation2 + $0x858] sm:$0xf0]  ;;  %v17947_v8 = vld [vmem:[#allocation2 + $0x1144] sm:$0xf] }
 0x149   :  { %4090 = vmatpush.bf16.msrb.mxu3 %v13131_v19  ;;  %v3804_v19 = vadd.f32 %v3803_v14, %v3790_v55  ;;  %v12691_v26 = vor.u32 %v17657_v12, %v12688_v13  ;;  %v12651_v55 = vor.u32 %v17647_v33, %v12648_v34  ;;  %v11971_v12 = vor.u32 %v17477_v45, %v11968_v49  ;;  %v13848_v13 = vld [vmem:[#allocation2 + $0x1168] sm:$0xf0]  ;;  %v11934_v14 = vld [vmem:[#allocation2 + $0x248] sm:$0xf]  ;;  %v17937_v33 = vld [vmem:[#allocation2 + $0x10f4] sm:$0xf] }
 0x14a   :  { %4049 = vmatpush.bf16.msrb.mxu0 %v12131_v16  ;;  %v17567_v16 = vld [vmem:[#allocation2 + $0x564] sm:$0xf]  ;;  %v12214_v45 = vld [vmem:[#allocation2 + $0x478] sm:$0xf]  ;;  %v17543_v49 = vld [vmem:[#allocation2 + $0x49c] sm:$0xf0] }
 0x14b   :  { %4063 = vmatpush.bf16.msrb.mxu1 %v12451_v31  ;;  %v19219_v29 = vadd.f32 %v3817_v21, %v3804_v19  ;;  %v13011_v31 = vor.u32 %v17737_v17, %v13008_v18  ;;  %v17473_v17 = vld [vmem:[#allocation2 + $0x26c] sm:$0xf0]  ;;  %v12291_v18 = vor.u32 %v17557_v58, %v12288_v60  ;;  %v17847_v60 = vld [vmem:[#allocation2 + $0xe24] sm:$0xf] }
 0x14c   :  { %4077 = vmatpush.bf16.msrb.mxu2 %v12771_v32  ;;  %v12328_v32 = vld [vmem:[#allocation2 + $0x588] sm:$0xf0]  ;;  %v17553_v21 = vld [vmem:[#allocation2 + $0x4ec] sm:$0xf0] }
 0x14d   :  { %4091 = vmatpush.bf16.msrb.mxu3 %v13091_v44  ;;  %v12011_v44 = vor.u32 %v17487_v27, %v12008_v28  ;;  %v12331_v51 = vor.u32 %v17567_v16, %v12328_v32  ;;  %v13851_v27 = vor.u32 %v17947_v8, %v13848_v13  ;;  %v11935_v28 = vor.u32 %v17473_v17, %v11934_v14  ;;  %v19221_v16 = vpop.f32.mrf.mxu0  ;;  %v13488_v32 = vld [vmem:[#allocation2 + $0xe98] sm:$0xf0]  ;;  %v12174_v8 = vld [vmem:[#allocation2 + $0x428] sm:$0xf] }
 0x14e   :  { %4050 = vmatpush.bf16.msrb.mxu0 %v12091_v62  ;;  %v17637_v62 = vld [vmem:[#allocation2 + $0x794] sm:$0xf] }
 0x14f   :  { %4064 = vmatpush.bf16.msrb.mxu1 %v12411_v53  ;;  %v12971_v53 = vor.u32 %v17727_v35, %v12968_v38  ;;  %v13808_v35 = vld [vmem:[#allocation2 + $0x1118] sm:$0xf0]  ;;  %v11894_v38 = vld [vmem:[#allocation2 + $0x1f8] sm:$0xf] }
 0x150   :  { %4078 = vmatpush.bf16.msrb.mxu2 %v12731_v1  ;;  %v12608_v1 = vld [vmem:[#allocation2 + $0x7b8] sm:$0xf0] }
 0x151   :  { %4092 = vmatpush.bf16.msrb.mxu3 %v13051_v5  ;;  %v13528_v5 = vld [vmem:[#allocation2 + $0xee8] sm:$0xf0]  ;;  %v12611_v19 = vor.u32 %v17637_v62, %v12608_v1  ;;  %v12215_v1 = vor.u32 %v17543_v49, %v12214_v45  ;;  %v19237_v45 = vpop.f32.mrf.mxu3 }
 0x152   :  { %4051 = vmatpush.bf16.msrb.mxu0 %v12051_v20  ;;  %v12254_v20 = vld [vmem:[#allocation2 + $0x4c8] sm:$0xf]  ;;  %v13448_v62 = vld [vmem:[#allocation2 + $0xe48] sm:$0xf0]  ;;  %20050 = vst [vmem:[#allocation18_spill] sm:$0xff] %v19237_v45 }
 0x153   :  { %4065 = vmatpush.bf16.msrb.mxu1 %v12371_v22  ;;  %v12931_v22 = vor.u32 %v17717_v2, %v12928_v7  ;;  %v12255_v34 = vor.u32 %v17553_v21, %v12254_v20  ;;  %v13768_v2 = vld [vmem:[#allocation2 + $0x10c8] sm:$0xf0]  ;;  %v11854_v7 = vld [vmem:[#allocation2 + $0x1a8] sm:$0xf]  ;;  %v13451_v13 = vor.u32 %v17847_v60, %v13448_v62  ;;  %v17917_v20 = vld [vmem:[#allocation2 + $0x1054] sm:$0xf] }
 0x154   :  { %4079 = vmatpush.bf16.msrb.mxu2 %v12691_v26  ;;  %v13531_v26 = vor.u32 %v17867_v4, %v13528_v5  ;;  %v17453_v4 = vld [vmem:[#allocation2 + $0x1cc] sm:$0xf0]  ;;  %v19223_v5 = vpop.f32.mrf.mxu1  ;;  %v17907_v60 = vld [vmem:[#allocation2 + $0x1004] sm:$0xf] }
 0x155   :  { %4093 = vmatpush.bf16.msrb.mxu3 %v13011_v31  ;;  %v17857_v31 = vld [vmem:[#allocation2 + $0xe74] sm:$0xf]  ;;  %v11855_v17 = vor.u32 %v17453_v4, %v11854_v7  ;;  %v12094_v4 = vld [vmem:[#allocation2 + $0x388] sm:$0xf]  ;;  %v12216_v45 = vld [vmem:[#allocation2 + $0x4a0] sm:$0xf0] }
 0x156   :  { %4052 = vmatpush.bf16.msrb.mxu0 %v12011_v44  ;;  %v17463_v44 = vld [vmem:[#allocation2 + $0x21c] sm:$0xf0] }
 0x157   :  { %4066 = vmatpush.bf16.msrb.mxu1 %v12331_v51  ;;  %v13491_v51 = vor.u32 %v17857_v31, %v13488_v32  ;;  %v11895_v58 = vor.u32 %v17463_v44, %v11894_v38  ;;  %v12134_v32 = vld [vmem:[#allocation2 + $0x3d8] sm:$0xf] }
 0x158   :  { %4080 = vmatpush.bf16.msrb.mxu2 %v12651_v55  ;;  %v13811_v55 = vor.u32 %v17937_v33, %v13808_v35  ;;  %v17523_v33 = vld [vmem:[#allocation2 + $0x3fc] sm:$0xf0] }
 0x159   :  { %4094 = vmatpush.bf16.msrb.mxu3 %v12971_v53  ;;  %v17927_v53 = vld [vmem:[#allocation2 + $0x10a4] sm:$0xf]  ;;  %v12135_v62 = vor.u32 %v17523_v33, %v12134_v32  ;;  %v17503_v32 = vld [vmem:[#allocation2 + $0x35c] sm:$0xf0] }
 0x15a   :  { %4053 = vmatpush.bf16.msrb.mxu0 %v11971_v12  ;;  %v17533_v12 = vld [vmem:[#allocation2 + $0x44c] sm:$0xf0]  ;;  %v13771_v14 = vor.u32 %v17927_v53, %v13768_v2  ;;  %v3831_v31 = vpop.f32.mrf.mxu0  ;;  %v13688_v53 = vld [vmem:[#allocation2 + $0x1028] sm:$0xf0] }
 0x15b   :  { %4067 = vmatpush.bf16.msrb.mxu1 %v12291_v18  ;;  %v17837_v18 = vld [vmem:[#allocation2 + $0xdd4] sm:$0xf]  ;;  %v12175_v21 = vor.u32 %v17533_v12, %v12174_v8  ;;  %v19235_v38 = vadd.f32 %v3831_v31, %v19219_v29  ;;  %v17433_v2 = vld [vmem:[#allocation2 + $0x12c] sm:$0xf0]  ;;  %v12054_v31 = vld [vmem:[#allocation2 + $0x338] sm:$0xf] }
 0x15c   :  { %4081 = vmatpush.bf16.msrb.mxu2 %v12611_v19  ;;  %v13408_v19 = vld [vmem:[#allocation2 + $0xdf8] sm:$0xf0]  ;;  %v3845_v7 = vpop.f32.mrf.mxu1  ;;  %v17513_v8 = vld [vmem:[#allocation2 + $0x3ac] sm:$0xf0] }
 0x15d   :  { %4095 = vmatpush.bf16.msrb.mxu3 %v12931_v22  ;;  %4054 = vmatmul.bf16.vlgmr.msrb.gmra.mxu0 %v19095_v11  ;;  %v13728_v22 = vld [vmem:[#allocation2 + $0x1078] sm:$0xf0]  ;;  %20049 = vst [vmem:[#allocation17_spill] sm:$0xff] %v19235_v38  ;;  %v13411_v44 = vor.u32 %v17837_v18, %v13408_v19  ;;  %v17897_v19 = vld [vmem:[#allocation2 + $0xfb4] sm:$0xf] }
 0x15e   :  { %4102 = vmatpush.bf16.msra.mxu0 %v13531_v26  ;;  %4068 = vmatmul.bf16.vlgmr.msrb.gmra.mxu1 %v19085_v0  ;;  %v11814_v26 = vld [vmem:[#allocation2 + $0x158] sm:$0xf]  ;;  %v13731_v49 = vor.u32 %v17917_v20, %v13728_v22  ;;  %v13328_v18 = vld [vmem:[#allocation2 + $0xd58] sm:$0xf0]  ;;  %v12095_v20 = vor.u32 %v17513_v8, %v12094_v4  ;;  %v17413_v4 = vld [vmem:[#allocation2 + $0x8c] sm:$0xf0] }
 0x15f   :  { %4116 = vmatpush.bf16.msra.mxu1 %v13851_v27  ;;  %4082 = vmatmul.bf16.vlgmr.msrb.gmra.mxu2 %v19104_v23  ;;  %v17443_v27 = vld [vmem:[#allocation2 + $0x17c] sm:$0xf0]  ;;  %v11734_v22 = vld [vmem:[#allocation2 + $0xb8] sm:$0xf]  ;;  %v12014_v8 = vld [vmem:[#allocation2 + $0x2e8] sm:$0xf] }
 0x160   :  { %4130 = vmatpush.bf16.msra.mxu2 %v11935_v28  ;;  %4096 = vmatmul.bf16.vlgmr.msrb.gmra.mxu3 %v19125_v37  ;;  %v19229_v28 = vpop.f32.mrf.mxu2 }
 0x161   :  { %4144 = vmatpush.bf16.msra.mxu3 %v12255_v34  ;;  %20048 = vst [vmem:[#allocation16_spill] sm:$0xff] %v19229_v28  ;;  %v19231_v34 = vld [vmem:[#allocation4] sm:$0xff] }
 0x162   :  { %4103 = vmatpush.bf16.msra.mxu0 %v13491_v51  ;;  %v20037_v35 = vperm.slane %v19231_v34, 3  ;;  %v11815_v51 = vor.u32 %v17443_v27, %v11814_v26  ;;  %v17423_v26 = vld [vmem:[#allocation2 + $0xdc] sm:$0xf0]  ;;  %v19243_v38 = vpop.f32.mrf.mxu0  ;;  %v17699_v28 = vld [vmem:[#allocation2 + $0x984] sm:$0xf] }
 0x163   :  { %4117 = vmatpush.bf16.msra.mxu1 %v13811_v55  ;;  %v17827_v55 = vld [vmem:[#allocation2 + $0xd84] sm:$0xf]  ;;  %20051 = vst [vmem:[#allocation19_spill] sm:$0xff] %v19243_v38  ;;  %v17458_v38 = vld [vmem:[#allocation2 + $0x1fc] sm:$0xf] }
 0x164   :  { %4131 = vmatpush.bf16.msra.mxu2 %v11895_v58  ;;  %v13368_v58 = vld [vmem:[#allocation2 + $0xda8] sm:$0xf0]  ;;  %v3846_v29 = vadd.f32 %v3845_v7, %v20037_v35  ;;  %v17493_v35 = vld [vmem:[#allocation2 + $0x30c] sm:$0xf0] }
 0x165   :  { %4145 = vmatpush.bf16.msra.mxu3 %v12215_v1  ;;  %v11774_v1 = vld [vmem:[#allocation2 + $0x108] sm:$0xf]  ;;  %v13371_v12 = vor.u32 %v17827_v55, %v13368_v58  ;;  %v17807_v55 = vld [vmem:[#allocation2 + $0xce4] sm:$0xf]  ;;  %v13288_v58 = vld [vmem:[#allocation2 + $0xd08] sm:$0xf0] }
 0x166   :  { %4104 = vmatpush.bf16.msra.mxu0 %v13451_v13  ;;  %v13691_v13 = vor.u32 %v17907_v60, %v13688_v53  ;;  %v17887_v60 = vld [vmem:[#allocation2 + $0xf64] sm:$0xf] }
 0x167   :  { %4118 = vmatpush.bf16.msra.mxu1 %v13771_v14  ;;  %v11775_v14 = vor.u32 %v17433_v2, %v11774_v1  ;;  %v13608_v1 = vld [vmem:[#allocation2 + $0xf88] sm:$0xf0]  ;;  %v11694_v2 = vld [vmem:[#allocation2 + $0x68] sm:$0xf] }
 0x168   :  { %4132 = vmatpush.bf16.msra.mxu2 %v11855_v17  ;;  %v17817_v17 = vld [vmem:[#allocation2 + $0xd34] sm:$0xf]  ;;  %v3859_v27 = vpop.f32.mrf.mxu2 }
 0x169   :  { %4146 = vmatpush.bf16.msra.mxu3 %v12175_v21  ;;  %v13648_v21 = vld [vmem:[#allocation2 + $0xfd8] sm:$0xf0]  ;;  %v3860_v33 = vadd.f32 %v3859_v27, %v3846_v29  ;;  %v13331_v7 = vor.u32 %v17817_v17, %v13328_v18  ;;  %v13291_v29 = vor.u32 %v17807_v55, %v13288_v58  ;;  %v17877_v18 = vld [vmem:[#allocation2 + $0xf14] sm:$0xf]  ;;  %v17483_v27 = vld [vmem:[#allocation2 + $0x2bc] sm:$0xf0] }
 0x16a   :  { %4105 = vmatpush.bf16.msra.mxu0 %v13411_v44  ;;  %v3873_v44 = vpop.f32.mrf.mxu3  ;;  %v13248_v17 = vld [vmem:[#allocation2 + $0xcb8] sm:$0xf0]  ;;  %v13214_v55 = vld [vmem:[#allocation2 + $0xc48] sm:$0xf]  ;;  %v17793_v58 = vld [vmem:[#allocation2 + $0xc6c] sm:$0xf0] }
 0x16b   :  { %4119 = vmatpush.bf16.msra.mxu1 %v13731_v49  ;;  %v13651_v49 = vor.u32 %v17897_v19, %v13648_v21  ;;  %v19241_v53 = vadd.f32 %v3873_v44, %v3860_v33  ;;  %v13568_v19 = vld [vmem:[#allocation2 + $0xf38] sm:$0xf0]  ;;  %v11654_v21 = vld [vmem:[#allocation2 + $0x18] sm:$0xf]  ;;  %v12894_v33 = vld [vmem:[#allocation2 + $0x9c8] sm:$0xf] }
 0x16c   :  { %4133 = vmatpush.bf16.msra.mxu2 %v11815_v51  ;;  %v11735_v51 = vor.u32 %v17423_v26, %v11734_v22  ;;  %v12015_v22 = vor.u32 %v17493_v35, %v12014_v8  ;;  %v11974_v26 = vld [vmem:[#allocation2 + $0x298] sm:$0xf]  ;;  %v17713_v44 = vld [vmem:[#allocation2 + $0x9ec] sm:$0xf0] }
 0x16d   :  { %4147 = vmatpush.bf16.msra.mxu3 %v12135_v62  ;;  %v12055_v62 = vor.u32 %v17503_v32, %v12054_v31  ;;  %v12574_v31 = vld [vmem:[#allocation2 + $0x748] sm:$0xf]  ;;  %v17633_v32 = vld [vmem:[#allocation2 + $0x76c] sm:$0xf0]  ;;  %v12534_v8 = vld [vmem:[#allocation2 + $0x6f8] sm:$0xf] }
 0x16e   :  { %4106 = vmatpush.bf16.msra.mxu0 %v13371_v12  ;;  %v17797_v12 = vld [vmem:[#allocation2 + $0xc94] sm:$0xf]  ;;  %v12575_v35 = vor.u32 %v17633_v32, %v12574_v31  ;;  %v17693_v32 = vld [vmem:[#allocation2 + $0x94c] sm:$0xf0] }
 0x16f   :  { %4120 = vmatpush.bf16.msra.mxu1 %v13691_v13  ;;  %v13611_v13 = vor.u32 %v17887_v60, %v13608_v1  ;;  %v13534_v60 = vld [vmem:[#allocation2 + $0xec8] sm:$0xf]  ;;  %v17873_v1 = vld [vmem:[#allocation2 + $0xeec] sm:$0xf0] }
 0x170   :  { %4134 = vmatpush.bf16.msra.mxu2 %v11775_v14  ;;  %v11695_v14 = vor.u32 %v17413_v4, %v11694_v2  ;;  %v12895_v2 = vor.u32 %v17713_v44, %v12894_v33  ;;  %v13215_v4 = vor.u32 %v17793_v58, %v13214_v55  ;;  %v13134_v33 = vld [vmem:[#allocation2 + $0xba8] sm:$0xf]  ;;  %v17853_v55 = vld [vmem:[#allocation2 + $0xe4c] sm:$0xf0] }
 0x171   :  { %4148 = vmatpush.bf16.msra.mxu3 %v12095_v20  ;;  %v17403_v20 = vld [vmem:[#allocation2 + $0x3c] sm:$0xf0]  ;;  %v13454_v44 = vld [vmem:[#allocation2 + $0xe28] sm:$0xf] }
 0x172   :  { %4107 = vmatpush.bf16.msra.mxu0 %v13331_v7  ;;  %v13251_v7 = vor.u32 %v17797_v12, %v13248_v17  ;;  %v17703_v12 = vld [vmem:[#allocation2 + $0x99c] sm:$0xf0]  ;;  %v13174_v17 = vld [vmem:[#allocation2 + $0xbf8] sm:$0xf] }
 0x173   :  { %4121 = vmatpush.bf16.msra.mxu1 %v13651_v49  ;;  %v13571_v49 = vor.u32 %v17877_v18, %v13568_v19  ;;  %v19245_v18 = vpop.f32.mrf.mxu1  ;;  %v12535_v19 = vor.u32 %v17623_v25, %v12534_v8 }
 0x174   :  { %4135 = vmatpush.bf16.msra.mxu2 %v11735_v51  ;;  %v11655_v51 = vor.u32 %v17403_v20, %v11654_v21  ;;  %v12855_v21 = vor.u32 %v17703_v12, %v12854_v47  ;;  %v12494_v20 = vld [vmem:[#allocation2 + $0x6a8] sm:$0xf]  ;;  %v19250_v47 = vpop.f32.mrf.mxu2  ;;  %v17843_v12 = vld [vmem:[#allocation2 + $0xdfc] sm:$0xf0] }
 0x175   :  { %4149 = vmatpush.bf16.msra.mxu3 %v12055_v62  ;;  %v11975_v62 = vor.u32 %v17483_v27, %v11974_v26  ;;  %v17613_v26 = vld [vmem:[#allocation2 + $0x6cc] sm:$0xf0]  ;;  %v12814_v27 = vld [vmem:[#allocation2 + $0x928] sm:$0xf] }
 0x176   :  { %4108 = vmatpush.bf16.msra.mxu0 %v13291_v29  ;;  %v13535_v29 = vor.u32 %v17873_v1, %v13534_v60  ;;  %v12495_v25 = vor.u32 %v17613_v26, %v12494_v20  ;;  %v12774_v60 = vld [vmem:[#allocation2 + $0x8d8] sm:$0xf]  ;;  %v13455_v1 = vor.u32 %v17853_v55, %v13454_v44  ;;  %v17593_v20 = vld [vmem:[#allocation2 + $0x62c] sm:$0xf0]  ;;  %v12734_v26 = vld [vmem:[#allocation2 + $0x888] sm:$0xf] }
 0x177   :  { %4122 = vmatpush.bf16.msra.mxu1 %v13611_v13  ;;  %v13494_v13 = vld [vmem:[#allocation2 + $0xe78] sm:$0xf]  ;;  %v13374_v44 = vld [vmem:[#allocation2 + $0xd88] sm:$0xf]  ;;  %v17833_v55 = vld [vmem:[#allocation2 + $0xdac] sm:$0xf0] }
 0x178   :  { %4136 = vmatpush.bf16.msra.mxu2 %v11695_v14  ;;  %v17863_v14 = vld [vmem:[#allocation2 + $0xe9c] sm:$0xf0] }
 0x179   :  { %4150 = vmatpush.bf16.msra.mxu3 %v12015_v22  ;;  %v13175_v22 = vor.u32 %v17783_v63, %v13174_v17  ;;  %v13495_v31 = vor.u32 %v17863_v14, %v13494_v13  ;;  %v12815_v63 = vor.u32 %v17693_v32, %v12814_v27  ;;  %v17673_v32 = vld [vmem:[#allocation2 + $0x8ac] sm:$0xf0] }
 0x17a   :  { %4109 = vmatpush.bf16.msra.mxu0 %v13251_v7  ;;  %v17773_v7 = vld [vmem:[#allocation2 + $0xbcc] sm:$0xf0]  ;;  %v3887_v8 = vpop.f32.mrf.mxu0 }
 0x17b   :  { %4123 = vmatpush.bf16.msra.mxu1 %v13571_v49  ;;  %v13135_v58 = vor.u32 %v17773_v7, %v13134_v33  ;;  %v12454_v49 = vld [vmem:[#allocation2 + $0x658] sm:$0xf]  ;;  %v3888_v17 = vadd.f32 %v3887_v8, %v19241_v53  ;;  %v13054_v33 = vld [vmem:[#allocation2 + $0xb08] sm:$0xf]  ;;  %v17753_v7 = vld [vmem:[#allocation2 + $0xb2c] sm:$0xf0]  ;;  %v12735_v53 = vor.u32 %v17673_v32, %v12734_v26 }
 0x17c   :  { %4137 = vmatpush.bf16.msra.mxu2 %v11655_v51  ;;  %v17603_v51 = vld [vmem:[#allocation2 + $0x67c] sm:$0xf0]  ;;  %v12654_v26 = vld [vmem:[#allocation2 + $0x7e8] sm:$0xf]  ;;  %v17653_v32 = vld [vmem:[#allocation2 + $0x80c] sm:$0xf0] }
 0x17d   :  { %4151 = vmatpush.bf16.msra.mxu3 %v11975_v62  ;;  %4110 = vmatmul.bf16.vlgmr.msra.gmra.mxu0 %v19129_v42  ;;  %v19253_v62 = vpop.f32.mrf.mxu3  ;;  %v12455_v13 = vor.u32 %v17603_v51, %v12454_v49  ;;  %v17583_v49 = vld [vmem:[#allocation2 + $0x5dc] sm:$0xf0]  ;;  %v12694_v51 = vld [vmem:[#allocation2 + $0x838] sm:$0xf] }
 0x17e   :  { %4158 = vmatpush.bf16.msrb.mxu0 %v12575_v35  ;;  %4124 = vmatmul.bf16.vlgmr.msra.gmra.mxu1 %v19127_v41  ;;  %20052 = vst [vmem:[#allocation20_spill] sm:$0xff] %v19253_v62  ;;  %v17683_v35 = vld [vmem:[#allocation2 + $0x8fc] sm:$0xf0] }
 0x17f   :  { %4172 = vmatpush.bf16.msrb.mxu1 %v12895_v2  ;;  %4138 = vmatmul.bf16.vlgmr.msra.gmra.mxu2 %v19080_v57  ;;  %v13094_v2 = vld [vmem:[#allocation2 + $0xb58] sm:$0xf]  ;;  %v12775_v14 = vor.u32 %v17683_v35, %v12774_v60  ;;  %v13375_v60 = vor.u32 %v17833_v55, %v13374_v44  ;;  %v17813_v44 = vld [vmem:[#allocation2 + $0xd0c] sm:$0xf0] }
 0x180   :  { %4186 = vmatpush.bf16.msrb.mxu2 %v13215_v4  ;;  %4152 = vmatmul.bf16.vlgmr.msra.gmra.mxu3 %v19095_v11  ;;  %v17763_v4 = vld [vmem:[#allocation2 + $0xb7c] sm:$0xf0] }
 0x181   :  { %4200 = vmatpush.bf16.msrb.mxu3 %v13535_v29  ;;  %v13414_v29 = vld [vmem:[#allocation2 + $0xdd8] sm:$0xf] }
 0x182   :  { %4159 = vmatpush.bf16.msrb.mxu0 %v12535_v19  ;;  %v13095_v19 = vor.u32 %v17763_v4, %v13094_v2  ;;  %v13415_v27 = vor.u32 %v17843_v12, %v13414_v29  ;;  %v3915_v35 = vpop.f32.mrf.mxu2  ;;  %v13014_v2 = vld [vmem:[#allocation2 + $0xab8] sm:$0xf]  ;;  %v17743_v4 = vld [vmem:[#allocation2 + $0xadc] sm:$0xf0]  ;;  %v19258_v62 = vpop.f32.mrf.mxu0 }
 0x183   :  { %4173 = vmatpush.bf16.msrb.mxu1 %v12855_v21  ;;  %v3901_v21 = vpop.f32.mrf.mxu1  ;;  %v13334_v29 = vld [vmem:[#allocation2 + $0xd38] sm:$0xf]  ;;  %v17823_v12 = vld [vmem:[#allocation2 + $0xd5c] sm:$0xf0]  ;;  %20054 = vst [vmem:[#allocation22_spill] sm:$0xff] %v19258_v62 }
 0x184   :  { %4187 = vmatpush.bf16.msrb.mxu2 %v13175_v22  ;;  %v12414_v22 = vld [vmem:[#allocation2 + $0x608] sm:$0xf] }
 0x185   :  { %4201 = vmatpush.bf16.msrb.mxu3 %v13495_v31  ;;  %v3902_v31 = vadd.f32 %v3901_v21, %v3888_v17  ;;  %v3929_v17 = vpop.f32.mrf.mxu3  ;;  %v13015_v21 = vor.u32 %v17743_v4, %v13014_v2  ;;  %v13254_v2 = vld [vmem:[#allocation2 + $0xc98] sm:$0xf]  ;;  %v17803_v4 = vld [vmem:[#allocation2 + $0xcbc] sm:$0xf0] }
 0x186   :  { %4160 = vmatpush.bf16.msrb.mxu0 %v12495_v25  ;;  %v12415_v25 = vor.u32 %v17593_v20, %v12414_v22  ;;  %v12334_v22 = vld [vmem:[#allocation2 + $0x568] sm:$0xf]  ;;  %v17573_v20 = vld [vmem:[#allocation2 + $0x58c] sm:$0xf0] }
 0x187   :  { %4174 = vmatpush.bf16.msrb.mxu1 %v12815_v63  ;;  %v13055_v63 = vor.u32 %v17753_v7, %v13054_v33  ;;  %v3916_v8 = vadd.f32 %v3915_v35, %v3902_v31  ;;  %v12974_v33 = vld [vmem:[#allocation2 + $0xa68] sm:$0xf]  ;;  %v17733_v7 = vld [vmem:[#allocation2 + $0xa8c] sm:$0xf0]  ;;  %v12335_v55 = vor.u32 %v17573_v20, %v12334_v22  ;;  %v12934_v35 = vld [vmem:[#allocation2 + $0xa18] sm:$0xf] }
 0x188   :  { %4188 = vmatpush.bf16.msrb.mxu2 %v13135_v58  ;;  %v12374_v58 = vld [vmem:[#allocation2 + $0x5b8] sm:$0xf]  ;;  %v13294_v31 = vld [vmem:[#allocation2 + $0xce8] sm:$0xf]  ;;  %v17548_v22 = vld [vmem:[#allocation2 + $0x4cc] sm:$0xf] }
 0x189   :  { %4202 = vmatpush.bf16.msrb.mxu3 %v13455_v1  ;;  %v17663_v1 = vld [vmem:[#allocation2 + $0x85c] sm:$0xf0]  ;;  %v12256_v20 = vld [vmem:[#allocation2 + $0x4f0] sm:$0xf0] }
 0x18a   :  { %4161 = vmatpush.bf16.msrb.mxu0 %v12455_v13  ;;  %v12375_v13 = vor.u32 %v17583_v49, %v12374_v58  ;;  %v17563_v58 = vld [vmem:[#allocation2 + $0x53c] sm:$0xf0]  ;;  %v12614_v49 = vld [vmem:[#allocation2 + $0x798] sm:$0xf] }
 0x18b   :  { %4175 = vmatpush.bf16.msrb.mxu1 %v12775_v14  ;;  %v19256_v14 = vadd.f32 %v3929_v17, %v3916_v8  ;;  %v13854_v8 = vld [vmem:[#allocation2 + $0x1148] sm:$0xf] }
 0x18c   :  { %4189 = vmatpush.bf16.msrb.mxu2 %v13095_v19  ;;  %v12695_v19 = vor.u32 %v17663_v1, %v12694_v51  ;;  %v17643_v51 = vld [vmem:[#allocation2 + $0x7bc] sm:$0xf0]  ;;  %v13295_v1 = vor.u32 %v17813_v44, %v13294_v31  ;;  %v12259_v31 = vor.u32 %v17548_v22, %v12256_v20  ;;  %v13814_v44 = vld [vmem:[#allocation2 + $0x10f8] sm:$0xf]  ;;  %v12496_v22 = vld [vmem:[#allocation2 + $0x6d0] sm:$0xf0] }
 0x18d   :  { %4203 = vmatpush.bf16.msrb.mxu3 %v13415_v27  ;;  %20053 = vst [vmem:[#allocation21_spill] sm:$0xff] %v19256_v14  ;;  %v13335_v27 = vor.u32 %v17823_v12, %v13334_v29  ;;  %v17953_v29 = vld [vmem:[#allocation2 + $0x116c] sm:$0xf0]  ;;  %v17468_v12 = vld [vmem:[#allocation2 + $0x24c] sm:$0xf] }
 0x18e   :  { %4162 = vmatpush.bf16.msrb.mxu0 %v12415_v25  ;;  %v12294_v25 = vld [vmem:[#allocation2 + $0x518] sm:$0xf]  ;;  %v17943_v14 = vld [vmem:[#allocation2 + $0x111c] sm:$0xf0] }
 0x18f   :  { %4176 = vmatpush.bf16.msrb.mxu1 %v12735_v53  ;;  %v12655_v53 = vor.u32 %v17653_v32, %v12654_v26  ;;  %v12295_v17 = vor.u32 %v17563_v58, %v12294_v25  ;;  %v17628_v26 = vld [vmem:[#allocation2 + $0x74c] sm:$0xf]  ;;  %v12576_v32 = vld [vmem:[#allocation2 + $0x770] sm:$0xf0]  ;;  %v11896_v25 = vld [vmem:[#allocation2 + $0x220] sm:$0xf0] }
 0x190   :  { %4190 = vmatpush.bf16.msrb.mxu2 %v13055_v63  ;;  %v12975_v63 = vor.u32 %v17733_v7, %v12974_v33  ;;  %v13855_v33 = vor.u32 %v17953_v29, %v13854_v8  ;;  %v17538_v58 = vld [vmem:[#allocation2 + $0x47c] sm:$0xf]  ;;  %v11856_v29 = vld [vmem:[#allocation2 + $0x1d0] sm:$0xf0] }
 0x191   :  { %4204 = vmatpush.bf16.msrb.mxu3 %v13375_v60  ;;  %v17723_v60 = vld [vmem:[#allocation2 + $0xa3c] sm:$0xf0] }
 0x192   :  { %4163 = vmatpush.bf16.msrb.mxu0 %v12375_v13  ;;  %v11936_v13 = vld [vmem:[#allocation2 + $0x270] sm:$0xf0] }
 0x193   :  { %4177 = vmatpush.bf16.msrb.mxu1 %v12695_v19  ;;  %v12615_v19 = vor.u32 %v17643_v51, %v12614_v49  ;;  %v11939_v7 = vor.u32 %v17468_v12, %v11936_v13  ;;  %v13815_v49 = vor.u32 %v17943_v14, %v13814_v44  ;;  %v19260_v51 = vpop.f32.mrf.mxu1  ;;  %v17528_v12 = vld [vmem:[#allocation2 + $0x42c] sm:$0xf]  ;;  %v17598_v44 = vld [vmem:[#allocation2 + $0x65c] sm:$0xf] }
 0x194   :  { %4191 = vmatpush.bf16.msrb.mxu2 %v13015_v21  ;;  %v12935_v21 = vor.u32 %v17723_v60, %v12934_v35  ;;  %20055 = vst [vmem:[#allocation23_spill] sm:$0xff] %v19260_v51  ;;  %v11899_v35 = vor.u32 %v17458_v38, %v11896_v25  ;;  %v13774_v60 = vld [vmem:[#allocation2 + $0x10a8] sm:$0xf]  ;;  %v17608_v13 = vld [vmem:[#allocation2 + $0x6ac] sm:$0xf]  ;;  %v20041_v38 = vperm.slane %v19231_v34, 4 }
 0x195   :  { %4205 = vmatpush.bf16.msrb.mxu3 %v13335_v27  ;;  %v13255_v27 = vor.u32 %v17803_v4, %v13254_v2  ;;  %v17933_v2 = vld [vmem:[#allocation2 + $0x10cc] sm:$0xf0]  ;;  %v17448_v4 = vld [vmem:[#allocation2 + $0x1ac] sm:$0xf]  ;;  %v13496_v51 = vld [vmem:[#allocation2 + $0xea0] sm:$0xf0] }
 0x196   :  { %4164 = vmatpush.bf16.msrb.mxu0 %v12335_v55  ;;  %v12579_v55 = vor.u32 %v17628_v26, %v12576_v32  ;;  %v13775_v14 = vor.u32 %v17933_v2, %v13774_v60  ;;  %v17438_v26 = vld [vmem:[#allocation2 + $0x15c] sm:$0xf]  ;;  %v19267_v32 = vpop.f32.mrf.mxu2  ;;  %v17913_v60 = vld [vmem:[#allocation2 + $0x102c] sm:$0xf0]  ;;  %v17428_v2 = vld [vmem:[#allocation2 + $0x10c] sm:$0xf] }
 0x197   :  { %4178 = vmatpush.bf16.msrb.mxu1 %v12655_v53  ;;  %v17618_v53 = vld [vmem:[#allocation2 + $0x6fc] sm:$0xf]  ;;  %20056 = vst [vmem:[#allocation24_spill] sm:$0xff] %v19267_v32  ;;  %v12856_v32 = vld [vmem:[#allocation2 + $0x9a0] sm:$0xf0] }
 0x198   :  { %4192 = vmatpush.bf16.msrb.mxu2 %v12975_v63  ;;  %v12536_v63 = vld [vmem:[#allocation2 + $0x720] sm:$0xf0] }
 0x199   :  { %4206 = vmatpush.bf16.msrb.mxu3 %v13295_v1  ;;  %v12219_v1 = vor.u32 %v17538_v58, %v12216_v45  ;;  %v12539_v8 = vor.u32 %v17618_v53, %v12536_v63  ;;  %v11859_v45 = vor.u32 %v17448_v4, %v11856_v29  ;;  %v19269_v58 = vpop.f32.mrf.mxu3  ;;  %v11776_v29 = vld [vmem:[#allocation2 + $0x130] sm:$0xf0] }
 0x19a   :  { %4165 = vmatpush.bf16.msrb.mxu0 %v12295_v17  ;;  %v12176_v17 = vld [vmem:[#allocation2 + $0x450] sm:$0xf0]  ;;  %v3943_v25 = vpop.f32.mrf.mxu0  ;;  %20057 = vst [vmem:[#allocation25_spill] sm:$0xff] %v19269_v58 }
 0x19b   :  { %4179 = vmatpush.bf16.msrb.mxu1 %v12615_v19  ;;  %v12179_v20 = vor.u32 %v17528_v12, %v12176_v17  ;;  %v13734_v19 = vld [vmem:[#allocation2 + $0x1058] sm:$0xf]  ;;  %v3944_v63 = vadd.f32 %v3943_v25, %v20041_v38  ;;  %v3957_v4 = vpop.f32.mrf.mxu1  ;;  %v17508_v12 = vld [vmem:[#allocation2 + $0x38c] sm:$0xf]  ;;  %v12096_v17 = vld [vmem:[#allocation2 + $0x3b0] sm:$0xf0] }
 0x19c   :  { %4193 = vmatpush.bf16.msrb.mxu2 %v12935_v21  ;;  %v17923_v21 = vld [vmem:[#allocation2 + $0x107c] sm:$0xf0]  ;;  %v17578_v25 = vld [vmem:[#allocation2 + $0x5bc] sm:$0xf]  ;;  %v12376_v38 = vld [vmem:[#allocation2 + $0x5e0] sm:$0xf0] }
 0x19d   :  { %4207 = vmatpush.bf16.msrb.mxu3 %v13255_v27  ;;  %4166 = vmatmul.bf16.vlgmr.msrb.gmra.mxu0 %v19085_v0  ;;  %v12499_v27 = vor.u32 %v17608_v13, %v12496_v22  ;;  %v13735_v53 = vor.u32 %v17923_v21, %v13734_v19  ;;  %v3958_v13 = vadd.f32 %v3957_v4, %v3944_v63  ;;  %v17588_v22 = vld [vmem:[#allocation2 + $0x60c] sm:$0xf]  ;;  %v13654_v21 = vld [vmem:[#allocation2 + $0xfb8] sm:$0xf]  ;;  %v12336_v58 = vld [vmem:[#allocation2 + $0x590] sm:$0xf0] }
 0x19e   :  { %4214 = vmatpush.bf16.msra.mxu0 %v13855_v33  ;;  %4180 = vmatmul.bf16.vlgmr.msrb.gmra.mxu1 %v19104_v23  ;;  %v11816_v33 = vld [vmem:[#allocation2 + $0x180] sm:$0xf0] }
 0x19f   :  { %4228 = vmatpush.bf16.msra.mxu1 %v11939_v7  ;;  %4194 = vmatmul.bf16.vlgmr.msrb.gmra.mxu2 %v19125_v37  ;;  %v17518_v7 = vld [vmem:[#allocation2 + $0x3dc] sm:$0xf] }
 0x1a0   :  { %4242 = vmatpush.bf16.msra.mxu2 %v12259_v31  ;;  %4208 = vmatmul.bf16.vlgmr.msrb.gmra.mxu3 %v19129_v42  ;;  %v12136_v31 = vld [vmem:[#allocation2 + $0x400] sm:$0xf0] }
 0x1a1   :  { %4256 = vmatpush.bf16.msra.mxu3 %v12579_v55  ;;  %v12456_v55 = vld [vmem:[#allocation2 + $0x680] sm:$0xf0] }
 0x1a2   :  { %4215 = vmatpush.bf16.msra.mxu0 %v13815_v49  ;;  %v11819_v49 = vor.u32 %v17438_v26, %v11816_v33  ;;  %v17903_v26 = vld [vmem:[#allocation2 + $0xfdc] sm:$0xf0]  ;;  %v17418_v33 = vld [vmem:[#allocation2 + $0xbc] sm:$0xf] }
 0x1a3   :  { %4229 = vmatpush.bf16.msra.mxu1 %v11899_v35  ;;  %v12139_v35 = vor.u32 %v17518_v7, %v12136_v31  ;;  %v11736_v31 = vld [vmem:[#allocation2 + $0xe0] sm:$0xf0]  ;;  %v13655_v4 = vor.u32 %v17903_v26, %v13654_v21  ;;  %v17883_v21 = vld [vmem:[#allocation2 + $0xf3c] sm:$0xf0]  ;;  %v17398_v26 = vld [vmem:[#allocation2 + $0x1c] sm:$0xf] }
 0x1a4   :  { %4243 = vmatpush.bf16.msra.mxu2 %v12219_v1  ;;  %v13694_v1 = vld [vmem:[#allocation2 + $0x1008] sm:$0xf] }
 0x1a5   :  { %4257 = vmatpush.bf16.msra.mxu3 %v12539_v8  ;;  %v12459_v8 = vor.u32 %v17598_v44, %v12456_v55  ;;  %v13695_v19 = vor.u32 %v17913_v60, %v13694_v1  ;;  %v12056_v44 = vld [vmem:[#allocation2 + $0x360] sm:$0xf0]  ;;  %v3971_v55 = vpop.f32.mrf.mxu2  ;;  %v13614_v1 = vld [vmem:[#allocation2 + $0xf68] sm:$0xf]  ;;  %v17893_v60 = vld [vmem:[#allocation2 + $0xf8c] sm:$0xf0] }
 0x1a6   :  { %4216 = vmatpush.bf16.msra.mxu0 %v13775_v14  ;;  %v12416_v14 = vld [vmem:[#allocation2 + $0x630] sm:$0xf0]  ;;  %v3972_v63 = vadd.f32 %v3971_v55, %v3958_v13  ;;  %v13615_v13 = vor.u32 %v17893_v60, %v13614_v1  ;;  %v17708_v55 = vld [vmem:[#allocation2 + $0x9cc] sm:$0xf] }
 0x1a7   :  { %4230 = vmatpush.bf16.msra.mxu1 %v11859_v45  ;;  %v11779_v45 = vor.u32 %v17428_v2, %v11776_v29  ;;  %v12419_v7 = vor.u32 %v17588_v22, %v12416_v14  ;;  %v17408_v2 = vld [vmem:[#allocation2 + $0x6c] sm:$0xf]  ;;  %v12016_v22 = vld [vmem:[#allocation2 + $0x310] sm:$0xf0] }
 0x1a8   :  { %4244 = vmatpush.bf16.msra.mxu2 %v12179_v20  ;;  %v12099_v20 = vor.u32 %v17508_v12, %v12096_v17  ;;  %v11696_v12 = vld [vmem:[#allocation2 + $0x90] sm:$0xf0]  ;;  %v17488_v17 = vld [vmem:[#allocation2 + $0x2ec] sm:$0xf] }
 0x1a9   :  { %4258 = vmatpush.bf16.msra.mxu3 %v12499_v27  ;;  %v17498_v27 = vld [vmem:[#allocation2 + $0x33c] sm:$0xf]  ;;  %v17568_v14 = vld [vmem:[#allocation2 + $0x56c] sm:$0xf]  ;;  %v13536_v60 = vld [vmem:[#allocation2 + $0xef0] sm:$0xf0] }
 0x1aa   :  { %4217 = vmatpush.bf16.msra.mxu0 %v13735_v53  ;;  %v3985_v53 = vpop.f32.mrf.mxu3  ;;  %v17868_v1 = vld [vmem:[#allocation2 + $0xecc] sm:$0xf] }
 0x1ab   :  { %4231 = vmatpush.bf16.msra.mxu1 %v11819_v49  ;;  %v11739_v49 = vor.u32 %v17418_v33, %v11736_v31  ;;  %v19273_v29 = vadd.f32 %v3985_v53, %v3972_v63  ;;  %v11656_v33 = vld [vmem:[#allocation2 + $0x40] sm:$0xf0]  ;;  %v17478_v31 = vld [vmem:[#allocation2 + $0x29c] sm:$0xf]  ;;  %v17788_v63 = vld [vmem:[#allocation2 + $0xc4c] sm:$0xf] }
 0x1ac   :  { %4245 = vmatpush.bf16.msra.mxu2 %v12139_v35  ;;  %v12059_v35 = vor.u32 %v17498_v27, %v12056_v44  ;;  %v12339_v27 = vor.u32 %v17568_v14, %v12336_v58  ;;  %v12296_v44 = vld [vmem:[#allocation2 + $0x540] sm:$0xf0]  ;;  %v13216_v53 = vld [vmem:[#allocation2 + $0xc70] sm:$0xf0]  ;;  %v17698_v14 = vld [vmem:[#allocation2 + $0x97c] sm:$0xf] }
 0x1ad   :  { %4259 = vmatpush.bf16.msra.mxu3 %v12459_v8  ;;  %20058 = vst [vmem:[#allocation26_spill] sm:$0xff] %v19273_v29  ;;  %v12379_v8 = vor.u32 %v17578_v25, %v12376_v38  ;;  %v17558_v38 = vld [vmem:[#allocation2 + $0x51c] sm:$0xf]  ;;  %v12896_v25 = vld [vmem:[#allocation2 + $0x9f0] sm:$0xf0] }
 0x1ae   :  { %4218 = vmatpush.bf16.msra.mxu0 %v13695_v19  ;;  %v13574_v19 = vld [vmem:[#allocation2 + $0xf18] sm:$0xf]  ;;  %v12899_v58 = vor.u32 %v17708_v55, %v12896_v25  ;;  %v17778_v29 = vld [vmem:[#allocation2 + $0xbfc] sm:$0xf]  ;;  %v13136_v55 = vld [vmem:[#allocation2 + $0xbd0] sm:$0xf0] }
 0x1af   :  { %4232 = vmatpush.bf16.msra.mxu1 %v11779_v45  ;;  %v11699_v45 = vor.u32 %v17408_v2, %v11696_v12  ;;  %v17948_v2 = vld [vmem:[#allocation2 + $0x114c] sm:$0xf]  ;;  %v13856_v12 = vld [vmem:[#allocation2 + $0x1170] sm:$0xf0] }
 0x1b0   :  { %4246 = vmatpush.bf16.msra.mxu2 %v12099_v20  ;;  %v12019_v20 = vor.u32 %v17488_v17, %v12016_v22  ;;  %v13219_v17 = vor.u32 %v17788_v63, %v13216_v53  ;;  %v13539_v22 = vor.u32 %v17868_v1, %v13536_v60  ;;  %v17848_v25 = vld [vmem:[#allocation2 + $0xe2c] sm:$0xf]  ;;  %v13456_v63 = vld [vmem:[#allocation2 + $0xe50] sm:$0xf0]  ;;  %v17678_v1 = vld [vmem:[#allocation2 + $0x8dc] sm:$0xf] }
 0x1b1   :  { %4260 = vmatpush.bf16.msra.mxu3 %v12419_v7  ;;  %v11976_v7 = vld [vmem:[#allocation2 + $0x2c0] sm:$0xf0]  ;;  %v13776_v53 = vld [vmem:[#allocation2 + $0x10d0] sm:$0xf0] }
 0x1b2   :  { %4219 = vmatpush.bf16.msra.mxu0 %v13655_v4  ;;  %v13575_v4 = vor.u32 %v17883_v21, %v13574_v19  ;;  %v13176_v19 = vld [vmem:[#allocation2 + $0xc20] sm:$0xf0]  ;;  %v17858_v21 = vld [vmem:[#allocation2 + $0xe7c] sm:$0xf] }
 0x1b3   :  { %4233 = vmatpush.bf16.msra.mxu1 %v11739_v49  ;;  %v11659_v49 = vor.u32 %v17398_v26, %v11656_v33  ;;  %v12859_v26 = vor.u32 %v17698_v14, %v12856_v32  ;;  %v13179_v33 = vor.u32 %v17778_v29, %v13176_v19  ;;  %v13459_v29 = vor.u32 %v17848_v25, %v13456_v63  ;;  %v12776_v60 = vld [vmem:[#allocation2 + $0x900] sm:$0xf0]  ;;  %v17668_v19 = vld [vmem:[#allocation2 + $0x88c] sm:$0xf]  ;;  %v17658_v25 = vld [vmem:[#allocation2 + $0x83c] sm:$0xf] }
 0x1b4   :  { %4247 = vmatpush.bf16.msra.mxu2 %v12059_v35  ;;  %v11979_v35 = vor.u32 %v17478_v31, %v11976_v7  ;;  %v13499_v31 = vor.u32 %v17858_v21, %v13496_v51  ;;  %v12816_v7 = vld [vmem:[#allocation2 + $0x950] sm:$0xf0]  ;;  %v12696_v63 = vld [vmem:[#allocation2 + $0x860] sm:$0xf0] }
 0x1b5   :  { %4261 = vmatpush.bf16.msra.mxu3 %v12379_v8  ;;  %v12299_v8 = vor.u32 %v17558_v38, %v12296_v44  ;;  %v17768_v38 = vld [vmem:[#allocation2 + $0xbac] sm:$0xf]  ;;  %v12736_v21 = vld [vmem:[#allocation2 + $0x8b0] sm:$0xf0] }
 0x1b6   :  { %4220 = vmatpush.bf16.msra.mxu0 %v13615_v13  ;;  %v13859_v13 = vor.u32 %v17948_v2, %v13856_v12  ;;  %v13139_v51 = vor.u32 %v17768_v38, %v13136_v55  ;;  %v13096_v2 = vld [vmem:[#allocation2 + $0xb80] sm:$0xf0]  ;;  %v17838_v12 = vld [vmem:[#allocation2 + $0xddc] sm:$0xf]  ;;  %v12739_v38 = vor.u32 %v17668_v19, %v12736_v21  ;;  %v17888_v19 = vld [vmem:[#allocation2 + $0xf6c] sm:$0xf] }
 0x1b7   :  { %4234 = vmatpush.bf16.msra.mxu1 %v11699_v45  ;;  %v17938_v45 = vld [vmem:[#allocation2 + $0x10fc] sm:$0xf]  ;;  %v13616_v21 = vld [vmem:[#allocation2 + $0xf90] sm:$0xf0] }
 0x1b8   :  { %4248 = vmatpush.bf16.msra.mxu2 %v12019_v20  ;;  %v13816_v20 = vld [vmem:[#allocation2 + $0x1120] sm:$0xf0] }
 0x1b9   :  { %4262 = vmatpush.bf16.msra.mxu3 %v12339_v27  ;;  %v17688_v27 = vld [vmem:[#allocation2 + $0x92c] sm:$0xf]  ;;  %v13819_v44 = vor.u32 %v17938_v45, %v13816_v20 }
 0x1ba   :  { %4221 = vmatpush.bf16.msra.mxu0 %v13575_v4  ;;  %v17928_v4 = vld [vmem:[#allocation2 + $0x10ac] sm:$0xf]  ;;  %v12819_v32 = vor.u32 %v17688_v27, %v12816_v7  ;;  %v13696_v7 = vld [vmem:[#allocation2 + $0x1030] sm:$0xf0] }
 0x1bb   :  { %4235 = vmatpush.bf16.msra.mxu1 %v11659_v49  ;;  %v17758_v49 = vld [vmem:[#allocation2 + $0xb5c] sm:$0xf]  ;;  %v17748_v45 = vld [vmem:[#allocation2 + $0xb0c] sm:$0xf] }
 0x1bc   :  { %4249 = vmatpush.bf16.msra.mxu2 %v11979_v35  ;;  %v13779_v35 = vor.u32 %v17928_v4, %v13776_v53  ;;  %v13099_v14 = vor.u32 %v17758_v49, %v13096_v2  ;;  %v17908_v27 = vld [vmem:[#allocation2 + $0x100c] sm:$0xf]  ;;  %v17738_v4 = vld [vmem:[#allocation2 + $0xabc] sm:$0xf]  ;;  %v12699_v49 = vor.u32 %v17658_v25, %v12696_v63  ;;  %v13576_v63 = vld [vmem:[#allocation2 + $0xf40] sm:$0xf0] }
 0x1bd   :  { %4263 = vmatpush.bf16.msra.mxu3 %v12299_v8  ;;  %4222 = vmatmul.bf16.vlgmr.msra.gmra.mxu0 %v19127_v41  ;;  %v13416_v8 = vld [vmem:[#allocation2 + $0xe00] sm:$0xf0]  ;;  %v13699_v53 = vor.u32 %v17908_v27, %v13696_v7  ;;  %v17718_v27 = vld [vmem:[#allocation2 + $0xa1c] sm:$0xf] }
 0x1be   :  { %4270 = vmatpush.bf16.msrb.mxu0 %v12899_v58  ;;  %4236 = vmatmul.bf16.vlgmr.msra.gmra.mxu1 %v19080_v57  ;;  %v17918_v58 = vld [vmem:[#allocation2 + $0x105c] sm:$0xf]  ;;  %v12936_v7 = vld [vmem:[#allocation2 + $0xa40] sm:$0xf0] }
 0x1bf   :  { %4284 = vmatpush.bf16.msrb.mxu1 %v13219_v17  ;;  %4250 = vmatmul.bf16.vlgmr.msra.gmra.mxu2 %v19095_v11  ;;  %v13736_v17 = vld [vmem:[#allocation2 + $0x1080] sm:$0xf0]  ;;  %v17878_v25 = vld [vmem:[#allocation2 + $0xf1c] sm:$0xf] }
 0x1c0   :  { %4298 = vmatpush.bf16.msrb.mxu2 %v13539_v22  ;;  %4264 = vmatmul.bf16.vlgmr.msra.gmra.mxu3 %v19085_v0  ;;  %v12779_v22 = vor.u32 %v17678_v1, %v12776_v60  ;;  %v13739_v20 = vor.u32 %v17918_v58, %v13736_v17  ;;  %v17898_v1 = vld [vmem:[#allocation2 + $0xfbc] sm:$0xf]  ;;  %v13656_v60 = vld [vmem:[#allocation2 + $0xfe0] sm:$0xf0]  ;;  %v17728_v58 = vld [vmem:[#allocation2 + $0xa6c] sm:$0xf] }
 0x1c1   :  { %4312 = vmatpush.bf16.msrb.mxu3 %v13859_v13  ;;  %v13419_v13 = vor.u32 %v17838_v12, %v13416_v8  ;;  %v17648_v12 = vld [vmem:[#allocation2 + $0x7ec] sm:$0xf]  ;;  %v12656_v8 = vld [vmem:[#allocation2 + $0x810] sm:$0xf0]  ;;  %v13659_v17 = vor.u32 %v17898_v1, %v13656_v60  ;;  %v12582_v1 = vld [vmem:[#allocation2 + $0x750] sm:$0xf] }
 0x1c2   :  { %4271 = vmatpush.bf16.msrb.mxu0 %v12859_v26  ;;  %v13056_v26 = vld [vmem:[#allocation2 + $0xb30] sm:$0xf0]  ;;  %v17634_v60 = vld [vmem:[#allocation2 + $0x774] sm:$0xf0] }
 0x1c3   :  { %4285 = vmatpush.bf16.msrb.mxu1 %v13179_v33  ;;  %v17828_v33 = vld [vmem:[#allocation2 + $0xd8c] sm:$0xf] }
 0x1c4   :  { %4299 = vmatpush.bf16.msrb.mxu2 %v13499_v31  ;;  %v13376_v31 = vld [vmem:[#allocation2 + $0xdb0] sm:$0xf0] }
 0x1c5   :  { %4313 = vmatpush.bf16.msrb.mxu3 %v13819_v44  ;;  %v13059_v44 = vor.u32 %v17748_v45, %v13056_v26  ;;  %v13379_v55 = vor.u32 %v17828_v33, %v13376_v31  ;;  %v12659_v45 = vor.u32 %v17648_v12, %v12656_v8  ;;  %v12616_v26 = vld [vmem:[#allocation2 + $0x7c0] sm:$0xf0]  ;;  %v17714_v12 = vld [vmem:[#allocation2 + $0x9f4] sm:$0xf0]  ;;  %v13579_v8 = vor.u32 %v17878_v25, %v13576_v63  ;;  %v12182_v25 = vld [vmem:[#allocation2 + $0x430] sm:$0xf] }
 0x1c6   :  { %4272 = vmatpush.bf16.msrb.mxu0 %v12819_v32  ;;  %v13016_v32 = vld [vmem:[#allocation2 + $0xae0] sm:$0xf0] }
 0x1c7   :  { %4286 = vmatpush.bf16.msrb.mxu1 %v13139_v51  ;;  %v17818_v51 = vld [vmem:[#allocation2 + $0xd3c] sm:$0xf] }
 0x1c8   :  { %4300 = vmatpush.bf16.msrb.mxu2 %v13459_v29  ;;  %v13336_v29 = vld [vmem:[#allocation2 + $0xd60] sm:$0xf0] }
 0x1c9   :  { %4314 = vmatpush.bf16.msrb.mxu3 %v13779_v35  ;;  %v13019_v35 = vor.u32 %v17738_v4, %v13016_v32  ;;  %v13339_v2 = vor.u32 %v17818_v51, %v13336_v29  ;;  %v11942_v4 = vld [vmem:[#allocation2 + $0x250] sm:$0xf]  ;;  %v17554_v29 = vld [vmem:[#allocation2 + $0x4f4] sm:$0xf0] }
 0x1ca   :  { %4273 = vmatpush.bf16.msrb.mxu0 %v12779_v22  ;;  %v12976_v22 = vld [vmem:[#allocation2 + $0xa90] sm:$0xf0]  ;;  %v12262_v32 = vld [vmem:[#allocation2 + $0x4d0] sm:$0xf] }
 0x1cb   :  { %4287 = vmatpush.bf16.msrb.mxu1 %v13099_v14  ;;  %v17808_v14 = vld [vmem:[#allocation2 + $0xcec] sm:$0xf]  ;;  %v12979_v33 = vor.u32 %v17728_v58, %v12976_v22  ;;  %v12583_v22 = vor.u32 %v17634_v60, %v12582_v1 }
 0x1cc   :  { %4301 = vmatpush.bf16.msrb.mxu2 %v13419_v13  ;;  %v13296_v13 = vld [vmem:[#allocation2 + $0xd10] sm:$0xf0] }
 0x1cd   :  { %4315 = vmatpush.bf16.msrb.mxu3 %v13739_v20  ;;  %v17638_v20 = vld [vmem:[#allocation2 + $0x79c] sm:$0xf]  ;;  %v13299_v31 = vor.u32 %v17808_v14, %v13296_v13  ;;  %v11902_v14 = vld [vmem:[#allocation2 + $0x200] sm:$0xf]  ;;  %v17464_v13 = vld [vmem:[#allocation2 + $0x224] sm:$0xf0] }
 0x1ce   :  { %4274 = vmatpush.bf16.msrb.mxu0 %v12739_v38  ;;  %v17798_v38 = vld [vmem:[#allocation2 + $0xc9c] sm:$0xf]  ;;  %v12619_v51 = vor.u32 %v17638_v20, %v12616_v26  ;;  %v12542_v20 = vld [vmem:[#allocation2 + $0x700] sm:$0xf]  ;;  %v17624_v26 = vld [vmem:[#allocation2 + $0x724] sm:$0xf0] }
 0x1cf   :  { %4288 = vmatpush.bf16.msrb.mxu1 %v13059_v44  ;;  %v13619_v44 = vor.u32 %v17888_v19, %v13616_v21  ;;  %v12222_v19 = vld [vmem:[#allocation2 + $0x480] sm:$0xf] }
 0x1d0   :  { %4302 = vmatpush.bf16.msrb.mxu2 %v13379_v55  ;;  %v13256_v55 = vld [vmem:[#allocation2 + $0xcc0] sm:$0xf0] }
 0x1d1   :  { %4316 = vmatpush.bf16.msrb.mxu3 %v13699_v53  ;;  %v17474_v53 = vld [vmem:[#allocation2 + $0x274] sm:$0xf0] }
 0x1d2   :  { %4275 = vmatpush.bf16.msrb.mxu0 %v12699_v49  ;;  %v12939_v49 = vor.u32 %v17718_v27, %v12936_v7  ;;  %v11943_v58 = vor.u32 %v17474_v53, %v11942_v4  ;;  %v11903_v27 = vor.u32 %v17464_v13, %v11902_v14  ;;  %v17534_v4 = vld [vmem:[#allocation2 + $0x454] sm:$0xf0]  ;;  %v12502_v53 = vld [vmem:[#allocation2 + $0x6b0] sm:$0xf]  ;;  %v12782_v14 = vld [vmem:[#allocation2 + $0x8e0] sm:$0xf] }
 0x1d3   :  { %4289 = vmatpush.bf16.msrb.mxu1 %v13019_v35  ;;  %v13259_v35 = vor.u32 %v17798_v38, %v13256_v55  ;;  %v12543_v38 = vor.u32 %v17624_v26, %v12542_v20  ;;  %v17454_v55 = vld [vmem:[#allocation2 + $0x1d4] sm:$0xf0]  ;;  %v12183_v60 = vor.u32 %v17534_v4, %v12182_v25  ;;  %v17684_v13 = vld [vmem:[#allocation2 + $0x904] sm:$0xf0]  ;;  %v11782_v20 = vld [vmem:[#allocation2 + $0x110] sm:$0xf] }
 0x1d4   :  { %4303 = vmatpush.bf16.msrb.mxu2 %v13339_v2  ;;  %v12902_v2 = vld [vmem:[#allocation2 + $0x9d0] sm:$0xf]  ;;  %v17434_v26 = vld [vmem:[#allocation2 + $0x134] sm:$0xf0] }
 0x1d5   :  { %4317 = vmatpush.bf16.msrb.mxu3 %v13659_v17  ;;  %v12263_v17 = vor.u32 %v17554_v29, %v12262_v32  ;;  %v12903_v21 = vor.u32 %v17714_v12, %v12902_v2  ;;  %v17614_v32 = vld [vmem:[#allocation2 + $0x6d4] sm:$0xf0]  ;;  %v17444_v2 = vld [vmem:[#allocation2 + $0x184] sm:$0xf0]  ;;  %v12142_v12 = vld [vmem:[#allocation2 + $0x3e0] sm:$0xf]  ;;  %v11783_v25 = vor.u32 %v17434_v26, %v11782_v20 }
 0x1d6   :  { %4276 = vmatpush.bf16.msrb.mxu0 %v12659_v45  ;;  %v17544_v45 = vld [vmem:[#allocation2 + $0x4a4] sm:$0xf0]  ;;  %v17694_v29 = vld [vmem:[#allocation2 + $0x954] sm:$0xf0]  ;;  %v12662_v20 = vld [vmem:[#allocation2 + $0x7f0] sm:$0xf] }
 0x1d7   :  { %4290 = vmatpush.bf16.msrb.mxu1 %v12979_v33  ;;  %v12862_v33 = vld [vmem:[#allocation2 + $0x980] sm:$0xf]  ;;  %v12223_v7 = vor.u32 %v17544_v45, %v12222_v19  ;;  %v17654_v26 = vld [vmem:[#allocation2 + $0x814] sm:$0xf0] }
 0x1d8   :  { %4304 = vmatpush.bf16.msrb.mxu2 %v13299_v31  ;;  %v17704_v31 = vld [vmem:[#allocation2 + $0x9a4] sm:$0xf0] }
 0x1d9   :  { %4318 = vmatpush.bf16.msrb.mxu3 %v13619_v44  ;;  %v11862_v44 = vld [vmem:[#allocation2 + $0x1b0] sm:$0xf]  ;;  %v12863_v63 = vor.u32 %v17704_v31, %v12862_v33  ;;  %v12783_v31 = vor.u32 %v17684_v13, %v12782_v14 }
 0x1da   :  { %4277 = vmatpush.bf16.msrb.mxu0 %v12619_v51  ;;  %v12822_v51 = vld [vmem:[#allocation2 + $0x930] sm:$0xf]  ;;  %v11863_v1 = vor.u32 %v17454_v55, %v11862_v44  ;;  %v17674_v55 = vld [vmem:[#allocation2 + $0x8b4] sm:$0xf0] }
 0x1db   :  { %4291 = vmatpush.bf16.msrb.mxu1 %v12939_v49  ;;  %v12503_v49 = vor.u32 %v17614_v32, %v12502_v53  ;;  %v12102_v33 = vld [vmem:[#allocation2 + $0x390] sm:$0xf]  ;;  %v11742_v53 = vld [vmem:[#allocation2 + $0xc0] sm:$0xf]  ;;  %v17424_v32 = vld [vmem:[#allocation2 + $0xe4] sm:$0xf0] }
 0x1dc   :  { %4305 = vmatpush.bf16.msrb.mxu2 %v13259_v35  ;;  %v11822_v35 = vld [vmem:[#allocation2 + $0x160] sm:$0xf]  ;;  %v12742_v44 = vld [vmem:[#allocation2 + $0x890] sm:$0xf] }
 0x1dd   :  { %4319 = vmatpush.bf16.msrb.mxu3 %v13579_v8  ;;  %4278 = vmatmul.bf16.vlgmr.msrb.gmra.mxu0 %v19104_v23  ;;  %v12823_v8 = vor.u32 %v17694_v29, %v12822_v51  ;;  %v11823_v19 = vor.u32 %v17444_v2, %v11822_v35  ;;  %v12062_v51 = vld [vmem:[#allocation2 + $0x340] sm:$0xf]  ;;  %v12743_v29 = vor.u32 %v17674_v55, %v12742_v44  ;;  %v17664_v2 = vld [vmem:[#allocation2 + $0x864] sm:$0xf0]  ;;  %v12022_v14 = vld [vmem:[#allocation2 + $0x2f0] sm:$0xf] }
 0x1de   :  { %4326 = vmatpush.bf16.msra.mxu0 %v11943_v58  ;;  %4292 = vmatmul.bf16.vlgmr.msrb.gmra.mxu1 %v19125_v37  ;;  %v17524_v58 = vld [vmem:[#allocation2 + $0x404] sm:$0xf0]  ;;  %v12702_v35 = vld [vmem:[#allocation2 + $0x840] sm:$0xf] }
 0x1df   :  { %4340 = vmatpush.bf16.msra.mxu1 %v12263_v17  ;;  %4306 = vmatmul.bf16.vlgmr.msrb.gmra.mxu2 %v19129_v42  ;;  %v12462_v17 = vld [vmem:[#allocation2 + $0x660] sm:$0xf]  ;;  %v12703_v13 = vor.u32 %v17664_v2, %v12702_v35  ;;  %v17484_v55 = vld [vmem:[#allocation2 + $0x2c4] sm:$0xf0]  ;;  %v13862_v35 = vld [vmem:[#allocation2 + $0x1150] sm:$0xf] }
 0x1e0   :  { %4354 = vmatpush.bf16.msra.mxu2 %v12583_v22  ;;  %4320 = vmatmul.bf16.vlgmr.msrb.gmra.mxu3 %v19127_v41  ;;  %v17604_v22 = vld [vmem:[#allocation2 + $0x684] sm:$0xf0]  ;;  %v11982_v44 = vld [vmem:[#allocation2 + $0x2a0] sm:$0xf]  ;;  %v17954_v2 = vld [vmem:[#allocation2 + $0x1174] sm:$0xf0] }
 0x1e1   :  { %4368 = vmatpush.bf16.msra.mxu3 %v12903_v21  ;;  %v12143_v21 = vor.u32 %v17524_v58, %v12142_v12  ;;  %v12463_v45 = vor.u32 %v17604_v22, %v12462_v17  ;;  %v11743_v12 = vor.u32 %v17424_v32, %v11742_v53  ;;  %v11702_v17 = vld [vmem:[#allocation2 + $0x70] sm:$0xf]  ;;  %v17414_v22 = vld [vmem:[#allocation2 + $0x94] sm:$0xf0]  ;;  %v12622_v53 = vld [vmem:[#allocation2 + $0x7a0] sm:$0xf] }
 0x1e2   :  { %4327 = vmatpush.bf16.msra.mxu0 %v11903_v27  ;;  %v17514_v27 = vld [vmem:[#allocation2 + $0x3b4] sm:$0xf0]  ;;  %v17644_v32 = vld [vmem:[#allocation2 + $0x7c4] sm:$0xf0] }
 0x1e3   :  { %4341 = vmatpush.bf16.msra.mxu1 %v12223_v7  ;;  %v12422_v7 = vld [vmem:[#allocation2 + $0x610] sm:$0xf] }
 0x1e4   :  { %4355 = vmatpush.bf16.msra.mxu2 %v12543_v38  ;;  %v17594_v38 = vld [vmem:[#allocation2 + $0x634] sm:$0xf0] }
 0x1e5   :  { %4369 = vmatpush.bf16.msra.mxu3 %v12863_v63  ;;  %v12103_v63 = vor.u32 %v17514_v27, %v12102_v33  ;;  %v12423_v4 = vor.u32 %v17594_v38, %v12422_v7  ;;  %v11703_v33 = vor.u32 %v17414_v22, %v11702_v17  ;;  %v17404_v27 = vld [vmem:[#allocation2 + $0x44] sm:$0xf0]  ;;  %v11944_v17 = vld [vmem:[#allocation2 + $0x278] sm:$0xf0]  ;;  %v12623_v22 = vor.u32 %v17644_v32, %v12622_v53  ;;  %v13462_v53 = vld [vmem:[#allocation2 + $0xe30] sm:$0xf] }
 0x1e6   :  { %4328 = vmatpush.bf16.msra.mxu0 %v11863_v1  ;;  %v17504_v1 = vld [vmem:[#allocation2 + $0x364] sm:$0xf0] }
 0x1e7   :  { %4342 = vmatpush.bf16.msra.mxu1 %v12183_v60  ;;  %v12382_v60 = vld [vmem:[#allocation2 + $0x5c0] sm:$0xf] }
 0x1e8   :  { %4356 = vmatpush.bf16.msra.mxu2 %v12503_v49  ;;  %v17584_v49 = vld [vmem:[#allocation2 + $0x5e4] sm:$0xf0] }
 0x1e9   :  { %4370 = vmatpush.bf16.msra.mxu3 %v12823_v8  ;;  %v12063_v8 = vor.u32 %v17504_v1, %v12062_v51  ;;  %v12383_v58 = vor.u32 %v17584_v49, %v12382_v60  ;;  %v13222_v51 = vld [vmem:[#allocation2 + $0xc50] sm:$0xf]  ;;  %v17874_v49 = vld [vmem:[#allocation2 + $0xef4] sm:$0xf0] }
 0x1ea   :  { %4329 = vmatpush.bf16.msra.mxu0 %v11823_v19  ;;  %v17494_v19 = vld [vmem:[#allocation2 + $0x314] sm:$0xf0]  ;;  %v13542_v1 = vld [vmem:[#allocation2 + $0xed0] sm:$0xf] }
 0x1eb   :  { %4343 = vmatpush.bf16.msra.mxu1 %v12143_v21  ;;  %v12342_v21 = vld [vmem:[#allocation2 + $0x570] sm:$0xf]  ;;  %v12023_v7 = vor.u32 %v17494_v19, %v12022_v14  ;;  %v13863_v19 = vor.u32 %v17954_v2, %v13862_v35 }
 0x1ec   :  { %4357 = vmatpush.bf16.msra.mxu2 %v12463_v45  ;;  %v17574_v45 = vld [vmem:[#allocation2 + $0x594] sm:$0xf0] }
 0x1ed   :  { %4371 = vmatpush.bf16.msra.mxu3 %v12783_v31  ;;  %v11662_v31 = vld [vmem:[#allocation2 + $0x20] sm:$0xf]  ;;  %v12343_v38 = vor.u32 %v17574_v45, %v12342_v21  ;;  %v17784_v45 = vld [vmem:[#allocation2 + $0xc24] sm:$0xf0] }
 0x1ee   :  { %4330 = vmatpush.bf16.msra.mxu0 %v11783_v25  ;;  %v12302_v25 = vld [vmem:[#allocation2 + $0x520] sm:$0xf]  ;;  %v11663_v60 = vor.u32 %v17404_v27, %v11662_v31  ;;  %v17944_v27 = vld [vmem:[#allocation2 + $0x1124] sm:$0xf0] }
 0x1ef   :  { %4344 = vmatpush.bf16.msra.mxu1 %v12103_v63  ;;  %v12663_v63 = vor.u32 %v17654_v26, %v12662_v20  ;;  %v13182_v21 = vld [vmem:[#allocation2 + $0xc00] sm:$0xf] }
 0x1f0   :  { %4358 = vmatpush.bf16.msra.mxu2 %v12423_v4  ;;  %v17564_v4 = vld [vmem:[#allocation2 + $0x544] sm:$0xf0]  ;;  %v13502_v20 = vld [vmem:[#allocation2 + $0xe80] sm:$0xf] }
 0x1f1   :  { %4372 = vmatpush.bf16.msra.mxu3 %v12743_v29  ;;  %v17794_v29 = vld [vmem:[#allocation2 + $0xc74] sm:$0xf0]  ;;  %v13822_v31 = vld [vmem:[#allocation2 + $0x1100] sm:$0xf] }
 0x1f2   :  { %4331 = vmatpush.bf16.msra.mxu0 %v11743_v12  ;;  %v11983_v12 = vor.u32 %v17484_v55, %v11982_v44  ;;  %v13223_v14 = vor.u32 %v17794_v29, %v13222_v51  ;;  %v13183_v44 = vor.u32 %v17784_v45, %v13182_v21  ;;  %v17854_v51 = vld [vmem:[#allocation2 + $0xe54] sm:$0xf0]  ;;  %v13782_v29 = vld [vmem:[#allocation2 + $0x10b0] sm:$0xf]  ;;  %v17439_v21 = vld [vmem:[#allocation2 + $0x164] sm:$0xf] }
 0x1f3   :  { %4345 = vmatpush.bf16.msra.mxu1 %v12063_v8  ;;  %v12303_v8 = vor.u32 %v17564_v4, %v12302_v25  ;;  %v13823_v25 = vor.u32 %v17944_v27, %v13822_v31  ;;  %v17774_v4 = vld [vmem:[#allocation2 + $0xbd4] sm:$0xf0]  ;;  %v13463_v2 = vor.u32 %v17854_v51, %v13462_v53  ;;  %v11824_v45 = vld [vmem:[#allocation2 + $0x188] sm:$0xf0]  ;;  %v13062_v31 = vld [vmem:[#allocation2 + $0xb10] sm:$0xf] }
 0x1f4   :  { %4359 = vmatpush.bf16.msra.mxu2 %v12383_v58  ;;  %v17469_v58 = vld [vmem:[#allocation2 + $0x254] sm:$0xf]  ;;  %v17754_v27 = vld [vmem:[#allocation2 + $0xb34] sm:$0xf0] }
 0x1f5   :  { %4373 = vmatpush.bf16.msra.mxu3 %v12703_v13  ;;  %v13543_v13 = vor.u32 %v17874_v49, %v13542_v1  ;;  %v11947_v26 = vor.u32 %v17469_v58, %v11944_v17  ;;  %v17934_v1 = vld [vmem:[#allocation2 + $0x10d4] sm:$0xf0]  ;;  %v11864_v49 = vld [vmem:[#allocation2 + $0x1d8] sm:$0xf0]  ;;  %v17764_v58 = vld [vmem:[#allocation2 + $0xb84] sm:$0xf0]  ;;  %v13063_v53 = vor.u32 %v17754_v27, %v13062_v31 }
 0x1f6   :  { %4332 = vmatpush.bf16.msra.mxu0 %v11703_v33  ;;  %v17864_v33 = vld [vmem:[#allocation2 + $0xea4] sm:$0xf0]  ;;  %v13422_v17 = vld [vmem:[#allocation2 + $0xde0] sm:$0xf]  ;;  %v13622_v31 = vld [vmem:[#allocation2 + $0xf70] sm:$0xf] }
 0x1f7   :  { %4346 = vmatpush.bf16.msra.mxu1 %v12023_v7  ;;  %v17459_v7 = vld [vmem:[#allocation2 + $0x204] sm:$0xf]  ;;  %v13503_v55 = vor.u32 %v17864_v33, %v13502_v20  ;;  %v17894_v27 = vld [vmem:[#allocation2 + $0xf94] sm:$0xf0] }
 0x1f8   :  { %4360 = vmatpush.bf16.msra.mxu2 %v12343_v38  ;;  %v11904_v38 = vld [vmem:[#allocation2 + $0x228] sm:$0xf0] }
 0x1f9   :  { %4374 = vmatpush.bf16.msra.mxu3 %v12663_v63  ;;  %v13142_v63 = vld [vmem:[#allocation2 + $0xbb0] sm:$0xf]  ;;  %v11907_v32 = vor.u32 %v17459_v7, %v11904_v38  ;;  %v11827_v38 = vor.u32 %v17439_v21, %v11824_v45  ;;  %v17734_v45 = vld [vmem:[#allocation2 + $0xa94] sm:$0xf0] }
 0x1fa   :  { %4333 = vmatpush.bf16.msra.mxu0 %v11663_v60  ;;  %v17449_v60 = vld [vmem:[#allocation2 + $0x1b4] sm:$0xf]  ;;  %v13143_v35 = vor.u32 %v17774_v4, %v13142_v63  ;;  %v13382_v7 = vld [vmem:[#allocation2 + $0xd90] sm:$0xf]  ;;  %v11784_v4 = vld [vmem:[#allocation2 + $0x138] sm:$0xf0] }
 0x1fb   :  { %4347 = vmatpush.bf16.msra.mxu1 %v11983_v12  ;;  %v13783_v12 = vor.u32 %v17934_v1, %v13782_v29  ;;  %v17429_v63 = vld [vmem:[#allocation2 + $0x114] sm:$0xf]  ;;  %v13022_v29 = vld [vmem:[#allocation2 + $0xac0] sm:$0xf]  ;;  %v17744_v1 = vld [vmem:[#allocation2 + $0xae4] sm:$0xf0] }
 0x1fc   :  { %4361 = vmatpush.bf16.msra.mxu2 %v12303_v8  ;;  %v13102_v8 = vld [vmem:[#allocation2 + $0xb60] sm:$0xf]  ;;  %v12982_v21 = vld [vmem:[#allocation2 + $0xa70] sm:$0xf] }
 0x1fd   :  { %4375 = vmatpush.bf16.msra.mxu3 %v12623_v22  ;;  %4334 = vmatmul.bf16.vlgmr.msra.gmra.mxu0 %v19080_v57  ;;  %v11867_v22 = vor.u32 %v17449_v60, %v11864_v49  ;;  %v13103_v20 = vor.u32 %v17764_v58, %v13102_v8  ;;  %v13342_v60 = vld [vmem:[#allocation2 + $0xd40] sm:$0xf]  ;;  %v19287_v49 = vpop.f32.mrf.mxu0  ;;  %v17904_v8 = vld [vmem:[#allocation2 + $0xfe4] sm:$0xf0]  ;;  %v17419_v58 = vld [vmem:[#allocation2 + $0xc4] sm:$0xf] }
 0x1fe   :  { %4382 = vmatpush.bf16.msrb.mxu0 %v13223_v14  ;;  %4348 = vmatmul.bf16.vlgmr.msra.gmra.mxu1 %v19095_v11  ;;  %v17844_v14 = vld [vmem:[#allocation2 + $0xe04] sm:$0xf0] }
 0x1ff   :  { %4396 = vmatpush.bf16.msrb.mxu1 %v13543_v13  ;;  %4362 = vmatmul.bf16.vlgmr.msra.gmra.mxu2 %v19085_v0  ;;  %v13742_v13 = vld [vmem:[#allocation2 + $0x1060] sm:$0xf] }
 0x200   :  { %4410 = vmatpush.bf16.msrb.mxu2 %v13863_v19  ;;  %4376 = vmatmul.bf16.vlgmr.msra.gmra.mxu3 %v19104_v23  ;;  %v17924_v19 = vld [vmem:[#allocation2 + $0x1084] sm:$0xf0] }
 0x201   :  { %4424 = vmatpush.bf16.msrb.mxu3 %v11947_v26  ;;  %v13423_v26 = vor.u32 %v17844_v14, %v13422_v17  ;;  %v13743_v33 = vor.u32 %v17924_v19, %v13742_v13  ;;  %v11744_v17 = vld [vmem:[#allocation2 + $0xe8] sm:$0xf0]  ;;  %v13023_v14 = vor.u32 %v17744_v1, %v13022_v29  ;;  %v13582_v29 = vld [vmem:[#allocation2 + $0xf20] sm:$0xf] }
 0x202   :  { %4383 = vmatpush.bf16.msrb.mxu0 %v13183_v44  ;;  %v17834_v44 = vld [vmem:[#allocation2 + $0xdb4] sm:$0xf0] }
 0x203   :  { %4397 = vmatpush.bf16.msrb.mxu1 %v13503_v55  ;;  %v13702_v55 = vld [vmem:[#allocation2 + $0x1010] sm:$0xf] }
 0x204   :  { %4411 = vmatpush.bf16.msrb.mxu2 %v13823_v25  ;;  %v17914_v25 = vld [vmem:[#allocation2 + $0x1034] sm:$0xf0] }
 0x205   :  { %4425 = vmatpush.bf16.msrb.mxu3 %v11907_v32  ;;  %v13383_v32 = vor.u32 %v17834_v44, %v13382_v7  ;;  %v13703_v51 = vor.u32 %v17914_v25, %v13702_v55  ;;  %v17409_v7 = vld [vmem:[#allocation2 + $0x74] sm:$0xf]  ;;  %v19291_v44 = vpop.f32.mrf.mxu2  ;;  %v12983_v55 = vor.u32 %v17734_v45, %v12982_v21  ;;  %v12942_v25 = vld [vmem:[#allocation2 + $0xa20] sm:$0xf]  ;;  %v12904_v45 = vld [vmem:[#allocation2 + $0x9f8] sm:$0xf0] }
 0x206   :  { %4384 = vmatpush.bf16.msrb.mxu0 %v13143_v35  ;;  %v11787_v35 = vor.u32 %v17429_v63, %v11784_v4  ;;  %20060 = vst [vmem:[#allocation28_spill] sm:$0xff] %v19291_v44  ;;  %v17724_v63 = vld [vmem:[#allocation2 + $0xa44] sm:$0xf0]  ;;  %v17709_v21 = vld [vmem:[#allocation2 + $0x9d4] sm:$0xf] }
 0x207   :  { %4398 = vmatpush.bf16.msrb.mxu1 %v13463_v2  ;;  %v17824_v2 = vld [vmem:[#allocation2 + $0xd64] sm:$0xf0]  ;;  %v12907_v62 = vor.u32 %v17709_v21, %v12904_v45  ;;  %v17539_v44 = vld [vmem:[#allocation2 + $0x484] sm:$0xf]  ;;  %v12824_v21 = vld [vmem:[#allocation2 + $0x958] sm:$0xf0] }
 0x208   :  { %4412 = vmatpush.bf16.msrb.mxu2 %v13783_v12  ;;  %v13662_v12 = vld [vmem:[#allocation2 + $0xfc0] sm:$0xf]  ;;  %v13343_v13 = vor.u32 %v17824_v2, %v13342_v60  ;;  %v17884_v60 = vld [vmem:[#allocation2 + $0xf44] sm:$0xf0]  ;;  %v11664_v2 = vld [vmem:[#allocation2 + $0x48] sm:$0xf0] }
 0x209   :  { %4426 = vmatpush.bf16.msrb.mxu3 %v11867_v22  ;;  %v19289_v22 = vpop.f32.mrf.mxu1  ;;  %v13663_v19 = vor.u32 %v17904_v8, %v13662_v12  ;;  %v19293_v12 = vpop.f32.mrf.mxu3  ;;  %v17549_v8 = vld [vmem:[#allocation2 + $0x4d4] sm:$0xf] }
 0x20a   :  { %4385 = vmatpush.bf16.msrb.mxu0 %v13103_v20  ;;  %20059 = vst [vmem:[#allocation27_spill] sm:$0xff] %v19289_v22  ;;  %v13302_v20 = vld [vmem:[#allocation2 + $0xcf0] sm:$0xf]  ;;  %v17939_v22 = vld [vmem:[#allocation2 + $0x1104] sm:$0xf] }
 0x20b   :  { %4399 = vmatpush.bf16.msrb.mxu1 %v13423_v26  ;;  %v11747_v26 = vor.u32 %v17419_v58, %v11744_v17  ;;  %20061 = vst [vmem:[#allocation29_spill] sm:$0xff] %v19293_v12  ;;  %v12264_v58 = vld [vmem:[#allocation2 + $0x4f8] sm:$0xf0]  ;;  %v17629_v17 = vld [vmem:[#allocation2 + $0x754] sm:$0xf] }
 0x20c   :  { %4413 = vmatpush.bf16.msrb.mxu2 %v13743_v33  ;;  %v17814_v33 = vld [vmem:[#allocation2 + $0xd14] sm:$0xf0] }
 0x20d   :  { %4427 = vmatpush.bf16.msrb.mxu3 %v11827_v38  ;;  %v11704_v38 = vld [vmem:[#allocation2 + $0x98] sm:$0xf0]  ;;  %v13303_v4 = vor.u32 %v17814_v33, %v13302_v20  ;;  %v17789_v33 = vld [vmem:[#allocation2 + $0xc54] sm:$0xf] }
 0x20e   :  { %4386 = vmatpush.bf16.msrb.mxu0 %v13063_v53  ;;  %v13623_v53 = vor.u32 %v17894_v27, %v13622_v31  ;;  %v11707_v1 = vor.u32 %v17409_v7, %v11704_v38  ;;  %v13224_v31 = vld [vmem:[#allocation2 + $0xc78] sm:$0xf0]  ;;  %v12267_v38 = vor.u32 %v17549_v8, %v12264_v58  ;;  %v17609_v58 = vld [vmem:[#allocation2 + $0x6b4] sm:$0xf] }
 0x20f   :  { %4400 = vmatpush.bf16.msrb.mxu1 %v13383_v32  ;;  %v13262_v32 = vld [vmem:[#allocation2 + $0xca0] sm:$0xf]  ;;  %v12184_v8 = vld [vmem:[#allocation2 + $0x458] sm:$0xf0] }
 0x210   :  { %4414 = vmatpush.bf16.msrb.mxu2 %v13703_v51  ;;  %v17804_v51 = vld [vmem:[#allocation2 + $0xcc4] sm:$0xf0] }
 0x211   :  { %4428 = vmatpush.bf16.msrb.mxu3 %v11787_v35  ;;  %v17399_v35 = vld [vmem:[#allocation2 + $0x24] sm:$0xf]  ;;  %v13263_v20 = vor.u32 %v17804_v51, %v13262_v32  ;;  %v19297_v27 = vpop.f32.mrf.mxu1  ;;  %v13184_v32 = vld [vmem:[#allocation2 + $0xc28] sm:$0xf0]  ;;  %v19299_v51 = vpop.f32.mrf.mxu2 }
 0x212   :  { %4387 = vmatpush.bf16.msrb.mxu0 %v13023_v14  ;;  %v19295_v14 = vpop.f32.mrf.mxu0  ;;  %20063 = vst [vmem:[#allocation31_spill] sm:$0xff] %v19297_v27  ;;  %v11667_v7 = vor.u32 %v17399_v35, %v11664_v2  ;;  %v17529_v2 = vld [vmem:[#allocation2 + $0x434] sm:$0xf] }
 0x213   :  { %4401 = vmatpush.bf16.msrb.mxu1 %v13343_v13  ;;  %20062 = vst [vmem:[#allocation30_spill] sm:$0xff] %v19295_v14  ;;  %v12943_v13 = vor.u32 %v17724_v63, %v12942_v25  ;;  %v12224_v14 = vld [vmem:[#allocation2 + $0x4a8] sm:$0xf0]  ;;  %v13227_v25 = vor.u32 %v17789_v33, %v13224_v31  ;;  %v17599_v33 = vld [vmem:[#allocation2 + $0x664] sm:$0xf] }
 0x214   :  { %4415 = vmatpush.bf16.msrb.mxu2 %v13663_v19  ;;  %v12584_v19 = vld [vmem:[#allocation2 + $0x778] sm:$0xf0]  ;;  %v12544_v63 = vld [vmem:[#allocation2 + $0x728] sm:$0xf0]  ;;  %20064 = vst [vmem:[#allocation32_spill] sm:$0xff] %v19299_v51 }
 0x215   :  { %4429 = vmatpush.bf16.msrb.mxu3 %v11747_v26  ;;  %v13583_v26 = vor.u32 %v17884_v60, %v13582_v29  ;;  %v12587_v12 = vor.u32 %v17629_v17, %v12584_v19  ;;  %v12227_v29 = vor.u32 %v17539_v44, %v12224_v14  ;;  %v17689_v19 = vld [vmem:[#allocation2 + $0x934] sm:$0xf]  ;;  %v13144_v14 = vld [vmem:[#allocation2 + $0xbd8] sm:$0xf0]  ;;  %v13024_v51 = vld [vmem:[#allocation2 + $0xae8] sm:$0xf0] }
 0x216   :  { %4388 = vmatpush.bf16.msrb.mxu0 %v12983_v55  ;;  %v17619_v55 = vld [vmem:[#allocation2 + $0x704] sm:$0xf]  ;;  %v17769_v44 = vld [vmem:[#allocation2 + $0xbb4] sm:$0xf]  ;;  %v12827_v45 = vor.u32 %v17689_v19, %v12824_v21 }
 0x217   :  { %4402 = vmatpush.bf16.msrb.mxu1 %v13303_v4  ;;  %v12864_v4 = vld [vmem:[#allocation2 + $0x9a8] sm:$0xf0]  ;;  %v12547_v60 = vor.u32 %v17619_v55, %v12544_v63  ;;  %v17679_v55 = vld [vmem:[#allocation2 + $0x8e4] sm:$0xf]  ;;  %v17749_v21 = vld [vmem:[#allocation2 + $0xb14] sm:$0xf] }
 0x218   :  { %4416 = vmatpush.bf16.msrb.mxu2 %v13623_v53  ;;  %v17779_v53 = vld [vmem:[#allocation2 + $0xc04] sm:$0xf]  ;;  %v12867_v35 = vor.u32 %v17699_v28, %v12864_v4  ;;  %v12187_v28 = vor.u32 %v17529_v2, %v12184_v8  ;;  %v13104_v4 = vld [vmem:[#allocation2 + $0xb88] sm:$0xf0] }
 0x219   :  { %4430 = vmatpush.bf16.msrb.mxu3 %v11707_v1  ;;  %v19301_v1 = vpop.f32.mrf.mxu3  ;;  %v13187_v17 = vor.u32 %v17779_v53, %v13184_v32  ;;  %v19309_v31 = vpop.f32.mrf.mxu1  ;;  %v17759_v63 = vld [vmem:[#allocation2 + $0xb64] sm:$0xf] }
 0x21a   :  { %4389 = vmatpush.bf16.msrb.mxu0 %v12943_v13  ;;  %v12504_v13 = vld [vmem:[#allocation2 + $0x6d8] sm:$0xf0]  ;;  %20066 = vst [vmem:[#allocation34_spill] sm:$0xff] %v19309_v31  ;;  %v19311_v2 = vpop.f32.mrf.mxu2  ;;  %v13107_v8 = vor.u32 %v17759_v63, %v13104_v4  ;;  %v12704_v63 = vld [vmem:[#allocation2 + $0x868] sm:$0xf0] }
 0x21b   :  { %4403 = vmatpush.bf16.msrb.mxu1 %v13263_v20  ;;  %v17519_v20 = vld [vmem:[#allocation2 + $0x3e4] sm:$0xf]  ;;  %20067 = vst [vmem:[#allocation35_spill] sm:$0xff] %v19311_v2  ;;  %v12944_v31 = vld [vmem:[#allocation2 + $0xa48] sm:$0xf0] }
 0x21c   :  { %4417 = vmatpush.bf16.msrb.mxu2 %v13583_v26  ;;  %v12144_v26 = vld [vmem:[#allocation2 + $0x408] sm:$0xf0]  ;;  %v17739_v4 = vld [vmem:[#allocation2 + $0xac4] sm:$0xf] }
 0x21d   :  { %4431 = vmatpush.bf16.msrb.mxu3 %v11667_v7  ;;  %4390 = vmatmul.bf16.vlgmr.msrb.gmra.mxu0 %v19125_v37  ;;  %v13147_v7 = vor.u32 %v17769_v44, %v13144_v14  ;;  %v12147_v53 = vor.u32 %v17519_v20, %v12144_v26  ;;  %v13064_v44 = vld [vmem:[#allocation2 + $0xb38] sm:$0xf0]  ;;  %v17499_v20 = vld [vmem:[#allocation2 + $0x344] sm:$0xf]  ;;  %v12064_v26 = vld [vmem:[#allocation2 + $0x368] sm:$0xf0] }
 0x21e   :  { %4438 = vmatpush.bf16.msra.mxu0 %v12267_v38  ;;  %4404 = vmatmul.bf16.vlgmr.msrb.gmra.mxu1 %v19129_v42  ;;  %v12464_v38 = vld [vmem:[#allocation2 + $0x688] sm:$0xf0]  ;;  %v12067_v2 = vor.u32 %v17499_v20, %v12064_v26 }
 0x21f   :  { %4452 = vmatpush.bf16.msra.mxu1 %v12587_v12  ;;  %4418 = vmatmul.bf16.vlgmr.msrb.gmra.mxu2 %v19127_v41  ;;  %v19306_v12 = vpop.f32.mrf.mxu0  ;;  %v11984_v20 = vld [vmem:[#allocation2 + $0x2c8] sm:$0xf0] }
 0x220   :  { %4466 = vmatpush.bf16.msra.mxu2 %v12907_v62  ;;  %20065 = vst [vmem:[#allocation33_spill] sm:$0xff] %v19306_v12  ;;  %4432 = vmatmul.bf16.vlgmr.msrb.gmra.mxu3 %v19080_v57  ;;  %v12507_v62 = vor.u32 %v17609_v58, %v12504_v13  ;;  %v12467_v57 = vor.u32 %v17599_v33, %v12464_v38  ;;  %v12424_v58 = vld [vmem:[#allocation2 + $0x638] sm:$0xf0]  ;;  %v17579_v33 = vld [vmem:[#allocation2 + $0x5c4] sm:$0xf] }
 0x221   :  { %4480 = vmatpush.bf16.msra.mxu3 %v13227_v25  ;;  %v12784_v25 = vld [vmem:[#allocation2 + $0x908] sm:$0xf0]  ;;  %v12744_v13 = vld [vmem:[#allocation2 + $0x8b8] sm:$0xf0]  ;;  %v19313_v19 = vpop.f32.mrf.mxu3  ;;  %v13067_v38 = vor.u32 %v17749_v21, %v13064_v44  ;;  %v17729_v21 = vld [vmem:[#allocation2 + $0xa74] sm:$0xf] }
 0x222   :  { %4439 = vmatpush.bf16.msra.mxu0 %v12227_v29  ;;  %v12787_v32 = vor.u32 %v17679_v55, %v12784_v25  ;;  %v17509_v29 = vld [vmem:[#allocation2 + $0x394] sm:$0xf]  ;;  %v12384_v55 = vld [vmem:[#allocation2 + $0x5e8] sm:$0xf0]  ;;  %v17659_v25 = vld [vmem:[#allocation2 + $0x844] sm:$0xf] }
 0x223   :  { %4453 = vmatpush.bf16.msra.mxu1 %v12547_v60  ;;  %v12104_v60 = vld [vmem:[#allocation2 + $0x3b8] sm:$0xf0] }
 0x224   :  { %4467 = vmatpush.bf16.msra.mxu2 %v12867_v35  ;;  %v17589_v35 = vld [vmem:[#allocation2 + $0x614] sm:$0xf]  ;;  %v12984_v44 = vld [vmem:[#allocation2 + $0xa98] sm:$0xf0] }
 0x225   :  { %4481 = vmatpush.bf16.msra.mxu3 %v13187_v17  ;;  %v17669_v17 = vld [vmem:[#allocation2 + $0x894] sm:$0xf] }
 0x226   :  { %4440 = vmatpush.bf16.msra.mxu0 %v12187_v28  ;;  %v12107_v28 = vor.u32 %v17509_v29, %v12104_v60  ;;  %v12024_v29 = vld [vmem:[#allocation2 + $0x318] sm:$0xf0]  ;;  %v17569_v60 = vld [vmem:[#allocation2 + $0x574] sm:$0xf] }
 0x227   :  { %4454 = vmatpush.bf16.msra.mxu1 %v12507_v62  ;;  %v19315_v14 = vpop.f32.mrf.mxu0  ;;  %v12427_v62 = vor.u32 %v17589_v35, %v12424_v58  ;;  %v19319_v35 = vpop.f32.mrf.mxu2  ;;  %v13027_v58 = vor.u32 %v17739_v4, %v13024_v51  ;;  %v12987_v51 = vor.u32 %v17729_v21, %v12984_v44  ;;  %v17719_v4 = vld [vmem:[#allocation2 + $0xa24] sm:$0xf] }
 0x228   :  { %4468 = vmatpush.bf16.msra.mxu2 %v12827_v45  ;;  %20068 = vst [vmem:[#allocation36_spill] sm:$0xff] %v19315_v14  ;;  %v12747_v45 = vor.u32 %v17669_v17, %v12744_v13  ;;  %v17649_v17 = vld [vmem:[#allocation2 + $0x7f4] sm:$0xf]  ;;  %v12664_v13 = vld [vmem:[#allocation2 + $0x818] sm:$0xf0]  ;;  %v12947_v21 = vor.u32 %v17719_v4, %v12944_v31 }
 0x229   :  { %4482 = vmatpush.bf16.msra.mxu3 %v13147_v7  ;;  %v19317_v7 = vpop.f32.mrf.mxu1  ;;  %20070 = vst [vmem:[#allocation38_spill] sm:$0xff] %v19319_v35  ;;  %v12667_v26 = vor.u32 %v17649_v17, %v12664_v13  ;;  %v13504_v14 = vld [vmem:[#allocation2 + $0xea8] sm:$0xf0] }
 0x22a   :  { %4441 = vmatpush.bf16.msra.mxu0 %v12147_v53  ;;  %20069 = vst [vmem:[#allocation37_spill] sm:$0xff] %v19317_v7  ;;  %v12387_v53 = vor.u32 %v17579_v33, %v12384_v55  ;;  %v17559_v33 = vld [vmem:[#allocation2 + $0x524] sm:$0xf]  ;;  %v12304_v55 = vld [vmem:[#allocation2 + $0x548] sm:$0xf0] }
 0x22b   :  { %4455 = vmatpush.bf16.msra.mxu1 %v12467_v57  ;;  %v12707_v57 = vor.u32 %v17659_v25, %v12704_v63  ;;  %v17639_v25 = vld [vmem:[#allocation2 + $0x7a4] sm:$0xf]  ;;  %v12624_v63 = vld [vmem:[#allocation2 + $0x7c8] sm:$0xf0]  ;;  %v12307_v17 = vor.u32 %v17559_v33, %v12304_v55  ;;  %v18100_v33 = vld [vmem:[#allocation6 + $0x484] sm:$0xf0] }
 0x22c   :  { %4469 = vmatpush.bf16.msra.mxu2 %v12787_v32  ;;  %v17489_v32 = vld [vmem:[#allocation2 + $0x2f4] sm:$0xf]  ;;  %v12627_v13 = vor.u32 %v17639_v25, %v12624_v63  ;;  %v20074_v55 = vperm.slane %v19143_v54, 0  ;;  %v20075_v25 = vperm.slane %v19143_v54, 1 }
 0x22d   :  { %4483 = vmatpush.bf16.msra.mxu3 %v13107_v8  ;;  %v12344_v8 = vld [vmem:[#allocation2 + $0x598] sm:$0xf0]  ;;  %v12027_v27 = vor.u32 %v17489_v32, %v12024_v29  ;;  %v17949_v29 = vld [vmem:[#allocation2 + $0x1154] sm:$0xf] }
 0x22e   :  { %4442 = vmatpush.bf16.msra.mxu0 %v12107_v28  ;;  %v17479_v28 = vld [vmem:[#allocation2 + $0x2a4] sm:$0xf]  ;;  %v13544_v32 = vld [vmem:[#allocation2 + $0xef8] sm:$0xf0]  ;;  %v3554_v31 = vadd.f32 %v19154_v30, %v20074_v55 }
 0x22f   :  { %4456 = vmatpush.bf16.msra.mxu1 %v12427_v62  ;;  %v19321_v62 = vpop.f32.mrf.mxu3 }
 0x230   :  { %4470 = vmatpush.bf16.msra.mxu2 %v12747_v45  ;;  %20071 = vst [vmem:[#allocation39_spill] sm:$0xff] %v19321_v62  ;;  %v12347_v45 = vor.u32 %v17569_v60, %v12344_v8  ;;  %v14150_v60 = vld [vmem:[#allocation6 + $0x230] sm:$0xf]  ;;  %v18030_v8 = vld [vmem:[#allocation6 + $0x254] sm:$0xf0] }
 0x231   :  { %4484 = vmatpush.bf16.msra.mxu3 %v13067_v38  ;;  %v19323_v38 = vpop.f32.mrf.mxu0  ;;  %v19325_v12 = vpop.f32.mrf.mxu1  ;;  %v14470_v62 = vld [vmem:[#allocation6 + $0x4b0] sm:$0xf]  ;;  %v14151_v7 = vor.u32 %v18030_v8, %v14150_v60  ;;  %v18010_v8 = vld [vmem:[#allocation6 + $0x1b4] sm:$0xf0] }
 0x232   :  { %4443 = vmatpush.bf16.msra.mxu0 %v12067_v2  ;;  %20072 = vst [vmem:[#allocation40_spill] sm:$0xff] %v19323_v38  ;;  %v17869_v2 = vld [vmem:[#allocation2 + $0xed4] sm:$0xf]  ;;  %v17859_v38 = vld [vmem:[#allocation2 + $0xe84] sm:$0xf] }
 0x233   :  { %4457 = vmatpush.bf16.msra.mxu1 %v12387_v53  ;;  %20073 = vst [vmem:[#allocation41_spill] sm:$0xff] %v19325_v12  ;;  %v11987_v53 = vor.u32 %v17479_v28, %v11984_v20  ;;  %v13547_v44 = vor.u32 %v17869_v2, %v13544_v32  ;;  %v19327_v12 = vpop.f32.mrf.mxu2  ;;  %v13824_v28 = vld [vmem:[#allocation2 + $0x1128] sm:$0xf0]  ;;  %v13507_v63 = vor.u32 %v17859_v38, %v13504_v14  ;;  %v17849_v32 = vld [vmem:[#allocation2 + $0xe34] sm:$0xf] }
 0x234   :  { %4471 = vmatpush.bf16.msra.mxu2 %v12707_v57  ;;  %v13864_v57 = vld [vmem:[#allocation2 + $0x1178] sm:$0xf0]  ;;  %v14110_v20 = vld [vmem:[#allocation6 + $0x1e0] sm:$0xf] }
 0x235   :  { %4485 = vmatpush.bf16.msra.mxu3 %v13027_v58  ;;  %v18110_v58 = vld [vmem:[#allocation6 + $0x4d4] sm:$0xf0]  ;;  %v13867_v35 = vor.u32 %v17949_v29, %v13864_v57  ;;  %v13464_v29 = vld [vmem:[#allocation2 + $0xe58] sm:$0xf0] }
 0x236   :  { %4444 = vmatpush.bf16.msra.mxu0 %v12027_v27  ;;  %v14471_v27 = vor.u32 %v18110_v58, %v14470_v62  ;;  %v13827_v62 = vor.u32 %v17939_v22, %v13824_v28  ;;  %v13784_v60 = vld [vmem:[#allocation2 + $0x10d8] sm:$0xf0]  ;;  %v3568_v22 = vadd.f32 %v19156_v43, %v3554_v31  ;;  %v17839_v58 = vld [vmem:[#allocation2 + $0xde4] sm:$0xf]  ;;  %v13744_v43 = vld [vmem:[#allocation2 + $0x1088] sm:$0xf0] }
 0x237   :  { %4458 = vmatpush.bf16.msra.mxu1 %v12347_v45  ;;  %v18020_v45 = vld [vmem:[#allocation6 + $0x204] sm:$0xf0]  ;;  %v19335_v4 = vpop.f32.mrf.mxu3  ;;  %v14390_v14 = vld [vmem:[#allocation6 + $0x410] sm:$0xf]  ;;  %v14350_v28 = vld [vmem:[#allocation6 + $0x3c0] sm:$0xf] }
 0x238   :  { %4472 = vmatpush.bf16.msra.mxu2 %v12667_v26  ;;  %v14430_v26 = vld [vmem:[#allocation6 + $0x460] sm:$0xf]  ;;  %v14111_v2 = vor.u32 %v18020_v45, %v14110_v20  ;;  %v18080_v20 = vld [vmem:[#allocation6 + $0x3e4] sm:$0xf0]  ;;  %v3582_v45 = vadd.f32 %v19161_v59, %v3568_v22  ;;  %v18070_v59 = vld [vmem:[#allocation6 + $0x394] sm:$0xf0] }
 0x239   :  { %4486 = vmatpush.bf16.msra.mxu3 %v12987_v51  ;;  %v3652_v51 = vadd.f32 %v19182_v15, %v20075_v25  ;;  %v19337_v57 = vpop.f32.mrf.mxu0  ;;  %v14431_v30 = vor.u32 %v18100_v33, %v14430_v26  ;;  %v14070_v15 = vld [vmem:[#allocation6 + $0x190] sm:$0xf]  ;;  %v19344_v38 = vpop.f32.mrf.mxu1  ;;  %v17829_v25 = vld [vmem:[#allocation2 + $0xd94] sm:$0xf]  ;;  %v13344_v22 = vld [vmem:[#allocation2 + $0xd68] sm:$0xf0] }
 0x23a   :  { %4445 = vmatpush.bf16.msra.mxu0 %v11987_v53  ;;  %v17929_v53 = vld [vmem:[#allocation2 + $0x10b4] sm:$0xf] }
 0x23b   :  { %4459 = vmatpush.bf16.msra.mxu1 %v12307_v17  ;;  %v13467_v17 = vor.u32 %v17849_v32, %v13464_v29  ;;  %v13990_v32 = vld [vmem:[#allocation6 + $0xf0] sm:$0xf]  ;;  %v17990_v29 = vld [vmem:[#allocation6 + $0x114] sm:$0xf0] }
 0x23c   :  { %4473 = vmatpush.bf16.msra.mxu2 %v12627_v13  ;;  %v14071_v13 = vor.u32 %v18010_v8, %v14070_v15 }
 0x23d   :  { %4487 = vmatpush.bf16.msra.mxu3 %v12947_v21  ;;  %4446 = vmatmul.bf16.vlgmr.msra.gmra.mxu0 %v19095_v11  ;;  %v13424_v11 = vld [vmem:[#allocation2 + $0xe08] sm:$0xf0]  ;;  %v17919_v21 = vld [vmem:[#allocation2 + $0x1064] sm:$0xf] }
 0x23e   :  { %4494 = vmatpush.bf16.msrb.mxu0 %v13547_v44  ;;  %4460 = vmatmul.bf16.vlgmr.msra.gmra.mxu1 %v19085_v0  ;;  %v13427_v26 = vor.u32 %v17839_v58, %v13424_v11  ;;  %v13747_v55 = vor.u32 %v17919_v21, %v13744_v43  ;;  %v13950_v58 = vld [vmem:[#allocation6 + $0xa0] sm:$0xf]  ;;  %v18060_v21 = vld [vmem:[#allocation6 + $0x344] sm:$0xf0] }
 0x23f   :  { %4508 = vmatpush.bf16.msrb.mxu1 %v13867_v35  ;;  %4474 = vmatmul.bf16.vlgmr.msra.gmra.mxu2 %v19104_v23  ;;  %v3666_v35 = vadd.f32 %v19186_v56, %v3652_v51  ;;  %v13787_v23 = vor.u32 %v17929_v53, %v13784_v60  ;;  %v18000_v56 = vld [vmem:[#allocation6 + $0x164] sm:$0xf0]  ;;  %v19351_v33 = vpop.f32.mrf.mxu3  ;;  %v13384_v51 = vld [vmem:[#allocation2 + $0xdb8] sm:$0xf0]  ;;  %v14270_v11 = vld [vmem:[#allocation6 + $0x320] sm:$0xf] }
 0x240   :  { %9376 = vmatpush.bf16.msrb.mxu2 %v14151_v7  ;;  %4488 = vmatmul.bf16.vlgmr.msra.gmra.mxu3 %v19125_v37  ;;  %v18090_v7 = vld [vmem:[#allocation6 + $0x434] sm:$0xf0]  ;;  %v19347_v37 = vpop.f32.mrf.mxu2  ;;  %v14310_v53 = vld [vmem:[#allocation6 + $0x370] sm:$0xf]  ;;  %v13387_v15 = vor.u32 %v17829_v25, %v13384_v51 }
 0x241   :  { %9390 = vmatpush.bf16.msrb.mxu3 %v14471_v27  ;;  %v14391_v44 = vor.u32 %v18090_v7, %v14390_v14  ;;  %v14030_v27 = vld [vmem:[#allocation6 + $0x140] sm:$0xf]  ;;  %v3680_v0 = vadd.f32 %v19188_v6, %v3666_v35  ;;  %v3596_v6 = vadd.f32 %v19167_v52, %v3582_v45  ;;  %v19355_v60 = vpop.f32.mrf.mxu0  ;;  %v13991_v14 = vor.u32 %v17990_v29, %v13990_v32  ;;  %v17819_v7 = vld [vmem:[#allocation2 + $0xd44] sm:$0xf]  ;;  %v17889_v45 = vld [vmem:[#allocation2 + $0xf74] sm:$0xf] }
 0x242   :  { %4495 = vmatpush.bf16.msrb.mxu0 %v13507_v63  ;;  %v14031_v31 = vor.u32 %v18000_v56, %v14030_v27  ;;  %v17909_v63 = vld [vmem:[#allocation2 + $0x1014] sm:$0xf]  ;;  %v17899_v35 = vld [vmem:[#allocation2 + $0xfc4] sm:$0xf]  ;;  %v13664_v52 = vld [vmem:[#allocation2 + $0xfe8] sm:$0xf0]  ;;  %v13347_v27 = vor.u32 %v17819_v7, %v13344_v22 }
 0x243   :  { %4509 = vmatpush.bf16.msrb.mxu1 %v13827_v62  ;;  %v14351_v62 = vor.u32 %v18080_v20, %v14350_v28  ;;  %v13667_v56 = vor.u32 %v17899_v35, %v13664_v52  ;;  %v13304_v20 = vld [vmem:[#allocation2 + $0xd18] sm:$0xf0]  ;;  %v13870_v7 = vld [vmem:[#allocation6] sm:$0xf]  ;;  %v17960_v35 = vld [vmem:[#allocation6 + $0x24] sm:$0xf0] }
 0x244   :  { %9377 = vmatpush.bf16.msrb.mxu2 %v14111_v2  ;;  %v13704_v2 = vld [vmem:[#allocation2 + $0x1038] sm:$0xf0]  ;;  %v18190_v52 = vld [vmem:[#allocation6 + $0x754] sm:$0xf0] }
 0x245   :  { %9391 = vmatpush.bf16.msrb.mxu3 %v14431_v30  ;;  %v3694_v30 = vadd.f32 %v19195_v50, %v3680_v0  ;;  %v13707_v8 = vor.u32 %v17909_v63, %v13704_v2  ;;  %v17980_v50 = vld [vmem:[#allocation6 + $0xc4] sm:$0xf0]  ;;  %v13910_v25 = vld [vmem:[#allocation6 + $0x50] sm:$0xf]  ;;  %v4522_v2 = vmax.f32 %v19165_v40, 0.0 }
 0x246   :  { %4496 = vmatpush.bf16.msrb.mxu0 %v13467_v17  ;;  %v3610_v17 = vadd.f32 %v19169_v39, %v3596_v6  ;;  %v13951_v28 = vor.u32 %v17980_v50, %v13950_v58  ;;  %v17809_v39 = vld [vmem:[#allocation2 + $0xcf4] sm:$0xf]  ;;  %v14230_v63 = vld [vmem:[#allocation6 + $0x2d0] sm:$0xf]  ;;  %v18270_v50 = vld [vmem:[#allocation6 + $0x9d4] sm:$0xf0] }
 0x247   :  { %4510 = vmatpush.bf16.msrb.mxu1 %v13787_v23  ;;  %v19358_v23 = vpop.f32.mrf.mxu1  ;;  %v19365_v51 = vpop.f32.mrf.mxu3 }
 0x248   :  { %9378 = vmatpush.bf16.msrb.mxu2 %v14071_v13  ;;  %v14311_v13 = vor.u32 %v18070_v59, %v14310_v53  ;;  %v19361_v43 = vpop.f32.mrf.mxu2  ;;  %v3624_v0 = vadd.f32 %v19172_v48, %v3610_v17  ;;  %v13307_v53 = vor.u32 %v17809_v39, %v13304_v20  ;;  %v17799_v48 = vld [vmem:[#allocation2 + $0xca4] sm:$0xf]  ;;  %v13264_v59 = vld [vmem:[#allocation2 + $0xcc8] sm:$0xf0] }
 0x249   :  { %9392 = vmatpush.bf16.msrb.mxu3 %v14391_v44  ;;  %v3708_v44 = vadd.f32 %v19199_v3, %v3694_v30  ;;  %v17970_v3 = vld [vmem:[#allocation6 + $0x74] sm:$0xf0]  ;;  %v19369_v29 = vpop.f32.mrf.mxu0  ;;  %v14190_v17 = vld [vmem:[#allocation6 + $0x280] sm:$0xf]  ;;  %v13267_v58 = vor.u32 %v17799_v48, %v13264_v59  ;;  %v18340_v59 = vld [vmem:[#allocation6 + $0xc04] sm:$0xf0] }
 0x24a   :  { %4497 = vmatpush.bf16.msrb.mxu0 %v13427_v26  ;;  %v3638_v32 = vadd.f32 %v19180_v9, %v3624_v0  ;;  %v18430_v39 = vld [vmem:[#allocation6 + $0xed4] sm:$0xf0]  ;;  %v15390_v48 = vld [vmem:[#allocation6 + $0xbe0] sm:$0xf] }
 0x24b   :  { %4511 = vmatpush.bf16.msrb.mxu1 %v13747_v55  ;;  %v3722_v26 = vadd.f32 %v19206_v36, %v3708_v44  ;;  %v14271_v55 = vor.u32 %v18060_v21, %v14270_v11  ;;  %v20076_v36 = vperm.slane %v19143_v54, 2  ;;  %v14790_v54 = vld [vmem:[#allocation6 + $0x730] sm:$0xf]  ;;  %v18350_v21 = vld [vmem:[#allocation6 + $0xc54] sm:$0xf0] }
 0x24c   :  { %9379 = vmatpush.bf16.msrb.mxu2 %v14031_v31  ;;  %v13624_v31 = vld [vmem:[#allocation2 + $0xf98] sm:$0xf0]  ;;  %v4532_v44 = vmax.f32 %v3638_v32, 0.0 }
 0x24d   :  { %9393 = vmatpush.bf16.msrb.mxu3 %v14351_v62  ;;  %v18050_v62 = vld [vmem:[#allocation6 + $0x2f4] sm:$0xf0]  ;;  %v3750_v6 = vadd.f32 %v19213_v10, %v20076_v36  ;;  %v13627_v30 = vor.u32 %v17889_v45, %v13624_v31  ;;  %v19375_v40 = vadd.f32 %v19208_v46, %v3722_v26  ;;  %v15110_v10 = vld [vmem:[#allocation6 + $0x9b0] sm:$0xf]  ;;  %v14791_v31 = vor.u32 %v18190_v52, %v14790_v54 }
 0x24e   :  { %4498 = vmatpush.bf16.msrb.mxu0 %v13387_v15  ;;  %v13911_v15 = vor.u32 %v17970_v3, %v13910_v25  ;;  %v14231_v22 = vor.u32 %v18050_v62, %v14230_v63  ;;  %v15430_v11 = vld [vmem:[#allocation6 + $0xc30] sm:$0xf]  ;;  %v19381_v45 = vld [vmem:[#allocation4] sm:$0xff]  ;;  %v15111_v25 = vor.u32 %v18270_v50, %v15110_v10  ;;  %v18180_v63 = vld [vmem:[#allocation6 + $0x704] sm:$0xf0]  ;;  %v19386_v36 = vpack.c.bf16 %v4532_v44, %v4522_v2 }
 0x24f   :  { %4512 = vmatpush.bf16.msrb.mxu1 %v13707_v8  ;;  %v17879_v8 = vld [vmem:[#allocation2 + $0xf24] sm:$0xf]  ;;  %v19377_v9 = vpop.f32.mrf.mxu1  ;;  %v4533_v20 = vmax.f32 %v19375_v40, 0.0  ;;  %v691_v0 = vperm.slane %v19381_v45, 5  ;;  %v15431_v3 = vor.u32 %v18350_v21, %v15430_v11  ;;  %v15070_v62 = vld [vmem:[#allocation6 + $0x960] sm:$0xf]  ;;  %v15391_v54 = vor.u32 %v18340_v59, %v15390_v48 }
 0x250   :  { %9380 = vmatpush.bf16.msrb.mxu2 %v13991_v14  ;;  %v13584_v14 = vld [vmem:[#allocation2 + $0xf48] sm:$0xf0]  ;;  %v19384_v26 = vpop.f32.mrf.mxu2  ;;  %v4523_v40 = vmax.f32 %v19197_v61, 0.0  ;;  %v14710_v52 = vld [vmem:[#allocation6 + $0x690] sm:$0xf] }
 0x251   :  { %9394 = vmatpush.bf16.msrb.mxu3 %v14311_v13  ;;  %v18040_v13 = vld [vmem:[#allocation6 + $0x2a4] sm:$0xf0]  ;;  %v13587_v46 = vor.u32 %v17879_v8, %v13584_v14  ;;  %v19392_v8 = vpop.f32.mrf.mxu3  ;;  %v15710_v14 = vld [vmem:[#allocation6 + $0xe60] sm:$0xf]  ;;  %v4042_v2 = vadd.f32 %v19301_v1, %v691_v0  ;;  %v18170_v10 = vld [vmem:[#allocation6 + $0x6b4] sm:$0xf0] }
 0x252   :  { %4499 = vmatpush.bf16.msrb.mxu0 %v13347_v27  ;;  %v3764_v27 = vadd.f32 %v19216_v24, %v3750_v6  ;;  %v14750_v24 = vld [vmem:[#allocation6 + $0x6e0] sm:$0xf]  ;;  %v15030_v61 = vld [vmem:[#allocation6 + $0x910] sm:$0xf]  ;;  %v18250_v1 = vld [vmem:[#allocation6 + $0x934] sm:$0xf0] }
 0x253   :  { %4513 = vmatpush.bf16.msrb.mxu1 %v13667_v56  ;;  %v13871_v56 = vor.u32 %v17960_v35, %v13870_v7  ;;  %v18420_v7 = vld [vmem:[#allocation6 + $0xe84] sm:$0xf0]  ;;  %v15350_v50 = vld [vmem:[#allocation6 + $0xb90] sm:$0xf]  ;;  %v18330_v11 = vld [vmem:[#allocation6 + $0xbb4] sm:$0xf0] }
 0x254   :  { %9381 = vmatpush.bf16.msrb.mxu2 %v13951_v28  ;;  %v15750_v28 = vld [vmem:[#allocation6 + $0xeb0] sm:$0xf]  ;;  %v3778_v6 = vadd.f32 %v19221_v16, %v3764_v27  ;;  %v14751_v16 = vor.u32 %v18180_v63, %v14750_v24  ;;  %v18410_v27 = vld [vmem:[#allocation6 + $0xe34] sm:$0xf0]  ;;  %v18240_v24 = vld [vmem:[#allocation6 + $0x8e4] sm:$0xf0] }
 0x255   :  { %9395 = vmatpush.bf16.msrb.mxu3 %v14271_v55  ;;  %v14191_v55 = vor.u32 %v18040_v13, %v14190_v17  ;;  %v15751_v32 = vor.u32 %v18430_v39, %v15750_v28  ;;  %v19399_v17 = vpop.f32.mrf.mxu0  ;;  %v15670_v44 = vld [vmem:[#allocation6 + $0xe10] sm:$0xf]  ;;  %v15310_v63 = vld [vmem:[#allocation6 + $0xb40] sm:$0xf]  ;;  %v18400_v59 = vld [vmem:[#allocation6 + $0xde4] sm:$0xf0] }
 0x256   :  { %4500 = vmatpush.bf16.msrb.mxu0 %v13307_v53  ;;  %v18260_v53 = vld [vmem:[#allocation6 + $0x984] sm:$0xf0]  ;;  %v20080_v28 = vld [vmem:[#allocation36_spill] sm:$0xff]  ;;  %v15630_v48 = vld [vmem:[#allocation6 + $0xdc0] sm:$0xf] }
 0x257   :  { %4514 = vmatpush.bf16.msrb.mxu1 %v13627_v30  ;;  %v20077_v30 = vperm.slane %v19231_v34, 3  ;;  %v15071_v13 = vor.u32 %v18260_v53, %v15070_v62  ;;  %v4056_v39 = vadd.f32 %v20080_v28, %v4042_v2  ;;  %v18320_v62 = vld [vmem:[#allocation6 + $0xb64] sm:$0xf0] }
 0x258   :  { %9382 = vmatpush.bf16.msrb.mxu2 %v13911_v15 }
 0x259   :  { %9396 = vmatpush.bf16.msrb.mxu3 %v14231_v22  ;;  %v3848_v15 = vadd.f32 %v19245_v18, %v20077_v30  ;;  %v20078_v22 = vperm.slane %v19231_v34, 4  ;;  %v4044_v18 = vadd.f32 %v19313_v19, %v691_v0  ;;  %v19404_v34 = vpop.f32.mrf.mxu1  ;;  %v3792_v19 = vadd.f32 %v19223_v5, %v3778_v6  ;;  %v20083_v6 = vld [vmem:[#allocation20_spill] sm:$0xff] }
 0x25a   :  { %4501 = vmatpush.bf16.msrb.mxu0 %v13267_v58  ;;  %v19402_v58 = vpack.c.bf16 %v4533_v20, %v4523_v40  ;;  %v20081_v20 = vld [vmem:[#allocation40_spill] sm:$0xff]  ;;  %v15031_v5 = vor.u32 %v18250_v1, %v15030_v61  ;;  %v20087_v61 = vld [vmem:[#allocation22_spill] sm:$0xff] }
 0x25b   :  { %4515 = vmatpush.bf16.msrb.mxu1 %v13587_v46  ;;  %v3946_v35 = vadd.f32 %v19287_v49, %v20078_v22  ;;  %v15711_v49 = vor.u32 %v18420_v7, %v15710_v14  ;;  %v3862_v21 = vadd.f32 %v19250_v47, %v3848_v15  ;;  %v20079_v46 = vld [vmem:[#allocation27_spill] sm:$0xff]  ;;  %v4058_v0 = vadd.f32 %v20081_v20, %v4044_v18  ;;  %v20084_v15 = vld [vmem:[#allocation28_spill] sm:$0xff]  ;;  %v20085_v7 = vld [vmem:[#allocation37_spill] sm:$0xff] }
 0x25c   :  { %9383 = vmatpush.bf16.msrb.mxu2 %v13871_v56  ;;  %v15351_v47 = vor.u32 %v18330_v11, %v15350_v50  ;;  %v4070_v40 = vadd.f32 %v20085_v7, %v4056_v39  ;;  %v15631_v11 = vor.u32 %v18400_v59, %v15630_v48  ;;  %v20089_v39 = vld [vmem:[#allocation29_spill] sm:$0xff]  ;;  %v20090_v20 = vld [vmem:[#allocation38_spill] sm:$0xff] }
 0x25d   :  { %9397 = vmatpush.bf16.msrb.mxu3 %v14191_v55  ;;  %4502 = vmatmul.bf16.vlgmr.msrb.gmra.mxu0 %v19129_v42  ;;  %v3960_v56 = vadd.f32 %v20079_v46, %v3946_v35  ;;  %v14711_v42 = vor.u32 %v18170_v10, %v14710_v52  ;;  %v14670_v55 = vld [vmem:[#allocation6 + $0x640] sm:$0xf]  ;;  %v3876_v30 = vadd.f32 %v20083_v6, %v3862_v21  ;;  %v20086_v35 = vld [vmem:[#allocation41_spill] sm:$0xff]  ;;  %v14950_v10 = vld [vmem:[#allocation6 + $0x870] sm:$0xf]  ;;  %v19425_v1 = vpop.f32.mrf.mxu0 }
 0x25e   :  { %9404 = vmatpush.bf16.msra.mxu0 %v14791_v31  ;;  %4516 = vmatmul.bf16.vlgmr.msrb.gmra.mxu1 %v19127_v41  ;;  %v18160_v41 = vld [vmem:[#allocation6 + $0x664] sm:$0xf0]  ;;  %v14990_v31 = vld [vmem:[#allocation6 + $0x8c0] sm:$0xf]  ;;  %v4072_v2 = vadd.f32 %v20086_v35, %v4058_v0  ;;  %v18150_v52 = vld [vmem:[#allocation6 + $0x614] sm:$0xf0]  ;;  %v4084_v0 = vadd.f32 %v20090_v20, %v4070_v40 }
 0x25f   :  { %9418 = vmatpush.bf16.msra.mxu1 %v15111_v25  ;;  %9384 = vmatmul.bf16.vlgmr.msrb.gmra.mxu2 %v19386_v36  ;;  %v19415_v25 = vpop.f32.mrf.mxu2  ;;  %v3974_v14 = vadd.f32 %v20084_v15, %v3960_v56  ;;  %v14671_v22 = vor.u32 %v18160_v41, %v14670_v55  ;;  %v14991_v18 = vor.u32 %v18240_v24, %v14990_v31  ;;  %v15270_v21 = vld [vmem:[#allocation6 + $0xaf0] sm:$0xf]  ;;  %v18390_v46 = vld [vmem:[#allocation6 + $0xd94] sm:$0xf0]  ;;  %v20088_v56 = vld [vmem:[#allocation18_spill] sm:$0xff] }
 0x260   :  { %9432 = vmatpush.bf16.msra.mxu2 %v15431_v3  ;;  %9398 = vmatmul.bf16.vlgmr.msrb.gmra.mxu3 %v19402_v58  ;;  %v15671_v3 = vor.u32 %v18410_v27, %v15670_v44  ;;  %v18310_v44 = vld [vmem:[#allocation6 + $0xb14] sm:$0xf0]  ;;  %v15590_v27 = vld [vmem:[#allocation6 + $0xd70] sm:$0xf]  ;;  %v14590_v31 = vld [vmem:[#allocation6 + $0x5a0] sm:$0xf] }
 0x261   :  { %9446 = vmatpush.bf16.msra.mxu3 %v15751_v32  ;;  %v20082_v32 = vld [vmem:[#allocation16_spill] sm:$0xff]  ;;  %v19427_v50 = vpop.f32.mrf.mxu1  ;;  %v15271_v41 = vor.u32 %v18310_v44, %v15270_v21  ;;  %v14910_v24 = vld [vmem:[#allocation6 + $0x820] sm:$0xf]  ;;  %v15591_v59 = vor.u32 %v18390_v46, %v15590_v27  ;;  %v18220_v6 = vld [vmem:[#allocation6 + $0x844] sm:$0xf0] }
 0x262   :  { %9405 = vmatpush.bf16.msra.mxu0 %v14751_v16  ;;  %v3806_v53 = vadd.f32 %v20082_v32, %v3792_v19  ;;  %v19422_v16 = vpop.f32.mrf.mxu3  ;;  %v18230_v19 = vld [vmem:[#allocation6 + $0x894] sm:$0xf0]  ;;  %v18300_v15 = vld [vmem:[#allocation6 + $0xac4] sm:$0xf0]  ;;  %v20094_v7 = vld [vmem:[#allocation26_spill] sm:$0xff] }
 0x263   :  { %9419 = vmatpush.bf16.msra.mxu1 %v15071_v13  ;;  %v15311_v13 = vor.u32 %v18320_v62, %v15310_v63  ;;  %v14951_v55 = vor.u32 %v18230_v19, %v14950_v10  ;;  %v20091_v63 = vld [vmem:[#allocation23_spill] sm:$0xff]  ;;  %v20092_v32 = vld [vmem:[#allocation33_spill] sm:$0xff]  ;;  %v20095_v40 = vld [vmem:[#allocation30_spill] sm:$0xff] }
 0x264   :  { %9433 = vmatpush.bf16.msra.mxu2 %v15391_v54  ;;  %v14630_v54 = vld [vmem:[#allocation6 + $0x5f0] sm:$0xf]  ;;  %v3820_v28 = vadd.f32 %v20088_v56, %v3806_v53  ;;  %v15550_v35 = vld [vmem:[#allocation6 + $0xd20] sm:$0xf]  ;;  %v18130_v21 = vld [vmem:[#allocation6 + $0x574] sm:$0xf0] }
 0x265   :  { %9447 = vmatpush.bf16.msra.mxu3 %v15711_v49  ;;  %v3890_v49 = vadd.f32 %v20087_v61, %v3876_v30  ;;  %v15230_v30 = vld [vmem:[#allocation6 + $0xaa0] sm:$0xf]  ;;  %v14550_v19 = vld [vmem:[#allocation6 + $0x550] sm:$0xf]  ;;  %v18290_v20 = vld [vmem:[#allocation6 + $0xa74] sm:$0xf0] }
 0x266   :  { %9406 = vmatpush.bf16.msra.mxu0 %v14711_v42  ;;  %v3988_v42 = vadd.f32 %v20089_v39, %v3974_v14  ;;  %v20093_v14 = vld [vmem:[#allocation19_spill] sm:$0xff]  ;;  %v14870_v44 = vld [vmem:[#allocation6 + $0x7d0] sm:$0xf]  ;;  %v20098_v27 = vld [vmem:[#allocation34_spill] sm:$0xff] }
 0x267   :  { %9420 = vmatpush.bf16.msra.mxu1 %v15031_v5  ;;  %v14631_v5 = vor.u32 %v18150_v52, %v14630_v54  ;;  %v3904_v62 = vadd.f32 %v20091_v63, %v3890_v49  ;;  %v19435_v53 = vpop.f32.mrf.mxu2  ;;  %v20097_v54 = vld [vmem:[#allocation39_spill] sm:$0xff]  ;;  %v14911_v49 = vor.u32 %v18220_v6, %v14910_v24  ;;  %v18210_v39 = vld [vmem:[#allocation6 + $0x7f4] sm:$0xf0] }
 0x268   :  { %9434 = vmatpush.bf16.msra.mxu2 %v15351_v47  ;;  %v4086_v47 = vadd.f32 %v19327_v12, %v4072_v2  ;;  %v4002_v48 = vadd.f32 %v20092_v32, %v3988_v42  ;;  %v19438_v12 = vadd.f32 %v20093_v14, %v3820_v28  ;;  %v18380_v2 = vld [vmem:[#allocation6 + $0xd44] sm:$0xf0]  ;;  %v4098_v52 = vadd.f32 %v20097_v54, %v4084_v0  ;;  %v15190_v42 = vld [vmem:[#allocation6 + $0xa50] sm:$0xf]  ;;  %v20099_v0 = vld [vmem:[#allocation17_spill] sm:$0xff] }
 0x269   :  { %9448 = vmatpush.bf16.msra.mxu3 %v15671_v3  ;;  %v18140_v3 = vld [vmem:[#allocation6 + $0x5c4] sm:$0xf0]  ;;  %v15551_v28 = vor.u32 %v18380_v2, %v15550_v35  ;;  %v20101_v24 = vld [vmem:[#allocation25_spill] sm:$0xff]  ;;  %v19457_v6 = vpop.f32.mrf.mxu1  ;;  %v15150_v2 = vld [vmem:[#allocation6 + $0xa00] sm:$0xf] }
 0x26a   :  { %9407 = vmatpush.bf16.msra.mxu0 %v14671_v22  ;;  %v4000_v22 = vadd.f32 %v20095_v40, %v20094_v7  ;;  %v14591_v10 = vor.u32 %v18140_v3, %v14590_v31  ;;  %v4100_v61 = vadd.f32 %v19335_v4, %v4086_v47  ;;  %v4016_v46 = vadd.f32 %v20098_v27, %v4002_v48  ;;  %v19446_v56 = vpop.f32.mrf.mxu3  ;;  %v20100_v47 = vld [vmem:[#allocation31_spill] sm:$0xff]  ;;  %v15510_v31 = vld [vmem:[#allocation6 + $0xcd0] sm:$0xf]  ;;  %v18370_v3 = vld [vmem:[#allocation6 + $0xcf4] sm:$0xf0] }
 0x26b   :  { %9421 = vmatpush.bf16.msra.mxu1 %v14991_v18  ;;  %v20096_v18 = vld [vmem:[#allocation24_spill] sm:$0xff]  ;;  %v4534_v4 = vmax.f32 %v19438_v12, 0.0  ;;  %v692_v48 = vperm.slane %v19381_v45, 6  ;;  %v4112_v14 = vadd.f32 %v19337_v57, %v4098_v52  ;;  %v15191_v12 = vor.u32 %v18290_v20, %v15190_v42  ;;  %v18120_v7 = vld [vmem:[#allocation6 + $0x524] sm:$0xf0]  ;;  %v20104_v57 = vld [vmem:[#allocation21_spill] sm:$0xff] }
 0x26c   :  { %9435 = vmatpush.bf16.msra.mxu2 %v15311_v13  ;;  %v3918_v13 = vadd.f32 %v20096_v18, %v3904_v62  ;;  %v20102_v62 = vld [vmem:[#allocation35_spill] sm:$0xff]  ;;  %v14830_v40 = vld [vmem:[#allocation6 + $0x780] sm:$0xf]  ;;  %v15511_v35 = vor.u32 %v18370_v3, %v15510_v31  ;;  %v20103_v54 = vld [vmem:[#allocation32_spill] sm:$0xff]  ;;  %v4525_v52 = vmax.f32 %v20104_v57, 0.0 }
 0x26d   :  { %9449 = vmatpush.bf16.msra.mxu3 %v15631_v11  ;;  %v15231_v11 = vor.u32 %v18300_v15, %v15230_v30  ;;  %v4030_v32 = vadd.f32 %v20102_v62, %v4016_v46  ;;  %v14551_v30 = vor.u32 %v18130_v21, %v14550_v19  ;;  %v14510_v15 = vld [vmem:[#allocation6 + $0x500] sm:$0xf]  ;;  %v18280_v18 = vld [vmem:[#allocation6 + $0xa24] sm:$0xf0]  ;;  %v16070_v21 = vld [vmem:[#allocation6 + $0x1130] sm:$0xf]  ;;  %v4126_v42 = vadd.f32 %v19344_v38, %v4112_v14 }
 0x26e   :  { %9408 = vmatpush.bf16.msra.mxu0 %v14631_v5  ;;  %v4524_v5 = vmax.f32 %v20099_v0, 0.0  ;;  %v3932_v63 = vadd.f32 %v20101_v24, %v3918_v13  ;;  %v15470_v13 = vld [vmem:[#allocation6 + $0xc80] sm:$0xf]  ;;  %v18360_v19 = vld [vmem:[#allocation6 + $0xca4] sm:$0xf0]  ;;  %v15151_v0 = vor.u32 %v18280_v18, %v15150_v2 }
 0x26f   :  { %9422 = vmatpush.bf16.msra.mxu1 %v14951_v55  ;;  %v4014_v55 = vadd.f32 %v20100_v47, %v4000_v22  ;;  %v18200_v22 = vld [vmem:[#allocation6 + $0x7a4] sm:$0xf0]  ;;  %v18510_v27 = vld [vmem:[#allocation6 + $0x1154] sm:$0xf0]  ;;  %v16390_v46 = vld [vmem:[#allocation6 + $0x13b0] sm:$0xf] }
 0x270   :  { %9436 = vmatpush.bf16.msra.mxu2 %v15271_v41  ;;  %v4114_v41 = vadd.f32 %v19355_v60, %v4100_v61  ;;  %v14871_v60 = vor.u32 %v18210_v39, %v14870_v44  ;;  %v14511_v44 = vor.u32 %v18120_v7, %v14510_v15  ;;  %v4536_v39 = vmax.f32 %v4030_v32, 0.0  ;;  %v16710_v31 = vld [vmem:[#allocation6 + $0x1630] sm:$0xf]  ;;  %v18670_v3 = vld [vmem:[#allocation6 + $0x1654] sm:$0xf0] }
 0x271   :  { %9450 = vmatpush.bf16.msra.mxu3 %v15591_v59  ;;  %v19455_v59 = vpop.f32.mrf.mxu0  ;;  %v4028_v61 = vadd.f32 %v20103_v54, %v4014_v55  ;;  %v14831_v20 = vor.u32 %v18200_v22, %v14830_v40  ;;  %v693_v47 = vperm.slane %v19381_v45, 7  ;;  %v15471_v55 = vor.u32 %v18360_v19, %v15470_v13  ;;  %v18500_v32 = vld [vmem:[#allocation6 + $0x1104] sm:$0xf0]  ;;  %v16670_v18 = vld [vmem:[#allocation6 + $0x15e0] sm:$0xf] }
 0x272   :  { %9409 = vmatpush.bf16.msra.mxu0 %v14591_v10  ;;  %v4128_v10 = vadd.f32 %v19358_v23, %v4114_v41  ;;  %v4140_v23 = vadd.f32 %v19347_v37, %v692_v48  ;;  %v16071_v41 = vor.u32 %v18510_v27, %v16070_v21  ;;  %v19468_v15 = vpack.c.bf16 %v4534_v4, %v4524_v5  ;;  %v4267_v14 = vpop.f32.mrf.mxu3  ;;  %v16350_v37 = vld [vmem:[#allocation6 + $0x1360] sm:$0xf]  ;;  %v18580_v45 = vld [vmem:[#allocation6 + $0x1384] sm:$0xf0]  ;;  %v19479_v4 = vpop.f32.mrf.mxu1 }
 0x273   :  { %9423 = vmatpush.bf16.msra.mxu1 %v14911_v49  ;;  %v4535_v49 = vmax.f32 %v3932_v63, 0.0  ;;  %v4526_v24 = vmax.f32 %v4028_v61, 0.0  ;;  %v4527_v7 = vmax.f32 %v4126_v42, 0.0  ;;  %v4142_v40 = vadd.f32 %v19361_v43, %v692_v48  ;;  %v18660_v13 = vld [vmem:[#allocation6 + $0x1604] sm:$0xf0] }
 0x274   :  { %9437 = vmatpush.bf16.msra.mxu2 %v15231_v11  ;;  %v19463_v11 = vpop.f32.mrf.mxu2  ;;  %v4537_v63 = vmax.f32 %v4128_v10, 0.0  ;;  %v16711_v22 = vor.u32 %v18670_v3, %v16710_v31  ;;  %v4238_v5 = vadd.f32 %v19427_v50, %v693_v47  ;;  %v4240_v61 = vadd.f32 %v19457_v6, %v693_v47  ;;  %v15990_v48 = vld [vmem:[#allocation6 + $0x1090] sm:$0xf]  ;;  %v18490_v10 = vld [vmem:[#allocation6 + $0x10b4] sm:$0xf0] }
 0x275   :  { %9451 = vmatpush.bf16.msra.mxu3 %v15551_v28  ;;  %v18590_v28 = vld [vmem:[#allocation6 + $0x13d4] sm:$0xf0]  ;;  %v19470_v38 = vpack.c.bf16 %v4535_v49, %v4525_v52  ;;  %v16351_v43 = vor.u32 %v18580_v45, %v16350_v37  ;;  %v4156_v19 = vadd.f32 %v19365_v51, %v4142_v40  ;;  %v16671_v21 = vor.u32 %v18660_v13, %v16670_v18  ;;  %v16630_v49 = vld [vmem:[#allocation6 + $0x1590] sm:$0xf]  ;;  %v18480_v51 = vld [vmem:[#allocation6 + $0x1064] sm:$0xf0] }
 0x276   :  { %9410 = vmatpush.bf16.msra.mxu0 %v14551_v30  ;;  %v16391_v62 = vor.u32 %v18590_v28, %v16390_v46  ;;  %v16030_v30 = vld [vmem:[#allocation6 + $0x10e0] sm:$0xf]  ;;  %v19481_v54 = vpack.c.bf16 %v4537_v63, %v4527_v7  ;;  %v18570_v50 = vld [vmem:[#allocation6 + $0x1334] sm:$0xf0]  ;;  %v4252_v27 = vadd.f32 %v19435_v53, %v4238_v5  ;;  %v15991_v52 = vor.u32 %v18490_v10, %v15990_v48  ;;  %v18640_v31 = vld [vmem:[#allocation6 + $0x1564] sm:$0xf0] }
 0x277   :  { %9424 = vmatpush.bf16.msra.mxu1 %v14871_v60  ;;  %v16031_v2 = vor.u32 %v18500_v32, %v16030_v30  ;;  %v4254_v46 = vadd.f32 %v19463_v11, %v4240_v61  ;;  %v16270_v42 = vld [vmem:[#allocation6 + $0x12c0] sm:$0xf]  ;;  %v15910_v63 = vld [vmem:[#allocation6 + $0xff0] sm:$0xf]  ;;  %v18550_v32 = vld [vmem:[#allocation6 + $0x1294] sm:$0xf0] }
 0x278   :  { %9438 = vmatpush.bf16.msra.mxu2 %v15191_v12  ;;  %v19474_v12 = vpack.c.bf16 %v4536_v39, %v4526_v24  ;;  %v15950_v39 = vld [vmem:[#allocation6 + $0x1040] sm:$0xf]  ;;  %v18540_v61 = vld [vmem:[#allocation6 + $0x1244] sm:$0xf0] }
 0x279   :  { %9452 = vmatpush.bf16.msra.mxu3 %v15511_v35  ;;  %v19472_v60 = vpop.f32.mrf.mxu0  ;;  %v4154_v35 = vadd.f32 %v19351_v33, %v4140_v23  ;;  %v16310_v33 = vld [vmem:[#allocation6 + $0x1310] sm:$0xf]  ;;  %v4266_v23 = vadd.f32 %v19446_v56, %v4252_v27  ;;  %v16590_v11 = vld [vmem:[#allocation6 + $0x1540] sm:$0xf]  ;;  %v4268_v3 = vadd.f32 %v4267_v14, %v4254_v46  ;;  %v18630_v14 = vld [vmem:[#allocation6 + $0x1514] sm:$0xf0] }
 0x27a   :  { %9411 = vmatpush.bf16.msra.mxu0 %v14511_v44  ;;  %v18650_v44 = vld [vmem:[#allocation6 + $0x15b4] sm:$0xf0]  ;;  %v16311_v28 = vor.u32 %v18570_v50, %v16310_v33  ;;  %v4295_v30 = vpop.f32.mrf.mxu1  ;;  %v16591_v56 = vor.u32 %v18640_v31, %v16590_v11  ;;  %v15870_v5 = vld [vmem:[#allocation6 + $0xfa0] sm:$0xf]  ;;  %v18620_v50 = vld [vmem:[#allocation6 + $0x14c4] sm:$0xf0] }
 0x27b   :  { %9425 = vmatpush.bf16.msra.mxu1 %v14831_v20  ;;  %v4168_v6 = vadd.f32 %v19369_v29, %v4154_v35  ;;  %v18560_v20 = vld [vmem:[#allocation6 + $0x12e4] sm:$0xf0]  ;;  %v16631_v29 = vor.u32 %v18650_v44, %v16630_v49  ;;  %v4280_v7 = vadd.f32 %v19472_v60, %v4266_v23  ;;  %v16190_v13 = vld [vmem:[#allocation6 + $0x1220] sm:$0xf]  ;;  %v18450_v49 = vld [vmem:[#allocation6 + $0xf74] sm:$0xf0] }
 0x27c   :  { %9439 = vmatpush.bf16.msra.mxu2 %v15151_v0  ;;  %v19491_v57 = vpop.f32.mrf.mxu2  ;;  %v4170_v0 = vadd.f32 %v19399_v17, %v4156_v19  ;;  %v16271_v24 = vor.u32 %v18560_v20, %v16270_v42  ;;  %v16230_v17 = vld [vmem:[#allocation6 + $0x1270] sm:$0xf]  ;;  %v16510_v33 = vld [vmem:[#allocation6 + $0x14a0] sm:$0xf]  ;;  %v19505_v19 = vld [vmem:[#allocation4 + $0x8] sm:$0x3] }
 0x27d   :  { %9453 = vmatpush.bf16.msra.mxu3 %v15471_v55  ;;  %9412 = vmatmul.bf16.vlgmr.msra.gmra.mxu0 %v19468_v15  ;;  %v4182_v53 = vadd.f32 %v19377_v9, %v4168_v6  ;;  %v19497_v55 = vpop.f32.mrf.mxu3  ;;  %v16231_v35 = vor.u32 %v18550_v32, %v16230_v17  ;;  %v4294_v60 = vadd.f32 %v19479_v4, %v4280_v7  ;;  %v16150_v44 = vld [vmem:[#allocation6 + $0x11d0] sm:$0xf]  ;;  %v18530_v46 = vld [vmem:[#allocation6 + $0x11f4] sm:$0xf0]  ;;  %v18440_v11 = vld [vmem:[#allocation6 + $0xf24] sm:$0xf0] }
 0x27e   :  { %9460 = vmatpush.bf16.msrb.mxu0 %v16071_v41  ;;  %9426 = vmatmul.bf16.vlgmr.msra.gmra.mxu1 %v19470_v38  ;;  %v15951_v41 = vor.u32 %v18480_v51, %v15950_v39  ;;  %v4184_v37 = vadd.f32 %v19404_v34, %v4170_v0  ;;  %v16191_v6 = vor.u32 %v18540_v61, %v16190_v13  ;;  %v694_v39 = vperm.slane %v19505_v19, 0  ;;  %v16470_v0 = vld [vmem:[#allocation6 + $0x1450] sm:$0xf]  ;;  %v18520_v31 = vld [vmem:[#allocation6 + $0x11a4] sm:$0xf0] }
 0x27f   :  { %9474 = vmatpush.bf16.msrb.mxu1 %v16391_v62  ;;  %9440 = vmatmul.bf16.vlgmr.msra.gmra.mxu2 %v19474_v12  ;;  %v18470_v62 = vld [vmem:[#allocation6 + $0x1014] sm:$0xf0]  ;;  %v4196_v45 = vadd.f32 %v19384_v26, %v4182_v53  ;;  %v16511_v4 = vor.u32 %v18620_v50, %v16510_v33  ;;  %v4308_v42 = vadd.f32 %v19491_v57, %v4294_v60  ;;  %v15790_v53 = vld [vmem:[#allocation6 + $0xf00] sm:$0xf]  ;;  %v17030_v57 = vld [vmem:[#allocation6 + $0x18b0] sm:$0xf] }
 0x280   :  { %9454 = vmatmul.bf16.vlgmr.msra.gmra.mxu3 %v19481_v54  ;;  %9488 = vmatpush.bf16.msrb.mxu2 %v16711_v22  ;;  %v15911_v40 = vor.u32 %v18470_v62, %v15910_v63  ;;  %v16550_v22 = vld [vmem:[#allocation6 + $0x14f0] sm:$0xf]  ;;  %v4198_v34 = vadd.f32 %v19415_v25, %v4184_v37  ;;  %v18105_v63 = vld [vmem:[#allocation6 + $0x4b4] sm:$0xf]  ;;  %v14472_v62 = vld [vmem:[#allocation6 + $0x4d8] sm:$0xf0]  ;;  %v15791_v37 = vor.u32 %v18440_v11, %v15790_v53 }
 0x281   :  { %v4281_v47 = vpop.f32.mrf.mxu0  ;;  %v16551_v48 = vor.u32 %v18630_v14, %v16550_v22  ;;  %v4210_v26 = vadd.f32 %v19392_v8, %v4196_v45  ;;  %v4322_v32 = vadd.f32 %v19497_v55, %v4308_v42  ;;  %v14112_v13 = vld [vmem:[#allocation6 + $0x208] sm:$0xf0]  ;;  %v18095_v61 = vld [vmem:[#allocation6 + $0x464] sm:$0xf]  ;;  %v18740_v60 = vld [vmem:[#allocation6 + $0x1884] sm:$0xf0] }
 0x282   :  { %9461 = vmatpush.bf16.msrb.mxu0 %v16031_v2  ;;  %v4282_v9 = vadd.f32 %v4281_v47, %v4268_v3  ;;  %v18460_v2 = vld [vmem:[#allocation6 + $0xfc4] sm:$0xf0]  ;;  %v4212_v8 = vadd.f32 %v19422_v16, %v4198_v34  ;;  %v16110_v16 = vld [vmem:[#allocation6 + $0x1180] sm:$0xf]  ;;  %v18025_v3 = vld [vmem:[#allocation6 + $0x234] sm:$0xf] }
 0x283   :  { %9475 = vmatpush.bf16.msrb.mxu1 %v16351_v43  ;;  %v15871_v10 = vor.u32 %v18460_v2, %v15870_v5  ;;  %v4224_v51 = vadd.f32 %v19425_v1, %v4210_v26  ;;  %v16111_v22 = vor.u32 %v18520_v31, %v16110_v16  ;;  %v14792_v5 = vld [vmem:[#allocation6 + $0x758] sm:$0xf0]  ;;  %v14475_v2 = vor.u32 %v18105_v63, %v14472_v62  ;;  %v16990_v26 = vld [vmem:[#allocation6 + $0x1860] sm:$0xf]  ;;  %v18165_v11 = vld [vmem:[#allocation6 + $0x694] sm:$0xf] }
 0x284   :  { %9489 = vmatpush.bf16.msrb.mxu2 %v16671_v21  ;;  %v4309_v18 = vpop.f32.mrf.mxu2  ;;  %v4296_v43 = vadd.f32 %v4295_v30, %v4282_v9  ;;  %v4226_v23 = vadd.f32 %v19455_v59, %v4212_v8  ;;  %v18750_v30 = vld [vmem:[#allocation6 + $0x18d4] sm:$0xf0]  ;;  %v16430_v9 = vld [vmem:[#allocation6 + $0x1400] sm:$0xf]  ;;  %v14072_v8 = vld [vmem:[#allocation6 + $0x1b8] sm:$0xf0] }
 0x285   :  { %v4323_v25 = vpop.f32.mrf.mxu3  ;;  %v4528_v17 = vmax.f32 %v4224_v51, 0.0  ;;  %v17031_v45 = vor.u32 %v18750_v30, %v17030_v57  ;;  %v14392_v42 = vld [vmem:[#allocation6 + $0x438] sm:$0xf0]  ;;  %v18075_v63 = vld [vmem:[#allocation6 + $0x3c4] sm:$0xf] }
 0x286   :  { %9462 = vmatpush.bf16.msrb.mxu0 %v15991_v52  ;;  %v4310_v21 = vadd.f32 %v4309_v18, %v4296_v43  ;;  %v15830_v52 = vld [vmem:[#allocation6 + $0xf50] sm:$0xf]  ;;  %v4538_v7 = vmax.f32 %v4226_v23, 0.0  ;;  %v18015_v18 = vld [vmem:[#allocation6 + $0x1e4] sm:$0xf] }
 0x287   :  { %9476 = vmatpush.bf16.msrb.mxu1 %v16311_v28  ;;  %v19507_v28 = vpop.f32.mrf.mxu1  ;;  %v15831_v20 = vor.u32 %v18450_v49, %v15830_v52  ;;  %9502 = vmatpush.bf16.msrb.mxu3 %v17031_v45  ;;  %v14115_v52 = vor.u32 %v18015_v18, %v14112_v13  ;;  %v18175_v49 = vld [vmem:[#allocation6 + $0x6e4] sm:$0xf]  ;;  %v14712_v16 = vld [vmem:[#allocation6 + $0x6b8] sm:$0xf0]  ;;  %v14352_v62 = vld [vmem:[#allocation6 + $0x3e8] sm:$0xf0] }
 0x288   :  { %9490 = vmatpush.bf16.msrb.mxu2 %v16631_v29  ;;  %v18610_v29 = vld [vmem:[#allocation6 + $0x1474] sm:$0xf0]  ;;  %v4324_v47 = vadd.f32 %v4323_v25, %v4310_v21  ;;  %v16991_v21 = vor.u32 %v18740_v60, %v16990_v26  ;;  %v14752_v25 = vld [vmem:[#allocation6 + $0x708] sm:$0xf0]  ;;  %v16910_v57 = vld [vmem:[#allocation6 + $0x17c0] sm:$0xf] }
 0x289   :  { %v4335_v27 = vpop.f32.mrf.mxu0  ;;  %v16471_v1 = vor.u32 %v18610_v29, %v16470_v0  ;;  %v18730_v0 = vld [vmem:[#allocation6 + $0x1834] sm:$0xf0]  ;;  %v14755_v53 = vor.u32 %v18175_v49, %v14752_v25  ;;  %v18720_v30 = vld [vmem:[#allocation6 + $0x17e4] sm:$0xf0]  ;;  %v14672_v45 = vld [vmem:[#allocation6 + $0x668] sm:$0xf0] }
 0x28a   :  { %9463 = vmatpush.bf16.msrb.mxu0 %v15951_v41  ;;  %v16151_v41 = vor.u32 %v18530_v46, %v16150_v44  ;;  %v4336_v55 = vadd.f32 %v4335_v27, %v694_v39  ;;  %v18005_v46 = vld [vmem:[#allocation6 + $0x194] sm:$0xf]  ;;  %v18710_v18 = vld [vmem:[#allocation6 + $0x1794] sm:$0xf0]  ;;  %v16830_v49 = vld [vmem:[#allocation6 + $0x1720] sm:$0xf] }
 0x28b   :  { %9477 = vmatpush.bf16.msrb.mxu1 %v16271_v24  ;;  %v14152_v24 = vld [vmem:[#allocation6 + $0x258] sm:$0xf0]  ;;  %9503 = vmatpush.bf16.msrb.mxu3 %v16991_v21  ;;  %v18700_v25 = vld [vmem:[#allocation6 + $0x1744] sm:$0xf0] }
 0x28c   :  { %9491 = vmatpush.bf16.msrb.mxu2 %v16591_v56  ;;  %v19515_v59 = vpop.f32.mrf.mxu2  ;;  %v18600_v56 = vld [vmem:[#allocation6 + $0x1424] sm:$0xf0]  ;;  %v14155_v14 = vor.u32 %v18025_v3, %v14152_v24  ;;  %v4350_v51 = vadd.f32 %v19507_v28, %v4336_v55  ;;  %v17995_v3 = vld [vmem:[#allocation6 + $0x144] sm:$0xf]  ;;  %v14032_v24 = vld [vmem:[#allocation6 + $0x168] sm:$0xf0] }
 0x28d   :  { %v16431_v34 = vor.u32 %v18600_v56, %v16430_v9  ;;  %v4377_v29 = vpop.f32.mrf.mxu3  ;;  %v14035_v9 = vor.u32 %v17995_v3, %v14032_v24  ;;  %v18155_v56 = vld [vmem:[#allocation6 + $0x644] sm:$0xf] }
 0x28e   :  { %9464 = vmatpush.bf16.msrb.mxu0 %v15911_v40  ;;  %v4539_v40 = vmax.f32 %v4324_v47, 0.0  ;;  %v14675_v13 = vor.u32 %v18155_v56, %v14672_v45  ;;  %v15432_v56 = vld [vmem:[#allocation6 + $0xc58] sm:$0xf0] }
 0x28f   :  { %9478 = vmatpush.bf16.msrb.mxu1 %v16231_v35  ;;  %v18185_v35 = vld [vmem:[#allocation6 + $0x734] sm:$0xf]  ;;  %v4351_v50 = vpop.f32.mrf.mxu1 }
 0x290   :  { %9492 = vmatpush.bf16.msrb.mxu2 %v16551_v48  ;;  %v14432_v48 = vld [vmem:[#allocation6 + $0x488] sm:$0xf0]  ;;  %v14795_v33 = vor.u32 %v18185_v35, %v14792_v5  ;;  %v18065_v35 = vld [vmem:[#allocation6 + $0x374] sm:$0xf]  ;;  %v14312_v5 = vld [vmem:[#allocation6 + $0x398] sm:$0xf0] }
 0x291   :  { %v4337_v43 = vpop.f32.mrf.mxu0  ;;  %v14435_v27 = vor.u32 %v18095_v61, %v14432_v48  ;;  %v14632_v48 = vld [vmem:[#allocation6 + $0x618] sm:$0xf0]  ;;  %v14315_v60 = vor.u32 %v18065_v35, %v14312_v5 }
 0x292   :  { %9465 = vmatpush.bf16.msrb.mxu0 %v15871_v10  ;;  %v4529_v10 = vmax.f32 %v4322_v32, 0.0  ;;  %v4338_v47 = vadd.f32 %v4337_v43, %v694_v39  ;;  %v16911_v32 = vor.u32 %v18720_v30, %v16910_v57  ;;  %v18145_v43 = vld [vmem:[#allocation6 + $0x5f4] sm:$0xf]  ;;  %v17955_v30 = vld [vmem:[#allocation6 + $0x4] sm:$0xf] }
 0x293   :  { %9479 = vmatpush.bf16.msrb.mxu1 %v16191_v6  ;;  %v19519_v6 = vpack.c.bf16 %v4538_v7, %v4528_v17  ;;  %v14715_v17 = vor.u32 %v18165_v11, %v14712_v16  ;;  %v14355_v7 = vor.u32 %v18075_v63, %v14352_v62  ;;  %v14232_v16 = vld [vmem:[#allocation6 + $0x2f8] sm:$0xf0]  ;;  %v18125_v63 = vld [vmem:[#allocation6 + $0x554] sm:$0xf] }
 0x294   :  { %9493 = vmatpush.bf16.msrb.mxu2 %v16511_v4  ;;  %v19521_v44 = vpack.c.bf16 %v4539_v40, %v4529_v10  ;;  %v18085_v4 = vld [vmem:[#allocation6 + $0x414] sm:$0xf]  ;;  %v4365_v31 = vpop.f32.mrf.mxu2  ;;  %v4352_v39 = vadd.f32 %v4351_v50, %v4338_v47  ;;  %v17975_v10 = vld [vmem:[#allocation6 + $0xa4] sm:$0xf]  ;;  %v15752_v5 = vld [vmem:[#allocation6 + $0xed8] sm:$0xf0] }
 0x295   :  { %v14395_v28 = vor.u32 %v18085_v4, %v14392_v42  ;;  %v4379_v26 = vpop.f32.mrf.mxu3  ;;  %v18055_v50 = vld [vmem:[#allocation6 + $0x324] sm:$0xf]  ;;  %v18045_v47 = vld [vmem:[#allocation6 + $0x2d4] sm:$0xf] }
 0x296   :  { %9466 = vmatpush.bf16.msrb.mxu0 %v15831_v20  ;;  %v16950_v20 = vld [vmem:[#allocation6 + $0x1810] sm:$0xf]  ;;  %v4366_v55 = vadd.f32 %v4365_v31, %v4352_v39  ;;  %v18690_v31 = vld [vmem:[#allocation6 + $0x16f4] sm:$0xf0]  ;;  %v14235_v39 = vor.u32 %v18045_v47, %v14232_v16  ;;  %v18405_v16 = vld [vmem:[#allocation6 + $0xe14] sm:$0xf] }
 0x297   :  { %9480 = vmatpush.bf16.msrb.mxu1 %v16151_v41  ;;  %v16951_v23 = vor.u32 %v18730_v0, %v16950_v20  ;;  %v14075_v41 = vor.u32 %v18005_v46, %v14072_v8  ;;  %v14635_v46 = vor.u32 %v18145_v43, %v14632_v48  ;;  %v16831_v8 = vor.u32 %v18700_v25, %v16830_v49  ;;  %v18135_v20 = vld [vmem:[#allocation6 + $0x5a4] sm:$0xf]  ;;  %v14592_v0 = vld [vmem:[#allocation6 + $0x5c8] sm:$0xf0] }
 0x298   :  { %9494 = vmatpush.bf16.msrb.mxu2 %v16471_v1  ;;  %v4364_v1 = vadd.f32 %v19515_v59, %v4350_v51  ;;  %v4380_v4 = vadd.f32 %v4379_v26, %v4366_v55  ;;  %v14595_v24 = vor.u32 %v18135_v20, %v14592_v0  ;;  %v14512_v43 = vld [vmem:[#allocation6 + $0x528] sm:$0xf0]  ;;  %v18335_v49 = vld [vmem:[#allocation6 + $0xbe4] sm:$0xf] }
 0x299   :  { %9504 = vmatpush.bf16.msrb.mxu3 %v16951_v23  ;;  %v13912_v23 = vld [vmem:[#allocation6 + $0x78] sm:$0xf0]  ;;  %v15392_v25 = vld [vmem:[#allocation6 + $0xc08] sm:$0xf0] }
 0x29a   :  { %9467 = vmatpush.bf16.msrb.mxu0 %v15791_v37  ;;  %v4391_v37 = vpop.f32.mrf.mxu0  ;;  %v4378_v59 = vadd.f32 %v4377_v29, %v4364_v1  ;;  %v14552_v1 = vld [vmem:[#allocation6 + $0x578] sm:$0xf0]  ;;  %v15072_v20 = vld [vmem:[#allocation6 + $0x988] sm:$0xf0]  ;;  %v15395_v0 = vor.u32 %v18335_v49, %v15392_v25  ;;  %v18215_v49 = vld [vmem:[#allocation6 + $0x824] sm:$0xf] }
 0x29b   :  { %9481 = vmatpush.bf16.msrb.mxu1 %v16111_v22  ;;  %v4405_v40 = vpop.f32.mrf.mxu1  ;;  %v17985_v22 = vld [vmem:[#allocation6 + $0xf4] sm:$0xf]  ;;  %v14912_v25 = vld [vmem:[#allocation6 + $0x848] sm:$0xf0] }
 0x29c   :  { %9495 = vmatpush.bf16.msrb.mxu2 %v16431_v34  ;;  %v4392_v21 = vadd.f32 %v4391_v37, %v4378_v59  ;;  %v14192_v37 = vld [vmem:[#allocation6 + $0x2a8] sm:$0xf0]  ;;  %v14555_v59 = vor.u32 %v18125_v63, %v14552_v1  ;;  %v18485_v1 = vld [vmem:[#allocation6 + $0x1094] sm:$0xf] }
 0x29d   :  { %9468 = vmatmul.bf16.vlgmr.msrb.gmra.mxu0 %v19519_v6  ;;  %9505 = vmatpush.bf16.msrb.mxu3 %v16911_v32  ;;  %v18035_v32 = vld [vmem:[#allocation6 + $0x284] sm:$0xf] }
 0x29e   :  { %9516 = vmatpush.bf16.msra.mxu0 %v14155_v14  ;;  %9482 = vmatmul.bf16.vlgmr.msrb.gmra.mxu1 %v19521_v44  ;;  %v13992_v14 = vld [vmem:[#allocation6 + $0x118] sm:$0xf0]  ;;  %v14195_v26 = vor.u32 %v18035_v32, %v14192_v37  ;;  %v15312_v32 = vld [vmem:[#allocation6 + $0xb68] sm:$0xf0] }
 0x29f   :  { %9530 = vmatpush.bf16.msra.mxu1 %v14475_v2  ;;  %v16870_v2 = vld [vmem:[#allocation6 + $0x1770] sm:$0xf]  ;;  %v13995_v34 = vor.u32 %v17985_v22, %v13992_v14  ;;  %v16750_v22 = vld [vmem:[#allocation6 + $0x1680] sm:$0xf]  ;;  %v18680_v14 = vld [vmem:[#allocation6 + $0x16a4] sm:$0xf0] }
 0x2a0   :  { %9544 = vmatpush.bf16.msra.mxu2 %v14795_v33  ;;  %v16871_v61 = vor.u32 %v18710_v18, %v16870_v2  ;;  %v13952_v33 = vld [vmem:[#allocation6 + $0xc8] sm:$0xf0]  ;;  %v16751_v2 = vor.u32 %v18680_v14, %v16750_v22  ;;  %v18265_v18 = vld [vmem:[#allocation6 + $0x9b4] sm:$0xf] }
 0x2a1   :  { %v13955_v42 = vor.u32 %v17975_v10, %v13952_v33  ;;  %v18505_v10 = vld [vmem:[#allocation6 + $0x1134] sm:$0xf]  ;;  %v16072_v33 = vld [vmem:[#allocation6 + $0x1158] sm:$0xf0]  ;;  %v15632_v37 = vld [vmem:[#allocation6 + $0xde8] sm:$0xf0] }
 0x2a2   :  { %9517 = vmatpush.bf16.msra.mxu0 %v14115_v52  ;;  %9506 = vmatpush.bf16.msrb.mxu3 %v16871_v61  ;;  %v14272_v52 = vld [vmem:[#allocation6 + $0x348] sm:$0xf0]  ;;  %v4393_v51 = vpop.f32.mrf.mxu0 }
 0x2a3   :  { %9531 = vmatpush.bf16.msra.mxu1 %v14435_v27  ;;  %v4419_v27 = vpop.f32.mrf.mxu2  ;;  %v14275_v29 = vor.u32 %v18055_v50, %v14272_v52  ;;  %v4394_v11 = vadd.f32 %v4393_v51, %v4380_v4  ;;  %v4407_v3 = vpop.f32.mrf.mxu1  ;;  %v18255_v4 = vld [vmem:[#allocation6 + $0x964] sm:$0xf]  ;;  %v15952_v22 = vld [vmem:[#allocation6 + $0x1068] sm:$0xf0] }
 0x2a4   :  { %9545 = vmatpush.bf16.msra.mxu2 %v14755_v53  ;;  %v17965_v53 = vld [vmem:[#allocation6 + $0x54] sm:$0xf] }
 0x2a5   :  { %v13915_v57 = vor.u32 %v17965_v53, %v13912_v23  ;;  %v16032_v53 = vld [vmem:[#allocation6 + $0x1108] sm:$0xf0]  ;;  %v15075_v23 = vor.u32 %v18255_v4, %v15072_v20 }
 0x2a6   :  { %9518 = vmatpush.bf16.msra.mxu0 %v14075_v41  ;;  %9507 = vmatpush.bf16.msrb.mxu3 %v16831_v8  ;;  %v4406_v41 = vadd.f32 %v4405_v40, %v4392_v21  ;;  %v18425_v40 = vld [vmem:[#allocation6 + $0xeb4] sm:$0xf]  ;;  %v15712_v8 = vld [vmem:[#allocation6 + $0xe88] sm:$0xf0] }
 0x2a7   :  { %9532 = vmatpush.bf16.msra.mxu1 %v14395_v28  ;;  %v16790_v28 = vld [vmem:[#allocation6 + $0x16d0] sm:$0xf]  ;;  %v15755_v52 = vor.u32 %v18425_v40, %v15752_v5  ;;  %v18475_v40 = vld [vmem:[#allocation6 + $0x1044] sm:$0xf]  ;;  %v15272_v5 = vld [vmem:[#allocation6 + $0xb18] sm:$0xf0] }
 0x2a8   :  { %9546 = vmatpush.bf16.msra.mxu2 %v14715_v17  ;;  %v16791_v62 = vor.u32 %v18690_v31, %v16790_v28  ;;  %v13872_v17 = vld [vmem:[#allocation6 + $0x28] sm:$0xf0]  ;;  %v4420_v45 = vadd.f32 %v4419_v27, %v4406_v41  ;;  %v18325_v41 = vld [vmem:[#allocation6 + $0xb94] sm:$0xf]  ;;  %v15672_v28 = vld [vmem:[#allocation6 + $0xe38] sm:$0xf0] }
 0x2a9   :  { %v13875_v55 = vor.u32 %v17955_v30, %v13872_v17  ;;  %v18245_v31 = vld [vmem:[#allocation6 + $0x914] sm:$0xf]  ;;  %v15675_v30 = vor.u32 %v18405_v16, %v15672_v28  ;;  %v18315_v17 = vld [vmem:[#allocation6 + $0xb44] sm:$0xf]  ;;  %v15872_v4 = vld [vmem:[#allocation6 + $0xfc8] sm:$0xf0] }
 0x2aa   :  { %9519 = vmatpush.bf16.msra.mxu0 %v14035_v9  ;;  %v18345_v9 = vld [vmem:[#allocation6 + $0xc34] sm:$0xf]  ;;  %9508 = vmatpush.bf16.msrb.mxu3 %v16791_v62  ;;  %v4530_v50 = vmax.f32 %v4420_v45, 0.0  ;;  %v15992_v62 = vld [vmem:[#allocation6 + $0x10b8] sm:$0xf0] }
 0x2ab   :  { %9533 = vmatpush.bf16.msra.mxu1 %v14355_v7  ;;  %v4408_v7 = vadd.f32 %v4407_v3, %v4394_v11  ;;  %v4421_v35 = vpop.f32.mrf.mxu2  ;;  %v15352_v11 = vld [vmem:[#allocation6 + $0xbb8] sm:$0xf0]  ;;  %v15995_v45 = vor.u32 %v18485_v1, %v15992_v62  ;;  %v18445_v28 = vld [vmem:[#allocation6 + $0xf54] sm:$0xf]  ;;  %v15152_v1 = vld [vmem:[#allocation6 + $0xa28] sm:$0xf0] }
 0x2ac   :  { %9547 = vmatpush.bf16.msra.mxu2 %v14675_v13  ;;  %v15112_v13 = vld [vmem:[#allocation6 + $0x9d8] sm:$0xf0]  ;;  %v15355_v63 = vor.u32 %v18325_v41, %v15352_v11  ;;  %v695_v11 = vperm.slane %v19505_v19, 1  ;;  %v18195_v19 = vld [vmem:[#allocation6 + $0x784] sm:$0xf] }
 0x2ad   :  { %v4422_v61 = vadd.f32 %v4421_v35, %v4408_v7  ;;  %v15115_v48 = vor.u32 %v18265_v18, %v15112_v13  ;;  %v15032_v3 = vld [vmem:[#allocation6 + $0x938] sm:$0xf0]  ;;  %v15315_v7 = vor.u32 %v18315_v17, %v15312_v32  ;;  %v19534_v18 = vpop.f32.mrf.mxu3  ;;  %v18355_v17 = vld [vmem:[#allocation6 + $0xc84] sm:$0xf]  ;;  %v15472_v32 = vld [vmem:[#allocation6 + $0xca8] sm:$0xf0] }
 0x2ae   :  { %9520 = vmatpush.bf16.msra.mxu0 %v13995_v34  ;;  %v18115_v34 = vld [vmem:[#allocation6 + $0x504] sm:$0xf]  ;;  %9509 = vmatpush.bf16.msrb.mxu3 %v16751_v2  ;;  %v18385_v2 = vld [vmem:[#allocation6 + $0xd74] sm:$0xf]  ;;  %v15592_v13 = vld [vmem:[#allocation6 + $0xd98] sm:$0xf0] }
 0x2af   :  { %9534 = vmatpush.bf16.msra.mxu1 %v14315_v60  ;;  %v15435_v60 = vor.u32 %v18345_v9, %v15432_v56  ;;  %v4540_v21 = vmax.f32 %v4422_v61, 0.0  ;;  %v14515_v27 = vor.u32 %v18115_v34, %v14512_v43  ;;  %v18235_v9 = vld [vmem:[#allocation6 + $0x8c4] sm:$0xf]  ;;  %v14992_v56 = vld [vmem:[#allocation6 + $0x8e8] sm:$0xf0]  ;;  %v15955_v34 = vor.u32 %v18475_v40, %v15952_v22 }
 0x2b0   :  { %9548 = vmatpush.bf16.msra.mxu2 %v14635_v46  ;;  %v18415_v46 = vld [vmem:[#allocation6 + $0xe64] sm:$0xf]  ;;  %v14995_v14 = vor.u32 %v18235_v9, %v14992_v56  ;;  %v18225_v61 = vld [vmem:[#allocation6 + $0x874] sm:$0xf]  ;;  %v14872_v41 = vld [vmem:[#allocation6 + $0x7f8] sm:$0xf0] }
 0x2b1   :  { %v19529_v51 = vpack.c.bf16 %v4540_v21, %v4530_v50  ;;  %v15715_v47 = vor.u32 %v18415_v46, %v15712_v8  ;;  %v15232_v50 = vld [vmem:[#allocation6 + $0xac8] sm:$0xf0]  ;;  %v18375_v21 = vld [vmem:[#allocation6 + $0xd24] sm:$0xf]  ;;  %v16712_v9 = vld [vmem:[#allocation6 + $0x1658] sm:$0xf0] }
 0x2b2   :  { %9521 = vmatpush.bf16.msra.mxu0 %v13955_v42  ;;  %9558 = vmatpush.bf16.msra.mxu3 %v15115_v48  ;;  %v16075_v42 = vor.u32 %v18505_v10, %v16072_v33  ;;  %v18465_v48 = vld [vmem:[#allocation6 + $0xff4] sm:$0xf]  ;;  %v15595_v10 = vor.u32 %v18385_v2, %v15592_v13  ;;  %v18295_v33 = vld [vmem:[#allocation6 + $0xaa4] sm:$0xf]  ;;  %v14832_v56 = vld [vmem:[#allocation6 + $0x7a8] sm:$0xf0] }
 0x2b3   :  { %9535 = vmatpush.bf16.msra.mxu1 %v14275_v29  ;;  %v18495_v29 = vld [vmem:[#allocation6 + $0x10e4] sm:$0xf]  ;;  %9496 = vmatmul.bf16.vlgmr.msrb.gmra.mxu2 %v19529_v51  ;;  %v15235_v46 = vor.u32 %v18295_v33, %v15232_v50  ;;  %v17032_v40 = vld [vmem:[#allocation6 + $0x18d8] sm:$0xf0]  ;;  %v14158_v13 = vld [vmem:[#allocation6 + $0x238] sm:$0xf] }
 0x2b4   :  { %9549 = vmatpush.bf16.msra.mxu2 %v14595_v24  ;;  %v16035_v24 = vor.u32 %v18495_v29, %v16032_v53  ;;  %v18455_v8 = vld [vmem:[#allocation6 + $0xfa4] sm:$0xf]  ;;  %v15192_v29 = vld [vmem:[#allocation6 + $0xa78] sm:$0xf0]  ;;  %v18365_v53 = vld [vmem:[#allocation6 + $0xcd4] sm:$0xf] }
 0x2b5   :  { %v15875_v16 = vor.u32 %v18455_v8, %v15872_v4  ;;  %v18645_v8 = vld [vmem:[#allocation6 + $0x1594] sm:$0xf]  ;;  %v16632_v4 = vld [vmem:[#allocation6 + $0x15b8] sm:$0xf0] }
 0x2b6   :  { %9522 = vmatpush.bf16.msra.mxu0 %v13915_v57  ;;  %9559 = vmatpush.bf16.msra.mxu3 %v15075_v23  ;;  %v15035_v57 = vor.u32 %v18245_v31, %v15032_v3  ;;  %v15512_v23 = vld [vmem:[#allocation6 + $0xcf8] sm:$0xf0]  ;;  %v4435_v31 = vpop.f32.mrf.mxu3 }
 0x2b7   :  { %9536 = vmatpush.bf16.msra.mxu1 %v14235_v39  ;;  %v18395_v39 = vld [vmem:[#allocation6 + $0xdc4] sm:$0xf] }
 0x2b8   :  { %9550 = vmatpush.bf16.msra.mxu2 %v14555_v59  ;;  %v15635_v35 = vor.u32 %v18395_v39, %v15632_v37  ;;  %v18305_v59 = vld [vmem:[#allocation6 + $0xaf4] sm:$0xf] }
 0x2b9   :  { %v15275_v43 = vor.u32 %v18305_v59, %v15272_v5  ;;  %v18665_v39 = vld [vmem:[#allocation6 + $0x1634] sm:$0xf]  ;;  %v14835_v59 = vor.u32 %v18195_v19, %v14832_v56  ;;  %v15475_v5 = vor.u32 %v18355_v17, %v15472_v32  ;;  %v16552_v19 = vld [vmem:[#allocation6 + $0x1518] sm:$0xf0] }
 0x2ba   :  { %9523 = vmatpush.bf16.msra.mxu0 %v13875_v55  ;;  %9560 = vmatpush.bf16.msra.mxu3 %v15035_v57  ;;  %v14952_v55 = vld [vmem:[#allocation6 + $0x898] sm:$0xf0]  ;;  %v4447_v57 = vpop.f32.mrf.mxu0  ;;  %v16715_v2 = vor.u32 %v18665_v39, %v16712_v9  ;;  %v18625_v9 = vld [vmem:[#allocation6 + $0x14f4] sm:$0xf] }
 0x2bb   :  { %9537 = vmatpush.bf16.msra.mxu1 %v14195_v26  ;;  %v15912_v26 = vld [vmem:[#allocation6 + $0x1018] sm:$0xf0]  ;;  %v4461_v37 = vpop.f32.mrf.mxu1 }
 0x2bc   :  { %9551 = vmatpush.bf16.msra.mxu2 %v14515_v27  ;;  %v15915_v27 = vor.u32 %v18465_v48, %v15912_v26  ;;  %v16672_v48 = vld [vmem:[#allocation6 + $0x1608] sm:$0xf0] }
 0x2bd   :  { %9524 = vmatmul.bf16.vlgmr.msra.gmra.mxu0 %v19386_v36 }
 0x2be   :  { %9572 = vmatpush.bf16.msrb.mxu0 %v15435_v60  ;;  %9538 = vmatmul.bf16.vlgmr.msra.gmra.mxu1 %v19402_v58  ;;  %v14955_v60 = vor.u32 %v18225_v61, %v14952_v55  ;;  %v18031_v61 = vld [vmem:[#allocation6 + $0x25c] sm:$0xf0]  ;;  %v4434_v55 = vadd.f32 %v19534_v18, %v695_v11 }
 0x2bf   :  { %9586 = vmatpush.bf16.msrb.mxu1 %v15755_v52  ;;  %9561 = vmatpush.bf16.msra.mxu3 %v14995_v14  ;;  %v15552_v52 = vld [vmem:[#allocation6 + $0xd48] sm:$0xf0]  ;;  %v18435_v14 = vld [vmem:[#allocation6 + $0xf04] sm:$0xf]  ;;  %v14159_v50 = vor.u32 %v18031_v61, %v14158_v13 }
 0x2c0   :  { %9600 = vmatpush.bf16.msrb.mxu2 %v16075_v42  ;;  %v14915_v42 = vor.u32 %v18215_v49, %v14912_v25  ;;  %v15555_v20 = vor.u32 %v18375_v21, %v15552_v52  ;;  %v14118_v52 = vld [vmem:[#allocation6 + $0x1e8] sm:$0xf]  ;;  %v18021_v49 = vld [vmem:[#allocation6 + $0x20c] sm:$0xf0]  ;;  %v4436_v25 = vadd.f32 %v4435_v31, %v695_v11  ;;  %v18635_v31 = vld [vmem:[#allocation6 + $0x1544] sm:$0xf] }
 0x2c2   :  { %9573 = vmatpush.bf16.msrb.mxu0 %v15395_v0  ;;  %v18285_v0 = vld [vmem:[#allocation6 + $0xa54] sm:$0xf]  ;;  %v4475_v33 = vpop.f32.mrf.mxu2 }
 0x2c3   :  { %9587 = vmatpush.bf16.msrb.mxu1 %v15715_v47  ;;  %9562 = vmatpush.bf16.msra.mxu3 %v14955_v60  ;;  %v18205_v47 = vld [vmem:[#allocation6 + $0x7d4] sm:$0xf]  ;;  %v15195_v3 = vor.u32 %v18285_v0, %v15192_v29  ;;  %v18735_v60 = vld [vmem:[#allocation6 + $0x1864] sm:$0xf]  ;;  %v16952_v0 = vld [vmem:[#allocation6 + $0x1838] sm:$0xf0]  ;;  %v4463_v29 = vpop.f32.mrf.mxu1 }
 0x2c4   :  { %9601 = vmatpush.bf16.msrb.mxu2 %v16035_v24  ;;  %v15832_v24 = vld [vmem:[#allocation6 + $0xf78] sm:$0xf0]  ;;  %v14875_v62 = vor.u32 %v18205_v47, %v14872_v41  ;;  %v14078_v47 = vld [vmem:[#allocation6 + $0x198] sm:$0xf]  ;;  %v18011_v41 = vld [vmem:[#allocation6 + $0x1bc] sm:$0xf0] }
 0x2c5   :  { %9552 = vmatmul.bf16.vlgmr.msra.gmra.mxu2 %v19468_v15 }
 0x2c6   :  { %9574 = vmatpush.bf16.msrb.mxu0 %v15355_v63  ;;  %v18275_v63 = vld [vmem:[#allocation6 + $0xa04] sm:$0xf] }
 0x2c7   :  { %9588 = vmatpush.bf16.msrb.mxu1 %v15675_v30  ;;  %9563 = vmatpush.bf16.msra.mxu3 %v14915_v42  ;;  %v15515_v30 = vor.u32 %v18365_v53, %v15512_v23  ;;  %v15155_v22 = vor.u32 %v18275_v63, %v15152_v1  ;;  %v4449_v42 = vpop.f32.mrf.mxu0  ;;  %v14119_v53 = vor.u32 %v18021_v49, %v14118_v52  ;;  %v16912_v63 = vld [vmem:[#allocation6 + $0x17e8] sm:$0xf0]  ;;  %v17981_v52 = vld [vmem:[#allocation6 + $0xcc] sm:$0xf0] }
 0x2c8   :  { %9602 = vmatpush.bf16.msrb.mxu2 %v15995_v45  ;;  %v15835_v45 = vor.u32 %v18445_v28, %v15832_v24  ;;  %v16635_v23 = vor.u32 %v18645_v8, %v16632_v4  ;;  %v18715_v24 = vld [vmem:[#allocation6 + $0x17c4] sm:$0xf]  ;;  %v14079_v1 = vor.u32 %v18011_v41, %v14078_v47  ;;  %v13918_v47 = vld [vmem:[#allocation6 + $0x58] sm:$0xf] }
 0x2ca   :  { %9575 = vmatpush.bf16.msrb.mxu0 %v15315_v7  ;;  %v18745_v7 = vld [vmem:[#allocation6 + $0x18b4] sm:$0xf]  ;;  %v4477_v39 = vpop.f32.mrf.mxu2 }
 0x2cb   :  { %9589 = vmatpush.bf16.msrb.mxu1 %v15635_v35  ;;  %v15792_v35 = vld [vmem:[#allocation6 + $0xf28] sm:$0xf0]  ;;  %9564 = vmatpush.bf16.msra.mxu3 %v14875_v62 }
 0x2cc   :  { %9603 = vmatpush.bf16.msrb.mxu2 %v15955_v34  ;;  %v17035_v34 = vor.u32 %v18745_v7, %v17032_v40  ;;  %v15795_v26 = vor.u32 %v18435_v14, %v15792_v35  ;;  %v16872_v7 = vld [vmem:[#allocation6 + $0x1798] sm:$0xf0]  ;;  %v19542_v35 = vld [vmem:[#allocation7] sm:$0xff] }
 0x2ce   :  { %9576 = vmatpush.bf16.msrb.mxu0 %v15275_v43  ;;  %v18655_v43 = vld [vmem:[#allocation6 + $0x15e4] sm:$0xf] }
 0x2cf   :  { %9590 = vmatpush.bf16.msrb.mxu1 %v15595_v10  ;;  %v16992_v10 = vld [vmem:[#allocation6 + $0x1888] sm:$0xf0]  ;;  %9565 = vmatpush.bf16.msra.mxu3 %v14835_v59  ;;  %v16675_v21 = vor.u32 %v18655_v43, %v16672_v48  ;;  %v16555_v59 = vor.u32 %v18625_v9, %v16552_v19  ;;  %v20043_v48 = vperm.slane %v19542_v35, 0  ;;  %v15118_v19 = vld [vmem:[#allocation6 + $0x9b8] sm:$0xf] }
 0x2d0   :  { %9604 = vmatpush.bf16.msrb.mxu2 %v15915_v27  ;;  %v4448_v27 = vadd.f32 %v4447_v57, %v4434_v55  ;;  %v16995_v18 = vor.u32 %v18735_v60, %v16992_v10  ;;  %v14038_v57 = vld [vmem:[#allocation6 + $0x148] sm:$0xf]  ;;  %v16512_v43 = vld [vmem:[#allocation6 + $0x14c8] sm:$0xf0] }
 0x2d1   :  { %v16832_v60 = vld [vmem:[#allocation6 + $0x1748] sm:$0xf0] }
 0x2d2   :  { %9577 = vmatpush.bf16.msrb.mxu0 %v15235_v46  ;;  %v4489_v46 = vpop.f32.mrf.mxu3  ;;  %v4462_v11 = vadd.f32 %v4461_v37, %v4448_v27  ;;  %v16915_v37 = vor.u32 %v18715_v24, %v16912_v63 }
 0x2d3   :  { %9591 = vmatpush.bf16.msrb.mxu1 %v15555_v20  ;;  %v18725_v20 = vld [vmem:[#allocation6 + $0x1814] sm:$0xf] }
 0x2d4   :  { %9605 = vmatpush.bf16.msrb.mxu2 %v15875_v16  ;;  %v4450_v16 = vadd.f32 %v4449_v42, %v4436_v25  ;;  %v16955_v28 = vor.u32 %v18725_v20, %v16952_v0  ;;  %v4476_v17 = vadd.f32 %v4475_v33, %v4462_v11  ;;  %v18685_v42 = vld [vmem:[#allocation6 + $0x16d4] sm:$0xf]  ;;  %v16792_v20 = vld [vmem:[#allocation6 + $0x16f8] sm:$0xf0] }
 0x2d5   :  { %v16795_v63 = vor.u32 %v18685_v42, %v16792_v20  ;;  %v15038_v42 = vld [vmem:[#allocation6 + $0x918] sm:$0xf]  ;;  %v18251_v20 = vld [vmem:[#allocation6 + $0x93c] sm:$0xf0] }
 0x2d6   :  { %9578 = vmatpush.bf16.msrb.mxu0 %v15195_v3  ;;  %v16592_v3 = vld [vmem:[#allocation6 + $0x1568] sm:$0xf0]  ;;  %v4464_v32 = vadd.f32 %v4463_v29, %v4450_v16  ;;  %v4490_v13 = vadd.f32 %v4489_v46, %v4476_v17  ;;  %v18605_v46 = vld [vmem:[#allocation6 + $0x1454] sm:$0xf]  ;;  %v14798_v17 = vld [vmem:[#allocation6 + $0x738] sm:$0xf] }
 0x2d7   :  { %9592 = vmatpush.bf16.msrb.mxu1 %v15515_v30  ;;  %v16595_v62 = vor.u32 %v18635_v31, %v16592_v3  ;;  %v18001_v30 = vld [vmem:[#allocation6 + $0x16c] sm:$0xf0]  ;;  %v18585_v31 = vld [vmem:[#allocation6 + $0x13b4] sm:$0xf]  ;;  %v16392_v3 = vld [vmem:[#allocation6 + $0x13d8] sm:$0xf0] }
 0x2d8   :  { %9606 = vmatpush.bf16.msrb.mxu2 %v15835_v45  ;;  %v18705_v45 = vld [vmem:[#allocation6 + $0x1774] sm:$0xf]  ;;  %v14039_v14 = vor.u32 %v18001_v30, %v14038_v57  ;;  %v4478_v61 = vadd.f32 %v4477_v39, %v4464_v32  ;;  %v18675_v57 = vld [vmem:[#allocation6 + $0x1684] sm:$0xf]  ;;  %v16752_v30 = vld [vmem:[#allocation6 + $0x16a8] sm:$0xf0] }
 0x2d9   :  { %v16875_v55 = vor.u32 %v18705_v45, %v16872_v7  ;;  %v18191_v32 = vld [vmem:[#allocation6 + $0x75c] sm:$0xf0]  ;;  %v16395_v45 = vor.u32 %v18585_v31, %v16392_v3  ;;  %v14678_v31 = vld [vmem:[#allocation6 + $0x648] sm:$0xf]  ;;  %v18161_v3 = vld [vmem:[#allocation6 + $0x66c] sm:$0xf0] }
 0x2da   :  { %9579 = vmatpush.bf16.msrb.mxu0 %v15155_v22  ;;  %v4503_v56 = vpop.f32.mrf.mxu0  ;;  %v4491_v40 = vpop.f32.mrf.mxu3 }
 0x2db   :  { %9593 = vmatpush.bf16.msrb.mxu1 %v15475_v5  ;;  %v4517_v22 = vpop.f32.mrf.mxu1  ;;  %v13998_v5 = vld [vmem:[#allocation6 + $0xf8] sm:$0xf]  ;;  %v4504_v10 = vadd.f32 %v4503_v56, %v4490_v13  ;;  %v4492_v49 = vadd.f32 %v4491_v40, %v4478_v61  ;;  %v18271_v56 = vld [vmem:[#allocation6 + $0x9dc] sm:$0xf0]  ;;  %v13878_v40 = vld [vmem:[#allocation6 + $0x8] sm:$0xf] }
 0x2dc   :  { %9607 = vmatpush.bf16.msrb.mxu2 %v15795_v26  ;;  %v18695_v26 = vld [vmem:[#allocation6 + $0x1724] sm:$0xf]  ;;  %v16352_v13 = vld [vmem:[#allocation6 + $0x1388] sm:$0xf0]  ;;  %v15438_v61 = vld [vmem:[#allocation6 + $0xc38] sm:$0xf] }
 0x2dd   :  { %9580 = vmatmul.bf16.vlgmr.msrb.gmra.mxu0 %v19474_v12  ;;  %v16835_v27 = vor.u32 %v18695_v26, %v16832_v60  ;;  %v4518_v0 = vadd.f32 %v4517_v22, %v4504_v10  ;;  %v17961_v22 = vld [vmem:[#allocation6 + $0x2c] sm:$0xf0]  ;;  %v15078_v10 = vld [vmem:[#allocation6 + $0x968] sm:$0xf] }
 0x2de   :  { %9628 = vmatpush.bf16.msra.mxu0 %v16715_v2  ;;  %9594 = vmatmul.bf16.vlgmr.msrb.gmra.mxu1 %v19481_v54  ;;  %v17991_v2 = vld [vmem:[#allocation6 + $0x11c] sm:$0xf0]  ;;  %v18181_v26 = vld [vmem:[#allocation6 + $0x70c] sm:$0xf0]  ;;  %v13879_v60 = vor.u32 %v17961_v22, %v13878_v40 }
 0x2df   :  { %9642 = vmatpush.bf16.msra.mxu1 %v17035_v34  ;;  %9608 = vmatmul.bf16.vlgmr.msrb.gmra.mxu2 %v19519_v6  ;;  %v18615_v34 = vld [vmem:[#allocation6 + $0x14a4] sm:$0xf]  ;;  %v13999_v33 = vor.u32 %v17991_v2, %v13998_v5  ;;  %v4531_v39 = vmax.f32 %v4518_v0, 0.0  ;;  %v14799_v5 = vor.u32 %v18191_v32, %v14798_v17  ;;  %v16232_v17 = vld [vmem:[#allocation6 + $0x1298] sm:$0xf0] }
 0x2e0   :  { %9656 = vmatpush.bf16.msra.mxu2 %v14159_v50  ;;  %v16515_v50 = vor.u32 %v18615_v34, %v16512_v43  ;;  %v18575_v2 = vld [vmem:[#allocation6 + $0x1364] sm:$0xf]  ;;  %v18351_v34 = vld [vmem:[#allocation6 + $0xc5c] sm:$0xf0]  ;;  %v14758_v43 = vld [vmem:[#allocation6 + $0x6e8] sm:$0xf] }
 0x2e1   :  { %v15318_v32 = vld [vmem:[#allocation6 + $0xb48] sm:$0xf]  ;;  %v18231_v40 = vld [vmem:[#allocation6 + $0x89c] sm:$0xf0] }
 0x2e2   :  { %9629 = vmatpush.bf16.msra.mxu0 %v16675_v21  ;;  %v13958_v21 = vld [vmem:[#allocation6 + $0xa8] sm:$0xf]  ;;  %v9385_v25 = vpop.f32.mrf.mxu2  ;;  %v4505_v4 = vpop.f32.mrf.mxu0 }
 0x2e3   :  { %9643 = vmatpush.bf16.msra.mxu1 %v16995_v18  ;;  %v16472_v18 = vld [vmem:[#allocation6 + $0x1478] sm:$0xf0]  ;;  %v9386_v8 = vadd.f32 %v9385_v25, %v20043_v48  ;;  %v9399_v29 = vpop.f32.mrf.mxu3  ;;  %v4519_v11 = vpop.f32.mrf.mxu1 }
 0x2e4   :  { %9657 = vmatpush.bf16.msra.mxu2 %v14119_v53  ;;  %v4506_v53 = vadd.f32 %v4505_v4, %v4492_v49  ;;  %v16475_v16 = vor.u32 %v18605_v46, %v16472_v18  ;;  %v18565_v49 = vld [vmem:[#allocation6 + $0x1314] sm:$0xf]  ;;  %v16312_v25 = vld [vmem:[#allocation6 + $0x1338] sm:$0xf0]  ;;  %v18341_v18 = vld [vmem:[#allocation6 + $0xc0c] sm:$0xf0] }
 0x2e5   :  { %v19547_v41 = vadd.f32 %v9399_v29, %v9386_v8  ;;  %v14718_v8 = vld [vmem:[#allocation6 + $0x698] sm:$0xf]  ;;  %v18171_v4 = vld [vmem:[#allocation6 + $0x6bc] sm:$0xf0]  ;;  %v16315_v0 = vor.u32 %v18565_v49, %v16312_v25 }
 0x2e6   :  { %9630 = vmatpush.bf16.msra.mxu0 %v16635_v23  ;;  %v13959_v23 = vor.u32 %v17981_v52, %v13958_v21  ;;  %v4520_v24 = vadd.f32 %v4519_v11, %v4506_v53  ;;  %v15439_v21 = vor.u32 %v18351_v34, %v15438_v61  ;;  %v14759_v52 = vor.u32 %v18181_v26, %v14758_v43  ;;  %v15358_v11 = vld [vmem:[#allocation6 + $0xb98] sm:$0xf]  ;;  %v16192_v34 = vld [vmem:[#allocation6 + $0x1248] sm:$0xf0] }
 0x2e7   :  { %9644 = vmatpush.bf16.msra.mxu1 %v16955_v28  ;;  %v17971_v28 = vld [vmem:[#allocation6 + $0x7c] sm:$0xf0]  ;;  %v14719_v53 = vor.u32 %v18171_v4, %v14718_v8  ;;  %v15278_v43 = vld [vmem:[#allocation6 + $0xaf8] sm:$0xf] }
 0x2e8   :  { %9658 = vmatpush.bf16.msra.mxu2 %v14079_v1  ;;  %v18595_v1 = vld [vmem:[#allocation6 + $0x1404] sm:$0xf]  ;;  %v13919_v9 = vor.u32 %v17971_v28, %v13918_v47  ;;  %v16272_v47 = vld [vmem:[#allocation6 + $0x12e8] sm:$0xf0]  ;;  %v18331_v28 = vld [vmem:[#allocation6 + $0xbbc] sm:$0xf0] }
 0x2ea   :  { %9631 = vmatpush.bf16.msra.mxu0 %v16595_v62  ;;  %v16432_v62 = vld [vmem:[#allocation6 + $0x1428] sm:$0xf0] }
 0x2eb   :  { %9645 = vmatpush.bf16.msra.mxu1 %v16915_v37  ;;  %v4541_v37 = vmax.f32 %v4520_v24, 0.0  ;;  %v16435_v7 = vor.u32 %v18595_v1, %v16432_v62  ;;  %v14998_v24 = vld [vmem:[#allocation6 + $0x8c8] sm:$0xf]  ;;  %v15359_v62 = vor.u32 %v18331_v28, %v15358_v11  ;;  %v19557_v22 = vpop.f32.mrf.mxu3  ;;  %v16112_v28 = vld [vmem:[#allocation6 + $0x11a8] sm:$0xf0] }
 0x2ec   :  { %9659 = vmatpush.bf16.msra.mxu2 %v14039_v14 }
 0x2ed   :  { %v19549_v14 = vpack.c.bf16 %v4541_v37, %v4531_v39  ;;  %v19555_v39 = vpop.f32.mrf.mxu2 }
 0x2ee   :  { %9632 = vmatpush.bf16.msra.mxu0 %v16555_v59  ;;  %v16755_v59 = vor.u32 %v18675_v57, %v16752_v30  ;;  %v14679_v57 = vor.u32 %v18161_v3, %v14678_v31  ;;  %v18545_v30 = vld [vmem:[#allocation6 + $0x1274] sm:$0xf] }
 0x2ef   :  { %9646 = vmatpush.bf16.msra.mxu1 %v16875_v55  ;;  %v15119_v55 = vor.u32 %v18271_v56, %v15118_v19  ;;  %9510 = vmatmul.bf16.vlgmr.msrb.gmra.mxu3 %v19549_v14  ;;  %v14638_v19 = vld [vmem:[#allocation6 + $0x5f8] sm:$0xf]  ;;  %v18151_v56 = vld [vmem:[#allocation6 + $0x61c] sm:$0xf0] }
 0x2f0   :  { %9660 = vmatpush.bf16.msra.mxu2 %v13999_v33  ;;  %v18261_v33 = vld [vmem:[#allocation6 + $0x98c] sm:$0xf0]  ;;  %9614 = vmatpush.bf16.msrb.mxu3 %v16395_v45  ;;  %v14639_v61 = vor.u32 %v18151_v56, %v14638_v19  ;;  %v16078_v19 = vld [vmem:[#allocation6 + $0x1138] sm:$0xf] }
 0x2f1   :  { %v15079_v46 = vor.u32 %v18261_v33, %v15078_v10  ;;  %v18311_v10 = vld [vmem:[#allocation6 + $0xb1c] sm:$0xf0]  ;;  %v14598_v33 = vld [vmem:[#allocation6 + $0x5a8] sm:$0xf] }
 0x2f2   :  { %9633 = vmatpush.bf16.msra.mxu0 %v16515_v50  ;;  %v16355_v50 = vor.u32 %v18575_v2, %v16352_v13  ;;  %v15279_v49 = vor.u32 %v18311_v10, %v15278_v43  ;;  %v16718_v10 = vld [vmem:[#allocation6 + $0x1638] sm:$0xf] }
 0x2f3   :  { %9647 = vmatpush.bf16.msra.mxu1 %v16835_v27  ;;  %v15398_v27 = vld [vmem:[#allocation6 + $0xbe8] sm:$0xf] }
 0x2f4   :  { %9661 = vmatpush.bf16.msra.mxu2 %v13959_v23  ;;  %9615 = vmatpush.bf16.msrb.mxu3 %v16355_v50  ;;  %v15399_v29 = vor.u32 %v18341_v18, %v15398_v27  ;;  %v18555_v23 = vld [vmem:[#allocation6 + $0x12c4] sm:$0xf]  ;;  %v18141_v50 = vld [vmem:[#allocation6 + $0x5cc] sm:$0xf0]  ;;  %v18525_v27 = vld [vmem:[#allocation6 + $0x11d4] sm:$0xf] }
 0x2f5   :  { %v16275_v1 = vor.u32 %v18555_v23, %v16272_v47  ;;  %v14599_v25 = vor.u32 %v18141_v50, %v14598_v33  ;;  %v15238_v18 = vld [vmem:[#allocation6 + $0xaa8] sm:$0xf]  ;;  %v18211_v23 = vld [vmem:[#allocation6 + $0x7fc] sm:$0xf0] }
 0x2f6   :  { %9634 = vmatpush.bf16.msra.mxu0 %v16475_v16  ;;  %v15039_v16 = vor.u32 %v18251_v20, %v15038_v42  ;;  %v18301_v42 = vld [vmem:[#allocation6 + $0xacc] sm:$0xf0]  ;;  %v14558_v20 = vld [vmem:[#allocation6 + $0x558] sm:$0xf]  ;;  %v18671_v33 = vld [vmem:[#allocation6 + $0x165c] sm:$0xf0] }
 0x2f7   :  { %9648 = vmatpush.bf16.msra.mxu1 %v16795_v63  ;;  %v18241_v63 = vld [vmem:[#allocation6 + $0x8ec] sm:$0xf0]  ;;  %v15239_v3 = vor.u32 %v18301_v42, %v15238_v18  ;;  %v16038_v50 = vld [vmem:[#allocation6 + $0x10e8] sm:$0xf]  ;;  %v14398_v18 = vld [vmem:[#allocation6 + $0x418] sm:$0xf] }
 0x2f8   :  { %9662 = vmatpush.bf16.msra.mxu2 %v13919_v9  ;;  %9616 = vmatpush.bf16.msrb.mxu3 %v16315_v0  ;;  %v14999_v37 = vor.u32 %v18241_v63, %v14998_v24  ;;  %v18321_v9 = vld [vmem:[#allocation6 + $0xb6c] sm:$0xf0]  ;;  %v18131_v0 = vld [vmem:[#allocation6 + $0x57c] sm:$0xf0]  ;;  %v15198_v63 = vld [vmem:[#allocation6 + $0xa58] sm:$0xf] }
 0x2f9   :  { %v15319_v13 = vor.u32 %v18321_v9, %v15318_v32  ;;  %v14559_v24 = vor.u32 %v18131_v0, %v14558_v20  ;;  %v18121_v32 = vld [vmem:[#allocation6 + $0x52c] sm:$0xf0]  ;;  %v15998_v0 = vld [vmem:[#allocation6 + $0x1098] sm:$0xf] }
 0x2fa   :  { %9635 = vmatpush.bf16.msra.mxu0 %v16435_v7  ;;  %v9413_v45 = vpop.f32.mrf.mxu0  ;;  %v14958_v7 = vld [vmem:[#allocation6 + $0x878] sm:$0xf]  ;;  %v18201_v9 = vld [vmem:[#allocation6 + $0x7ac] sm:$0xf0] }
 0x2fb   :  { %9649 = vmatpush.bf16.msra.mxu1 %v16755_v59  ;;  %v9414_v59 = vadd.f32 %v9413_v45, %v19547_v41  ;;  %v9427_v2 = vpop.f32.mrf.mxu1  ;;  %v18221_v41 = vld [vmem:[#allocation6 + $0x84c] sm:$0xf0]  ;;  %v18511_v45 = vld [vmem:[#allocation6 + $0x115c] sm:$0xf0] }
 0x2fc   :  { %9663 = vmatpush.bf16.msra.mxu2 %v13879_v60  ;;  %9617 = vmatpush.bf16.msrb.mxu3 %v16275_v1  ;;  %v14959_v60 = vor.u32 %v18231_v40, %v14958_v7  ;;  %v18291_v1 = vld [vmem:[#allocation6 + $0xa7c] sm:$0xf0]  ;;  %v16398_v7 = vld [vmem:[#allocation6 + $0x13b8] sm:$0xf]  ;;  %v18661_v20 = vld [vmem:[#allocation6 + $0x160c] sm:$0xf0] }
 0x2fd   :  { %9636 = vmatmul.bf16.vlgmr.msra.gmra.mxu0 %v19529_v51  ;;  %v9428_v26 = vadd.f32 %v9427_v2, %v9414_v59  ;;  %v18591_v40 = vld [vmem:[#allocation6 + $0x13dc] sm:$0xf0]  ;;  %v15199_v59 = vor.u32 %v18291_v1, %v15198_v63  ;;  %v18081_v63 = vld [vmem:[#allocation6 + $0x3ec] sm:$0xf0]  ;;  %v16638_v1 = vld [vmem:[#allocation6 + $0x1598] sm:$0xf] }
 0x2fe   :  { %9684 = vmatpush.bf16.msrb.mxu0 %v14799_v5  ;;  %9650 = vmatmul.bf16.vlgmr.msra.gmra.mxu1 %v19549_v14  ;;  %v16235_v5 = vor.u32 %v18545_v30, %v16232_v17  ;;  %v18111_v30 = vld [vmem:[#allocation6 + $0x4dc] sm:$0xf0]  ;;  %v14518_v17 = vld [vmem:[#allocation6 + $0x508] sm:$0xf]  ;;  %v16399_v43 = vor.u32 %v18591_v40, %v16398_v7 }
 0x2ff   :  { %9698 = vmatpush.bf16.msrb.mxu1 %v15119_v55  ;;  %9664 = vmatmul.bf16.vlgmr.msra.gmra.mxu2 %v19386_v36  ;;  %v18535_v55 = vld [vmem:[#allocation6 + $0x1224] sm:$0xf]  ;;  %v14519_v2 = vor.u32 %v18121_v32, %v14518_v17  ;;  %v18481_v17 = vld [vmem:[#allocation6 + $0x106c] sm:$0xf0]  ;;  %v16278_v32 = vld [vmem:[#allocation6 + $0x12c8] sm:$0xf] }
 0x300   :  { %9712 = vmatpush.bf16.msrb.mxu2 %v15439_v21  ;;  %9566 = vmatmul.bf16.vlgmr.msra.gmra.mxu3 %v19470_v38  ;;  %v14918_v21 = vld [vmem:[#allocation6 + $0x828] sm:$0xf]  ;;  %v18071_v7 = vld [vmem:[#allocation6 + $0x39c] sm:$0xf0] }
 0x301   :  { %9618 = vmatpush.bf16.msrb.mxu3 %v16235_v5  ;;  %v14919_v4 = vor.u32 %v18221_v41, %v14918_v21  ;;  %v18501_v21 = vld [vmem:[#allocation6 + $0x110c] sm:$0xf0]  ;;  %v16358_v41 = vld [vmem:[#allocation6 + $0x1368] sm:$0xf] }
 0x302   :  { %9685 = vmatpush.bf16.msrb.mxu0 %v14759_v52  ;;  %v16195_v52 = vor.u32 %v18535_v55, %v16192_v34  ;;  %v9441_v8 = vpop.f32.mrf.mxu2  ;;  %v18281_v55 = vld [vmem:[#allocation6 + $0xa2c] sm:$0xf0]  ;;  %v16079_v34 = vor.u32 %v18511_v45, %v16078_v19  ;;  %v14318_v45 = vld [vmem:[#allocation6 + $0x378] sm:$0xf]  ;;  %v16598_v40 = vld [vmem:[#allocation6 + $0x1548] sm:$0xf] }
 0x303   :  { %9699 = vmatpush.bf16.msrb.mxu1 %v15079_v46  ;;  %v16152_v46 = vld [vmem:[#allocation6 + $0x11f8] sm:$0xf0]  ;;  %v9455_v47 = vpop.f32.mrf.mxu3 }
 0x304   :  { %9713 = vmatpush.bf16.msrb.mxu2 %v15399_v29  ;;  %v9442_v29 = vadd.f32 %v9441_v8, %v9428_v26  ;;  %v16155_v11 = vor.u32 %v18525_v27, %v16152_v46  ;;  %v14438_v26 = vld [vmem:[#allocation6 + $0x468] sm:$0xf]  ;;  %v16719_v27 = vor.u32 %v18671_v33, %v16718_v10  ;;  %v16039_v46 = vor.u32 %v18501_v21, %v16038_v50  ;;  %v18091_v8 = vld [vmem:[#allocation6 + $0x43c] sm:$0xf0]  ;;  %v18061_v21 = vld [vmem:[#allocation6 + $0x34c] sm:$0xf0] }
 0x305   :  { %9619 = vmatpush.bf16.msrb.mxu3 %v16195_v52  ;;  %v18581_v52 = vld [vmem:[#allocation6 + $0x138c] sm:$0xf0]  ;;  %v14278_v50 = vld [vmem:[#allocation6 + $0x328] sm:$0xf] }
 0x306   :  { %9686 = vmatpush.bf16.msrb.mxu0 %v14719_v53  ;;  %v14878_v53 = vld [vmem:[#allocation6 + $0x7d8] sm:$0xf]  ;;  %v19561_v31 = vadd.f32 %v9455_v47, %v9442_v29  ;;  %v16359_v42 = vor.u32 %v18581_v52, %v16358_v41  ;;  %v18491_v29 = vld [vmem:[#allocation6 + $0x10bc] sm:$0xf0] }
 0x307   :  { %9700 = vmatpush.bf16.msrb.mxu1 %v15039_v16  ;;  %v18515_v16 = vld [vmem:[#allocation6 + $0x1184] sm:$0xf]  ;;  %v18571_v47 = vld [vmem:[#allocation6 + $0x133c] sm:$0xf0]  ;;  %v16558_v41 = vld [vmem:[#allocation6 + $0x14f8] sm:$0xf] }
 0x308   :  { %9714 = vmatpush.bf16.msrb.mxu2 %v15359_v62  ;;  %v14478_v62 = vld [vmem:[#allocation6 + $0x4b8] sm:$0xf]  ;;  %v16115_v56 = vor.u32 %v18515_v16, %v16112_v28  ;;  %v19568_v16 = vpop.f32.mrf.mxu1 }
 0x309   :  { %9620 = vmatpush.bf16.msrb.mxu3 %v16155_v11  ;;  %v14479_v5 = vor.u32 %v18111_v30, %v14478_v62  ;;  %v14399_v11 = vor.u32 %v18091_v8, %v14398_v18  ;;  %v15958_v30 = vld [vmem:[#allocation6 + $0x1048] sm:$0xf]  ;;  %v18541_v8 = vld [vmem:[#allocation6 + $0x124c] sm:$0xf0] }
 0x30a   :  { %9687 = vmatpush.bf16.msrb.mxu0 %v14679_v57  ;;  %v14879_v57 = vor.u32 %v18211_v23, %v14878_v53  ;;  %v19564_v53 = vpop.f32.mrf.mxu0  ;;  %v16318_v23 = vld [vmem:[#allocation6 + $0x1318] sm:$0xf]  ;;  %v16198_v18 = vld [vmem:[#allocation6 + $0x1228] sm:$0xf] }
 0x30b   :  { %9701 = vmatpush.bf16.msrb.mxu1 %v14999_v37  ;;  %v14838_v37 = vld [vmem:[#allocation6 + $0x788] sm:$0xf]  ;;  %v16319_v62 = vor.u32 %v18571_v47, %v16318_v23  ;;  %v16199_v23 = vor.u32 %v18541_v8, %v16198_v18  ;;  %v18621_v47 = vld [vmem:[#allocation6 + $0x14cc] sm:$0xf0]  ;;  %v18096_v18 = vld [vmem:[#allocation6 + $0x46c] sm:$0xf] }
 0x30c   :  { %9715 = vmatpush.bf16.msrb.mxu2 %v15319_v13  ;;  %v14839_v13 = vor.u32 %v18201_v9, %v14838_v37  ;;  %v18561_v37 = vld [vmem:[#allocation6 + $0x12ec] sm:$0xf0]  ;;  %v14440_v8 = vld [vmem:[#allocation6 + $0x490] sm:$0xf0] }
 0x30d   :  { %9621 = vmatpush.bf16.msrb.mxu3 %v16115_v56  ;;  %v15959_v56 = vor.u32 %v18481_v17, %v15958_v30  ;;  %v16478_v17 = vld [vmem:[#allocation6 + $0x1458] sm:$0xf] }
 0x30e   :  { %9688 = vmatpush.bf16.msrb.mxu0 %v14639_v61  ;;  %v15158_v61 = vld [vmem:[#allocation6 + $0xa08] sm:$0xf] }
 0x30f   :  { %9702 = vmatpush.bf16.msrb.mxu1 %v14959_v60  ;;  %v18101_v60 = vld [vmem:[#allocation6 + $0x48c] sm:$0xf0] }
 0x310   :  { %9716 = vmatpush.bf16.msrb.mxu2 %v15279_v49  ;;  %v15159_v49 = vor.u32 %v18281_v55, %v15158_v61  ;;  %9622 = vmatmul.bf16.vlgmr.msrb.gmra.mxu3 %v19521_v44  ;;  %v16238_v55 = vld [vmem:[#allocation6 + $0x1278] sm:$0xf] }
 0x311   :  { %9670 = vmatpush.bf16.msra.mxu3 %v14479_v5  ;;  %v18641_v5 = vld [vmem:[#allocation6 + $0x156c] sm:$0xf0] }
 0x312   :  { %9689 = vmatpush.bf16.msrb.mxu0 %v14599_v25  ;;  %v14439_v25 = vor.u32 %v18101_v60, %v14438_v26  ;;  %v14319_v26 = vor.u32 %v18071_v7, %v14318_v45  ;;  %v16599_v10 = vor.u32 %v18641_v5, %v16598_v40  ;;  %v18441_v45 = vld [vmem:[#allocation6 + $0xf2c] sm:$0xf0]  ;;  %v16118_v7 = vld [vmem:[#allocation6 + $0x1188] sm:$0xf] }
 0x313   :  { %9703 = vmatpush.bf16.msrb.mxu1 %v14919_v4  ;;  %v16678_v4 = vld [vmem:[#allocation6 + $0x15e8] sm:$0xf]  ;;  %v18521_v40 = vld [vmem:[#allocation6 + $0x11ac] sm:$0xf0] }
 0x314   :  { %9717 = vmatpush.bf16.msrb.mxu2 %v15239_v3  ;;  %v16679_v28 = vor.u32 %v18661_v20, %v16678_v4  ;;  %v15999_v3 = vor.u32 %v18491_v29, %v15998_v0  ;;  %v14238_v20 = vld [vmem:[#allocation6 + $0x2d8] sm:$0xf]  ;;  %v18051_v0 = vld [vmem:[#allocation6 + $0x2fc] sm:$0xf0]  ;;  %v16518_v29 = vld [vmem:[#allocation6 + $0x14a8] sm:$0xf] }
 0x315   :  { %9671 = vmatpush.bf16.msra.mxu3 %v14439_v25  ;;  %v18631_v25 = vld [vmem:[#allocation6 + $0x151c] sm:$0xf0] }
 0x316   :  { %9690 = vmatpush.bf16.msrb.mxu0 %v14559_v24  ;;  %v14358_v24 = vld [vmem:[#allocation6 + $0x3c8] sm:$0xf]  ;;  %v16559_v4 = vor.u32 %v18631_v25, %v16558_v41  ;;  %v18421_v41 = vld [vmem:[#allocation6 + $0xe8c] sm:$0xf0]  ;;  %v14800_v25 = vld [vmem:[#allocation6 + $0x760] sm:$0xf0] }
 0x317   :  { %9704 = vmatpush.bf16.msrb.mxu1 %v14879_v57  ;;  %v18651_v57 = vld [vmem:[#allocation6 + $0x15bc] sm:$0xf0]  ;;  %v14359_v9 = vor.u32 %v18081_v63, %v14358_v24  ;;  %v14239_v63 = vor.u32 %v18051_v0, %v14238_v20  ;;  %v15678_v0 = vld [vmem:[#allocation6 + $0xe18] sm:$0xf] }
 0x318   :  { %9718 = vmatpush.bf16.msrb.mxu2 %v15199_v59  ;;  %v16639_v19 = vor.u32 %v18651_v57, %v16638_v1  ;;  %v16279_v59 = vor.u32 %v18561_v37, %v16278_v32  ;;  %v18531_v24 = vld [vmem:[#allocation6 + $0x11fc] sm:$0xf0]  ;;  %v14198_v1 = vld [vmem:[#allocation6 + $0x288] sm:$0xf]  ;;  %v16519_v57 = vor.u32 %v18621_v47, %v16518_v29  ;;  %v15758_v37 = vld [vmem:[#allocation6 + $0xeb8] sm:$0xf] }
 0x319   :  { %9672 = vmatpush.bf16.msra.mxu3 %v14399_v11  ;;  %v15838_v11 = vld [vmem:[#allocation6 + $0xf58] sm:$0xf]  ;;  %v18611_v32 = vld [vmem:[#allocation6 + $0x147c] sm:$0xf0] }
 0x31a   :  { %9691 = vmatpush.bf16.msrb.mxu0 %v14519_v2  ;;  %v15918_v2 = vld [vmem:[#allocation6 + $0xff8] sm:$0xf]  ;;  %v9469_v61 = vpop.f32.mrf.mxu0  ;;  %v18411_v29 = vld [vmem:[#allocation6 + $0xe3c] sm:$0xf0] }
 0x31b   :  { %9705 = vmatpush.bf16.msrb.mxu1 %v14839_v13  ;;  %v18471_v13 = vld [vmem:[#allocation6 + $0x101c] sm:$0xf0]  ;;  %v9483_v60 = vpop.f32.mrf.mxu1 }
 0x31c   :  { %9719 = vmatpush.bf16.msrb.mxu2 %v15159_v49  ;;  %v15919_v33 = vor.u32 %v18471_v13, %v15918_v2  ;;  %v14160_v2 = vld [vmem:[#allocation6 + $0x260] sm:$0xf0]  ;;  %v18106_v13 = vld [vmem:[#allocation6 + $0x4bc] sm:$0xf] }
 0x31d   :  { %9692 = vmatmul.bf16.vlgmr.msrb.gmra.mxu0 %v19468_v15  ;;  %9673 = vmatpush.bf16.msra.mxu3 %v14359_v9 }
 0x31e   :  { %9740 = vmatpush.bf16.msra.mxu0 %v16079_v34  ;;  %9706 = vmatmul.bf16.vlgmr.msrb.gmra.mxu1 %v19470_v38  ;;  %v18551_v34 = vld [vmem:[#allocation6 + $0x129c] sm:$0xf0] }
 0x31f   :  { %9754 = vmatpush.bf16.msra.mxu1 %v16399_v43  ;;  %9720 = vmatmul.bf16.vlgmr.msrb.gmra.mxu2 %v19474_v12  ;;  %v9470_v43 = vadd.f32 %v9469_v61, %v19561_v31  ;;  %v16239_v49 = vor.u32 %v18551_v34, %v16238_v55  ;;  %v14279_v31 = vor.u32 %v18061_v21, %v14278_v50  ;;  %v14480_v61 = vld [vmem:[#allocation6 + $0x4e0] sm:$0xf0]  ;;  %v15718_v21 = vld [vmem:[#allocation6 + $0xe68] sm:$0xf] }
 0x320   :  { %9768 = vmatpush.bf16.msra.mxu2 %v16719_v27  ;;  %v15878_v27 = vld [vmem:[#allocation6 + $0xfa8] sm:$0xf]  ;;  %v16479_v55 = vor.u32 %v18611_v32, %v16478_v17  ;;  %v14483_v50 = vor.u32 %v18106_v13, %v14480_v61 }
 0x321   :  { %v19572_v52 = vadd.f32 %v9483_v60, %v9470_v43  ;;  %9674 = vmatpush.bf16.msra.mxu3 %v14319_v26  ;;  %v16119_v26 = vor.u32 %v18521_v40, %v16118_v7  ;;  %v16438_v60 = vld [vmem:[#allocation6 + $0x1408] sm:$0xf]  ;;  %v14040_v7 = vld [vmem:[#allocation6 + $0x170] sm:$0xf0]  ;;  %v19581_v40 = vpop.f32.mrf.mxu2 }
 0x322   :  { %9741 = vmatpush.bf16.msra.mxu0 %v16039_v46  ;;  %v18461_v46 = vld [vmem:[#allocation6 + $0xfcc] sm:$0xf0]  ;;  %v19574_v47 = vpop.f32.mrf.mxu0  ;;  %v15638_v32 = vld [vmem:[#allocation6 + $0xdc8] sm:$0xf] }
 0x323   :  { %9755 = vmatpush.bf16.msra.mxu1 %v16359_v42  ;;  %v15879_v42 = vor.u32 %v18461_v46, %v15878_v27  ;;  %v18016_v27 = vld [vmem:[#allocation6 + $0x1ec] sm:$0xf]  ;;  %v14120_v46 = vld [vmem:[#allocation6 + $0x210] sm:$0xf0] }
 0x324   :  { %9769 = vmatpush.bf16.msra.mxu2 %v16679_v28  ;;  %v18451_v28 = vld [vmem:[#allocation6 + $0xf7c] sm:$0xf0]  ;;  %v14123_v20 = vor.u32 %v18016_v27, %v14120_v46 }
 0x325   :  { %9675 = vmatpush.bf16.msra.mxu3 %v14279_v31  ;;  %v15839_v30 = vor.u32 %v18451_v28, %v15838_v11  ;;  %v14443_v11 = vor.u32 %v18096_v18, %v14440_v8  ;;  %v14760_v28 = vld [vmem:[#allocation6 + $0x710] sm:$0xf0] }
 0x326   :  { %9742 = vmatpush.bf16.msra.mxu0 %v15999_v3  ;;  %v16158_v3 = vld [vmem:[#allocation6 + $0x11d8] sm:$0xf] }
 0x327   :  { %9756 = vmatpush.bf16.msra.mxu1 %v16319_v62  ;;  %v18041_v62 = vld [vmem:[#allocation6 + $0x2ac] sm:$0xf0]  ;;  %v16159_v9 = vor.u32 %v18531_v24, %v16158_v3  ;;  %v18006_v3 = vld [vmem:[#allocation6 + $0x19c] sm:$0xf]  ;;  %v14080_v24 = vld [vmem:[#allocation6 + $0x1c0] sm:$0xf0] }
 0x328   :  { %9770 = vmatpush.bf16.msra.mxu2 %v16639_v19  ;;  %v18431_v19 = vld [vmem:[#allocation6 + $0xedc] sm:$0xf0]  ;;  %v14199_v5 = vor.u32 %v18041_v62, %v14198_v1  ;;  %v14400_v1 = vld [vmem:[#allocation6 + $0x440] sm:$0xf0]  ;;  %v19579_v62 = vpop.f32.mrf.mxu1  ;;  %v14083_v17 = vor.u32 %v18006_v3, %v14080_v24  ;;  %v18056_v3 = vld [vmem:[#allocation6 + $0x32c] sm:$0xf] }
 0x329   :  { %9676 = vmatpush.bf16.msra.mxu3 %v14239_v63  ;;  %v15759_v34 = vor.u32 %v18431_v19, %v15758_v37  ;;  %v18086_v63 = vld [vmem:[#allocation6 + $0x41c] sm:$0xf]  ;;  %v18401_v37 = vld [vmem:[#allocation6 + $0xdec] sm:$0xf0]  ;;  %v14280_v24 = vld [vmem:[#allocation6 + $0x350] sm:$0xf0] }
 0x32a   :  { %9743 = vmatpush.bf16.msra.mxu0 %v15959_v56  ;;  %v15798_v56 = vld [vmem:[#allocation6 + $0xf08] sm:$0xf]  ;;  %v14403_v19 = vor.u32 %v18086_v63, %v14400_v1  ;;  %v15639_v13 = vor.u32 %v18401_v37, %v15638_v32  ;;  %v18371_v32 = vld [vmem:[#allocation6 + $0xcfc] sm:$0xf0]  ;;  %v18136_v37 = vld [vmem:[#allocation6 + $0x5ac] sm:$0xf] }
 0x32b   :  { %9757 = vmatpush.bf16.msra.mxu1 %v16279_v59  ;;  %v18026_v59 = vld [vmem:[#allocation6 + $0x23c] sm:$0xf]  ;;  %v15799_v43 = vor.u32 %v18441_v45, %v15798_v56  ;;  %v14720_v56 = vld [vmem:[#allocation6 + $0x6c0] sm:$0xf0]  ;;  %v17996_v45 = vld [vmem:[#allocation6 + $0x14c] sm:$0xf] }
 0x32c   :  { %9771 = vmatpush.bf16.msra.mxu2 %v16599_v10  ;;  %v18601_v10 = vld [vmem:[#allocation6 + $0x142c] sm:$0xf0] }
 0x32d   :  { %9677 = vmatpush.bf16.msra.mxu3 %v14199_v5  ;;  %v16439_v31 = vor.u32 %v18601_v10, %v16438_v60  ;;  %v18076_v5 = vld [vmem:[#allocation6 + $0x3cc] sm:$0xf] }
 0x32e   :  { %9744 = vmatpush.bf16.msra.mxu0 %v15919_v33  ;;  %v14163_v33 = vor.u32 %v18026_v59, %v14160_v2  ;;  %v20042_v59 = vperm.slane %v19542_v35, 1  ;;  %v14360_v2 = vld [vmem:[#allocation6 + $0x3f0] sm:$0xf0] }
 0x32f   :  { %9758 = vmatpush.bf16.msra.mxu1 %v16239_v49  ;;  %v18186_v49 = vld [vmem:[#allocation6 + $0x73c] sm:$0xf]  ;;  %v14363_v10 = vor.u32 %v18076_v5, %v14360_v2  ;;  %v14240_v5 = vld [vmem:[#allocation6 + $0x300] sm:$0xf0] }
 0x330   :  { %9772 = vmatpush.bf16.msra.mxu2 %v16559_v4  ;;  %v15719_v4 = vor.u32 %v18421_v41, %v15718_v21  ;;  %9678 = vmatmul.bf16.vlgmr.msra.gmra.mxu3 %v19402_v58  ;;  %v14000_v21 = vld [vmem:[#allocation6 + $0x120] sm:$0xf0] }
 0x331   :  { %9726 = vmatpush.bf16.msrb.mxu3 %v15759_v34  ;;  %v15598_v34 = vld [vmem:[#allocation6 + $0xd78] sm:$0xf] }
 0x332   :  { %9745 = vmatpush.bf16.msra.mxu0 %v15879_v42  ;;  %v14803_v42 = vor.u32 %v18186_v49, %v14800_v25  ;;  %v18066_v49 = vld [vmem:[#allocation6 + $0x37c] sm:$0xf]  ;;  %v14320_v25 = vld [vmem:[#allocation6 + $0x3a0] sm:$0xf0] }
 0x333   :  { %9759 = vmatpush.bf16.msra.mxu1 %v16199_v23  ;;  %v18176_v23 = vld [vmem:[#allocation6 + $0x6ec] sm:$0xf] }
 0x334   :  { %9773 = vmatpush.bf16.msra.mxu2 %v16519_v57  ;;  %v15679_v57 = vor.u32 %v18411_v29, %v15678_v0  ;;  %v14323_v0 = vor.u32 %v18066_v49, %v14320_v25  ;;  %v14640_v29 = vld [vmem:[#allocation6 + $0x620] sm:$0xf0]  ;;  %v14200_v49 = vld [vmem:[#allocation6 + $0x2b0] sm:$0xf0]  ;;  %v18346_v25 = vld [vmem:[#allocation6 + $0xc3c] sm:$0xf] }
 0x335   :  { %9727 = vmatpush.bf16.msrb.mxu3 %v15719_v4  ;;  %v15558_v4 = vld [vmem:[#allocation6 + $0xd28] sm:$0xf] }
 0x336   :  { %9746 = vmatpush.bf16.msra.mxu0 %v15839_v30  ;;  %v14763_v30 = vor.u32 %v18176_v23, %v14760_v28  ;;  %v17976_v23 = vld [vmem:[#allocation6 + $0xac] sm:$0xf]  ;;  %v9497_v28 = vpop.f32.mrf.mxu2 }
 0x337   :  { %9760 = vmatpush.bf16.msra.mxu1 %v16159_v9  ;;  %v18166_v9 = vld [vmem:[#allocation6 + $0x69c] sm:$0xf]  ;;  %v19590_v63 = vadd.f32 %v9497_v28, %v19572_v52  ;;  %v18361_v52 = vld [vmem:[#allocation6 + $0xcac] sm:$0xf0] }
 0x338   :  { %9774 = vmatpush.bf16.msra.mxu2 %v16479_v55  ;;  %v14723_v61 = vor.u32 %v18166_v9, %v14720_v56  ;;  %v14043_v55 = vor.u32 %v17996_v45, %v14040_v7  ;;  %v14283_v9 = vor.u32 %v18056_v3, %v14280_v24  ;;  %v17966_v56 = vld [vmem:[#allocation6 + $0x5c] sm:$0xf]  ;;  %v13920_v45 = vld [vmem:[#allocation6 + $0x80] sm:$0xf0]  ;;  %v16998_v3 = vld [vmem:[#allocation6 + $0x1868] sm:$0xf] }
 0x339   :  { %9728 = vmatpush.bf16.msrb.mxu3 %v15679_v57  ;;  %v18046_v7 = vld [vmem:[#allocation6 + $0x2dc] sm:$0xf]  ;;  %v18741_v24 = vld [vmem:[#allocation6 + $0x188c] sm:$0xf0] }
 0x33a   :  { %9747 = vmatpush.bf16.msra.mxu0 %v15799_v43  ;;  %v18391_v43 = vld [vmem:[#allocation6 + $0xd9c] sm:$0xf0]  ;;  %v9525_v60 = vpop.f32.mrf.mxu0 }
 0x33b   :  { %9761 = vmatpush.bf16.msra.mxu1 %v16119_v26  ;;  %v18156_v26 = vld [vmem:[#allocation6 + $0x64c] sm:$0xf]  ;;  %v9526_v41 = vadd.f32 %v9525_v60, %v20042_v59  ;;  %v9539_v27 = vpop.f32.mrf.mxu1  ;;  %v15599_v46 = vor.u32 %v18391_v43, %v15598_v34  ;;  %v18126_v34 = vld [vmem:[#allocation6 + $0x55c] sm:$0xf]  ;;  %v14560_v43 = vld [vmem:[#allocation6 + $0x580] sm:$0xf0]  ;;  %v14243_v60 = vor.u32 %v18046_v7, %v14240_v5 }
 0x33c   :  { %9775 = vmatpush.bf16.msra.mxu2 %v16439_v31  ;;  %v16958_v5 = vld [vmem:[#allocation6 + $0x1818] sm:$0xf] }
 0x33d   :  { %9748 = vmatmul.bf16.vlgmr.msra.gmra.mxu0 %v19519_v6  ;;  %9729 = vmatpush.bf16.msrb.mxu3 %v15639_v13  ;;  %v19587_v18 = vadd.f32 %v9539_v27, %v9526_v41  ;;  %v15478_v13 = vld [vmem:[#allocation6 + $0xc88] sm:$0xf]  ;;  %v18036_v41 = vld [vmem:[#allocation6 + $0x28c] sm:$0xf]  ;;  %v18502_v59 = vld [vmem:[#allocation6 + $0x1114] sm:$0xf0] }
 0x33e   :  { %9796 = vmatpush.bf16.msrb.mxu0 %v14163_v33  ;;  %9762 = vmatmul.bf16.vlgmr.msra.gmra.mxu1 %v19521_v44  ;;  %v14680_v33 = vld [vmem:[#allocation6 + $0x670] sm:$0xf0]  ;;  %v15479_v27 = vor.u32 %v18361_v52, %v15478_v13  ;;  %v18496_v13 = vld [vmem:[#allocation6 + $0x10ec] sm:$0xf] }
 0x33f   :  { %9810 = vmatpush.bf16.msrb.mxu1 %v14483_v50  ;;  %9776 = vmatmul.bf16.vlgmr.msra.gmra.mxu2 %v19529_v51  ;;  %v17986_v50 = vld [vmem:[#allocation6 + $0xfc] sm:$0xf]  ;;  %v14683_v8 = vor.u32 %v18156_v26, %v14680_v33  ;;  %v17038_v26 = vld [vmem:[#allocation6 + $0x18b8] sm:$0xf]  ;;  %v17956_v33 = vld [vmem:[#allocation6 + $0xc] sm:$0xf] }
 0x340   :  { %9824 = vmatpush.bf16.msrb.mxu2 %v14803_v42  ;;  %v14003_v31 = vor.u32 %v17986_v50, %v14000_v21  ;;  %v18381_v42 = vld [vmem:[#allocation6 + $0xd4c] sm:$0xf0]  ;;  %v13880_v50 = vld [vmem:[#allocation6 + $0x30] sm:$0xf0]  ;;  %v19592_v21 = vpop.f32.mrf.mxu2 }
 0x341   :  { %9730 = vmatpush.bf16.msrb.mxu3 %v15599_v46  ;;  %v15559_v1 = vor.u32 %v18381_v42, %v15558_v4  ;;  %v15440_v46 = vld [vmem:[#allocation6 + $0xc60] sm:$0xf0]  ;;  %v14563_v4 = vor.u32 %v18126_v34, %v14560_v43  ;;  %v18326_v34 = vld [vmem:[#allocation6 + $0xb9c] sm:$0xf] }
 0x342   :  { %9797 = vmatpush.bf16.msrb.mxu0 %v14123_v20  ;;  %v18146_v20 = vld [vmem:[#allocation6 + $0x5fc] sm:$0xf]  ;;  %v15360_v43 = vld [vmem:[#allocation6 + $0xbc0] sm:$0xf0] }
 0x343   :  { %9811 = vmatpush.bf16.msrb.mxu1 %v14443_v11  ;;  %v13960_v11 = vld [vmem:[#allocation6 + $0xd0] sm:$0xf0]  ;;  %v14643_v57 = vor.u32 %v18146_v20, %v14640_v29  ;;  %v13883_v20 = vor.u32 %v17956_v33, %v13880_v50  ;;  %v18116_v29 = vld [vmem:[#allocation6 + $0x50c] sm:$0xf]  ;;  %v15363_v50 = vor.u32 %v18326_v34, %v15360_v43 }
 0x344   :  { %9825 = vmatpush.bf16.msrb.mxu2 %v14763_v30  ;;  %v13963_v30 = vor.u32 %v17976_v23, %v13960_v11  ;;  %v14520_v23 = vld [vmem:[#allocation6 + $0x530] sm:$0xf0]  ;;  %v15443_v11 = vor.u32 %v18346_v25, %v15440_v46  ;;  %v18316_v46 = vld [vmem:[#allocation6 + $0xb4c] sm:$0xf] }
 0x345   :  { %9731 = vmatpush.bf16.msrb.mxu3 %v15559_v1  ;;  %v18506_v1 = vld [vmem:[#allocation6 + $0x113c] sm:$0xf] }
 0x346   :  { %9798 = vmatpush.bf16.msrb.mxu0 %v14083_v17  ;;  %v15518_v17 = vld [vmem:[#allocation6 + $0xcd8] sm:$0xf] }
 0x347   :  { %9812 = vmatpush.bf16.msrb.mxu1 %v14403_v19  ;;  %v14600_v19 = vld [vmem:[#allocation6 + $0x5d0] sm:$0xf0]  ;;  %v15519_v2 = vor.u32 %v18371_v32, %v15518_v17  ;;  %v18416_v32 = vld [vmem:[#allocation6 + $0xe6c] sm:$0xf] }
 0x348   :  { %9826 = vmatpush.bf16.msrb.mxu2 %v14723_v61  ;;  %v14603_v61 = vor.u32 %v18136_v37, %v14600_v19  ;;  %v15400_v17 = vld [vmem:[#allocation6 + $0xc10] sm:$0xf0]  ;;  %v16999_v19 = vor.u32 %v18741_v24, %v16998_v3  ;;  %v9553_v7 = vpop.f32.mrf.mxu2  ;;  %v18306_v24 = vld [vmem:[#allocation6 + $0xafc] sm:$0xf] }
 0x349   :  { %9732 = vmatpush.bf16.msrb.mxu3 %v15519_v2  ;;  %v15720_v37 = vld [vmem:[#allocation6 + $0xe90] sm:$0xf0]  ;;  %v18731_v2 = vld [vmem:[#allocation6 + $0x183c] sm:$0xf0] }
 0x34a   :  { %9799 = vmatpush.bf16.msrb.mxu0 %v14043_v55  ;;  %v13923_v55 = vor.u32 %v17966_v56, %v13920_v45  ;;  %v15723_v52 = vor.u32 %v18416_v32, %v15720_v37  ;;  %v15960_v3 = vld [vmem:[#allocation6 + $0x1070] sm:$0xf0] }
 0x34b   :  { %9813 = vmatpush.bf16.msrb.mxu1 %v14363_v10  ;;  %v18751_v10 = vld [vmem:[#allocation6 + $0x18dc] sm:$0xf0] }
 0x34c   :  { %9827 = vmatpush.bf16.msrb.mxu2 %v14683_v8  ;;  %v18426_v8 = vld [vmem:[#allocation6 + $0xebc] sm:$0xf]  ;;  %v17039_v42 = vor.u32 %v18751_v10, %v17038_v26  ;;  %v16959_v10 = vor.u32 %v18731_v2, %v16958_v5  ;;  %v18296_v5 = vld [vmem:[#allocation6 + $0xaac] sm:$0xf]  ;;  %v15240_v2 = vld [vmem:[#allocation6 + $0xad0] sm:$0xf0] }
 0x34d   :  { %9733 = vmatpush.bf16.msrb.mxu3 %v15479_v27  ;;  %v18406_v26 = vld [vmem:[#allocation6 + $0xe1c] sm:$0xf]  ;;  %v16000_v27 = vld [vmem:[#allocation6 + $0x10c0] sm:$0xf0]  ;;  %v15243_v43 = vor.u32 %v18296_v5, %v15240_v2 }
 0x34e   :  { %9800 = vmatpush.bf16.msrb.mxu0 %v14003_v31  ;;  %v15760_v31 = vld [vmem:[#allocation6 + $0xee0] sm:$0xf0] }
 0x34f   :  { %9814 = vmatpush.bf16.msrb.mxu1 %v14323_v0  ;;  %v14203_v0 = vor.u32 %v18036_v41, %v14200_v49  ;;  %v15763_v28 = vor.u32 %v18426_v8, %v15760_v31  ;;  %v16918_v41 = vld [vmem:[#allocation6 + $0x17c8] sm:$0xf]  ;;  %v18721_v49 = vld [vmem:[#allocation6 + $0x17ec] sm:$0xf0]  ;;  %v15320_v8 = vld [vmem:[#allocation6 + $0xb70] sm:$0xf0] }
 0x350   :  { %9828 = vmatpush.bf16.msrb.mxu2 %v14643_v57  ;;  %v16080_v57 = vld [vmem:[#allocation6 + $0x1160] sm:$0xf0]  ;;  %9734 = vmatmul.bf16.vlgmr.msrb.gmra.mxu3 %v19481_v54  ;;  %v18396_v31 = vld [vmem:[#allocation6 + $0xdcc] sm:$0xf] }
 0x351   :  { %9782 = vmatpush.bf16.msra.mxu3 %v17039_v42  ;;  %v16083_v56 = vor.u32 %v18506_v1, %v16080_v57  ;;  %v16919_v42 = vor.u32 %v18721_v49, %v16918_v41  ;;  %v15280_v1 = vld [vmem:[#allocation6 + $0xb20] sm:$0xf0]  ;;  %v18386_v57 = vld [vmem:[#allocation6 + $0xd7c] sm:$0xf] }
 0x352   :  { %9801 = vmatpush.bf16.msrb.mxu0 %v13963_v30  ;;  %v18336_v30 = vld [vmem:[#allocation6 + $0xbec] sm:$0xf]  ;;  %v15283_v37 = vor.u32 %v18306_v24, %v15280_v1  ;;  %v18286_v41 = vld [vmem:[#allocation6 + $0xa5c] sm:$0xf]  ;;  %v15200_v49 = vld [vmem:[#allocation6 + $0xa80] sm:$0xf0] }
 0x353   :  { %9815 = vmatpush.bf16.msrb.mxu1 %v14283_v9  ;;  %v14523_v9 = vor.u32 %v18116_v29, %v14520_v23  ;;  %v15403_v45 = vor.u32 %v18336_v30, %v15400_v17  ;;  %v16878_v29 = vld [vmem:[#allocation6 + $0x1778] sm:$0xf]  ;;  %v18711_v23 = vld [vmem:[#allocation6 + $0x179c] sm:$0xf0]  ;;  %v15600_v30 = vld [vmem:[#allocation6 + $0xda0] sm:$0xf0] }
 0x354   :  { %9829 = vmatpush.bf16.msrb.mxu2 %v14603_v61  ;;  %v19596_v61 = vadd.f32 %v9553_v7, %v19587_v18  ;;  %v18486_v18 = vld [vmem:[#allocation6 + $0x109c] sm:$0xf]  ;;  %v16879_v17 = vor.u32 %v18711_v23, %v16878_v29  ;;  %v15920_v7 = vld [vmem:[#allocation6 + $0x1020] sm:$0xf0]  ;;  %v15480_v24 = vld [vmem:[#allocation6 + $0xcb0] sm:$0xf0] }
 0x355   :  { %9783 = vmatpush.bf16.msra.mxu3 %v16999_v19  ;;  %v18701_v19 = vld [vmem:[#allocation6 + $0x174c] sm:$0xf0]  ;;  %v15120_v23 = vld [vmem:[#allocation6 + $0x9e0] sm:$0xf0]  ;;  %v18666_v1 = vld [vmem:[#allocation6 + $0x163c] sm:$0xf] }
 0x356   :  { %9802 = vmatpush.bf16.msrb.mxu0 %v13923_v55  ;;  %v16040_v55 = vld [vmem:[#allocation6 + $0x1110] sm:$0xf0] }
 0x357   :  { %9816 = vmatpush.bf16.msrb.mxu1 %v14243_v60  ;;  %v15680_v60 = vld [vmem:[#allocation6 + $0xe40] sm:$0xf0]  ;;  %v16043_v33 = vor.u32 %v18496_v13, %v16040_v55  ;;  %v18376_v13 = vld [vmem:[#allocation6 + $0xd2c] sm:$0xf] }
 0x358   :  { %9830 = vmatpush.bf16.msrb.mxu2 %v14563_v4  ;;  %v15683_v25 = vor.u32 %v18406_v26, %v15680_v60  ;;  %v15640_v4 = vld [vmem:[#allocation6 + $0xdf0] sm:$0xf0]  ;;  %v16798_v26 = vld [vmem:[#allocation6 + $0x16d8] sm:$0xf]  ;;  %v18691_v60 = vld [vmem:[#allocation6 + $0x16fc] sm:$0xf0] }
 0x359   :  { %9784 = vmatpush.bf16.msra.mxu3 %v16959_v10  ;;  %v18456_v10 = vld [vmem:[#allocation6 + $0xfac] sm:$0xf] }
 0x35a   :  { %9803 = vmatpush.bf16.msrb.mxu0 %v13883_v20  ;;  %v16003_v20 = vor.u32 %v18486_v18, %v16000_v27  ;;  %v18366_v18 = vld [vmem:[#allocation6 + $0xcdc] sm:$0xf]  ;;  %v16799_v27 = vor.u32 %v18691_v60, %v16798_v26  ;;  %v16680_v26 = vld [vmem:[#allocation6 + $0x1610] sm:$0xf0]  ;;  %v18736_v60 = vld [vmem:[#allocation6 + $0x186c] sm:$0xf] }
 0x35b   :  { %9817 = vmatpush.bf16.msrb.mxu1 %v14203_v0  ;;  %v15323_v0 = vor.u32 %v18316_v46, %v15320_v8  ;;  %v16758_v46 = vld [vmem:[#allocation6 + $0x1688] sm:$0xf]  ;;  %v18681_v8 = vld [vmem:[#allocation6 + $0x16ac] sm:$0xf0] }
 0x35c   :  { %9831 = vmatpush.bf16.msrb.mxu2 %v14523_v9  ;;  %v16838_v9 = vld [vmem:[#allocation6 + $0x1728] sm:$0xf] }
 0x35d   :  { %9804 = vmatmul.bf16.vlgmr.msrb.gmra.mxu0 %v19386_v36  ;;  %9785 = vmatpush.bf16.msra.mxu3 %v16919_v42  ;;  %v16839_v55 = vor.u32 %v18701_v19, %v16838_v9  ;;  %v18446_v42 = vld [vmem:[#allocation6 + $0xf5c] sm:$0xf] }
 0x35e   :  { %9852 = vmatpush.bf16.msra.mxu0 %v15443_v11  ;;  %9818 = vmatmul.bf16.vlgmr.msrb.gmra.mxu1 %v19402_v58  ;;  %v18476_v11 = vld [vmem:[#allocation6 + $0x104c] sm:$0xf] }
 0x35f   :  { %9866 = vmatpush.bf16.msra.mxu1 %v15763_v28  ;;  %9832 = vmatmul.bf16.vlgmr.msrb.gmra.mxu2 %v19468_v15  ;;  %v15643_v28 = vor.u32 %v18396_v31, %v15640_v4  ;;  %v15963_v32 = vor.u32 %v18476_v11, %v15960_v3  ;;  %v15203_v4 = vor.u32 %v18286_v41, %v15200_v49  ;;  %v18276_v11 = vld [vmem:[#allocation6 + $0xa0c] sm:$0xf] }
 0x360   :  { %9880 = vmatpush.bf16.msra.mxu2 %v16083_v56  ;;  %v18466_v56 = vld [vmem:[#allocation6 + $0xffc] sm:$0xf]  ;;  %v18356_v3 = vld [vmem:[#allocation6 + $0xc8c] sm:$0xf] }
 0x361   :  { %9786 = vmatpush.bf16.msra.mxu3 %v16879_v17  ;;  %v15923_v34 = vor.u32 %v18466_v56, %v15920_v7  ;;  %v18746_v17 = vld [vmem:[#allocation6 + $0x18bc] sm:$0xf]  ;;  %v15483_v56 = vor.u32 %v18356_v3, %v15480_v24  ;;  %v15800_v7 = vld [vmem:[#allocation6 + $0xf30] sm:$0xf0]  ;;  %v14086_v24 = vld [vmem:[#allocation6 + $0x1a0] sm:$0xf] }
 0x362   :  { %9853 = vmatpush.bf16.msra.mxu0 %v15403_v45  ;;  %v15603_v45 = vor.u32 %v18386_v57, %v15600_v30  ;;  %v16759_v57 = vor.u32 %v18681_v8, %v16758_v46  ;;  %v16720_v30 = vld [vmem:[#allocation6 + $0x1660] sm:$0xf0]  ;;  %v19601_v46 = vpop.f32.mrf.mxu3  ;;  %v15000_v3 = vld [vmem:[#allocation6 + $0x8f0] sm:$0xf0] }
 0x363   :  { %9867 = vmatpush.bf16.msra.mxu1 %v15723_v52  ;;  %v15560_v52 = vld [vmem:[#allocation6 + $0xd50] sm:$0xf0]  ;;  %v16723_v5 = vor.u32 %v18666_v1, %v16720_v30  ;;  %v18636_v30 = vld [vmem:[#allocation6 + $0x154c] sm:$0xf] }
 0x364   :  { %9881 = vmatpush.bf16.msra.mxu2 %v16043_v33  ;;  %v15563_v33 = vor.u32 %v18376_v13, %v15560_v52  ;;  %v18256_v13 = vld [vmem:[#allocation6 + $0x96c] sm:$0xf]  ;;  %v15080_v52 = vld [vmem:[#allocation6 + $0x990] sm:$0xf0] }
 0x365   :  { %9787 = vmatpush.bf16.msra.mxu3 %v16839_v55  ;;  %v14166_v55 = vld [vmem:[#allocation6 + $0x240] sm:$0xf] }
 0x366   :  { %9854 = vmatpush.bf16.msra.mxu0 %v15363_v50  ;;  %v15880_v50 = vld [vmem:[#allocation6 + $0xfd0] sm:$0xf0] }
 0x367   :  { %9868 = vmatpush.bf16.msra.mxu1 %v15683_v25  ;;  %v15520_v25 = vld [vmem:[#allocation6 + $0xd00] sm:$0xf0]  ;;  %v15883_v31 = vor.u32 %v18456_v10, %v15880_v50  ;;  %v17000_v10 = vld [vmem:[#allocation6 + $0x1890] sm:$0xf0]  ;;  %v15083_v50 = vor.u32 %v18256_v13, %v15080_v52  ;;  %v18002_v52 = vld [vmem:[#allocation6 + $0x174] sm:$0xf0] }
 0x368   :  { %9882 = vmatpush.bf16.msra.mxu2 %v16003_v20  ;;  %v15840_v20 = vld [vmem:[#allocation6 + $0xf80] sm:$0xf0]  ;;  %v15523_v29 = vor.u32 %v18366_v18, %v15520_v25  ;;  %v18246_v18 = vld [vmem:[#allocation6 + $0x91c] sm:$0xf]  ;;  %v17003_v8 = vor.u32 %v18736_v60, %v17000_v10 }
 0x369   :  { %9788 = vmatpush.bf16.msra.mxu3 %v16799_v27  ;;  %v15040_v25 = vld [vmem:[#allocation6 + $0x940] sm:$0xf0]  ;;  %v14126_v27 = vld [vmem:[#allocation6 + $0x1f0] sm:$0xf] }
 0x36a   :  { %9855 = vmatpush.bf16.msra.mxu0 %v15323_v0  ;;  %v18266_v0 = vld [vmem:[#allocation6 + $0x9bc] sm:$0xf]  ;;  %v16880_v60 = vld [vmem:[#allocation6 + $0x17a0] sm:$0xf0] }
 0x36b   :  { %9869 = vmatpush.bf16.msra.mxu1 %v15643_v28  ;;  %v15160_v28 = vld [vmem:[#allocation6 + $0xa30] sm:$0xf0]  ;;  %v15123_v9 = vor.u32 %v18266_v0, %v15120_v23  ;;  %v16960_v0 = vld [vmem:[#allocation6 + $0x1840] sm:$0xf0] }
 0x36c   :  { %9883 = vmatpush.bf16.msra.mxu2 %v15963_v32  ;;  %v17040_v32 = vld [vmem:[#allocation6 + $0x18e0] sm:$0xf0]  ;;  %v15163_v19 = vor.u32 %v18276_v11, %v15160_v28  ;;  %v18236_v28 = vld [vmem:[#allocation6 + $0x8cc] sm:$0xf] }
 0x36d   :  { %v17043_v2 = vor.u32 %v18746_v17, %v17040_v32  ;;  %9789 = vmatpush.bf16.msra.mxu3 %v16759_v57  ;;  %v18012_v57 = vld [vmem:[#allocation6 + $0x1c4] sm:$0xf0]  ;;  %v16600_v17 = vld [vmem:[#allocation6 + $0x1570] sm:$0xf0]  ;;  %v18716_v32 = vld [vmem:[#allocation6 + $0x17cc] sm:$0xf] }
 0x36e   :  { %9856 = vmatpush.bf16.msra.mxu0 %v15283_v37  ;;  %v15843_v37 = vor.u32 %v18446_v42, %v15840_v20  ;;  %v16640_v42 = vld [vmem:[#allocation6 + $0x15c0] sm:$0xf0]  ;;  %v18726_v20 = vld [vmem:[#allocation6 + $0x181c] sm:$0xf] }
 0x36f   :  { %9870 = vmatpush.bf16.msra.mxu1 %v15603_v45  ;;  %v18436_v45 = vld [vmem:[#allocation6 + $0xf0c] sm:$0xf]  ;;  %v16963_v1 = vor.u32 %v18726_v20, %v16960_v0 }
 0x370   :  { %9884 = vmatpush.bf16.msra.mxu2 %v15923_v34  ;;  %v18032_v34 = vld [vmem:[#allocation6 + $0x264] sm:$0xf0]  ;;  %9790 = vmatmul.bf16.vlgmr.msra.gmra.mxu3 %v19549_v14 }
 0x371   :  { %9838 = vmatpush.bf16.msrb.mxu3 %v15123_v9  ;;  %v14167_v41 = vor.u32 %v18032_v34, %v14166_v55  ;;  %v15003_v9 = vor.u32 %v18236_v28, %v15000_v3  ;;  %v18626_v55 = vld [vmem:[#allocation6 + $0x14fc] sm:$0xf]  ;;  %v16560_v34 = vld [vmem:[#allocation6 + $0x1520] sm:$0xf0]  ;;  %v19610_v28 = vpop.f32.mrf.mxu0 }
 0x372   :  { %9857 = vmatpush.bf16.msra.mxu0 %v15243_v43  ;;  %v18656_v43 = vld [vmem:[#allocation6 + $0x15ec] sm:$0xf]  ;;  %v9511_v13 = vpop.f32.mrf.mxu3  ;;  %20106 = vst [vmem:[#allocation36_spill] sm:$0xff] %v19610_v28  ;;  %v18687_v28 = vld [vmem:[#allocation6 + $0x16e4] sm:$0xf] }
 0x373   :  { %9871 = vmatpush.bf16.msra.mxu1 %v15563_v33  ;;  %v15803_v33 = vor.u32 %v18436_v45, %v15800_v7  ;;  %v16683_v49 = vor.u32 %v18656_v43, %v16680_v26  ;;  %v18226_v45 = vld [vmem:[#allocation6 + $0x87c] sm:$0xf]  ;;  %v14960_v7 = vld [vmem:[#allocation6 + $0x8a0] sm:$0xf0]  ;;  %v19608_v43 = vadd.f32 %v9511_v13, %v19590_v63 }
 0x374   :  { %9885 = vmatpush.bf16.msra.mxu2 %v15883_v31  ;;  %v18022_v31 = vld [vmem:[#allocation6 + $0x214] sm:$0xf0]  ;;  %v18706_v26 = vld [vmem:[#allocation6 + $0x177c] sm:$0xf]  ;;  %v14963_v10 = vor.u32 %v18226_v45, %v14960_v7 }
 0x375   :  { %9839 = vmatpush.bf16.msrb.mxu3 %v15083_v50  ;;  %v14127_v23 = vor.u32 %v18022_v31, %v14126_v27  ;;  %20105 = vst [vmem:[#allocation27_spill] sm:$0xff] %v19608_v43  ;;  %v16563_v50 = vor.u32 %v18626_v55, %v16560_v34  ;;  %v17992_v27 = vld [vmem:[#allocation6 + $0x124] sm:$0xf0]  ;;  %v16520_v31 = vld [vmem:[#allocation6 + $0x14d0] sm:$0xf0] }
 0x376   :  { %9858 = vmatpush.bf16.msra.mxu0 %v15203_v4  ;;  %v18646_v4 = vld [vmem:[#allocation6 + $0x159c] sm:$0xf]  ;;  %v16400_v34 = vld [vmem:[#allocation6 + $0x13e0] sm:$0xf0]  ;;  %v18423_v43 = vld [vmem:[#allocation6 + $0xe9c] sm:$0xf0] }
 0x377   :  { %9872 = vmatpush.bf16.msra.mxu1 %v15523_v29  ;;  %v15043_v29 = vor.u32 %v18246_v18, %v15040_v25  ;;  %v16643_v11 = vor.u32 %v18646_v4, %v16640_v42  ;;  %v14006_v18 = vld [vmem:[#allocation6 + $0x100] sm:$0xf]  ;;  %v16883_v25 = vor.u32 %v18706_v26, %v16880_v60  ;;  %v18696_v4 = vld [vmem:[#allocation6 + $0x172c] sm:$0xf]  ;;  %v16840_v42 = vld [vmem:[#allocation6 + $0x1750] sm:$0xf0] }
 0x378   :  { %9886 = vmatpush.bf16.msra.mxu2 %v15843_v37  ;;  %v16920_v37 = vld [vmem:[#allocation6 + $0x17f0] sm:$0xf0]  ;;  %v14007_v20 = vor.u32 %v17992_v27, %v14006_v18  ;;  %v16843_v3 = vor.u32 %v18696_v4, %v16840_v42  ;;  %v18586_v13 = vld [vmem:[#allocation6 + $0x13bc] sm:$0xf]  ;;  %v18596_v26 = vld [vmem:[#allocation6 + $0x140c] sm:$0xf] }
 0x379   :  { %9840 = vmatpush.bf16.msrb.mxu3 %v15043_v29  ;;  %v18206_v29 = vld [vmem:[#allocation6 + $0x7dc] sm:$0xf]  ;;  %v16440_v60 = vld [vmem:[#allocation6 + $0x1430] sm:$0xf0]  ;;  %v15126_v18 = vld [vmem:[#allocation6 + $0x9c0] sm:$0xf] }
 0x37a   :  { %9859 = vmatpush.bf16.msra.mxu0 %v15163_v19  ;;  %v14087_v19 = vor.u32 %v18012_v57, %v14086_v24  ;;  %v19612_v24 = vpop.f32.mrf.mxu3  ;;  %v18606_v57 = vld [vmem:[#allocation6 + $0x145c] sm:$0xf]  ;;  %v16443_v4 = vor.u32 %v18596_v26, %v16440_v60 }
 0x37b   :  { %9873 = vmatpush.bf16.msra.mxu1 %v15483_v56  ;;  %v16603_v56 = vor.u32 %v18636_v30, %v16600_v17  ;;  %v16480_v30 = vld [vmem:[#allocation6 + $0x1480] sm:$0xf0]  ;;  %v18686_v17 = vld [vmem:[#allocation6 + $0x16dc] sm:$0xf] }
 0x37c   :  { %9887 = vmatpush.bf16.msra.mxu2 %v15803_v33  ;;  %v16483_v7 = vor.u32 %v18606_v57, %v16480_v30  ;;  %v15446_v57 = vld [vmem:[#allocation6 + $0xc40] sm:$0xf] }
 0x37d   :  { %9860 = vmatmul.bf16.vlgmr.msra.gmra.mxu0 %v19474_v12  ;;  %9841 = vmatpush.bf16.msrb.mxu3 %v15003_v9 }
 0x37e   :  { %9908 = vmatpush.bf16.msrb.mxu0 %v16723_v5  ;;  %9874 = vmatmul.bf16.vlgmr.msra.gmra.mxu1 %v19481_v54  ;;  %v14046_v5 = vld [vmem:[#allocation6 + $0x150] sm:$0xf] }
 0x37f   :  { %9922 = vmatpush.bf16.msrb.mxu1 %v17043_v2  ;;  %9888 = vmatmul.bf16.vlgmr.msra.gmra.mxu2 %v19519_v6  ;;  %v16923_v2 = vor.u32 %v18716_v32, %v16920_v37  ;;  %v14047_v33 = vor.u32 %v18002_v52, %v14046_v5  ;;  %v16800_v32 = vld [vmem:[#allocation6 + $0x1700] sm:$0xf0]  ;;  %v19614_v37 = vpop.f32.mrf.mxu1  ;;  %v13926_v5 = vld [vmem:[#allocation6 + $0x60] sm:$0xf]  ;;  %v19616_v52 = vpop.f32.mrf.mxu2 }
 0x380   :  { %9936 = vmatpush.bf16.msrb.mxu2 %v14167_v41  ;;  %v18216_v41 = vld [vmem:[#allocation6 + $0x82c] sm:$0xf]  ;;  %20107 = vst [vmem:[#allocation40_spill] sm:$0xff] %v19614_v37  ;;  %v16803_v55 = vor.u32 %v18686_v17, %v16800_v32  ;;  %v18352_v17 = vld [vmem:[#allocation6 + $0xc64] sm:$0xf0] }
 0x381   :  { %9842 = vmatpush.bf16.msrb.mxu3 %v14963_v10  ;;  %20108 = vst [vmem:[#allocation16_spill] sm:$0xff] %v19616_v52  ;;  %v18676_v10 = vld [vmem:[#allocation6 + $0x168c] sm:$0xf]  ;;  %v14766_v32 = vld [vmem:[#allocation6 + $0x6f0] sm:$0xf] }
 0x382   :  { %9909 = vmatpush.bf16.msrb.mxu0 %v16683_v49  ;;  %v14920_v49 = vld [vmem:[#allocation6 + $0x850] sm:$0xf0]  ;;  %v13968_v52 = vld [vmem:[#allocation6 + $0xd8] sm:$0xf0]  ;;  %v18507_v37 = vld [vmem:[#allocation6 + $0x1144] sm:$0xf] }
 0x383   :  { %9923 = vmatpush.bf16.msrb.mxu1 %v17003_v8  ;;  %v18616_v8 = vld [vmem:[#allocation6 + $0x14ac] sm:$0xf]  ;;  %v14923_v63 = vor.u32 %v18216_v41, %v14920_v49  ;;  %v18192_v49 = vld [vmem:[#allocation6 + $0x764] sm:$0xf0] }
 0x384   :  { %9937 = vmatpush.bf16.msrb.mxu2 %v14127_v23  ;;  %v16523_v0 = vor.u32 %v18616_v8, %v16520_v31  ;;  %v14880_v23 = vld [vmem:[#allocation6 + $0x800] sm:$0xf0]  ;;  %v16403_v8 = vor.u32 %v18586_v13, %v16400_v34  ;;  %v9581_v31 = vpop.f32.mrf.mxu0  ;;  %v18566_v13 = vld [vmem:[#allocation6 + $0x131c] sm:$0xf]  ;;  %v15406_v34 = vld [vmem:[#allocation6 + $0xbf0] sm:$0xf] }
 0x385   :  { %9843 = vmatpush.bf16.msrb.mxu3 %v14923_v63  ;;  %v14883_v9 = vor.u32 %v18206_v29, %v14880_v23  ;;  %v9567_v63 = vpop.f32.mrf.mxu3 }
 0x386   :  { %9910 = vmatpush.bf16.msrb.mxu0 %v16643_v11  ;;  %v13966_v11 = vld [vmem:[#allocation6 + $0xb0] sm:$0xf] }
 0x387   :  { %9924 = vmatpush.bf16.msrb.mxu1 %v16963_v1  ;;  %v17982_v1 = vld [vmem:[#allocation6 + $0xd4] sm:$0xf0]  ;;  %v9595_v30 = vpop.f32.mrf.mxu1  ;;  %v9609_v60 = vpop.f32.mrf.mxu2 }
 0x388   :  { %9938 = vmatpush.bf16.msrb.mxu2 %v14087_v19  ;;  %v18196_v19 = vld [vmem:[#allocation6 + $0x78c] sm:$0xf]  ;;  %v13967_v45 = vor.u32 %v17982_v1, %v13966_v11  ;;  %v9568_v11 = vadd.f32 %v9567_v63, %v19596_v61  ;;  %v16360_v1 = vld [vmem:[#allocation6 + $0x1390] sm:$0xf0]  ;;  %v15447_v61 = vor.u32 %v18352_v17, %v15446_v57  ;;  %v18242_v57 = vld [vmem:[#allocation6 + $0x8f4] sm:$0xf0] }
 0x389   :  { %9844 = vmatpush.bf16.msrb.mxu3 %v14883_v9  ;;  %v18182_v9 = vld [vmem:[#allocation6 + $0x714] sm:$0xf0]  ;;  %v16280_v63 = vld [vmem:[#allocation6 + $0x12f0] sm:$0xf0] }
 0x38a   :  { %9911 = vmatpush.bf16.msrb.mxu0 %v16603_v56  ;;  %v14840_v56 = vld [vmem:[#allocation6 + $0x7b0] sm:$0xf0] }
 0x38b   :  { %9925 = vmatpush.bf16.msrb.mxu1 %v16923_v2  ;;  %v17972_v2 = vld [vmem:[#allocation6 + $0x84] sm:$0xf0]  ;;  %v14843_v41 = vor.u32 %v18196_v19, %v14840_v56  ;;  %v9582_v19 = vadd.f32 %v9581_v31, %v9568_v11  ;;  %v15086_v56 = vld [vmem:[#allocation6 + $0x970] sm:$0xf] }
 0x38c   :  { %9939 = vmatpush.bf16.msrb.mxu2 %v14047_v33  ;;  %v16760_v33 = vld [vmem:[#allocation6 + $0x16b0] sm:$0xf0]  ;;  %v13927_v27 = vor.u32 %v17972_v2, %v13926_v5  ;;  %v14767_v2 = vor.u32 %v18182_v9, %v14766_v32  ;;  %v14686_v11 = vld [vmem:[#allocation6 + $0x650] sm:$0xf] }
 0x38d   :  { %v16763_v42 = vor.u32 %v18676_v10, %v16760_v33  ;;  %9845 = vmatpush.bf16.msrb.mxu3 %v14843_v41  ;;  %v9596_v26 = vadd.f32 %v9595_v30, %v9582_v19  ;;  %v18342_v33 = vld [vmem:[#allocation6 + $0xc14] sm:$0xf0]  ;;  %v18172_v41 = vld [vmem:[#allocation6 + $0x6c4] sm:$0xf0]  ;;  %v18546_v19 = vld [vmem:[#allocation6 + $0x127c] sm:$0xf] }
 0x38e   :  { %9912 = vmatpush.bf16.msrb.mxu0 %v16563_v50  ;;  %v14806_v50 = vld [vmem:[#allocation6 + $0x740] sm:$0xf]  ;;  %v15407_v31 = vor.u32 %v18342_v33, %v15406_v34  ;;  %v18536_v33 = vld [vmem:[#allocation6 + $0x122c] sm:$0xf] }
 0x38f   :  { %9926 = vmatpush.bf16.msrb.mxu1 %v16883_v25  ;;  %v18272_v25 = vld [vmem:[#allocation6 + $0x9e4] sm:$0xf0]  ;;  %v14807_v29 = vor.u32 %v18192_v49, %v14806_v50  ;;  %v14726_v50 = vld [vmem:[#allocation6 + $0x6a0] sm:$0xf]  ;;  %v19627_v30 = vpop.f32.mrf.mxu1 }
 0x390   :  { %9940 = vmatpush.bf16.msrb.mxu2 %v14007_v20  ;;  %v13886_v20 = vld [vmem:[#allocation6 + $0x10] sm:$0xf]  ;;  %v15127_v23 = vor.u32 %v18272_v25, %v15126_v18  ;;  %9846 = vmatmul.bf16.vlgmr.msrb.gmra.mxu3 %v19470_v38  ;;  %v15046_v49 = vld [vmem:[#allocation6 + $0x920] sm:$0xf]  ;;  %v18252_v18 = vld [vmem:[#allocation6 + $0x944] sm:$0xf0]  ;;  %v9610_v25 = vadd.f32 %v9609_v60, %v9596_v26 }
 0x391   :  { %9894 = vmatpush.bf16.msra.mxu3 %v16403_v8  ;;  %v19622_v8 = vpop.f32.mrf.mxu3  ;;  %20111 = vst [vmem:[#allocation37_spill] sm:$0xff] %v19627_v30  ;;  %v18422_v30 = vld [vmem:[#allocation6 + $0xe94] sm:$0xf0] }
 0x392   :  { %9913 = vmatpush.bf16.msrb.mxu0 %v16523_v0  ;;  %v17962_v0 = vld [vmem:[#allocation6 + $0x34] sm:$0xf0]  ;;  %20109 = vst [vmem:[#allocation20_spill] sm:$0xff] %v19622_v8 }
 0x393   :  { %9927 = vmatpush.bf16.msrb.mxu1 %v16843_v3  ;;  %v18576_v3 = vld [vmem:[#allocation6 + $0x136c] sm:$0xf] }
 0x394   :  { %9941 = vmatpush.bf16.msrb.mxu2 %v13967_v45  ;;  %v18262_v45 = vld [vmem:[#allocation6 + $0x994] sm:$0xf0]  ;;  %v16363_v5 = vor.u32 %v18576_v3, %v16360_v1  ;;  %v15006_v1 = vld [vmem:[#allocation6 + $0x8d0] sm:$0xf] }
 0x395   :  { %v15087_v10 = vor.u32 %v18262_v45, %v15086_v56  ;;  %v18162_v3 = vld [vmem:[#allocation6 + $0x674] sm:$0xf0]  ;;  %v16240_v56 = vld [vmem:[#allocation6 + $0x12a0] sm:$0xf0]  ;;  %v15326_v45 = vld [vmem:[#allocation6 + $0xb50] sm:$0xf] }
 0x396   :  { %9914 = vmatpush.bf16.msrb.mxu0 %v16483_v7  ;;  %v13887_v7 = vor.u32 %v17962_v0, %v13886_v20  ;;  %9895 = vmatpush.bf16.msra.mxu3 %v16363_v5  ;;  %v15366_v20 = vld [vmem:[#allocation6 + $0xba0] sm:$0xf]  ;;  %v19624_v0 = vpop.f32.mrf.mxu0  ;;  %v14687_v9 = vor.u32 %v18162_v3, %v14686_v11  ;;  %v18322_v5 = vld [vmem:[#allocation6 + $0xb74] sm:$0xf0]  ;;  %v16243_v34 = vor.u32 %v18546_v19, %v16240_v56 }
 0x397   :  { %9928 = vmatpush.bf16.msrb.mxu1 %v16803_v55  ;;  %v16320_v55 = vld [vmem:[#allocation6 + $0x1340] sm:$0xf0]  ;;  %20110 = vst [vmem:[#allocation28_spill] sm:$0xff] %v19624_v0  ;;  %v15327_v26 = vor.u32 %v18322_v5, %v15326_v45  ;;  %v18302_v56 = vld [vmem:[#allocation6 + $0xad4] sm:$0xf0] }
 0x398   :  { %9942 = vmatpush.bf16.msrb.mxu2 %v13927_v27  ;;  %v16323_v27 = vor.u32 %v18566_v13, %v16320_v55  ;;  %v14966_v13 = vld [vmem:[#allocation6 + $0x880] sm:$0xf]  ;;  %v18232_v55 = vld [vmem:[#allocation6 + $0x8a4] sm:$0xf0]  ;;  %v18187_v0 = vld [vmem:[#allocation6 + $0x744] sm:$0xf] }
 0x399   :  { %v14566_v45 = vld [vmem:[#allocation6 + $0x560] sm:$0xf] }
 0x39a   :  { %9915 = vmatpush.bf16.msrb.mxu0 %v16443_v4  ;;  %v14727_v4 = vor.u32 %v18172_v41, %v14726_v50  ;;  %9896 = vmatpush.bf16.msra.mxu3 %v16323_v27  ;;  %v16200_v50 = vld [vmem:[#allocation6 + $0x1250] sm:$0xf0]  ;;  %v15286_v41 = vld [vmem:[#allocation6 + $0xb00] sm:$0xf] }
 0x39b   :  { %9929 = vmatpush.bf16.msrb.mxu1 %v16763_v42  ;;  %v18556_v42 = vld [vmem:[#allocation6 + $0x12cc] sm:$0xf]  ;;  %v16203_v3 = vor.u32 %v18536_v33, %v16200_v50  ;;  %v14886_v5 = vld [vmem:[#allocation6 + $0x7e0] sm:$0xf] }
 0x39c   :  { %9943 = vmatpush.bf16.msrb.mxu2 %v13887_v7  ;;  %v16283_v17 = vor.u32 %v18556_v42, %v16280_v63  ;;  %v15007_v7 = vor.u32 %v18242_v57, %v15006_v1  ;;  %v18142_v42 = vld [vmem:[#allocation6 + $0x5d4] sm:$0xf0]  ;;  %v14926_v63 = vld [vmem:[#allocation6 + $0x830] sm:$0xf]  ;;  %v14486_v33 = vld [vmem:[#allocation6 + $0x4c0] sm:$0xf] }
 0x39d   :  { %9916 = vmatmul.bf16.vlgmr.msrb.gmra.mxu0 %v19529_v51 }
 0x39e   :  { %9964 = vmatpush.bf16.msra.mxu0 %v14807_v29  ;;  %9930 = vmatmul.bf16.vlgmr.msrb.gmra.mxu1 %v19549_v14  ;;  %v15047_v29 = vor.u32 %v18252_v18, %v15046_v49  ;;  %v9637_v49 = vpop.f32.mrf.mxu0  ;;  %v14967_v18 = vor.u32 %v18232_v55, %v14966_v13  ;;  %v18516_v13 = vld [vmem:[#allocation6 + $0x118c] sm:$0xf]  ;;  %v16120_v55 = vld [vmem:[#allocation6 + $0x11b0] sm:$0xf0] }
 0x39f   :  { %9978 = vmatpush.bf16.msra.mxu1 %v15127_v23  ;;  %v18332_v23 = vld [vmem:[#allocation6 + $0xbc4] sm:$0xf0]  ;;  %9944 = vmatmul.bf16.vlgmr.msrb.gmra.mxu2 %v19386_v36 }
 0x3a0   :  { %9992 = vmatpush.bf16.msra.mxu2 %v15447_v61  ;;  %v15367_v32 = vor.u32 %v18332_v23, %v15366_v20  ;;  %v14646_v61 = vld [vmem:[#allocation6 + $0x600] sm:$0xf]  ;;  %9897 = vmatpush.bf16.msra.mxu3 %v16283_v17  ;;  %v18222_v20 = vld [vmem:[#allocation6 + $0x854] sm:$0xf0]  ;;  %v9651_v23 = vpop.f32.mrf.mxu1  ;;  %v18526_v17 = vld [vmem:[#allocation6 + $0x11dc] sm:$0xf] }
 0x3a1   :  { %v14927_v19 = vor.u32 %v18222_v20, %v14926_v63  ;;  %v16123_v20 = vor.u32 %v18516_v13, %v16120_v55  ;;  %v18672_v13 = vld [vmem:[#allocation6 + $0x1664] sm:$0xf0]  ;;  %v16046_v55 = vld [vmem:[#allocation6 + $0x10f0] sm:$0xf] }
 0x3a2   :  { %9965 = vmatpush.bf16.msra.mxu0 %v14767_v2  ;;  %v18152_v2 = vld [vmem:[#allocation6 + $0x624] sm:$0xf0] }
 0x3a3   :  { %9979 = vmatpush.bf16.msra.mxu1 %v15087_v10  ;;  %v14647_v60 = vor.u32 %v18152_v2, %v14646_v61  ;;  %v9623_v10 = vpop.f32.mrf.mxu3  ;;  %v18212_v61 = vld [vmem:[#allocation6 + $0x804] sm:$0xf0] }
 0x3a4   :  { %9993 = vmatpush.bf16.msra.mxu2 %v15407_v31  ;;  %v9624_v27 = vadd.f32 %v9623_v10, %v9610_v25  ;;  %v18312_v31 = vld [vmem:[#allocation6 + $0xb24] sm:$0xf0]  ;;  %9898 = vmatpush.bf16.msra.mxu3 %v16243_v34  ;;  %v14887_v50 = vor.u32 %v18212_v61, %v14886_v5  ;;  %v14446_v5 = vld [vmem:[#allocation6 + $0x470] sm:$0xf]  ;;  %v18102_v61 = vld [vmem:[#allocation6 + $0x494] sm:$0xf0] }
 0x3a5   :  { %v15287_v1 = vor.u32 %v18312_v31, %v15286_v41  ;;  %v18292_v10 = vld [vmem:[#allocation6 + $0xa84] sm:$0xf0]  ;;  %v18202_v31 = vld [vmem:[#allocation6 + $0x7b4] sm:$0xf0] }
 0x3a6   :  { %9966 = vmatpush.bf16.msra.mxu0 %v14727_v4  ;;  %v14606_v4 = vld [vmem:[#allocation6 + $0x5b0] sm:$0xf]  ;;  %v9638_v11 = vadd.f32 %v9637_v49, %v9624_v27  ;;  %v18112_v41 = vld [vmem:[#allocation6 + $0x4e4] sm:$0xf0] }
 0x3a7   :  { %9980 = vmatpush.bf16.msra.mxu1 %v15047_v29  ;;  %v19629_v29 = vpop.f32.mrf.mxu2  ;;  %v14607_v57 = vor.u32 %v18142_v42, %v14606_v4  ;;  %v14526_v49 = vld [vmem:[#allocation6 + $0x510] sm:$0xf]  ;;  %v16086_v4 = vld [vmem:[#allocation6 + $0x1140] sm:$0xf]  ;;  %v19633_v42 = vpop.f32.mrf.mxu0 }
 0x3a8   :  { %9994 = vmatpush.bf16.msra.mxu2 %v15367_v32  ;;  %20112 = vst [vmem:[#allocation41_spill] sm:$0xff] %v19629_v29  ;;  %v16160_v32 = vld [vmem:[#allocation6 + $0x1200] sm:$0xf0]  ;;  %v19631_v25 = vadd.f32 %v9651_v23, %v9638_v11  ;;  %9899 = vmatpush.bf16.msra.mxu3 %v16203_v3  ;;  %v14846_v27 = vld [vmem:[#allocation6 + $0x790] sm:$0xf] }
 0x3a9   :  { %v16163_v2 = vor.u32 %v18526_v17, %v16160_v32  ;;  %20114 = vst [vmem:[#allocation18_spill] sm:$0xff] %v19633_v42  ;;  %v18512_v23 = vld [vmem:[#allocation6 + $0x1164] sm:$0xf0]  ;;  %v16406_v11 = vld [vmem:[#allocation6 + $0x13c0] sm:$0xf]  ;;  %v19637_v17 = vpop.f32.mrf.mxu1 }
 0x3aa   :  { %9967 = vmatpush.bf16.msra.mxu0 %v14687_v9  ;;  %v15246_v9 = vld [vmem:[#allocation6 + $0xab0] sm:$0xf]  ;;  %20113 = vst [vmem:[#allocation22_spill] sm:$0xff] %v19631_v25  ;;  %v18592_v3 = vld [vmem:[#allocation6 + $0x13e4] sm:$0xf0] }
 0x3ab   :  { %9981 = vmatpush.bf16.msra.mxu1 %v15007_v7  ;;  %v18132_v7 = vld [vmem:[#allocation6 + $0x584] sm:$0xf0]  ;;  %v15247_v34 = vor.u32 %v18302_v56, %v15246_v9  ;;  %20115 = vst [vmem:[#allocation29_spill] sm:$0xff] %v19637_v17  ;;  %v14847_v9 = vor.u32 %v18202_v31, %v14846_v27  ;;  %v18282_v56 = vld [vmem:[#allocation6 + $0xa34] sm:$0xf0] }
 0x3ac   :  { %9995 = vmatpush.bf16.msra.mxu2 %v15327_v26  ;;  %v14567_v26 = vor.u32 %v18132_v7, %v14566_v45  ;;  %9900 = vmatpush.bf16.msra.mxu3 %v16163_v2  ;;  %v16087_v45 = vor.u32 %v18512_v23, %v16086_v4  ;;  %v16407_v7 = vor.u32 %v18592_v3, %v16406_v11  ;;  %v16726_v2 = vld [vmem:[#allocation6 + $0x1640] sm:$0xf]  ;;  %v18662_v4 = vld [vmem:[#allocation6 + $0x1614] sm:$0xf0]  ;;  %v18492_v23 = vld [vmem:[#allocation6 + $0x10c4] sm:$0xf0] }
 0x3ad   :  { %v16326_v11 = vld [vmem:[#allocation6 + $0x1320] sm:$0xf]  ;;  %v18572_v3 = vld [vmem:[#allocation6 + $0x1344] sm:$0xf0]  ;;  %v16206_v17 = vld [vmem:[#allocation6 + $0x1230] sm:$0xf] }
 0x3ae   :  { %9968 = vmatpush.bf16.msra.mxu0 %v14647_v60  ;;  %v15206_v60 = vld [vmem:[#allocation6 + $0xa60] sm:$0xf]  ;;  %v18632_v25 = vld [vmem:[#allocation6 + $0x1524] sm:$0xf0]  ;;  %v18542_v42 = vld [vmem:[#allocation6 + $0x1254] sm:$0xf0] }
 0x3af   :  { %9982 = vmatpush.bf16.msra.mxu1 %v14967_v18  ;;  %v18122_v18 = vld [vmem:[#allocation6 + $0x534] sm:$0xf0]  ;;  %v19635_v63 = vpop.f32.mrf.mxu2  ;;  %v19639_v27 = vpop.f32.mrf.mxu0  ;;  %v15726_v29 = vld [vmem:[#allocation6 + $0xe70] sm:$0xf] }
 0x3b0   :  { %9996 = vmatpush.bf16.msra.mxu2 %v15287_v1  ;;  %v15207_v1 = vor.u32 %v18292_v10, %v15206_v60  ;;  %v14527_v32 = vor.u32 %v18122_v18, %v14526_v49  ;;  %9901 = vmatpush.bf16.msra.mxu3 %v16123_v20  ;;  %v14447_v10 = vor.u32 %v18102_v61, %v14446_v5  ;;  %v18092_v49 = vld [vmem:[#allocation6 + $0x444] sm:$0xf0]  ;;  %v16686_v18 = vld [vmem:[#allocation6 + $0x15f0] sm:$0xf]  ;;  %v16006_v20 = vld [vmem:[#allocation6 + $0x10a0] sm:$0xf] }
 0x3b1   :  { %v16327_v5 = vor.u32 %v18572_v3, %v16326_v11  ;;  %v18652_v61 = vld [vmem:[#allocation6 + $0x15c4] sm:$0xf0]  ;;  %v16246_v11 = vld [vmem:[#allocation6 + $0x1280] sm:$0xf] }
 0x3b2   :  { %9969 = vmatpush.bf16.msra.mxu0 %v14607_v57  ;;  %v14487_v57 = vor.u32 %v18112_v41, %v14486_v33  ;;  %v16727_v33 = vor.u32 %v18672_v13, %v16726_v2  ;;  %v14406_v41 = vld [vmem:[#allocation6 + $0x420] sm:$0xf]  ;;  %v15966_v2 = vld [vmem:[#allocation6 + $0x1050] sm:$0xf]  ;;  %v18482_v13 = vld [vmem:[#allocation6 + $0x1074] sm:$0xf0] }
 0x3b3   :  { %9983 = vmatpush.bf16.msra.mxu1 %v14927_v19  ;;  %v15166_v19 = vld [vmem:[#allocation6 + $0xa10] sm:$0xf]  ;;  %9902 = vmatmul.bf16.vlgmr.msra.gmra.mxu3 %v19521_v44  ;;  %v18552_v3 = vld [vmem:[#allocation6 + $0x12a4] sm:$0xf0] }
 0x3b4   :  { %9997 = vmatpush.bf16.msra.mxu2 %v15247_v34  ;;  %9950 = vmatpush.bf16.msrb.mxu3 %v14487_v57  ;;  %v16366_v34 = vld [vmem:[#allocation6 + $0x1370] sm:$0xf]  ;;  %v15167_v60 = vor.u32 %v18282_v56, %v15166_v19  ;;  %v14407_v57 = vor.u32 %v18092_v49, %v14406_v41  ;;  %v16007_v19 = vor.u32 %v18492_v23, %v16006_v20  ;;  %v14326_v41 = vld [vmem:[#allocation6 + $0x380] sm:$0xf]  ;;  %v18072_v49 = vld [vmem:[#allocation6 + $0x3a4] sm:$0xf0] }
 0x3b5   :  { %v14366_v56 = vld [vmem:[#allocation6 + $0x3d0] sm:$0xf]  ;;  %v15926_v20 = vld [vmem:[#allocation6 + $0x1000] sm:$0xf]  ;;  %v18472_v23 = vld [vmem:[#allocation6 + $0x1024] sm:$0xf0] }
 0x3b6   :  { %9970 = vmatpush.bf16.msra.mxu0 %v14567_v26  ;;  %v18582_v26 = vld [vmem:[#allocation6 + $0x1394] sm:$0xf0] }
 0x3b7   :  { %9984 = vmatpush.bf16.msra.mxu1 %v14887_v50  ;;  %v16047_v50 = vor.u32 %v18502_v59, %v16046_v55  ;;  %v16367_v31 = vor.u32 %v18582_v26, %v16366_v34  ;;  %v19646_v59 = vpop.f32.mrf.mxu1  ;;  %v16286_v55 = vld [vmem:[#allocation6 + $0x12d0] sm:$0xf]  ;;  %v18562_v34 = vld [vmem:[#allocation6 + $0x12f4] sm:$0xf0]  ;;  %v19651_v26 = vld [vmem:[#allocation7] sm:$0xff] }
 0x3b8   :  { %9998 = vmatpush.bf16.msra.mxu2 %v15207_v1  ;;  %v19644_v1 = vpop.f32.mrf.mxu2  ;;  %9951 = vmatpush.bf16.msrb.mxu3 %v14447_v10 }
 0x3ba   :  { %9971 = vmatpush.bf16.msra.mxu0 %v14527_v32  ;;  %v19648_v32 = vpop.f32.mrf.mxu3 }
 0x3bb   :  { %9985 = vmatpush.bf16.msra.mxu1 %v14847_v9  ;;  %20116 = vst [vmem:[#allocation38_spill] sm:$0xff] %v19648_v32  ;;  %v16687_v9 = vor.u32 %v18662_v4, %v16686_v18  ;;  %v16606_v18 = vld [vmem:[#allocation6 + $0x1550] sm:$0xf]  ;;  %v18642_v4 = vld [vmem:[#allocation6 + $0x1574] sm:$0xf0] }
 0x3bc   :  { %9999 = vmatpush.bf16.msra.mxu2 %v15167_v60  ;;  %v20044_v60 = vperm.slane %v19651_v26, 2  ;;  %9952 = vmatpush.bf16.msrb.mxu3 %v14407_v57  ;;  %v19657_v57 = vpop.f32.mrf.mxu0 }
 0x3bd   :  { %9972 = vmatmul.bf16.vlgmr.msra.gmra.mxu0 %v19468_v15 }
 0x3be   :  { %10020 = vmatpush.bf16.msrb.mxu0 %v16087_v45  ;;  %9986 = vmatmul.bf16.vlgmr.msra.gmra.mxu1 %v19470_v38  ;;  %v18082_v45 = vld [vmem:[#allocation6 + $0x3f4] sm:$0xf0]  ;;  %v9666_v48 = vadd.f32 %v19635_v63, %v20044_v60  ;;  %v15886_v63 = vld [vmem:[#allocation6 + $0xfb0] sm:$0xf] }
 0x3bf   :  { %10034 = vmatpush.bf16.msrb.mxu1 %v16407_v7  ;;  %v16646_v7 = vld [vmem:[#allocation6 + $0x15a0] sm:$0xf]  ;;  %10000 = vmatmul.bf16.vlgmr.msra.gmra.mxu2 %v19474_v12  ;;  %v14367_v10 = vor.u32 %v18082_v45, %v14366_v56  ;;  %v16607_v56 = vor.u32 %v18642_v4, %v16606_v18  ;;  %v18462_v60 = vld [vmem:[#allocation6 + $0xfd4] sm:$0xf0]  ;;  %v18052_v18 = vld [vmem:[#allocation6 + $0x304] sm:$0xf0] }
 0x3c0   :  { %10048 = vmatpush.bf16.msrb.mxu2 %v16727_v33  ;;  %v16647_v33 = vor.u32 %v18652_v61, %v16646_v7  ;;  %v15927_v7 = vor.u32 %v18472_v23, %v15926_v20  ;;  %v18062_v61 = vld [vmem:[#allocation6 + $0x354] sm:$0xf0]  ;;  %v16526_v4 = vld [vmem:[#allocation6 + $0x14b0] sm:$0xf]  ;;  %v15846_v20 = vld [vmem:[#allocation6 + $0xf60] sm:$0xf] }
 0x3c1   :  { %9953 = vmatpush.bf16.msrb.mxu3 %v14367_v10  ;;  %v18452_v23 = vld [vmem:[#allocation6 + $0xf84] sm:$0xf0] }
 0x3c2   :  { %10021 = vmatpush.bf16.msrb.mxu0 %v16047_v50  ;;  %v15967_v50 = vor.u32 %v18482_v13, %v15966_v2  ;;  %v9679_v45 = vpop.f32.mrf.mxu3  ;;  %v16566_v2 = vld [vmem:[#allocation6 + $0x1500] sm:$0xf]  ;;  %v19659_v13 = vpop.f32.mrf.mxu1 }
 0x3c3   :  { %10035 = vmatpush.bf16.msrb.mxu1 %v16367_v31  ;;  %v16287_v31 = vor.u32 %v18562_v34, %v16286_v55  ;;  %20117 = vst [vmem:[#allocation23_spill] sm:$0xff] %v19659_v13  ;;  %v9680_v55 = vadd.f32 %v9679_v45, %v9666_v48  ;;  %v16247_v34 = vor.u32 %v18552_v3, %v16246_v11  ;;  %v18622_v48 = vld [vmem:[#allocation6 + $0x14d4] sm:$0xf0]  ;;  %v16166_v3 = vld [vmem:[#allocation6 + $0x11e0] sm:$0xf] }
 0x3c4   :  { %10049 = vmatpush.bf16.msrb.mxu2 %v16687_v9  ;;  %v9721_v9 = vpop.f32.mrf.mxu2  ;;  %v18532_v45 = vld [vmem:[#allocation6 + $0x1204] sm:$0xf0]  ;;  %v18188_v13 = vld [vmem:[#allocation6 + $0x74c] sm:$0xf] }
 0x3c5   :  { %v9694_v10 = vadd.f32 %v19639_v27, %v9680_v55  ;;  %v16167_v55 = vor.u32 %v18532_v45, %v16166_v3  ;;  %v18602_v3 = vld [vmem:[#allocation6 + $0x1434] sm:$0xf0] }
 0x3c6   :  { %10022 = vmatpush.bf16.msrb.mxu0 %v16007_v19  ;;  %v14327_v19 = vor.u32 %v18072_v49, %v14326_v41  ;;  %v15887_v41 = vor.u32 %v18462_v60, %v15886_v63  ;;  %v14246_v49 = vld [vmem:[#allocation6 + $0x2e0] sm:$0xf]  ;;  %v16527_v60 = vor.u32 %v18622_v48, %v16526_v4  ;;  %v15806_v63 = vld [vmem:[#allocation6 + $0xf10] sm:$0xf]  ;;  %v14488_v4 = vld [vmem:[#allocation6 + $0x4e8] sm:$0xf0] }
 0x3c7   :  { %10036 = vmatpush.bf16.msrb.mxu1 %v16327_v5  ;;  %v14286_v5 = vld [vmem:[#allocation6 + $0x330] sm:$0xf]  ;;  %v9708_v11 = vadd.f32 %v19646_v59, %v9694_v10  ;;  %v14247_v27 = vor.u32 %v18052_v18, %v14246_v49  ;;  %v18442_v10 = vld [vmem:[#allocation6 + $0xf34] sm:$0xf0]  ;;  %v18107_v18 = vld [vmem:[#allocation6 + $0x4c4] sm:$0xf] }
 0x3c8   :  { %10050 = vmatpush.bf16.msrb.mxu2 %v16647_v33  ;;  %9954 = vmatpush.bf16.msrb.mxu3 %v14327_v19  ;;  %v14287_v33 = vor.u32 %v18062_v61, %v14286_v5  ;;  %v19663_v19 = vpop.f32.mrf.mxu0  ;;  %v15847_v5 = vor.u32 %v18452_v23, %v15846_v20  ;;  %v15766_v61 = vld [vmem:[#allocation6 + $0xec0] sm:$0xf]  ;;  %v18522_v49 = vld [vmem:[#allocation6 + $0x11b4] sm:$0xf0]  ;;  %v15807_v23 = vor.u32 %v18442_v10, %v15806_v63 }
 0x3c9   :  { %v14491_v32 = vor.u32 %v18107_v18, %v14488_v4  ;;  %v15686_v10 = vld [vmem:[#allocation6 + $0xe20] sm:$0xf]  ;;  %v18007_v18 = vld [vmem:[#allocation6 + $0x1a4] sm:$0xf]  ;;  %v14088_v4 = vld [vmem:[#allocation6 + $0x1c8] sm:$0xf0] }
 0x3ca   :  { %10023 = vmatpush.bf16.msrb.mxu0 %v15967_v50  ;;  %v16567_v50 = vor.u32 %v18632_v25, %v16566_v2  ;;  %v19665_v25 = vadd.f32 %v9721_v9, %v9708_v11  ;;  %v19669_v59 = vpop.f32.mrf.mxu1  ;;  %v18027_v9 = vld [vmem:[#allocation6 + $0x244] sm:$0xf] }
 0x3cb   :  { %10037 = vmatpush.bf16.msrb.mxu1 %v16287_v31  ;;  %v16207_v31 = vor.u32 %v18542_v42, %v16206_v17  ;;  %v16486_v42 = vld [vmem:[#allocation6 + $0x1460] sm:$0xf]  ;;  %v18612_v17 = vld [vmem:[#allocation6 + $0x1484] sm:$0xf0] }
 0x3cc   :  { %10051 = vmatpush.bf16.msrb.mxu2 %v16607_v56  ;;  %9955 = vmatpush.bf16.msrb.mxu3 %v14287_v33  ;;  %v14206_v56 = vld [vmem:[#allocation6 + $0x290] sm:$0xf]  ;;  %v19667_v2 = vpop.f32.mrf.mxu2  ;;  %v16487_v48 = vor.u32 %v18612_v17, %v16486_v42 }
 0x3cd   :  { %20118 = vst [vmem:[#allocation33_spill] sm:$0xff] %v19667_v2  ;;  %v16126_v33 = vld [vmem:[#allocation6 + $0x1190] sm:$0xf]  ;;  %v18503_v2 = vld [vmem:[#allocation6 + $0x111c] sm:$0xf0] }
 0x3ce   :  { %10024 = vmatpush.bf16.msrb.mxu0 %v15927_v7  ;;  %v18042_v7 = vld [vmem:[#allocation6 + $0x2b4] sm:$0xf0]  ;;  %v16127_v11 = vor.u32 %v18522_v49, %v16126_v33  ;;  %v18412_v33 = vld [vmem:[#allocation6 + $0xe44] sm:$0xf0]  ;;  %v18177_v49 = vld [vmem:[#allocation6 + $0x6f4] sm:$0xf] }
 0x3cf   :  { %10038 = vmatpush.bf16.msrb.mxu1 %v16247_v34  ;;  %v18432_v34 = vld [vmem:[#allocation6 + $0xee4] sm:$0xf0] }
 0x3d0   :  { %10052 = vmatpush.bf16.msrb.mxu2 %v16567_v50  ;;  %9956 = vmatpush.bf16.msrb.mxu3 %v14247_v27  ;;  %v14207_v50 = vor.u32 %v18042_v7, %v14206_v56  ;;  %v15767_v20 = vor.u32 %v18432_v34, %v15766_v61  ;;  %v14808_v27 = vld [vmem:[#allocation6 + $0x768] sm:$0xf0]  ;;  %v18017_v56 = vld [vmem:[#allocation6 + $0x1f4] sm:$0xf]  ;;  %v14128_v7 = vld [vmem:[#allocation6 + $0x218] sm:$0xf0]  ;;  %v19671_v42 = vpop.f32.mrf.mxu0 }
 0x3d1   :  { %20119 = vst [vmem:[#allocation19_spill] sm:$0xff] %v19671_v42  ;;  %v14811_v34 = vor.u32 %v18187_v0, %v14808_v27  ;;  %v14131_v63 = vor.u32 %v18017_v56, %v14128_v7  ;;  %v15687_v0 = vor.u32 %v18412_v33, %v15686_v10  ;;  %v14728_v27 = vld [vmem:[#allocation6 + $0x6c8] sm:$0xf0]  ;;  %v17997_v56 = vld [vmem:[#allocation6 + $0x154] sm:$0xf] }
 0x3d2   :  { %10025 = vmatpush.bf16.msrb.mxu0 %v15887_v41  ;;  %v14168_v41 = vld [vmem:[#allocation6 + $0x268] sm:$0xf0]  ;;  %v14048_v7 = vld [vmem:[#allocation6 + $0x178] sm:$0xf0]  ;;  %v15606_v33 = vld [vmem:[#allocation6 + $0xd80] sm:$0xf] }
 0x3d3   :  { %10039 = vmatpush.bf16.msrb.mxu1 %v16207_v31  ;;  %v16446_v31 = vld [vmem:[#allocation6 + $0x1410] sm:$0xf]  ;;  %v14171_v45 = vor.u32 %v18027_v9, %v14168_v41  ;;  %v19675_v9 = vpop.f32.mrf.mxu1  ;;  %v14768_v41 = vld [vmem:[#allocation6 + $0x718] sm:$0xf0]  ;;  %v14051_v10 = vor.u32 %v17997_v56, %v14048_v7  ;;  %v18382_v7 = vld [vmem:[#allocation6 + $0xd54] sm:$0xf0] }
 0x3d4   :  { %10053 = vmatpush.bf16.msrb.mxu2 %v16527_v60  ;;  %9957 = vmatpush.bf16.msrb.mxu3 %v14207_v50  ;;  %v18097_v60 = vld [vmem:[#allocation6 + $0x474] sm:$0xf]  ;;  %v19673_v17 = vpop.f32.mrf.mxu2  ;;  %v16447_v61 = vor.u32 %v18602_v3, %v16446_v31  ;;  %20120 = vst [vmem:[#allocation26_spill] sm:$0xff] %v19675_v9  ;;  %v18402_v31 = vld [vmem:[#allocation6 + $0xdf4] sm:$0xf0] }
 0x3d5   :  { %v18167_v3 = vld [vmem:[#allocation6 + $0x6a4] sm:$0xf]  ;;  %v15566_v56 = vld [vmem:[#allocation6 + $0xd30] sm:$0xf]  ;;  %v15454_v9 = vld [vmem:[#allocation6 + $0xc48] sm:$0xf] }
 0x3d6   :  { %10026 = vmatpush.bf16.msrb.mxu0 %v15847_v5  ;;  %v14448_v5 = vld [vmem:[#allocation6 + $0x498] sm:$0xf0]  ;;  %v14894_v42 = vld [vmem:[#allocation6 + $0x7e8] sm:$0xf] }
 0x3d7   :  { %10040 = vmatpush.bf16.msrb.mxu1 %v16167_v55  ;;  %v15727_v55 = vor.u32 %v18422_v30, %v15726_v29  ;;  %9958 = vmatmul.bf16.vlgmr.msrb.gmra.mxu3 %v19402_v58  ;;  %v14451_v50 = vor.u32 %v18097_v60, %v14448_v5  ;;  %v18087_v30 = vld [vmem:[#allocation6 + $0x424] sm:$0xf]  ;;  %v14408_v29 = vld [vmem:[#allocation6 + $0x448] sm:$0xf0]  ;;  %v18077_v60 = vld [vmem:[#allocation6 + $0x3d4] sm:$0xf] }
 0x3d8   :  { %10054 = vmatpush.bf16.msrb.mxu2 %v16487_v48  ;;  %10006 = vmatpush.bf16.msra.mxu3 %v15767_v20  ;;  %v19681_v48 = vpop.f32.mrf.mxu3  ;;  %v14771_v20 = vor.u32 %v18177_v49, %v14768_v41  ;;  %v14368_v5 = vld [vmem:[#allocation6 + $0x3f8] sm:$0xf0]  ;;  %v18392_v49 = vld [vmem:[#allocation6 + $0xda4] sm:$0xf0] }
 0x3da   :  { %10027 = vmatpush.bf16.msrb.mxu0 %v15807_v23  ;;  %v14091_v23 = vor.u32 %v18007_v18, %v14088_v4  ;;  %v14371_v4 = vor.u32 %v18077_v60, %v14368_v5  ;;  %v14648_v5 = vld [vmem:[#allocation6 + $0x628] sm:$0xf0] }
 0x3db   :  { %10041 = vmatpush.bf16.msrb.mxu1 %v16127_v11  ;;  %v15646_v11 = vld [vmem:[#allocation6 + $0xdd0] sm:$0xf]  ;;  %v9819_v18 = vpop.f32.mrf.mxu1 }
 0x3dc   :  { %10055 = vmatpush.bf16.msrb.mxu2 %v16447_v61  ;;  %10007 = vmatpush.bf16.msra.mxu3 %v15727_v55  ;;  %v9805_v61 = vpop.f32.mrf.mxu0  ;;  %v15647_v55 = vor.u32 %v18402_v31, %v15646_v11  ;;  %v19686_v41 = vpop.f32.mrf.mxu2  ;;  %v18067_v11 = vld [vmem:[#allocation6 + $0x384] sm:$0xf] }
 0x3dd   :  { %10028 = vmatmul.bf16.vlgmr.msrb.gmra.mxu0 %v19519_v6  ;;  %20121 = vst [vmem:[#allocation30_spill] sm:$0xff] %v19686_v41  ;;  %v16808_v41 = vld [vmem:[#allocation6 + $0x1708] sm:$0xf0] }
 0x3de   :  { %10076 = vmatpush.bf16.msra.mxu0 %v14171_v45  ;;  %10042 = vmatmul.bf16.vlgmr.msrb.gmra.mxu1 %v19521_v44  ;;  %v14411_v45 = vor.u32 %v18087_v30, %v14408_v29  ;;  %v14688_v30 = vld [vmem:[#allocation6 + $0x678] sm:$0xf0]  ;;  %v17987_v29 = vld [vmem:[#allocation6 + $0x104] sm:$0xf] }
 0x3df   :  { %10090 = vmatpush.bf16.msra.mxu1 %v14491_v32  ;;  %v20045_v32 = vperm.slane %v19651_v26, 3  ;;  %10056 = vmatmul.bf16.vlgmr.msrb.gmra.mxu2 %v19529_v51 }
 0x3e0   :  { %10104 = vmatpush.bf16.msra.mxu2 %v14811_v34  ;;  %10008 = vmatpush.bf16.msra.mxu3 %v15687_v0  ;;  %v14008_v0 = vld [vmem:[#allocation6 + $0x128] sm:$0xf0] }
 0x3e1   :  { %v9806_v34 = vadd.f32 %v9805_v61, %v20045_v32  ;;  %v18147_v61 = vld [vmem:[#allocation6 + $0x604] sm:$0xf]  ;;  %v17977_v32 = vld [vmem:[#allocation6 + $0xb4] sm:$0xf] }
 0x3e2   :  { %10077 = vmatpush.bf16.msra.mxu0 %v14131_v63  ;;  %v14731_v63 = vor.u32 %v18167_v3, %v14728_v27  ;;  %v9735_v3 = vpop.f32.mrf.mxu3  ;;  %v14011_v27 = vor.u32 %v17987_v29, %v14008_v0  ;;  %v14608_v29 = vld [vmem:[#allocation6 + $0x5d8] sm:$0xf0]  ;;  %v17967_v0 = vld [vmem:[#allocation6 + $0x64] sm:$0xf] }
 0x3e3   :  { %10091 = vmatpush.bf16.msra.mxu1 %v14451_v50  ;;  %v18157_v50 = vld [vmem:[#allocation6 + $0x654] sm:$0xf]  ;;  %v9820_v8 = vadd.f32 %v9819_v18, %v9806_v34  ;;  %v14288_v18 = vld [vmem:[#allocation6 + $0x358] sm:$0xf0] }
 0x3e4   :  { %10105 = vmatpush.bf16.msra.mxu2 %v14771_v20  ;;  %v14328_v20 = vld [vmem:[#allocation6 + $0x3a8] sm:$0xf0]  ;;  %10009 = vmatpush.bf16.msra.mxu3 %v15647_v55  ;;  %v14691_v31 = vor.u32 %v18157_v50, %v14688_v30  ;;  %v18057_v34 = vld [vmem:[#allocation6 + $0x334] sm:$0xf]  ;;  %v18372_v50 = vld [vmem:[#allocation6 + $0xd04] sm:$0xf0] }
 0x3e5   :  { %v14331_v60 = vor.u32 %v18067_v11, %v14328_v20  ;;  %v18137_v30 = vld [vmem:[#allocation6 + $0x5b4] sm:$0xf]  ;;  %v13928_v11 = vld [vmem:[#allocation6 + $0x88] sm:$0xf0] }
 0x3e6   :  { %10078 = vmatpush.bf16.msra.mxu0 %v14091_v23  ;;  %v15607_v23 = vor.u32 %v18392_v49, %v15606_v33  ;;  %v13971_v33 = vor.u32 %v17977_v32, %v13968_v52  ;;  %v15526_v49 = vld [vmem:[#allocation6 + $0xce0] sm:$0xf]  ;;  %v14611_v32 = vor.u32 %v18137_v30, %v14608_v29 }
 0x3e7   :  { %10092 = vmatpush.bf16.msra.mxu1 %v14411_v45  ;;  %v9736_v45 = vadd.f32 %v9735_v3, %v19665_v25  ;;  %v14291_v25 = vor.u32 %v18057_v34, %v14288_v18  ;;  %v13888_v34 = vld [vmem:[#allocation6 + $0x38] sm:$0xf0]  ;;  %v18037_v18 = vld [vmem:[#allocation6 + $0x294] sm:$0xf] }
 0x3e8   :  { %10106 = vmatpush.bf16.msra.mxu2 %v14731_v63  ;;  %10010 = vmatpush.bf16.msra.mxu3 %v15607_v23  ;;  %v15567_v63 = vor.u32 %v18382_v7, %v15566_v56  ;;  %v18047_v23 = vld [vmem:[#allocation6 + $0x2e4] sm:$0xf]  ;;  %v18362_v56 = vld [vmem:[#allocation6 + $0xcb4] sm:$0xf0]  ;;  %v13931_v7 = vor.u32 %v17967_v0, %v13928_v11  ;;  %v14528_v0 = vld [vmem:[#allocation6 + $0x538] sm:$0xf0] }
 0x3e9   :  { %v9750_v55 = vadd.f32 %v19663_v19, %v9736_v45  ;;  %v14248_v19 = vld [vmem:[#allocation6 + $0x308] sm:$0xf0] }
 0x3ea   :  { %10079 = vmatpush.bf16.msra.mxu0 %v14051_v10  ;;  %v14651_v10 = vor.u32 %v18147_v61, %v14648_v5  ;;  %v18127_v61 = vld [vmem:[#allocation6 + $0x564] sm:$0xf]  ;;  %v14568_v45 = vld [vmem:[#allocation6 + $0x588] sm:$0xf0]  ;;  %v17957_v5 = vld [vmem:[#allocation6 + $0x14] sm:$0xf] }
 0x3eb   :  { %10093 = vmatpush.bf16.msra.mxu1 %v14371_v4  ;;  %v9833_v4 = vpop.f32.mrf.mxu2  ;;  %v9764_v20 = vadd.f32 %v19669_v59, %v9750_v55  ;;  %v14251_v59 = vor.u32 %v18047_v23, %v14248_v19  ;;  %v14208_v55 = vld [vmem:[#allocation6 + $0x2b8] sm:$0xf0]  ;;  %v13891_v30 = vor.u32 %v17957_v5, %v13888_v34  ;;  %v17006_v23 = vld [vmem:[#allocation6 + $0x1870] sm:$0xf]  ;;  %v18742_v19 = vld [vmem:[#allocation6 + $0x1894] sm:$0xf0] }
 0x3ec   :  { %10107 = vmatpush.bf16.msra.mxu2 %v14691_v31  ;;  %v19691_v3 = vadd.f32 %v9833_v4, %v9820_v8  ;;  %10011 = vmatpush.bf16.msra.mxu3 %v15567_v63  ;;  %v15527_v31 = vor.u32 %v18372_v50, %v15526_v49  ;;  %v18752_v8 = vld [vmem:[#allocation6 + $0x18e4] sm:$0xf0]  ;;  %v18347_v63 = vld [vmem:[#allocation6 + $0xc44] sm:$0xf]  ;;  %v15448_v50 = vld [vmem:[#allocation6 + $0xc68] sm:$0xf0]  ;;  %v14211_v29 = vor.u32 %v18037_v18, %v14208_v55 }
 0x3ed   :  { %v19694_v52 = vadd.f32 %v19673_v17, %v9764_v20  ;;  %v18427_v17 = vld [vmem:[#allocation6 + $0xec4] sm:$0xf]  ;;  %v15768_v4 = vld [vmem:[#allocation6 + $0xee8] sm:$0xf0]  ;;  %v15451_v11 = vor.u32 %v18347_v63, %v15448_v50  ;;  %v18732_v5 = vld [vmem:[#allocation6 + $0x1844] sm:$0xf0] }
 0x3ee   :  { %10080 = vmatpush.bf16.msra.mxu0 %v14011_v27  ;;  %v15486_v27 = vld [vmem:[#allocation6 + $0xc90] sm:$0xf]  ;;  %v15771_v20 = vor.u32 %v18427_v17, %v15768_v4  ;;  %v18497_v34 = vld [vmem:[#allocation6 + $0x10f4] sm:$0xf]  ;;  %v16048_v55 = vld [vmem:[#allocation6 + $0x1118] sm:$0xf0] }
 0x3ef   :  { %10094 = vmatpush.bf16.msra.mxu1 %v14331_v60  ;;  %v17046_v60 = vld [vmem:[#allocation6 + $0x18c0] sm:$0xf]  ;;  %v15487_v49 = vor.u32 %v18362_v56, %v15486_v27  ;;  %v18337_v27 = vld [vmem:[#allocation6 + $0xbf4] sm:$0xf]  ;;  %v15408_v56 = vld [vmem:[#allocation6 + $0xc18] sm:$0xf0] }
 0x3f0   :  { %10108 = vmatpush.bf16.msra.mxu2 %v14651_v10  ;;  %10012 = vmatpush.bf16.msra.mxu3 %v15527_v31  ;;  %v14571_v10 = vor.u32 %v18127_v61, %v14568_v45  ;;  %v16088_v31 = vld [vmem:[#allocation6 + $0x1168] sm:$0xf0]  ;;  %v17007_v45 = vor.u32 %v18742_v19, %v17006_v23  ;;  %v18327_v63 = vld [vmem:[#allocation6 + $0xba4] sm:$0xf]  ;;  %v15328_v23 = vld [vmem:[#allocation6 + $0xb78] sm:$0xf0] }
 0x3f1   :  { %v18407_v50 = vld [vmem:[#allocation6 + $0xe24] sm:$0xf]  ;;  %v15688_v17 = vld [vmem:[#allocation6 + $0xe48] sm:$0xf0]  ;;  %v18397_v19 = vld [vmem:[#allocation6 + $0xdd4] sm:$0xf] }
 0x3f2   :  { %10081 = vmatpush.bf16.msra.mxu0 %v13971_v33  ;;  %v17047_v33 = vor.u32 %v18752_v8, %v17046_v60  ;;  %v16091_v60 = vor.u32 %v18507_v37, %v16088_v31  ;;  %v16966_v8 = vld [vmem:[#allocation6 + $0x1820] sm:$0xf]  ;;  %v19699_v37 = vpop.f32.mrf.mxu3  ;;  %v15648_v31 = vld [vmem:[#allocation6 + $0xdf8] sm:$0xf0] }
 0x3f3   :  { %10095 = vmatpush.bf16.msra.mxu1 %v14291_v25  ;;  %v18117_v25 = vld [vmem:[#allocation6 + $0x514] sm:$0xf]  ;;  %v16967_v4 = vor.u32 %v18732_v5, %v16966_v8  ;;  %20122 = vst [vmem:[#allocation24_spill] sm:$0xff] %v19699_v37  ;;  %v18307_v8 = vld [vmem:[#allocation6 + $0xb04] sm:$0xf] }
 0x3f4   :  { %10109 = vmatpush.bf16.msra.mxu2 %v14611_v32  ;;  %10013 = vmatpush.bf16.msra.mxu3 %v15487_v49  ;;  %v18417_v32 = vld [vmem:[#allocation6 + $0xe74] sm:$0xf]  ;;  %v14531_v61 = vor.u32 %v18117_v25, %v14528_v0  ;;  %v15368_v49 = vld [vmem:[#allocation6 + $0xbc8] sm:$0xf0]  ;;  %v18487_v25 = vld [vmem:[#allocation6 + $0x10a4] sm:$0xf]  ;;  %v15691_v0 = vor.u32 %v18407_v50, %v15688_v17 }
 0x3f5   :  { %v15288_v5 = vld [vmem:[#allocation6 + $0xb28] sm:$0xf0]  ;;  %v16846_v17 = vld [vmem:[#allocation6 + $0x1730] sm:$0xf]  ;;  %v18103_v37 = vld [vmem:[#allocation6 + $0x49c] sm:$0xf0] }
 0x3f6   :  { %10082 = vmatpush.bf16.msra.mxu0 %v13931_v7  ;;  %v15728_v7 = vld [vmem:[#allocation6 + $0xe98] sm:$0xf0]  ;;  %v15291_v50 = vor.u32 %v18307_v8, %v15288_v5  ;;  %v16766_v5 = vld [vmem:[#allocation6 + $0x1690] sm:$0xf] }
 0x3f7   :  { %10096 = vmatpush.bf16.msra.mxu1 %v14251_v59  ;;  %v15411_v59 = vor.u32 %v18337_v27, %v15408_v56  ;;  %10014 = vmatmul.bf16.vlgmr.msra.gmra.mxu3 %v19481_v54  ;;  %v15731_v18 = vor.u32 %v18417_v32, %v15728_v7  ;;  %v16886_v7 = vld [vmem:[#allocation6 + $0x1780] sm:$0xf] }
 0x3f8   :  { %10110 = vmatpush.bf16.msra.mxu2 %v14571_v10  ;;  %10062 = vmatpush.bf16.msrb.mxu3 %v17047_v33  ;;  %v16051_v10 = vor.u32 %v18497_v34, %v16048_v55  ;;  %v15371_v33 = vor.u32 %v18327_v63, %v15368_v49  ;;  %v18387_v34 = vld [vmem:[#allocation6 + $0xd84] sm:$0xf] }
 0x3fa   :  { %10083 = vmatpush.bf16.msra.mxu0 %v13891_v30  ;;  %v16926_v30 = vld [vmem:[#allocation6 + $0x17d0] sm:$0xf]  ;;  %v9791_v49 = vpop.f32.mrf.mxu3 }
 0x3fb   :  { %10097 = vmatpush.bf16.msra.mxu1 %v14211_v29  ;;  %v18722_v29 = vld [vmem:[#allocation6 + $0x17f4] sm:$0xf0] }
 0x3fc   :  { %10111 = vmatpush.bf16.msra.mxu2 %v14531_v61  ;;  %10063 = vmatpush.bf16.msrb.mxu3 %v17007_v45  ;;  %v16927_v27 = vor.u32 %v18722_v29, %v16926_v30  ;;  %v18712_v61 = vld [vmem:[#allocation6 + $0x17a4] sm:$0xf0]  ;;  %v18477_v45 = vld [vmem:[#allocation6 + $0x1054] sm:$0xf]  ;;  %v15928_v29 = vld [vmem:[#allocation6 + $0x1028] sm:$0xf0] }
 0x3fd   :  { %10084 = vmatmul.bf16.vlgmr.msra.gmra.mxu0 %v19386_v36  ;;  %v16887_v55 = vor.u32 %v18712_v61, %v16886_v7  ;;  %v15888_v61 = vld [vmem:[#allocation6 + $0xfd8] sm:$0xf0] }
 0x3fe   :  { %10132 = vmatpush.bf16.msrb.mxu0 %v15451_v11  ;;  %10098 = vmatmul.bf16.vlgmr.msra.gmra.mxu1 %v19402_v58  ;;  %v16008_v11 = vld [vmem:[#allocation6 + $0x10c8] sm:$0xf0] }
 0x3ff   :  { %10146 = vmatpush.bf16.msrb.mxu1 %v15771_v20  ;;  %v18317_v20 = vld [vmem:[#allocation6 + $0xb54] sm:$0xf]  ;;  %10112 = vmatmul.bf16.vlgmr.msra.gmra.mxu2 %v19468_v15  ;;  %v16011_v56 = vor.u32 %v18487_v25, %v16008_v11 }
 0x400   :  { %10160 = vmatpush.bf16.msrb.mxu2 %v16091_v60  ;;  %10064 = vmatpush.bf16.msrb.mxu3 %v16967_v4  ;;  %v15331_v32 = vor.u32 %v18317_v20, %v15328_v23  ;;  %v15651_v60 = vor.u32 %v18397_v19, %v15648_v31  ;;  %v18702_v4 = vld [vmem:[#allocation6 + $0x1754] sm:$0xf0]  ;;  %v18297_v25 = vld [vmem:[#allocation6 + $0xab4] sm:$0xf]  ;;  %v15568_v20 = vld [vmem:[#allocation6 + $0xd58] sm:$0xf0] }
 0x401   :  { %v18377_v11 = vld [vmem:[#allocation6 + $0xd34] sm:$0xf]  ;;  %v16847_v23 = vor.u32 %v18702_v4, %v16846_v17  ;;  %v15128_v4 = vld [vmem:[#allocation6 + $0x9e8] sm:$0xf0] }
 0x402   :  { %10133 = vmatpush.bf16.msrb.mxu0 %v15411_v59  ;;  %v15968_v59 = vld [vmem:[#allocation6 + $0x1078] sm:$0xf0]  ;;  %v15571_v7 = vor.u32 %v18377_v11, %v15568_v20  ;;  %v16728_v20 = vld [vmem:[#allocation6 + $0x1668] sm:$0xf0] }
 0x403   :  { %10147 = vmatpush.bf16.msrb.mxu1 %v15731_v18  ;;  %v15608_v18 = vld [vmem:[#allocation6 + $0xda8] sm:$0xf0]  ;;  %v15971_v63 = vor.u32 %v18477_v45, %v15968_v59 }
 0x404   :  { %10161 = vmatpush.bf16.msrb.mxu2 %v16051_v10  ;;  %10065 = vmatpush.bf16.msrb.mxu3 %v16927_v27  ;;  %v18467_v10 = vld [vmem:[#allocation6 + $0x1004] sm:$0xf]  ;;  %v15611_v30 = vor.u32 %v18387_v34, %v15608_v18  ;;  %v16806_v27 = vld [vmem:[#allocation6 + $0x16e0] sm:$0xf]  ;;  %v15208_v45 = vld [vmem:[#allocation6 + $0xa88] sm:$0xf0] }
 0x405   :  { %v15931_v19 = vor.u32 %v18467_v10, %v15928_v29  ;;  %v15528_v59 = vld [vmem:[#allocation6 + $0xd08] sm:$0xf0]  ;;  %v18682_v34 = vld [vmem:[#allocation6 + $0x16b4] sm:$0xf0]  ;;  %v18277_v10 = vld [vmem:[#allocation6 + $0xa14] sm:$0xf] }
 0x406   :  { %10134 = vmatpush.bf16.msrb.mxu0 %v15371_v33  ;;  %v19703_v33 = vadd.f32 %v9791_v49, %v19694_v52  ;;  %v18287_v52 = vld [vmem:[#allocation6 + $0xa64] sm:$0xf]  ;;  %v15848_v49 = vld [vmem:[#allocation6 + $0xf88] sm:$0xf0]  ;;  %v18357_v29 = vld [vmem:[#allocation6 + $0xc94] sm:$0xf]  ;;  %v16767_v11 = vor.u32 %v18682_v34, %v16766_v5 }
 0x407   :  { %10148 = vmatpush.bf16.msrb.mxu1 %v15691_v0  ;;  %v15248_v0 = vld [vmem:[#allocation6 + $0xad8] sm:$0xf0]  ;;  %v18657_v5 = vld [vmem:[#allocation6 + $0x15f4] sm:$0xf] }
 0x408   :  { %10162 = vmatpush.bf16.msrb.mxu2 %v16011_v56  ;;  %20123 = vst [vmem:[#allocation39_spill] sm:$0xff] %v19703_v33  ;;  %10066 = vmatpush.bf16.msrb.mxu3 %v16887_v55  ;;  %v15251_v31 = vor.u32 %v18297_v25, %v15248_v0  ;;  %v18692_v56 = vld [vmem:[#allocation6 + $0x1704] sm:$0xf0]  ;;  %v15211_v55 = vor.u32 %v18287_v52, %v15208_v45  ;;  %v15488_v25 = vld [vmem:[#allocation6 + $0xcb8] sm:$0xf0] }
 0x409   :  { %v16807_v8 = vor.u32 %v18692_v56, %v16806_v27  ;;  %v18667_v0 = vld [vmem:[#allocation6 + $0x1644] sm:$0xf]  ;;  %v17048_v27 = vld [vmem:[#allocation6 + $0x18e8] sm:$0xf0]  ;;  %v14174_v33 = vld [vmem:[#allocation6 + $0x248] sm:$0xf] }
 0x40a   :  { %10135 = vmatpush.bf16.msrb.mxu0 %v15331_v32  ;;  %v18457_v32 = vld [vmem:[#allocation6 + $0xfb4] sm:$0xf]  ;;  %v16731_v52 = vor.u32 %v18667_v0, %v16728_v20  ;;  %v16688_v34 = vld [vmem:[#allocation6 + $0x1618] sm:$0xf0]  ;;  %v18647_v0 = vld [vmem:[#allocation6 + $0x15a4] sm:$0xf] }
 0x40b   :  { %10149 = vmatpush.bf16.msrb.mxu1 %v15651_v60  ;;  %v18367_v60 = vld [vmem:[#allocation6 + $0xce4] sm:$0xf]  ;;  %v15891_v18 = vor.u32 %v18457_v32, %v15888_v61  ;;  %v15491_v32 = vor.u32 %v18357_v29, %v15488_v25  ;;  %v15808_v61 = vld [vmem:[#allocation6 + $0xf38] sm:$0xf0]  ;;  %v18023_v25 = vld [vmem:[#allocation6 + $0x21c] sm:$0xf0] }
 0x40c   :  { %10163 = vmatpush.bf16.msrb.mxu2 %v15971_v63  ;;  %10067 = vmatpush.bf16.msrb.mxu3 %v16847_v23  ;;  %v18447_v63 = vld [vmem:[#allocation6 + $0xf64] sm:$0xf]  ;;  %v15531_v17 = vor.u32 %v18367_v60, %v15528_v59  ;;  %v18257_v60 = vld [vmem:[#allocation6 + $0x974] sm:$0xf]  ;;  %v15088_v59 = vld [vmem:[#allocation6 + $0x998] sm:$0xf0] }
 0x40d   :  { %v18747_v23 = vld [vmem:[#allocation6 + $0x18c4] sm:$0xf] }
 0x40e   :  { %10136 = vmatpush.bf16.msrb.mxu0 %v15291_v50  ;;  %v18267_v50 = vld [vmem:[#allocation6 + $0x9c4] sm:$0xf]  ;;  %v17051_v45 = vor.u32 %v18747_v23, %v17048_v27  ;;  %v16968_v23 = vld [vmem:[#allocation6 + $0x1848] sm:$0xf0] }
 0x40f   :  { %10150 = vmatpush.bf16.msrb.mxu1 %v15611_v30  ;;  %v15168_v30 = vld [vmem:[#allocation6 + $0xa38] sm:$0xf0]  ;;  %v18727_v20 = vld [vmem:[#allocation6 + $0x1824] sm:$0xf] }
 0x410   :  { %10164 = vmatpush.bf16.msrb.mxu2 %v15931_v19  ;;  %10068 = vmatpush.bf16.msrb.mxu3 %v16807_v8  ;;  %v15851_v19 = vor.u32 %v18447_v63, %v15848_v49  ;;  %v15171_v56 = vor.u32 %v18277_v10, %v15168_v30  ;;  %v18033_v8 = vld [vmem:[#allocation6 + $0x26c] sm:$0xf0]  ;;  %v15091_v49 = vor.u32 %v18257_v60, %v15088_v59  ;;  %v15048_v10 = vld [vmem:[#allocation6 + $0x948] sm:$0xf0]  ;;  %v14134_v30 = vld [vmem:[#allocation6 + $0x1f8] sm:$0xf]  ;;  %v19710_v59 = vpop.f32.mrf.mxu0 }
 0x411   :  { %v16608_v60 = vld [vmem:[#allocation6 + $0x1578] sm:$0xf0] }
 0x412   :  { %10137 = vmatpush.bf16.msrb.mxu0 %v15251_v31  ;;  %v15131_v31 = vor.u32 %v18267_v50, %v15128_v4  ;;  %v14175_v50 = vor.u32 %v18033_v8, %v14174_v33  ;;  %v18247_v4 = vld [vmem:[#allocation6 + $0x924] sm:$0xf]  ;;  %v19708_v33 = vpop.f32.mrf.mxu3  ;;  %v18717_v8 = vld [vmem:[#allocation6 + $0x17d4] sm:$0xf] }
 0x413   :  { %10151 = vmatpush.bf16.msrb.mxu1 %v15571_v7  ;;  %v18437_v7 = vld [vmem:[#allocation6 + $0xf14] sm:$0xf]  ;;  %v15051_v27 = vor.u32 %v18247_v4, %v15048_v10  ;;  %20124 = vst [vmem:[#allocation34_spill] sm:$0xff] %v19708_v33  ;;  %v18003_v10 = vld [vmem:[#allocation6 + $0x17c] sm:$0xf0] }
 0x414   :  { %10165 = vmatpush.bf16.msrb.mxu2 %v15891_v18  ;;  %10069 = vmatpush.bf16.msrb.mxu3 %v16767_v11  ;;  %v18737_v18 = vld [vmem:[#allocation6 + $0x1874] sm:$0xf]  ;;  %v15811_v63 = vor.u32 %v18437_v7, %v15808_v61  ;;  %v16648_v11 = vld [vmem:[#allocation6 + $0x15c8] sm:$0xf0]  ;;  %v14094_v7 = vld [vmem:[#allocation6 + $0x1a8] sm:$0xf]  ;;  %v16971_v61 = vor.u32 %v18727_v20, %v16968_v23 }
 0x415   :  { %v16848_v33 = vld [vmem:[#allocation6 + $0x1758] sm:$0xf0] }
 0x416   :  { %10138 = vmatpush.bf16.msrb.mxu0 %v15211_v55  ;;  %v17008_v55 = vld [vmem:[#allocation6 + $0x1898] sm:$0xf0] }
 0x417   :  { %10152 = vmatpush.bf16.msrb.mxu1 %v15531_v17  ;;  %v16691_v17 = vor.u32 %v18657_v5, %v16688_v34  ;;  %10070 = vmatmul.bf16.vlgmr.msrb.gmra.mxu3 %v19549_v14  ;;  %v17011_v29 = vor.u32 %v18737_v18, %v17008_v55  ;;  %v16928_v5 = vld [vmem:[#allocation6 + $0x17f8] sm:$0xf0]  ;;  %v19713_v18 = vpop.f32.mrf.mxu1 }
 0x418   :  { %10166 = vmatpush.bf16.msrb.mxu2 %v15851_v19  ;;  %10118 = vmatpush.bf16.msra.mxu3 %v15131_v31  ;;  %v14135_v19 = vor.u32 %v18023_v25, %v14134_v30  ;;  %v16651_v31 = vor.u32 %v18647_v0, %v16648_v11  ;;  %v16931_v4 = vor.u32 %v18717_v8, %v16928_v5  ;;  %v18627_v30 = vld [vmem:[#allocation6 + $0x1504] sm:$0xf]  ;;  %v19715_v25 = vpop.f32.mrf.mxu2  ;;  %v16888_v11 = vld [vmem:[#allocation6 + $0x17a8] sm:$0xf0]  ;;  %v9861_v8 = vpop.f32.mrf.mxu0  ;;  %v18697_v5 = vld [vmem:[#allocation6 + $0x1734] sm:$0xf] }
 0x419   :  { %v18707_v0 = vld [vmem:[#allocation6 + $0x1784] sm:$0xf] }
 0x41a   :  { %10139 = vmatpush.bf16.msrb.mxu0 %v15171_v56  ;;  %v18237_v56 = vld [vmem:[#allocation6 + $0x8d4] sm:$0xf] }
 0x41b   :  { %10153 = vmatpush.bf16.msrb.mxu1 %v15491_v32  ;;  %v15008_v32 = vld [vmem:[#allocation6 + $0x8f8] sm:$0xf0] }
 0x41c   :  { %10167 = vmatpush.bf16.msrb.mxu2 %v15811_v63  ;;  %10119 = vmatpush.bf16.msra.mxu3 %v15091_v49  ;;  %v15011_v34 = vor.u32 %v18237_v56, %v15008_v32  ;;  %v18227_v49 = vld [vmem:[#allocation6 + $0x884] sm:$0xf]  ;;  %v14928_v56 = vld [vmem:[#allocation6 + $0x858] sm:$0xf0]  ;;  %v14014_v32 = vld [vmem:[#allocation6 + $0x108] sm:$0xf] }
 0x41d   :  { %10140 = vmatmul.bf16.vlgmr.msrb.gmra.mxu0 %v19474_v12 }
 0x41e   :  { %10188 = vmatpush.bf16.msra.mxu0 %v16731_v52  ;;  %10154 = vmatmul.bf16.vlgmr.msrb.gmra.mxu1 %v19481_v54  ;;  %v18013_v52 = vld [vmem:[#allocation6 + $0x1cc] sm:$0xf0] }
 0x41f   :  { %10202 = vmatpush.bf16.msra.mxu1 %v17051_v45  ;;  %v18637_v45 = vld [vmem:[#allocation6 + $0x1554] sm:$0xf]  ;;  %10168 = vmatmul.bf16.vlgmr.msrb.gmra.mxu2 %v19519_v6  ;;  %v14095_v55 = vor.u32 %v18013_v52, %v14094_v7  ;;  %v17993_v52 = vld [vmem:[#allocation6 + $0x12c] sm:$0xf0] }
 0x420   :  { %10216 = vmatpush.bf16.msra.mxu2 %v14175_v50  ;;  %10120 = vmatpush.bf16.msra.mxu3 %v15051_v27  ;;  %v16611_v63 = vor.u32 %v18637_v45, %v16608_v60  ;;  %v14968_v50 = vld [vmem:[#allocation6 + $0x8a8] sm:$0xf0]  ;;  %v9847_v27 = vpop.f32.mrf.mxu3  ;;  %v18617_v45 = vld [vmem:[#allocation6 + $0x14b4] sm:$0xf]  ;;  %v16528_v60 = vld [vmem:[#allocation6 + $0x14d8] sm:$0xf0] }
 0x421   :  { %v14971_v20 = vor.u32 %v18227_v49, %v14968_v50  ;;  %v9848_v7 = vadd.f32 %v9847_v27, %v19691_v3  ;;  %v14015_v49 = vor.u32 %v17993_v52, %v14014_v32  ;;  %v16531_v50 = vor.u32 %v18617_v45, %v16528_v60  ;;  %v9889_v27 = vpop.f32.mrf.mxu2  ;;  %v16408_v45 = vld [vmem:[#allocation6 + $0x13e8] sm:$0xf0]  ;;  %v18597_v60 = vld [vmem:[#allocation6 + $0x1414] sm:$0xf] }
 0x422   :  { %10189 = vmatpush.bf16.msra.mxu0 %v16691_v17  ;;  %v14054_v17 = vld [vmem:[#allocation6 + $0x158] sm:$0xf]  ;;  %v16851_v3 = vor.u32 %v18697_v5, %v16848_v33  ;;  %v18587_v33 = vld [vmem:[#allocation6 + $0x13c4] sm:$0xf]  ;;  %v16811_v52 = vor.u32 %v18687_v28, %v16808_v41  ;;  %v18677_v5 = vld [vmem:[#allocation6 + $0x1694] sm:$0xf] }
 0x423   :  { %10203 = vmatpush.bf16.msra.mxu1 %v17011_v29  ;;  %v16568_v29 = vld [vmem:[#allocation6 + $0x1528] sm:$0xf0]  ;;  %v14055_v23 = vor.u32 %v18003_v10, %v14054_v17  ;;  %v18207_v17 = vld [vmem:[#allocation6 + $0x7e4] sm:$0xf]  ;;  %v17963_v28 = vld [vmem:[#allocation6 + $0x3c] sm:$0xf0] }
 0x424   :  { %10217 = vmatpush.bf16.msra.mxu2 %v14135_v19  ;;  %10121 = vmatpush.bf16.msra.mxu3 %v15011_v34  ;;  %v16571_v19 = vor.u32 %v18627_v30, %v16568_v29  ;;  %v9862_v34 = vadd.f32 %v9861_v8, %v9848_v7  ;;  %v14888_v10 = vld [vmem:[#allocation6 + $0x808] sm:$0xf0]  ;;  %v17983_v30 = vld [vmem:[#allocation6 + $0xdc] sm:$0xf0]  ;;  %v18607_v29 = vld [vmem:[#allocation6 + $0x1464] sm:$0xf] }
 0x425   :  { %v13934_v7 = vld [vmem:[#allocation6 + $0x68] sm:$0xf]  ;;  %v16448_v8 = vld [vmem:[#allocation6 + $0x1438] sm:$0xf0] }
 0x426   :  { %10190 = vmatpush.bf16.msra.mxu0 %v16651_v31  ;;  %v18217_v31 = vld [vmem:[#allocation6 + $0x834] sm:$0xf] }
 0x427   :  { %10204 = vmatpush.bf16.msra.mxu1 %v16971_v61  ;;  %v16891_v61 = vor.u32 %v18707_v0, %v16888_v11  ;;  %v16488_v0 = vld [vmem:[#allocation6 + $0x1488] sm:$0xf0] }
 0x428   :  { %10218 = vmatpush.bf16.msra.mxu2 %v14095_v55  ;;  %10122 = vmatpush.bf16.msra.mxu3 %v14971_v20  ;;  %v14931_v55 = vor.u32 %v18217_v31, %v14928_v56  ;;  %v14891_v20 = vor.u32 %v18207_v17, %v14888_v10  ;;  %v18197_v31 = vld [vmem:[#allocation6 + $0x794] sm:$0xf]  ;;  %v14848_v56 = vld [vmem:[#allocation6 + $0x7b8] sm:$0xf0]  ;;  %v16491_v32 = vor.u32 %v18607_v29, %v16488_v0  ;;  %v18193_v17 = vld [vmem:[#allocation6 + $0x76c] sm:$0xf0] }
 0x429   :  { %v15134_v10 = vld [vmem:[#allocation6 + $0x9c8] sm:$0xf]  ;;  %v18577_v0 = vld [vmem:[#allocation6 + $0x1374] sm:$0xf] }
 0x42a   :  { %10191 = vmatpush.bf16.msra.mxu0 %v16611_v63  ;;  %v9875_v63 = vpop.f32.mrf.mxu1 }
 0x42b   :  { %10205 = vmatpush.bf16.msra.mxu1 %v16931_v4  ;;  %v13974_v4 = vld [vmem:[#allocation6 + $0xb8] sm:$0xf]  ;;  %v9876_v11 = vadd.f32 %v9875_v63, %v9862_v34  ;;  %v16768_v34 = vld [vmem:[#allocation6 + $0x16b8] sm:$0xf0]  ;;  %v14851_v63 = vor.u32 %v18197_v31, %v14848_v56  ;;  %v18183_v56 = vld [vmem:[#allocation6 + $0x71c] sm:$0xf0] }
 0x42c   :  { %10219 = vmatpush.bf16.msra.mxu2 %v14055_v23  ;;  %10123 = vmatpush.bf16.msra.mxu3 %v14931_v55  ;;  %v14814_v55 = vld [vmem:[#allocation6 + $0x748] sm:$0xf]  ;;  %v14774_v31 = vld [vmem:[#allocation6 + $0x6f8] sm:$0xf] }
 0x42d   :  { %v19718_v23 = vadd.f32 %v9889_v27, %v9876_v11  ;;  %v18273_v11 = vld [vmem:[#allocation6 + $0x9ec] sm:$0xf0]  ;;  %v14815_v41 = vor.u32 %v18193_v17, %v14814_v55  ;;  %v16368_v27 = vld [vmem:[#allocation6 + $0x1398] sm:$0xf0]  ;;  %v14734_v55 = vld [vmem:[#allocation6 + $0x6a8] sm:$0xf] }
 0x42e   :  { %10192 = vmatpush.bf16.msra.mxu0 %v16571_v19  ;;  %v13975_v19 = vor.u32 %v17983_v30, %v13974_v4  ;;  %v16451_v4 = vor.u32 %v18597_v60, %v16448_v8  ;;  %v16771_v30 = vor.u32 %v18677_v5, %v16768_v34  ;;  %v15135_v29 = vor.u32 %v18273_v11, %v15134_v10  ;;  %v16328_v60 = vld [vmem:[#allocation6 + $0x1348] sm:$0xf0]  ;;  %v15414_v8 = vld [vmem:[#allocation6 + $0xbf8] sm:$0xf]  ;;  %v18343_v34 = vld [vmem:[#allocation6 + $0xc1c] sm:$0xf0] }
 0x42f   :  { %10206 = vmatpush.bf16.msra.mxu1 %v16891_v61  ;;  %v17973_v61 = vld [vmem:[#allocation6 + $0x8c] sm:$0xf0]  ;;  %v15054_v17 = vld [vmem:[#allocation6 + $0x928] sm:$0xf] }
 0x430   :  { %10220 = vmatpush.bf16.msra.mxu2 %v14015_v49  ;;  %10124 = vmatpush.bf16.msra.mxu3 %v14891_v20  ;;  %v13935_v49 = vor.u32 %v17973_v61, %v13934_v7  ;;  %v18353_v20 = vld [vmem:[#allocation6 + $0xc6c] sm:$0xf0]  ;;  %v16371_v61 = vor.u32 %v18577_v0, %v16368_v27  ;;  %v14694_v0 = vld [vmem:[#allocation6 + $0x658] sm:$0xf]  ;;  %v18163_v27 = vld [vmem:[#allocation6 + $0x67c] sm:$0xf0] }
 0x431   :  { %v18253_v10 = vld [vmem:[#allocation6 + $0x94c] sm:$0xf0] }
 0x432   :  { %10193 = vmatpush.bf16.msra.mxu0 %v16531_v50  ;;  %v16411_v50 = vor.u32 %v18587_v33, %v16408_v45  ;;  %v15455_v33 = vor.u32 %v18353_v20, %v15454_v9  ;;  %v18567_v45 = vld [vmem:[#allocation6 + $0x1324] sm:$0xf]  ;;  %v19723_v9 = vpop.f32.mrf.mxu3  ;;  %v15014_v20 = vld [vmem:[#allocation6 + $0x8d8] sm:$0xf] }
 0x433   :  { %10207 = vmatpush.bf16.msra.mxu1 %v16851_v3  ;;  %v13894_v3 = vld [vmem:[#allocation6 + $0x18] sm:$0xf]  ;;  %v16331_v11 = vor.u32 %v18567_v45, %v16328_v60  ;;  %v18323_v60 = vld [vmem:[#allocation6 + $0xb7c] sm:$0xf0] }
 0x434   :  { %10221 = vmatpush.bf16.msra.mxu2 %v13975_v19  ;;  %10125 = vmatpush.bf16.msra.mxu3 %v14851_v63  ;;  %v15094_v19 = vld [vmem:[#allocation6 + $0x978] sm:$0xf]  ;;  %v13895_v7 = vor.u32 %v17963_v28, %v13894_v3  ;;  %v18173_v63 = vld [vmem:[#allocation6 + $0x6cc] sm:$0xf0]  ;;  %v15374_v3 = vld [vmem:[#allocation6 + $0xba8] sm:$0xf]  ;;  %v19725_v28 = vpop.f32.mrf.mxu0 }
 0x435   :  { %20125 = vst [vmem:[#allocation17_spill] sm:$0xff] %v19725_v28  ;;  %v16214_v28 = vld [vmem:[#allocation6 + $0x1238] sm:$0xf] }
 0x436   :  { %10194 = vmatpush.bf16.msra.mxu0 %v16491_v32  ;;  %v18263_v32 = vld [vmem:[#allocation6 + $0x99c] sm:$0xf0] }
 0x437   :  { %10208 = vmatpush.bf16.msra.mxu1 %v16811_v52  ;;  %v14775_v52 = vor.u32 %v18183_v56, %v14774_v31  ;;  %10126 = vmatmul.bf16.vlgmr.msra.gmra.mxu3 %v19470_v38  ;;  %v15095_v5 = vor.u32 %v18263_v32, %v15094_v19  ;;  %v18243_v31 = vld [vmem:[#allocation6 + $0x8fc] sm:$0xf0]  ;;  %v19728_v56 = vpop.f32.mrf.mxu1 }
 0x438   :  { %10222 = vmatpush.bf16.msra.mxu2 %v13935_v49  ;;  %10174 = vmatpush.bf16.msrb.mxu3 %v16411_v50  ;;  %v15415_v49 = vor.u32 %v18343_v34, %v15414_v8  ;;  %v14735_v50 = vor.u32 %v18173_v63, %v14734_v55  ;;  %20126 = vst [vmem:[#allocation31_spill] sm:$0xff] %v19728_v56  ;;  %v14654_v8 = vld [vmem:[#allocation6 + $0x608] sm:$0xf]  ;;  %v18233_v55 = vld [vmem:[#allocation6 + $0x8ac] sm:$0xf0] }
 0x439   :  { %v15015_v45 = vor.u32 %v18243_v31, %v15014_v20  ;;  %v14974_v34 = vld [vmem:[#allocation6 + $0x888] sm:$0xf]  ;;  %v14934_v20 = vld [vmem:[#allocation6 + $0x838] sm:$0xf]  ;;  %v18223_v31 = vld [vmem:[#allocation6 + $0x85c] sm:$0xf0] }
 0x43a   :  { %10195 = vmatpush.bf16.msra.mxu0 %v16451_v4  ;;  %v18557_v4 = vld [vmem:[#allocation6 + $0x12d4] sm:$0xf]  ;;  %v14454_v56 = vld [vmem:[#allocation6 + $0x478] sm:$0xf] }
 0x43b   :  { %10209 = vmatpush.bf16.msra.mxu1 %v16771_v30  ;;  %v16288_v30 = vld [vmem:[#allocation6 + $0x12f8] sm:$0xf0] }
 0x43c   :  { %10223 = vmatpush.bf16.msra.mxu2 %v13895_v7  ;;  %10175 = vmatpush.bf16.msrb.mxu3 %v16371_v61  ;;  %v16291_v19 = vor.u32 %v18557_v4, %v16288_v30  ;;  %v14695_v7 = vor.u32 %v18163_v27, %v14694_v0  ;;  %v18547_v61 = vld [vmem:[#allocation6 + $0x1284] sm:$0xf]  ;;  %v15294_v4 = vld [vmem:[#allocation6 + $0xb08] sm:$0xf]  ;;  %v9917_v30 = vpop.f32.mrf.mxu0  ;;  %v14614_v0 = vld [vmem:[#allocation6 + $0x5b8] sm:$0xf] }
 0x43d   :  { %10196 = vmatmul.bf16.vlgmr.msra.gmra.mxu0 %v19529_v51  ;;  %v18143_v27 = vld [vmem:[#allocation6 + $0x5dc] sm:$0xf0] }
 0x43e   :  { %10244 = vmatpush.bf16.msrb.mxu0 %v14815_v41  ;;  %10210 = vmatmul.bf16.vlgmr.msra.gmra.mxu1 %v19549_v14  ;;  %v15055_v41 = vor.u32 %v18253_v10, %v15054_v17  ;;  %v9903_v10 = vpop.f32.mrf.mxu3 }
 0x43f   :  { %10258 = vmatpush.bf16.msrb.mxu1 %v15135_v29  ;;  %v18333_v29 = vld [vmem:[#allocation6 + $0xbcc] sm:$0xf0]  ;;  %10224 = vmatmul.bf16.vlgmr.msra.gmra.mxu2 %v19386_v36 }
 0x440   :  { %10272 = vmatpush.bf16.msrb.mxu2 %v15455_v33  ;;  %10176 = vmatpush.bf16.msrb.mxu3 %v16331_v11  ;;  %v15375_v32 = vor.u32 %v18333_v29, %v15374_v3  ;;  %v16248_v33 = vld [vmem:[#allocation6 + $0x12a8] sm:$0xf0]  ;;  %v9904_v3 = vadd.f32 %v9903_v10, %v19718_v23  ;;  %v18313_v29 = vld [vmem:[#allocation6 + $0xb2c] sm:$0xf0] }
 0x441   :  { %v16251_v63 = vor.u32 %v18547_v61, %v16248_v33  ;;  %v15295_v33 = vor.u32 %v18313_v29, %v15294_v4  ;;  %v18133_v10 = vld [vmem:[#allocation6 + $0x58c] sm:$0xf0] }
 0x442   :  { %10245 = vmatpush.bf16.msrb.mxu0 %v14775_v52  ;;  %v15334_v52 = vld [vmem:[#allocation6 + $0xb58] sm:$0xf]  ;;  %v18293_v4 = vld [vmem:[#allocation6 + $0xa8c] sm:$0xf0] }
 0x443   :  { %10259 = vmatpush.bf16.msrb.mxu1 %v15095_v5  ;;  %v18153_v5 = vld [vmem:[#allocation6 + $0x62c] sm:$0xf0]  ;;  %v15335_v17 = vor.u32 %v18323_v60, %v15334_v52  ;;  %v14615_v52 = vor.u32 %v18143_v27, %v14614_v0  ;;  %v18527_v60 = vld [vmem:[#allocation6 + $0x11e4] sm:$0xf]  ;;  %v14534_v0 = vld [vmem:[#allocation6 + $0x518] sm:$0xf] }
 0x444   :  { %10273 = vmatpush.bf16.msrb.mxu2 %v15415_v49  ;;  %10177 = vmatpush.bf16.msrb.mxu3 %v16291_v19  ;;  %v14655_v11 = vor.u32 %v18153_v5, %v14654_v8  ;;  %v18537_v49 = vld [vmem:[#allocation6 + $0x1234] sm:$0xf]  ;;  %v19731_v19 = vpop.f32.mrf.mxu2  ;;  %v15254_v8 = vld [vmem:[#allocation6 + $0xab8] sm:$0xf]  ;;  %v14935_v5 = vor.u32 %v18223_v31, %v14934_v20  ;;  %v18123_v27 = vld [vmem:[#allocation6 + $0x53c] sm:$0xf0] }
 0x445   :  { %20127 = vst [vmem:[#allocation25_spill] sm:$0xff] %v19731_v19  ;;  %v18213_v19 = vld [vmem:[#allocation6 + $0x80c] sm:$0xf0]  ;;  %v14854_v20 = vld [vmem:[#allocation6 + $0x798] sm:$0xf] }
 0x446   :  { %10246 = vmatpush.bf16.msrb.mxu0 %v14735_v50  ;;  %v16208_v50 = vld [vmem:[#allocation6 + $0x1258] sm:$0xf0]  ;;  %v14895_v29 = vor.u32 %v18213_v19, %v14894_v42  ;;  %v18203_v31 = vld [vmem:[#allocation6 + $0x7bc] sm:$0xf0]  ;;  %v14535_v19 = vor.u32 %v18123_v27, %v14534_v0  ;;  %v18093_v0 = vld [vmem:[#allocation6 + $0x44c] sm:$0xf0] }
 0x447   :  { %10260 = vmatpush.bf16.msrb.mxu1 %v15055_v41  ;;  %v14975_v41 = vor.u32 %v18233_v55, %v14974_v34  ;;  %v16211_v61 = vor.u32 %v18537_v49, %v16208_v50  ;;  %v18303_v34 = vld [vmem:[#allocation6 + $0xadc] sm:$0xf0]  ;;  %v14574_v55 = vld [vmem:[#allocation6 + $0x568] sm:$0xf]  ;;  %v16128_v49 = vld [vmem:[#allocation6 + $0x11b8] sm:$0xf0] }
 0x448   :  { %10274 = vmatpush.bf16.msrb.mxu2 %v15375_v32  ;;  %v9931_v32 = vpop.f32.mrf.mxu1  ;;  %10178 = vmatpush.bf16.msrb.mxu3 %v16251_v63  ;;  %v15214_v50 = vld [vmem:[#allocation6 + $0xa68] sm:$0xf]  ;;  %v16694_v27 = vld [vmem:[#allocation6 + $0x15f8] sm:$0xf] }
 0x44a   :  { %10247 = vmatpush.bf16.msrb.mxu0 %v14695_v7  ;;  %v9918_v7 = vadd.f32 %v9917_v30, %v9904_v3  ;;  %v18517_v30 = vld [vmem:[#allocation6 + $0x1194] sm:$0xf]  ;;  %v14494_v3 = vld [vmem:[#allocation6 + $0x4c8] sm:$0xf] }
 0x44b   :  { %10261 = vmatpush.bf16.msrb.mxu1 %v15015_v45  ;;  %v16168_v45 = vld [vmem:[#allocation6 + $0x1208] sm:$0xf0] }
 0x44c   :  { %10275 = vmatpush.bf16.msrb.mxu2 %v15335_v17  ;;  %v19733_v23 = vadd.f32 %v9931_v32, %v9918_v7  ;;  %10179 = vmatpush.bf16.msrb.mxu3 %v16211_v61  ;;  %v16171_v63 = vor.u32 %v18527_v60, %v16168_v45  ;;  %v15255_v17 = vor.u32 %v18303_v34, %v15254_v8  ;;  %v16094_v32 = vld [vmem:[#allocation6 + $0x1148] sm:$0xf]  ;;  %v19735_v7 = vpop.f32.mrf.mxu0  ;;  %v19737_v61 = vpop.f32.mrf.mxu2  ;;  %v18593_v45 = vld [vmem:[#allocation6 + $0x13ec] sm:$0xf0] }
 0x44d   :  { %20129 = vst [vmem:[#allocation32_spill] sm:$0xff] %v19735_v7  ;;  %v16414_v60 = vld [vmem:[#allocation6 + $0x13c8] sm:$0xf]  ;;  %v15215_v8 = vor.u32 %v18293_v4, %v15214_v50  ;;  %v14855_v34 = vor.u32 %v18203_v31, %v14854_v20  ;;  %v14455_v4 = vor.u32 %v18103_v37, %v14454_v56  ;;  %v18573_v56 = vld [vmem:[#allocation6 + $0x134c] sm:$0xf0] }
 0x44e   :  { %10248 = vmatpush.bf16.msrb.mxu0 %v14655_v11  ;;  %20128 = vst [vmem:[#allocation35_spill] sm:$0xff] %v19733_v23  ;;  %v14575_v11 = vor.u32 %v18133_v10, %v14574_v55  ;;  %v15174_v55 = vld [vmem:[#allocation6 + $0xa18] sm:$0xf]  ;;  %v18283_v10 = vld [vmem:[#allocation6 + $0xa3c] sm:$0xf0]  ;;  %v16415_v7 = vor.u32 %v18593_v45, %v16414_v60  ;;  %v19750_v60 = vpop.f32.mrf.mxu3 }
 0x44f   :  { %10262 = vmatpush.bf16.msrb.mxu1 %v14975_v41  ;;  %v18113_v41 = vld [vmem:[#allocation6 + $0x4ec] sm:$0xf0]  ;;  %v15175_v50 = vor.u32 %v18283_v10, %v15174_v55  ;;  %v16334_v37 = vld [vmem:[#allocation6 + $0x1328] sm:$0xf]  ;;  %20131 = vst [vmem:[#allocation42_spill] sm:$0xff] %v19750_v60 }
 0x450   :  { %10276 = vmatpush.bf16.msrb.mxu2 %v15295_v33  ;;  %10180 = vmatpush.bf16.msrb.mxu3 %v16171_v63  ;;  %v16131_v33 = vor.u32 %v18517_v30, %v16128_v49  ;;  %v19739_v42 = vpop.f32.mrf.mxu1  ;;  %v16734_v63 = vld [vmem:[#allocation6 + $0x1648] sm:$0xf]  ;;  %v18673_v30 = vld [vmem:[#allocation6 + $0x166c] sm:$0xf0]  ;;  %v16054_v49 = vld [vmem:[#allocation6 + $0x10f8] sm:$0xf]  ;;  %v16335_v55 = vor.u32 %v18573_v56, %v16334_v37 }
 0x451   :  { %20130 = vst [vmem:[#allocation21_spill] sm:$0xff] %v19739_v42  ;;  %v18653_v10 = vld [vmem:[#allocation6 + $0x15cc] sm:$0xf0]  ;;  %v16254_v37 = vld [vmem:[#allocation6 + $0x1288] sm:$0xf] }
 0x452   :  { %10249 = vmatpush.bf16.msrb.mxu0 %v14615_v52  ;;  %v18513_v52 = vld [vmem:[#allocation6 + $0x116c] sm:$0xf0] }
 0x453   :  { %10263 = vmatpush.bf16.msrb.mxu1 %v14935_v5  ;;  %v14495_v5 = vor.u32 %v18113_v41, %v14494_v3  ;;  %v16095_v23 = vor.u32 %v18513_v52, %v16094_v32  ;;  %v16735_v3 = vor.u32 %v18673_v30, %v16734_v63  ;;  %v14414_v41 = vld [vmem:[#allocation6 + $0x428] sm:$0xf]  ;;  %v18663_v32 = vld [vmem:[#allocation6 + $0x161c] sm:$0xf0]  ;;  %v18493_v52 = vld [vmem:[#allocation6 + $0x10cc] sm:$0xf0] }
 0x454   :  { %10277 = vmatpush.bf16.msrb.mxu2 %v15255_v17  ;;  %10181 = vmatpush.bf16.msrb.mxu3 %v16131_v33  ;;  %v16374_v17 = vld [vmem:[#allocation6 + $0x1378] sm:$0xf]  ;;  %v19741_v20 = vpop.f32.mrf.mxu0  ;;  %v16014_v33 = vld [vmem:[#allocation6 + $0x10a8] sm:$0xf]  ;;  %v16695_v45 = vor.u32 %v18663_v32, %v16694_v27  ;;  %v18483_v30 = vld [vmem:[#allocation6 + $0x107c] sm:$0xf0] }
 0x455   :  { %v15974_v63 = vld [vmem:[#allocation6 + $0x1058] sm:$0xf]  ;;  %v18643_v32 = vld [vmem:[#allocation6 + $0x157c] sm:$0xf0]  ;;  %v18553_v56 = vld [vmem:[#allocation6 + $0x12ac] sm:$0xf0] }
 0x456   :  { %10250 = vmatpush.bf16.msrb.mxu0 %v14575_v11  ;;  %v18583_v11 = vld [vmem:[#allocation6 + $0x139c] sm:$0xf0]  ;;  %v16614_v27 = vld [vmem:[#allocation6 + $0x1558] sm:$0xf]  ;;  %v18633_v60 = vld [vmem:[#allocation6 + $0x152c] sm:$0xf0] }
 0x457   :  { %10264 = vmatpush.bf16.msrb.mxu1 %v14895_v29  ;;  %v16055_v29 = vor.u32 %v18503_v2, %v16054_v49  ;;  %10182 = vmatmul.bf16.vlgmr.msrb.gmra.mxu3 %v19521_v44  ;;  %v16375_v31 = vor.u32 %v18583_v11, %v16374_v17  ;;  %v16294_v49 = vld [vmem:[#allocation6 + $0x12d8] sm:$0xf]  ;;  %v18563_v17 = vld [vmem:[#allocation6 + $0x12fc] sm:$0xf0] }
 0x458   :  { %10278 = vmatpush.bf16.msrb.mxu2 %v15215_v8  ;;  %10230 = vmatpush.bf16.msra.mxu3 %v14495_v5  ;;  %v19748_v2 = vpop.f32.mrf.mxu1  ;;  %v16015_v8 = vor.u32 %v18493_v52, %v16014_v33  ;;  %v14374_v5 = vld [vmem:[#allocation6 + $0x3d8] sm:$0xf]  ;;  %v19753_v11 = vld [vmem:[#allocation7] sm:$0xff]  ;;  %v15934_v33 = vld [vmem:[#allocation6 + $0x1008] sm:$0xf] }
 0x459   :  { %v18473_v52 = vld [vmem:[#allocation6 + $0x102c] sm:$0xf0] }
 0x45a   :  { %10251 = vmatpush.bf16.msrb.mxu0 %v14535_v19  ;;  %v18083_v19 = vld [vmem:[#allocation6 + $0x3fc] sm:$0xf0] }
 0x45b   :  { %10265 = vmatpush.bf16.msrb.mxu1 %v14855_v34  ;;  %v16654_v34 = vld [vmem:[#allocation6 + $0x15a8] sm:$0xf] }
 0x45c   :  { %10279 = vmatpush.bf16.msrb.mxu2 %v15175_v50  ;;  %10231 = vmatpush.bf16.msra.mxu3 %v14455_v4  ;;  %v20046_v50 = vperm.slane %v19753_v11, 4  ;;  %v14375_v4 = vor.u32 %v18083_v19, %v14374_v5  ;;  %v16615_v5 = vor.u32 %v18643_v32, %v16614_v27  ;;  %v9959_v19 = vpop.f32.mrf.mxu3  ;;  %v18053_v27 = vld [vmem:[#allocation6 + $0x30c] sm:$0xf0]  ;;  %v16534_v32 = vld [vmem:[#allocation6 + $0x14b8] sm:$0xf] }
 0x45d   :  { %10252 = vmatmul.bf16.vlgmr.msrb.gmra.mxu0 %v19468_v15 }
 0x45e   :  { %10300 = vmatpush.bf16.msra.mxu0 %v16095_v23  ;;  %10266 = vmatmul.bf16.vlgmr.msrb.gmra.mxu1 %v19470_v38  ;;  %v19746_v23 = vpop.f32.mrf.mxu2  ;;  %v9946_v42 = vadd.f32 %v19737_v61, %v20046_v50  ;;  %v15894_v61 = vld [vmem:[#allocation6 + $0xfb8] sm:$0xf]  ;;  %v18463_v50 = vld [vmem:[#allocation6 + $0xfdc] sm:$0xf0] }
 0x45f   :  { %10314 = vmatpush.bf16.msra.mxu1 %v16415_v7  ;;  %v14415_v7 = vor.u32 %v18093_v0, %v14414_v41  ;;  %10280 = vmatmul.bf16.vlgmr.msrb.gmra.mxu2 %v19474_v12  ;;  %v14334_v41 = vld [vmem:[#allocation6 + $0x388] sm:$0xf]  ;;  %v18073_v0 = vld [vmem:[#allocation6 + $0x3ac] sm:$0xf0] }
 0x460   :  { %10328 = vmatpush.bf16.msra.mxu2 %v16735_v3  ;;  %v16655_v3 = vor.u32 %v18653_v10, %v16654_v34  ;;  %v15935_v34 = vor.u32 %v18473_v52, %v15934_v33  ;;  %v18063_v10 = vld [vmem:[#allocation6 + $0x35c] sm:$0xf0]  ;;  %v15854_v33 = vld [vmem:[#allocation6 + $0xf68] sm:$0xf]  ;;  %v18453_v52 = vld [vmem:[#allocation6 + $0xf8c] sm:$0xf0] }
 0x461   :  { %10232 = vmatpush.bf16.msra.mxu3 %v14415_v7  ;;  %v19759_v7 = vpop.f32.mrf.mxu0 }
 0x462   :  { %10301 = vmatpush.bf16.msra.mxu0 %v16055_v29  ;;  %v15975_v29 = vor.u32 %v18483_v30, %v15974_v63  ;;  %20132 = vst [vmem:[#allocation43_spill] sm:$0xff] %v19759_v7  ;;  %v16574_v63 = vld [vmem:[#allocation6 + $0x1508] sm:$0xf]  ;;  %v19761_v30 = vpop.f32.mrf.mxu1  ;;  %v18543_v7 = vld [vmem:[#allocation6 + $0x125c] sm:$0xf0] }
 0x463   :  { %10315 = vmatpush.bf16.msra.mxu1 %v16375_v31  ;;  %v16295_v31 = vor.u32 %v18563_v17, %v16294_v49  ;;  %20133 = vst [vmem:[#allocation44_spill] sm:$0xff] %v19761_v30  ;;  %v9960_v49 = vadd.f32 %v9959_v19, %v9946_v42  ;;  %v16255_v17 = vor.u32 %v18553_v56, %v16254_v37  ;;  %v18623_v42 = vld [vmem:[#allocation6 + $0x14dc] sm:$0xf0]  ;;  %v16174_v56 = vld [vmem:[#allocation6 + $0x11e8] sm:$0xf] }
 0x464   :  { %10329 = vmatpush.bf16.msra.mxu2 %v16695_v45  ;;  %v18533_v19 = vld [vmem:[#allocation6 + $0x120c] sm:$0xf0]  ;;  %v15734_v30 = vld [vmem:[#allocation6 + $0xe78] sm:$0xf] }
 0x465   :  { %10233 = vmatpush.bf16.msra.mxu3 %v14375_v4  ;;  %v9974_v4 = vadd.f32 %v19741_v20, %v9960_v49  ;;  %v16175_v49 = vor.u32 %v18533_v19, %v16174_v56  ;;  %v18603_v56 = vld [vmem:[#allocation6 + $0x143c] sm:$0xf0] }
 0x466   :  { %10302 = vmatpush.bf16.msra.mxu0 %v16015_v8  ;;  %v10001_v45 = vpop.f32.mrf.mxu2  ;;  %v14335_v8 = vor.u32 %v18073_v0, %v14334_v41  ;;  %v15895_v41 = vor.u32 %v18463_v50, %v15894_v61  ;;  %v14254_v0 = vld [vmem:[#allocation6 + $0x2e8] sm:$0xf]  ;;  %v16535_v50 = vor.u32 %v18623_v42, %v16534_v32  ;;  %v15814_v61 = vld [vmem:[#allocation6 + $0xf18] sm:$0xf]  ;;  %v14496_v32 = vld [vmem:[#allocation6 + $0x4f0] sm:$0xf0] }
 0x467   :  { %10316 = vmatpush.bf16.msra.mxu1 %v16335_v55  ;;  %v14294_v55 = vld [vmem:[#allocation6 + $0x338] sm:$0xf]  ;;  %v9988_v37 = vadd.f32 %v19748_v2, %v9974_v4  ;;  %v14255_v20 = vor.u32 %v18053_v27, %v14254_v0  ;;  %v18443_v4 = vld [vmem:[#allocation6 + $0xf3c] sm:$0xf0]  ;;  %v18108_v27 = vld [vmem:[#allocation6 + $0x4cc] sm:$0xf] }
 0x468   :  { %10330 = vmatpush.bf16.msra.mxu2 %v16655_v3  ;;  %v14295_v3 = vor.u32 %v18063_v10, %v14294_v55  ;;  %v15855_v55 = vor.u32 %v18453_v52, %v15854_v33  ;;  %v15774_v10 = vld [vmem:[#allocation6 + $0xec8] sm:$0xf]  ;;  %v18523_v0 = vld [vmem:[#allocation6 + $0x11bc] sm:$0xf0]  ;;  %v15815_v52 = vor.u32 %v18443_v4, %v15814_v61 }
 0x469   :  { %10234 = vmatpush.bf16.msra.mxu3 %v14335_v8  ;;  %v19765_v8 = vpop.f32.mrf.mxu0  ;;  %v15694_v4 = vld [vmem:[#allocation6 + $0xe28] sm:$0xf] }
 0x46a   :  { %10303 = vmatpush.bf16.msra.mxu0 %v15975_v29  ;;  %v16575_v29 = vor.u32 %v18633_v60, %v16574_v63  ;;  %v19767_v60 = vadd.f32 %v10001_v45, %v9988_v37  ;;  %v19771_v2 = vpop.f32.mrf.mxu1  ;;  %v18028_v45 = vld [vmem:[#allocation6 + $0x24c] sm:$0xf] }
 0x46b   :  { %10317 = vmatpush.bf16.msra.mxu1 %v16295_v31  ;;  %v16215_v31 = vor.u32 %v18543_v7, %v16214_v28  ;;  %v16494_v28 = vld [vmem:[#allocation6 + $0x1468] sm:$0xf]  ;;  %v18613_v7 = vld [vmem:[#allocation6 + $0x148c] sm:$0xf0] }
 0x46c   :  { %10331 = vmatpush.bf16.msra.mxu2 %v16615_v5  ;;  %v14214_v5 = vld [vmem:[#allocation6 + $0x298] sm:$0xf]  ;;  %v16495_v42 = vor.u32 %v18613_v7, %v16494_v28 }
 0x46d   :  { %10235 = vmatpush.bf16.msra.mxu3 %v14295_v3  ;;  %v16134_v3 = vld [vmem:[#allocation6 + $0x1198] sm:$0xf] }
 0x46e   :  { %10304 = vmatpush.bf16.msra.mxu0 %v15935_v34  ;;  %v18043_v34 = vld [vmem:[#allocation6 + $0x2bc] sm:$0xf0]  ;;  %v19769_v63 = vpop.f32.mrf.mxu2  ;;  %v16135_v37 = vor.u32 %v18523_v0, %v16134_v3  ;;  %v18413_v3 = vld [vmem:[#allocation6 + $0xe4c] sm:$0xf0]  ;;  %v18178_v0 = vld [vmem:[#allocation6 + $0x6fc] sm:$0xf] }
 0x46f   :  { %10318 = vmatpush.bf16.msra.mxu1 %v16255_v17  ;;  %20134 = vst [vmem:[#allocation45_spill] sm:$0xff] %v19769_v63  ;;  %v18433_v17 = vld [vmem:[#allocation6 + $0xeec] sm:$0xf0]  ;;  %v14499_v63 = vor.u32 %v18108_v27, %v14496_v32  ;;  %v18008_v27 = vld [vmem:[#allocation6 + $0x1ac] sm:$0xf] }
 0x470   :  { %10332 = vmatpush.bf16.msra.mxu2 %v16575_v29  ;;  %v14215_v29 = vor.u32 %v18043_v34, %v14214_v5  ;;  %v15775_v33 = vor.u32 %v18433_v17, %v15774_v10  ;;  %v18018_v5 = vld [vmem:[#allocation6 + $0x1fc] sm:$0xf]  ;;  %v14136_v34 = vld [vmem:[#allocation6 + $0x220] sm:$0xf0]  ;;  %v14096_v32 = vld [vmem:[#allocation6 + $0x1d0] sm:$0xf0] }
 0x471   :  { %10236 = vmatpush.bf16.msra.mxu3 %v14255_v20  ;;  %v14816_v20 = vld [vmem:[#allocation6 + $0x770] sm:$0xf0]  ;;  %v19773_v28 = vpop.f32.mrf.mxu0  ;;  %v14139_v61 = vor.u32 %v18018_v5, %v14136_v34  ;;  %v17998_v5 = vld [vmem:[#allocation6 + $0x15c] sm:$0xf]  ;;  %v14056_v34 = vld [vmem:[#allocation6 + $0x180] sm:$0xf0] }
 0x472   :  { %10305 = vmatpush.bf16.msra.mxu0 %v15895_v41  ;;  %v14176_v41 = vld [vmem:[#allocation6 + $0x270] sm:$0xf0]  ;;  %20135 = vst [vmem:[#allocation46_spill] sm:$0xff] %v19773_v28  ;;  %v14819_v17 = vor.u32 %v18188_v13, %v14816_v20  ;;  %v15695_v13 = vor.u32 %v18413_v3, %v15694_v4  ;;  %v14059_v4 = vor.u32 %v17998_v5, %v14056_v34  ;;  %v15614_v3 = vld [vmem:[#allocation6 + $0xd88] sm:$0xf] }
 0x473   :  { %10319 = vmatpush.bf16.msra.mxu1 %v16215_v31  ;;  %v16454_v31 = vld [vmem:[#allocation6 + $0x1418] sm:$0xf]  ;;  %v14179_v19 = vor.u32 %v18028_v45, %v14176_v41  ;;  %v19777_v45 = vpop.f32.mrf.mxu1  ;;  %v14776_v41 = vld [vmem:[#allocation6 + $0x720] sm:$0xf0]  ;;  %v14736_v20 = vld [vmem:[#allocation6 + $0x6d0] sm:$0xf0] }
 0x474   :  { %10333 = vmatpush.bf16.msra.mxu2 %v16535_v50  ;;  %v18098_v50 = vld [vmem:[#allocation6 + $0x47c] sm:$0xf]  ;;  %v16455_v10 = vor.u32 %v18603_v56, %v16454_v31  ;;  %20136 = vst [vmem:[#allocation47_spill] sm:$0xff] %v19777_v45  ;;  %v18403_v31 = vld [vmem:[#allocation6 + $0xdfc] sm:$0xf0] }
 0x475   :  { %10237 = vmatpush.bf16.msra.mxu3 %v14215_v29  ;;  %v18168_v56 = vld [vmem:[#allocation6 + $0x6ac] sm:$0xf]  ;;  %v15574_v5 = vld [vmem:[#allocation6 + $0xd38] sm:$0xf]  ;;  %v18383_v34 = vld [vmem:[#allocation6 + $0xd5c] sm:$0xf0] }
 0x476   :  { %10306 = vmatpush.bf16.msra.mxu0 %v15855_v55  ;;  %v14456_v55 = vld [vmem:[#allocation6 + $0x4a0] sm:$0xf0]  ;;  %v19775_v7 = vpop.f32.mrf.mxu2  ;;  %v18508_v28 = vld [vmem:[#allocation6 + $0x114c] sm:$0xf] }
 0x477   :  { %10320 = vmatpush.bf16.msra.mxu1 %v16175_v49  ;;  %v15735_v49 = vor.u32 %v18423_v43, %v15734_v30  ;;  %v14459_v29 = vor.u32 %v18098_v50, %v14456_v55  ;;  %v18088_v43 = vld [vmem:[#allocation6 + $0x42c] sm:$0xf]  ;;  %v14416_v30 = vld [vmem:[#allocation6 + $0x450] sm:$0xf0]  ;;  %v18078_v50 = vld [vmem:[#allocation6 + $0x3dc] sm:$0xf] }
 0x478   :  { %10334 = vmatpush.bf16.msra.mxu2 %v16495_v42  ;;  %10238 = vmatmul.bf16.vlgmr.msra.gmra.mxu3 %v19402_v58  ;;  %v19783_v42 = vpop.f32.mrf.mxu3  ;;  %v14376_v55 = vld [vmem:[#allocation6 + $0x400] sm:$0xf0] }
 0x479   :  { %10286 = vmatpush.bf16.msrb.mxu3 %v15775_v33  ;;  %v14779_v33 = vor.u32 %v18178_v0, %v14776_v41  ;;  %v18393_v0 = vld [vmem:[#allocation6 + $0xdac] sm:$0xf0] }
 0x47a   :  { %10307 = vmatpush.bf16.msra.mxu0 %v15815_v52  ;;  %v14099_v52 = vor.u32 %v18008_v27, %v14096_v32  ;;  %v14379_v32 = vor.u32 %v18078_v50, %v14376_v55  ;;  %v14656_v55 = vld [vmem:[#allocation6 + $0x630] sm:$0xf0] }
 0x47b   :  { %10321 = vmatpush.bf16.msra.mxu1 %v16135_v37  ;;  %v15654_v37 = vld [vmem:[#allocation6 + $0xdd8] sm:$0xf]  ;;  %v10099_v27 = vpop.f32.mrf.mxu1 }
 0x47c   :  { %10335 = vmatpush.bf16.msra.mxu2 %v16455_v10  ;;  %v10085_v10 = vpop.f32.mrf.mxu0 }
 0x47d   :  { %10308 = vmatmul.bf16.vlgmr.msra.gmra.mxu0 %v19519_v6  ;;  %10287 = vmatpush.bf16.msrb.mxu3 %v15735_v49  ;;  %v15655_v49 = vor.u32 %v18403_v31, %v15654_v37  ;;  %v18068_v37 = vld [vmem:[#allocation6 + $0x38c] sm:$0xf] }
 0x47e   :  { %10356 = vmatpush.bf16.msrb.mxu0 %v14179_v19  ;;  %10322 = vmatmul.bf16.vlgmr.msra.gmra.mxu1 %v19521_v44  ;;  %v14419_v19 = vor.u32 %v18088_v43, %v14416_v30  ;;  %v19788_v41 = vpop.f32.mrf.mxu2  ;;  %v14696_v43 = vld [vmem:[#allocation6 + $0x680] sm:$0xf0]  ;;  %v17988_v30 = vld [vmem:[#allocation6 + $0x10c] sm:$0xf] }
 0x47f   :  { %10370 = vmatpush.bf16.msrb.mxu1 %v14499_v63  ;;  %v20047_v63 = vperm.slane %v19753_v11, 5  ;;  %10336 = vmatmul.bf16.vlgmr.msra.gmra.mxu2 %v19529_v51  ;;  %20137 = vst [vmem:[#allocation48_spill] sm:$0xff] %v19788_v41  ;;  %v13976_v41 = vld [vmem:[#allocation6 + $0xe0] sm:$0xf0] }
 0x480   :  { %10384 = vmatpush.bf16.msrb.mxu2 %v14819_v17 }
 0x481   :  { %10288 = vmatpush.bf16.msrb.mxu3 %v15695_v13  ;;  %v10086_v17 = vadd.f32 %v10085_v10, %v20047_v63  ;;  %v14016_v13 = vld [vmem:[#allocation6 + $0x130] sm:$0xf0]  ;;  %v18148_v10 = vld [vmem:[#allocation6 + $0x60c] sm:$0xf]  ;;  %v17978_v63 = vld [vmem:[#allocation6 + $0xbc] sm:$0xf] }
 0x482   :  { %10357 = vmatpush.bf16.msrb.mxu0 %v14139_v61  ;;  %v14739_v61 = vor.u32 %v18168_v56, %v14736_v20  ;;  %v10015_v56 = vpop.f32.mrf.mxu3  ;;  %v14019_v20 = vor.u32 %v17988_v30, %v14016_v13  ;;  %v14616_v30 = vld [vmem:[#allocation6 + $0x5e0] sm:$0xf0]  ;;  %v17968_v13 = vld [vmem:[#allocation6 + $0x6c] sm:$0xf] }
 0x483   :  { %10371 = vmatpush.bf16.msrb.mxu1 %v14459_v29  ;;  %v18158_v29 = vld [vmem:[#allocation6 + $0x65c] sm:$0xf]  ;;  %v10100_v45 = vadd.f32 %v10099_v27, %v10086_v17  ;;  %v14296_v27 = vld [vmem:[#allocation6 + $0x360] sm:$0xf0] }
 0x484   :  { %10385 = vmatpush.bf16.msrb.mxu2 %v14779_v33  ;;  %v14336_v33 = vld [vmem:[#allocation6 + $0x3b0] sm:$0xf0]  ;;  %v14699_v31 = vor.u32 %v18158_v29, %v14696_v43  ;;  %v18058_v17 = vld [vmem:[#allocation6 + $0x33c] sm:$0xf]  ;;  %v18373_v29 = vld [vmem:[#allocation6 + $0xd0c] sm:$0xf0] }
 0x485   :  { %10289 = vmatpush.bf16.msrb.mxu3 %v15655_v49  ;;  %v14339_v50 = vor.u32 %v18068_v37, %v14336_v33  ;;  %v18138_v43 = vld [vmem:[#allocation6 + $0x5bc] sm:$0xf]  ;;  %v13936_v37 = vld [vmem:[#allocation6 + $0x90] sm:$0xf0] }
 0x486   :  { %10358 = vmatpush.bf16.msrb.mxu0 %v14099_v52  ;;  %v15615_v52 = vor.u32 %v18393_v0, %v15614_v3  ;;  %v13979_v3 = vor.u32 %v17978_v63, %v13976_v41  ;;  %v15534_v0 = vld [vmem:[#allocation6 + $0xce8] sm:$0xf]  ;;  %v14619_v41 = vor.u32 %v18138_v43, %v14616_v30 }
 0x487   :  { %10372 = vmatpush.bf16.msrb.mxu1 %v14419_v19  ;;  %v10016_v19 = vadd.f32 %v10015_v56, %v19767_v60  ;;  %v14299_v60 = vor.u32 %v18058_v17, %v14296_v27  ;;  %v13896_v17 = vld [vmem:[#allocation6 + $0x40] sm:$0xf0]  ;;  %v18038_v27 = vld [vmem:[#allocation6 + $0x29c] sm:$0xf] }
 0x488   :  { %10386 = vmatpush.bf16.msrb.mxu2 %v14739_v61  ;;  %v15575_v61 = vor.u32 %v18383_v34, %v15574_v5  ;;  %v18363_v5 = vld [vmem:[#allocation6 + $0xcbc] sm:$0xf0]  ;;  %v13939_v34 = vor.u32 %v17968_v13, %v13936_v37  ;;  %v14536_v13 = vld [vmem:[#allocation6 + $0x540] sm:$0xf0] }
 0x489   :  { %10290 = vmatpush.bf16.msrb.mxu3 %v15615_v52  ;;  %v10030_v49 = vadd.f32 %v19765_v8, %v10016_v19  ;;  %v18048_v52 = vld [vmem:[#allocation6 + $0x2ec] sm:$0xf]  ;;  %v14256_v8 = vld [vmem:[#allocation6 + $0x310] sm:$0xf0] }
 0x48a   :  { %10359 = vmatpush.bf16.msrb.mxu0 %v14059_v4  ;;  %v14659_v4 = vor.u32 %v18148_v10, %v14656_v55  ;;  %v18128_v10 = vld [vmem:[#allocation6 + $0x56c] sm:$0xf]  ;;  %v14576_v19 = vld [vmem:[#allocation6 + $0x590] sm:$0xf0]  ;;  %v17958_v55 = vld [vmem:[#allocation6 + $0x1c] sm:$0xf] }
 0x48b   :  { %10373 = vmatpush.bf16.msrb.mxu1 %v14379_v32  ;;  %v10113_v32 = vpop.f32.mrf.mxu2  ;;  %v10044_v33 = vadd.f32 %v19771_v2, %v10030_v49  ;;  %v14259_v2 = vor.u32 %v18048_v52, %v14256_v8  ;;  %v14216_v49 = vld [vmem:[#allocation6 + $0x2c0] sm:$0xf0]  ;;  %v13899_v43 = vor.u32 %v17958_v55, %v13896_v17  ;;  %v17014_v52 = vld [vmem:[#allocation6 + $0x1878] sm:$0xf]  ;;  %v18743_v8 = vld [vmem:[#allocation6 + $0x189c] sm:$0xf0] }
 0x48c   :  { %10387 = vmatpush.bf16.msrb.mxu2 %v14699_v31  ;;  %v19793_v56 = vadd.f32 %v10113_v32, %v10100_v45  ;;  %v15535_v31 = vor.u32 %v18373_v29, %v15534_v0  ;;  %v18753_v45 = vld [vmem:[#allocation6 + $0x18ec] sm:$0xf0]  ;;  %v15456_v29 = vld [vmem:[#allocation6 + $0xc70] sm:$0xf0]  ;;  %v14219_v30 = vor.u32 %v18038_v27, %v14216_v49  ;;  %v18498_v17 = vld [vmem:[#allocation6 + $0x10fc] sm:$0xf] }
 0x48d   :  { %10291 = vmatpush.bf16.msrb.mxu3 %v15575_v61  ;;  %v19796_v63 = vadd.f32 %v19775_v7, %v10044_v33  ;;  %v18348_v61 = vld [vmem:[#allocation6 + $0xc4c] sm:$0xf]  ;;  %v15776_v32 = vld [vmem:[#allocation6 + $0xef0] sm:$0xf0]  ;;  %v18733_v55 = vld [vmem:[#allocation6 + $0x184c] sm:$0xf0] }
 0x48e   :  { %10360 = vmatpush.bf16.msrb.mxu0 %v14019_v20  ;;  %v15494_v20 = vld [vmem:[#allocation6 + $0xc98] sm:$0xf]  ;;  %v18428_v7 = vld [vmem:[#allocation6 + $0xecc] sm:$0xf]  ;;  %v15459_v37 = vor.u32 %v18348_v61, %v15456_v29  ;;  %v16056_v49 = vld [vmem:[#allocation6 + $0x1120] sm:$0xf0] }
 0x48f   :  { %10374 = vmatpush.bf16.msrb.mxu1 %v14339_v50  ;;  %v17054_v50 = vld [vmem:[#allocation6 + $0x18c8] sm:$0xf]  ;;  %v15495_v0 = vor.u32 %v18363_v5, %v15494_v20  ;;  %v15779_v33 = vor.u32 %v18428_v7, %v15776_v32  ;;  %v18338_v20 = vld [vmem:[#allocation6 + $0xbfc] sm:$0xf]  ;;  %v15416_v5 = vld [vmem:[#allocation6 + $0xc20] sm:$0xf0] }
 0x490   :  { %10388 = vmatpush.bf16.msrb.mxu2 %v14659_v4  ;;  %v14579_v4 = vor.u32 %v18128_v10, %v14576_v19  ;;  %v17015_v19 = vor.u32 %v18743_v8, %v17014_v52  ;;  %v18328_v61 = vld [vmem:[#allocation6 + $0xbac] sm:$0xf]  ;;  %v15696_v7 = vld [vmem:[#allocation6 + $0xe50] sm:$0xf0]  ;;  %v15336_v52 = vld [vmem:[#allocation6 + $0xb80] sm:$0xf0] }
 0x491   :  { %10292 = vmatpush.bf16.msrb.mxu3 %v15535_v31  ;;  %v16096_v31 = vld [vmem:[#allocation6 + $0x1170] sm:$0xf0]  ;;  %v18408_v29 = vld [vmem:[#allocation6 + $0xe2c] sm:$0xf]  ;;  %v18398_v8 = vld [vmem:[#allocation6 + $0xddc] sm:$0xf] }
 0x492   :  { %10361 = vmatpush.bf16.msrb.mxu0 %v13979_v3  ;;  %v17055_v3 = vor.u32 %v18753_v45, %v17054_v50  ;;  %v16099_v50 = vor.u32 %v18508_v28, %v16096_v31  ;;  %v16974_v45 = vld [vmem:[#allocation6 + $0x1828] sm:$0xf]  ;;  %v19801_v28 = vpop.f32.mrf.mxu3  ;;  %v15656_v31 = vld [vmem:[#allocation6 + $0xe00] sm:$0xf0] }
 0x493   :  { %10375 = vmatpush.bf16.msrb.mxu1 %v14299_v60  ;;  %v18118_v60 = vld [vmem:[#allocation6 + $0x51c] sm:$0xf]  ;;  %v16975_v32 = vor.u32 %v18733_v55, %v16974_v45  ;;  %v18308_v45 = vld [vmem:[#allocation6 + $0xb0c] sm:$0xf]  ;;  %v15296_v55 = vld [vmem:[#allocation6 + $0xb30] sm:$0xf0] }
 0x494   :  { %10389 = vmatpush.bf16.msrb.mxu2 %v14619_v41  ;;  %v18418_v41 = vld [vmem:[#allocation6 + $0xe7c] sm:$0xf]  ;;  %v14539_v10 = vor.u32 %v18118_v60, %v14536_v13  ;;  %v18488_v60 = vld [vmem:[#allocation6 + $0x10ac] sm:$0xf]  ;;  %v15699_v13 = vor.u32 %v18408_v29, %v15696_v7  ;;  %v15299_v29 = vor.u32 %v18308_v45, %v15296_v55  ;;  %v16854_v7 = vld [vmem:[#allocation6 + $0x1738] sm:$0xf] }
 0x495   :  { %10293 = vmatpush.bf16.msrb.mxu3 %v15495_v0  ;;  %v15376_v0 = vld [vmem:[#allocation6 + $0xbd0] sm:$0xf0]  ;;  %v16774_v55 = vld [vmem:[#allocation6 + $0x1698] sm:$0xf] }
 0x496   :  { %10362 = vmatpush.bf16.msrb.mxu0 %v13939_v34  ;;  %v15736_v34 = vld [vmem:[#allocation6 + $0xea0] sm:$0xf0] }
 0x497   :  { %10376 = vmatpush.bf16.msrb.mxu1 %v14259_v2  ;;  %v15419_v2 = vor.u32 %v18338_v20, %v15416_v5  ;;  %v15739_v27 = vor.u32 %v18418_v41, %v15736_v34  ;;  %v16894_v34 = vld [vmem:[#allocation6 + $0x1788] sm:$0xf] }
 0x498   :  { %10390 = vmatpush.bf16.msrb.mxu2 %v14579_v4  ;;  %10294 = vmatmul.bf16.vlgmr.msrb.gmra.mxu3 %v19481_v54  ;;  %v16059_v4 = vor.u32 %v18498_v17, %v16056_v49  ;;  %v18388_v17 = vld [vmem:[#allocation6 + $0xd8c] sm:$0xf] }
 0x499   :  { %10342 = vmatpush.bf16.msra.mxu3 %v17055_v3  ;;  %v15379_v3 = vor.u32 %v18328_v61, %v15376_v0 }
 0x49a   :  { %10363 = vmatpush.bf16.msrb.mxu0 %v13899_v43  ;;  %v16934_v43 = vld [vmem:[#allocation6 + $0x17d8] sm:$0xf]  ;;  %v10071_v0 = vpop.f32.mrf.mxu3 }
 0x49b   :  { %10377 = vmatpush.bf16.msrb.mxu1 %v14219_v30  ;;  %v18723_v30 = vld [vmem:[#allocation6 + $0x17fc] sm:$0xf0] }
 0x49c   :  { %10391 = vmatpush.bf16.msrb.mxu2 %v14539_v10  ;;  %v16935_v20 = vor.u32 %v18723_v30, %v16934_v43  ;;  %v18713_v10 = vld [vmem:[#allocation6 + $0x17ac] sm:$0xf0]  ;;  %v15936_v30 = vld [vmem:[#allocation6 + $0x1030] sm:$0xf0] }
 0x49d   :  { %10364 = vmatmul.bf16.vlgmr.msrb.gmra.mxu0 %v19386_v36  ;;  %10343 = vmatpush.bf16.msra.mxu3 %v17015_v19  ;;  %v18478_v19 = vld [vmem:[#allocation6 + $0x105c] sm:$0xf]  ;;  %v16895_v49 = vor.u32 %v18713_v10, %v16894_v34  ;;  %v15896_v10 = vld [vmem:[#allocation6 + $0xfe0] sm:$0xf0] }
 0x49e   :  { %10412 = vmatpush.bf16.msra.mxu0 %v15459_v37  ;;  %10378 = vmatmul.bf16.vlgmr.msrb.gmra.mxu1 %v19402_v58  ;;  %v16016_v37 = vld [vmem:[#allocation6 + $0x10d0] sm:$0xf0] }
 0x49f   :  { %10426 = vmatpush.bf16.msra.mxu1 %v15779_v33  ;;  %v18318_v33 = vld [vmem:[#allocation6 + $0xb5c] sm:$0xf]  ;;  %10392 = vmatmul.bf16.vlgmr.msrb.gmra.mxu2 %v19468_v15  ;;  %v16019_v5 = vor.u32 %v18488_v60, %v16016_v37 }
 0x4a0   :  { %10440 = vmatpush.bf16.msra.mxu2 %v16099_v50  ;;  %v15339_v41 = vor.u32 %v18318_v33, %v15336_v52  ;;  %v15659_v50 = vor.u32 %v18398_v8, %v15656_v31  ;;  %v18298_v60 = vld [vmem:[#allocation6 + $0xabc] sm:$0xf]  ;;  %v15576_v33 = vld [vmem:[#allocation6 + $0xd60] sm:$0xf0] }
 0x4a1   :  { %10344 = vmatpush.bf16.msra.mxu3 %v16975_v32  ;;  %v18703_v32 = vld [vmem:[#allocation6 + $0x175c] sm:$0xf0]  ;;  %v18378_v37 = vld [vmem:[#allocation6 + $0xd3c] sm:$0xf] }
 0x4a2   :  { %10413 = vmatpush.bf16.msra.mxu0 %v15419_v2  ;;  %v15976_v2 = vld [vmem:[#allocation6 + $0x1080] sm:$0xf0]  ;;  %v16855_v52 = vor.u32 %v18703_v32, %v16854_v7  ;;  %v15579_v34 = vor.u32 %v18378_v37, %v15576_v33  ;;  %v15136_v32 = vld [vmem:[#allocation6 + $0x9f0] sm:$0xf0] }
 0x4a3   :  { %10427 = vmatpush.bf16.msra.mxu1 %v15739_v27  ;;  %v15616_v27 = vld [vmem:[#allocation6 + $0xdb0] sm:$0xf0]  ;;  %v15979_v61 = vor.u32 %v18478_v19, %v15976_v2 }
 0x4a4   :  { %10441 = vmatpush.bf16.msra.mxu2 %v16059_v4  ;;  %v18468_v4 = vld [vmem:[#allocation6 + $0x100c] sm:$0xf]  ;;  %v15619_v43 = vor.u32 %v18388_v17, %v15616_v27  ;;  %v15216_v19 = vld [vmem:[#allocation6 + $0xa90] sm:$0xf0]  ;;  %v18683_v17 = vld [vmem:[#allocation6 + $0x16bc] sm:$0xf0] }
 0x4a5   :  { %10345 = vmatpush.bf16.msra.mxu3 %v16935_v20  ;;  %v15939_v8 = vor.u32 %v18468_v4, %v15936_v30  ;;  %v16814_v20 = vld [vmem:[#allocation6 + $0x16e8] sm:$0xf]  ;;  %v15536_v2 = vld [vmem:[#allocation6 + $0xd10] sm:$0xf0]  ;;  %v18278_v4 = vld [vmem:[#allocation6 + $0xa1c] sm:$0xf]  ;;  %v16775_v37 = vor.u32 %v18683_v17, %v16774_v55 }
 0x4a6   :  { %10414 = vmatpush.bf16.msra.mxu0 %v15379_v3  ;;  %v19805_v3 = vadd.f32 %v10071_v0, %v19796_v63  ;;  %v18288_v63 = vld [vmem:[#allocation6 + $0xa6c] sm:$0xf]  ;;  %v15856_v0 = vld [vmem:[#allocation6 + $0xf90] sm:$0xf0]  ;;  %v18358_v30 = vld [vmem:[#allocation6 + $0xc9c] sm:$0xf] }
 0x4a7   :  { %10428 = vmatpush.bf16.msra.mxu1 %v15699_v13  ;;  %v15256_v13 = vld [vmem:[#allocation6 + $0xae0] sm:$0xf0]  ;;  %v16736_v33 = vld [vmem:[#allocation6 + $0x1670] sm:$0xf0]  ;;  %v18658_v55 = vld [vmem:[#allocation6 + $0x15fc] sm:$0xf] }
 0x4a8   :  { %10442 = vmatpush.bf16.msra.mxu2 %v16019_v5  ;;  %20138 = vst [vmem:[#allocation49_spill] sm:$0xff] %v19805_v3  ;;  %v15259_v31 = vor.u32 %v18298_v60, %v15256_v13  ;;  %v18693_v5 = vld [vmem:[#allocation6 + $0x170c] sm:$0xf0]  ;;  %v15496_v60 = vld [vmem:[#allocation6 + $0xcc0] sm:$0xf0] }
 0x4a9   :  { %10346 = vmatpush.bf16.msra.mxu3 %v16895_v49  ;;  %v16815_v45 = vor.u32 %v18693_v5, %v16814_v20  ;;  %v15219_v49 = vor.u32 %v18288_v63, %v15216_v19  ;;  %v18668_v13 = vld [vmem:[#allocation6 + $0x164c] sm:$0xf]  ;;  %v17056_v20 = vld [vmem:[#allocation6 + $0x18f0] sm:$0xf0]  ;;  %v14182_v3 = vld [vmem:[#allocation6 + $0x250] sm:$0xf] }
 0x4aa   :  { %10415 = vmatpush.bf16.msra.mxu0 %v15339_v41  ;;  %v18458_v41 = vld [vmem:[#allocation6 + $0xfbc] sm:$0xf]  ;;  %v16739_v63 = vor.u32 %v18668_v13, %v16736_v33  ;;  %v16696_v17 = vld [vmem:[#allocation6 + $0x1620] sm:$0xf0]  ;;  %v18648_v13 = vld [vmem:[#allocation6 + $0x15ac] sm:$0xf] }
 0x4ab   :  { %10429 = vmatpush.bf16.msra.mxu1 %v15659_v50  ;;  %v18368_v50 = vld [vmem:[#allocation6 + $0xcec] sm:$0xf]  ;;  %v15899_v27 = vor.u32 %v18458_v41, %v15896_v10  ;;  %v15499_v41 = vor.u32 %v18358_v30, %v15496_v60  ;;  %v15816_v10 = vld [vmem:[#allocation6 + $0xf40] sm:$0xf0]  ;;  %v18024_v60 = vld [vmem:[#allocation6 + $0x224] sm:$0xf0] }
 0x4ac   :  { %10443 = vmatpush.bf16.msra.mxu2 %v15979_v61  ;;  %v18448_v61 = vld [vmem:[#allocation6 + $0xf6c] sm:$0xf]  ;;  %v15539_v7 = vor.u32 %v18368_v50, %v15536_v2  ;;  %v18258_v50 = vld [vmem:[#allocation6 + $0x97c] sm:$0xf]  ;;  %v15096_v2 = vld [vmem:[#allocation6 + $0x9a0] sm:$0xf0] }
 0x4ad   :  { %10347 = vmatpush.bf16.msra.mxu3 %v16855_v52  ;;  %v18748_v52 = vld [vmem:[#allocation6 + $0x18cc] sm:$0xf] }
 0x4ae   :  { %10416 = vmatpush.bf16.msra.mxu0 %v15299_v29  ;;  %v18268_v29 = vld [vmem:[#allocation6 + $0x9cc] sm:$0xf]  ;;  %v17059_v19 = vor.u32 %v18748_v52, %v17056_v20  ;;  %v16976_v52 = vld [vmem:[#allocation6 + $0x1850] sm:$0xf0] }
 0x4af   :  { %10430 = vmatpush.bf16.msra.mxu1 %v15619_v43  ;;  %v15176_v43 = vld [vmem:[#allocation6 + $0xa40] sm:$0xf0]  ;;  %v18728_v33 = vld [vmem:[#allocation6 + $0x182c] sm:$0xf] }
 0x4b0   :  { %10444 = vmatpush.bf16.msra.mxu2 %v15939_v8  ;;  %v15859_v8 = vor.u32 %v18448_v61, %v15856_v0  ;;  %v15179_v5 = vor.u32 %v18278_v4, %v15176_v43  ;;  %v15099_v0 = vor.u32 %v18258_v50, %v15096_v2  ;;  %v15056_v4 = vld [vmem:[#allocation6 + $0x950] sm:$0xf0]  ;;  %v14142_v43 = vld [vmem:[#allocation6 + $0x200] sm:$0xf]  ;;  %v16616_v50 = vld [vmem:[#allocation6 + $0x1580] sm:$0xf0]  ;;  %v19812_v2 = vpop.f32.mrf.mxu0 }
 0x4b1   :  { %10348 = vmatpush.bf16.msra.mxu3 %v16815_v45  ;;  %v18034_v45 = vld [vmem:[#allocation6 + $0x274] sm:$0xf0]  ;;  %20140 = vst [vmem:[#allocation51_spill] sm:$0xff] %v19812_v2  ;;  %v16816_v2 = vld [vmem:[#allocation6 + $0x1710] sm:$0xf0] }
 0x4b2   :  { %10417 = vmatpush.bf16.msra.mxu0 %v15259_v31  ;;  %v15139_v31 = vor.u32 %v18268_v29, %v15136_v32  ;;  %v14183_v29 = vor.u32 %v18034_v45, %v14182_v3  ;;  %v18248_v32 = vld [vmem:[#allocation6 + $0x92c] sm:$0xf]  ;;  %v19810_v3 = vpop.f32.mrf.mxu3  ;;  %v18718_v45 = vld [vmem:[#allocation6 + $0x17dc] sm:$0xf] }
 0x4b3   :  { %10431 = vmatpush.bf16.msra.mxu1 %v15579_v34  ;;  %v18438_v34 = vld [vmem:[#allocation6 + $0xf1c] sm:$0xf]  ;;  %v15059_v20 = vor.u32 %v18248_v32, %v15056_v4  ;;  %20139 = vst [vmem:[#allocation50_spill] sm:$0xff] %v19810_v3  ;;  %v18004_v4 = vld [vmem:[#allocation6 + $0x184] sm:$0xf0] }
 0x4b4   :  { %10445 = vmatpush.bf16.msra.mxu2 %v15899_v27  ;;  %v18738_v27 = vld [vmem:[#allocation6 + $0x187c] sm:$0xf]  ;;  %v15819_v61 = vor.u32 %v18438_v34, %v15816_v10  ;;  %v14102_v34 = vld [vmem:[#allocation6 + $0x1b0] sm:$0xf]  ;;  %v16979_v10 = vor.u32 %v18728_v33, %v16976_v52 }
 0x4b5   :  { %10349 = vmatpush.bf16.msra.mxu3 %v16775_v37  ;;  %v16656_v37 = vld [vmem:[#allocation6 + $0x15d0] sm:$0xf0]  ;;  %v15462_v3 = vld [vmem:[#allocation6 + $0xc50] sm:$0xf] }
 0x4b6   :  { %10418 = vmatpush.bf16.msra.mxu0 %v15219_v49  ;;  %v17016_v49 = vld [vmem:[#allocation6 + $0x18a0] sm:$0xf0] }
 0x4b7   :  { %10432 = vmatpush.bf16.msra.mxu1 %v15539_v7  ;;  %v16699_v7 = vor.u32 %v18658_v55, %v16696_v17  ;;  %v17019_v30 = vor.u32 %v18738_v27, %v17016_v49  ;;  %v16936_v55 = vld [vmem:[#allocation6 + $0x1800] sm:$0xf0]  ;;  %v19815_v27 = vpop.f32.mrf.mxu1 }
 0x4b8   :  { %10446 = vmatpush.bf16.msra.mxu2 %v15859_v8  ;;  %10350 = vmatmul.bf16.vlgmr.msra.gmra.mxu3 %v19549_v14  ;;  %v14143_v8 = vor.u32 %v18024_v60, %v14142_v43  ;;  %20141 = vst [vmem:[#allocation52_spill] sm:$0xff] %v19815_v27  ;;  %v16939_v32 = vor.u32 %v18718_v45, %v16936_v55  ;;  %v18628_v43 = vld [vmem:[#allocation6 + $0x150c] sm:$0xf]  ;;  %v19817_v60 = vpop.f32.mrf.mxu2  ;;  %v10141_v45 = vpop.f32.mrf.mxu0  ;;  %v18698_v55 = vld [vmem:[#allocation6 + $0x173c] sm:$0xf] }
 0x4b9   :  { %10398 = vmatpush.bf16.msrb.mxu3 %v15139_v31  ;;  %v16659_v31 = vor.u32 %v18648_v13, %v16656_v37  ;;  %20142 = vst [vmem:[#allocation53_spill] sm:$0xff] %v19817_v60  ;;  %v18708_v13 = vld [vmem:[#allocation6 + $0x178c] sm:$0xf]  ;;  %v16896_v37 = vld [vmem:[#allocation6 + $0x17b0] sm:$0xf0] }
 0x4ba   :  { %10419 = vmatpush.bf16.msra.mxu0 %v15179_v5  ;;  %v18238_v5 = vld [vmem:[#allocation6 + $0x8dc] sm:$0xf]  ;;  %v16856_v60 = vld [vmem:[#allocation6 + $0x1760] sm:$0xf0]  ;;  %v18688_v27 = vld [vmem:[#allocation6 + $0x16ec] sm:$0xf] }
 0x4bb   :  { %10433 = vmatpush.bf16.msra.mxu1 %v15499_v41  ;;  %v15016_v41 = vld [vmem:[#allocation6 + $0x900] sm:$0xf0] }
 0x4bc   :  { %10447 = vmatpush.bf16.msra.mxu2 %v15819_v61  ;;  %v15019_v17 = vor.u32 %v18238_v5, %v15016_v41  ;;  %v14936_v5 = vld [vmem:[#allocation6 + $0x860] sm:$0xf0]  ;;  %v14022_v41 = vld [vmem:[#allocation6 + $0x110] sm:$0xf] }
 0x4bd   :  { %10420 = vmatmul.bf16.vlgmr.msra.gmra.mxu0 %v19474_v12  ;;  %10399 = vmatpush.bf16.msrb.mxu3 %v15099_v0  ;;  %v18228_v0 = vld [vmem:[#allocation6 + $0x88c] sm:$0xf] }
 0x4be   :  { %10468 = vmatpush.bf16.msrb.mxu0 %v16739_v63  ;;  %10434 = vmatmul.bf16.vlgmr.msra.gmra.mxu1 %v19481_v54  ;;  %v18014_v63 = vld [vmem:[#allocation6 + $0x1d4] sm:$0xf0] }
 0x4bf   :  { %10482 = vmatpush.bf16.msrb.mxu1 %v17059_v19  ;;  %v18638_v19 = vld [vmem:[#allocation6 + $0x155c] sm:$0xf]  ;;  %10448 = vmatmul.bf16.vlgmr.msra.gmra.mxu2 %v19519_v6  ;;  %v14103_v49 = vor.u32 %v18014_v63, %v14102_v34  ;;  %v17994_v63 = vld [vmem:[#allocation6 + $0x134] sm:$0xf0] }
 0x4c0   :  { %10496 = vmatpush.bf16.msrb.mxu2 %v14183_v29  ;;  %v16619_v61 = vor.u32 %v18638_v19, %v16616_v50  ;;  %v14976_v29 = vld [vmem:[#allocation6 + $0x8b0] sm:$0xf0]  ;;  %v18618_v19 = vld [vmem:[#allocation6 + $0x14bc] sm:$0xf]  ;;  %v16536_v50 = vld [vmem:[#allocation6 + $0x14e0] sm:$0xf0] }
 0x4c1   :  { %10400 = vmatpush.bf16.msrb.mxu3 %v15059_v20  ;;  %v14979_v33 = vor.u32 %v18228_v0, %v14976_v29  ;;  %v10127_v20 = vpop.f32.mrf.mxu3  ;;  %v14023_v0 = vor.u32 %v17994_v63, %v14022_v41  ;;  %v16539_v29 = vor.u32 %v18618_v19, %v16536_v50  ;;  %v16819_v63 = vor.u32 %v18688_v27, %v16816_v2  ;;  %v16416_v19 = vld [vmem:[#allocation6 + $0x13f0] sm:$0xf0]  ;;  %v18598_v50 = vld [vmem:[#allocation6 + $0x141c] sm:$0xf]  ;;  %v17964_v2 = vld [vmem:[#allocation6 + $0x44] sm:$0xf0] }
 0x4c2   :  { %10469 = vmatpush.bf16.msrb.mxu0 %v16699_v7  ;;  %v14062_v7 = vld [vmem:[#allocation6 + $0x160] sm:$0xf]  ;;  %v10128_v34 = vadd.f32 %v10127_v20, %v19793_v56  ;;  %v16859_v56 = vor.u32 %v18698_v55, %v16856_v60  ;;  %v10169_v20 = vpop.f32.mrf.mxu2  ;;  %v18588_v60 = vld [vmem:[#allocation6 + $0x13cc] sm:$0xf]  ;;  %v18678_v55 = vld [vmem:[#allocation6 + $0x169c] sm:$0xf] }
 0x4c3   :  { %10483 = vmatpush.bf16.msrb.mxu1 %v17019_v30  ;;  %v16576_v30 = vld [vmem:[#allocation6 + $0x1530] sm:$0xf0]  ;;  %v14063_v52 = vor.u32 %v18004_v4, %v14062_v7  ;;  %v18208_v7 = vld [vmem:[#allocation6 + $0x7ec] sm:$0xf] }
 0x4c4   :  { %10497 = vmatpush.bf16.msrb.mxu2 %v14143_v8  ;;  %v16579_v8 = vor.u32 %v18628_v43, %v16576_v30  ;;  %v14896_v4 = vld [vmem:[#allocation6 + $0x810] sm:$0xf0]  ;;  %v17984_v43 = vld [vmem:[#allocation6 + $0xe4] sm:$0xf0]  ;;  %v18608_v30 = vld [vmem:[#allocation6 + $0x146c] sm:$0xf] }
 0x4c5   :  { %10401 = vmatpush.bf16.msrb.mxu3 %v15019_v17  ;;  %v10142_v17 = vadd.f32 %v10141_v45, %v10128_v34  ;;  %v13942_v34 = vld [vmem:[#allocation6 + $0x70] sm:$0xf]  ;;  %v16456_v45 = vld [vmem:[#allocation6 + $0x1440] sm:$0xf0] }
 0x4c6   :  { %10470 = vmatpush.bf16.msrb.mxu0 %v16659_v31  ;;  %v18218_v31 = vld [vmem:[#allocation6 + $0x83c] sm:$0xf] }
 0x4c7   :  { %10484 = vmatpush.bf16.msrb.mxu1 %v16979_v10  ;;  %v16899_v10 = vor.u32 %v18708_v13, %v16896_v37  ;;  %v16496_v13 = vld [vmem:[#allocation6 + $0x1490] sm:$0xf0] }
 0x4c8   :  { %10498 = vmatpush.bf16.msrb.mxu2 %v14103_v49  ;;  %v14939_v49 = vor.u32 %v18218_v31, %v14936_v5  ;;  %v18198_v31 = vld [vmem:[#allocation6 + $0x79c] sm:$0xf]  ;;  %v14856_v5 = vld [vmem:[#allocation6 + $0x7c0] sm:$0xf0]  ;;  %v16499_v41 = vor.u32 %v18608_v30, %v16496_v13 }
 0x4c9   :  { %10402 = vmatpush.bf16.msrb.mxu3 %v14979_v33  ;;  %v14899_v33 = vor.u32 %v18208_v7, %v14896_v4  ;;  %v18194_v7 = vld [vmem:[#allocation6 + $0x774] sm:$0xf0]  ;;  %v15142_v4 = vld [vmem:[#allocation6 + $0x9d0] sm:$0xf]  ;;  %v18578_v13 = vld [vmem:[#allocation6 + $0x137c] sm:$0xf] }
 0x4ca   :  { %10471 = vmatpush.bf16.msrb.mxu0 %v16619_v61  ;;  %v10155_v61 = vpop.f32.mrf.mxu1 }
 0x4cb   :  { %10485 = vmatpush.bf16.msrb.mxu1 %v16939_v32  ;;  %v13982_v32 = vld [vmem:[#allocation6 + $0xc0] sm:$0xf]  ;;  %v10156_v37 = vadd.f32 %v10155_v61, %v10142_v17  ;;  %v16776_v17 = vld [vmem:[#allocation6 + $0x16c0] sm:$0xf0]  ;;  %v14859_v61 = vor.u32 %v18198_v31, %v14856_v5  ;;  %v18184_v5 = vld [vmem:[#allocation6 + $0x724] sm:$0xf0] }
 0x4cc   :  { %10499 = vmatpush.bf16.msrb.mxu2 %v14063_v52  ;;  %v14782_v31 = vld [vmem:[#allocation6 + $0x700] sm:$0xf] }
 0x4cd   :  { %10403 = vmatpush.bf16.msrb.mxu3 %v14939_v49  ;;  %v19820_v52 = vadd.f32 %v10169_v20, %v10156_v37  ;;  %v14822_v49 = vld [vmem:[#allocation6 + $0x750] sm:$0xf]  ;;  %v18274_v37 = vld [vmem:[#allocation6 + $0x9f4] sm:$0xf0]  ;;  %v16376_v20 = vld [vmem:[#allocation6 + $0x13a0] sm:$0xf0] }
 0x4ce   :  { %10472 = vmatpush.bf16.msrb.mxu0 %v16579_v8  ;;  %v13983_v8 = vor.u32 %v17984_v43, %v13982_v32  ;;  %v16459_v32 = vor.u32 %v18598_v50, %v16456_v45  ;;  %v16779_v43 = vor.u32 %v18678_v55, %v16776_v17  ;;  %v14823_v27 = vor.u32 %v18194_v7, %v14822_v49  ;;  %v16336_v50 = vld [vmem:[#allocation6 + $0x1350] sm:$0xf0]  ;;  %v15422_v45 = vld [vmem:[#allocation6 + $0xc00] sm:$0xf]  ;;  %v18344_v17 = vld [vmem:[#allocation6 + $0xc24] sm:$0xf0] }
 0x4cf   :  { %10486 = vmatpush.bf16.msrb.mxu1 %v16899_v10  ;;  %v17974_v10 = vld [vmem:[#allocation6 + $0x94] sm:$0xf0]  ;;  %v15143_v30 = vor.u32 %v18274_v37, %v15142_v4  ;;  %v14742_v49 = vld [vmem:[#allocation6 + $0x6b0] sm:$0xf] }
 0x4d0   :  { %10500 = vmatpush.bf16.msrb.mxu2 %v14023_v0  ;;  %v13943_v0 = vor.u32 %v17974_v10, %v13942_v34  ;;  %v16379_v10 = vor.u32 %v18578_v13, %v16376_v20  ;;  %v15062_v7 = vld [vmem:[#allocation6 + $0x930] sm:$0xf]  ;;  %v18254_v4 = vld [vmem:[#allocation6 + $0x954] sm:$0xf0]  ;;  %v18164_v13 = vld [vmem:[#allocation6 + $0x684] sm:$0xf0]  ;;  %v19827_v20 = vpop.f32.mrf.mxu0 }
 0x4d1   :  { %10404 = vmatpush.bf16.msrb.mxu3 %v14899_v33  ;;  %v18354_v33 = vld [vmem:[#allocation6 + $0xc74] sm:$0xf0]  ;;  %20143 = vst [vmem:[#allocation54_spill] sm:$0xff] %v19827_v20  ;;  %v16742_v20 = vld [vmem:[#allocation6 + $0x1650] sm:$0xf] }
 0x4d2   :  { %10473 = vmatpush.bf16.msrb.mxu0 %v16539_v29  ;;  %v16419_v29 = vor.u32 %v18588_v60, %v16416_v19  ;;  %v15463_v60 = vor.u32 %v18354_v33, %v15462_v3  ;;  %v18568_v19 = vld [vmem:[#allocation6 + $0x132c] sm:$0xf]  ;;  %v19825_v3 = vpop.f32.mrf.mxu3  ;;  %v15022_v33 = vld [vmem:[#allocation6 + $0x8e0] sm:$0xf] }
 0x4d3   :  { %10487 = vmatpush.bf16.msrb.mxu1 %v16859_v56  ;;  %v13902_v56 = vld [vmem:[#allocation6 + $0x20] sm:$0xf]  ;;  %v16339_v37 = vor.u32 %v18568_v19, %v16336_v50  ;;  %v18324_v50 = vld [vmem:[#allocation6 + $0xb84] sm:$0xf0] }
 0x4d4   :  { %10501 = vmatpush.bf16.msrb.mxu2 %v13983_v8  ;;  %v15102_v8 = vld [vmem:[#allocation6 + $0x980] sm:$0xf]  ;;  %v13903_v34 = vor.u32 %v17964_v2, %v13902_v56  ;;  %v15382_v56 = vld [vmem:[#allocation6 + $0xbb0] sm:$0xf]  ;;  %v15063_v2 = vor.u32 %v18254_v4, %v15062_v7 }
 0x4d5   :  { %10405 = vmatpush.bf16.msrb.mxu3 %v14859_v61  ;;  %v18174_v61 = vld [vmem:[#allocation6 + $0x6d4] sm:$0xf0] }
 0x4d6   :  { %10474 = vmatpush.bf16.msrb.mxu0 %v16499_v41  ;;  %v18264_v41 = vld [vmem:[#allocation6 + $0x9a4] sm:$0xf0] }
 0x4d7   :  { %10488 = vmatpush.bf16.msrb.mxu1 %v16819_v63  ;;  %v14783_v63 = vor.u32 %v18184_v5, %v14782_v31  ;;  %v15103_v55 = vor.u32 %v18264_v41, %v15102_v8  ;;  %v18244_v31 = vld [vmem:[#allocation6 + $0x904] sm:$0xf0]  ;;  %v19830_v8 = vpop.f32.mrf.mxu1 }
 0x4d8   :  { %10502 = vmatpush.bf16.msrb.mxu2 %v13943_v0  ;;  %10406 = vmatmul.bf16.vlgmr.msrb.gmra.mxu3 %v19470_v38  ;;  %v15423_v0 = vor.u32 %v18344_v17, %v15422_v45  ;;  %20144 = vst [vmem:[#allocation55_spill] sm:$0xff] %v19830_v8  ;;  %v15023_v19 = vor.u32 %v18244_v31, %v15022_v33  ;;  %v14662_v45 = vld [vmem:[#allocation6 + $0x610] sm:$0xf]  ;;  %v14942_v33 = vld [vmem:[#allocation6 + $0x840] sm:$0xf] }
 0x4d9   :  { %10454 = vmatpush.bf16.msra.mxu3 %v16419_v29  ;;  %v14743_v29 = vor.u32 %v18174_v61, %v14742_v49  ;;  %v14982_v17 = vld [vmem:[#allocation6 + $0x890] sm:$0xf]  ;;  %v18234_v49 = vld [vmem:[#allocation6 + $0x8b4] sm:$0xf0]  ;;  %v18224_v31 = vld [vmem:[#allocation6 + $0x864] sm:$0xf0] }
 0x4da   :  { %10475 = vmatpush.bf16.msrb.mxu0 %v16459_v32  ;;  %v18558_v32 = vld [vmem:[#allocation6 + $0x12dc] sm:$0xf]  ;;  %v10183_v4 = vpop.f32.mrf.mxu3  ;;  %v18214_v8 = vld [vmem:[#allocation6 + $0x814] sm:$0xf0] }
 0x4db   :  { %10489 = vmatpush.bf16.msrb.mxu1 %v16779_v43  ;;  %v16296_v43 = vld [vmem:[#allocation6 + $0x1300] sm:$0xf0] }
 0x4dc   :  { %10503 = vmatpush.bf16.msrb.mxu2 %v13903_v34  ;;  %v16299_v5 = vor.u32 %v18558_v32, %v16296_v43  ;;  %v15302_v32 = vld [vmem:[#allocation6 + $0xb10] sm:$0xf]  ;;  %v10184_v43 = vadd.f32 %v10183_v4, %v19820_v52  ;;  %v14943_v52 = vor.u32 %v18224_v31, %v14942_v33  ;;  %v14862_v33 = vld [vmem:[#allocation6 + $0x7a0] sm:$0xf]  ;;  %v18204_v31 = vld [vmem:[#allocation6 + $0x7c4] sm:$0xf0] }
 0x4dd   :  { %10476 = vmatmul.bf16.vlgmr.msrb.gmra.mxu0 %v19529_v51  ;;  %10455 = vmatpush.bf16.msra.mxu3 %v16379_v10  ;;  %v18548_v10 = vld [vmem:[#allocation6 + $0x128c] sm:$0xf]  ;;  %v14902_v4 = vld [vmem:[#allocation6 + $0x7f0] sm:$0xf] }
 0x4de   :  { %10524 = vmatpush.bf16.msra.mxu0 %v14823_v27  ;;  %10490 = vmatmul.bf16.vlgmr.msrb.gmra.mxu1 %v19549_v14  ;;  %v18334_v27 = vld [vmem:[#allocation6 + $0xbd4] sm:$0xf0] }
 0x4df   :  { %10538 = vmatpush.bf16.msra.mxu1 %v15143_v30  ;;  %v14702_v30 = vld [vmem:[#allocation6 + $0x660] sm:$0xf]  ;;  %10504 = vmatmul.bf16.vlgmr.msrb.gmra.mxu2 %v19386_v36  ;;  %v15383_v41 = vor.u32 %v18334_v27, %v15382_v56  ;;  %v14983_v56 = vor.u32 %v18234_v49, %v14982_v17  ;;  %v14582_v17 = vld [vmem:[#allocation6 + $0x570] sm:$0xf]  ;;  %v18134_v49 = vld [vmem:[#allocation6 + $0x594] sm:$0xf0] }
 0x4e0   :  { %10552 = vmatpush.bf16.msra.mxu2 %v15463_v60  ;;  %v14703_v34 = vor.u32 %v18164_v13, %v14702_v30  ;;  %v16256_v60 = vld [vmem:[#allocation6 + $0x12b0] sm:$0xf0]  ;;  %v14622_v27 = vld [vmem:[#allocation6 + $0x5c0] sm:$0xf]  ;;  %v18144_v30 = vld [vmem:[#allocation6 + $0x5e4] sm:$0xf0]  ;;  %v10197_v13 = vpop.f32.mrf.mxu0 }
 0x4e1   :  { %10456 = vmatpush.bf16.msra.mxu3 %v16339_v37  ;;  %v16259_v61 = vor.u32 %v18548_v10, %v16256_v60  ;;  %v14623_v60 = vor.u32 %v18144_v30, %v14622_v27  ;;  %v14903_v27 = vor.u32 %v18214_v8, %v14902_v4  ;;  %v14542_v30 = vld [vmem:[#allocation6 + $0x520] sm:$0xf]  ;;  %v18284_v8 = vld [vmem:[#allocation6 + $0xa44] sm:$0xf0] }
 0x4e2   :  { %10525 = vmatpush.bf16.msra.mxu0 %v14783_v63  ;;  %v15342_v63 = vld [vmem:[#allocation6 + $0xb60] sm:$0xf] }
 0x4e3   :  { %10539 = vmatpush.bf16.msra.mxu1 %v15103_v55  ;;  %v18154_v55 = vld [vmem:[#allocation6 + $0x634] sm:$0xf0]  ;;  %v15343_v7 = vor.u32 %v18324_v50, %v15342_v63  ;;  %v18528_v63 = vld [vmem:[#allocation6 + $0x11ec] sm:$0xf]  ;;  %v16176_v50 = vld [vmem:[#allocation6 + $0x1210] sm:$0xf0] }
 0x4e4   :  { %10553 = vmatpush.bf16.msra.mxu2 %v15423_v0  ;;  %v14663_v37 = vor.u32 %v18154_v55, %v14662_v45  ;;  %v18538_v0 = vld [vmem:[#allocation6 + $0x123c] sm:$0xf]  ;;  %v18304_v55 = vld [vmem:[#allocation6 + $0xae4] sm:$0xf0]  ;;  %v14462_v4 = vld [vmem:[#allocation6 + $0x480] sm:$0xf] }
 0x4e5   :  { %10457 = vmatpush.bf16.msra.mxu3 %v16299_v5  ;;  %v10198_v5 = vadd.f32 %v10197_v13, %v10184_v43  ;;  %v18294_v43 = vld [vmem:[#allocation6 + $0xa94] sm:$0xf0]  ;;  %v18124_v13 = vld [vmem:[#allocation6 + $0x544] sm:$0xf0] }
 0x4e6   :  { %10526 = vmatpush.bf16.msra.mxu0 %v14743_v29  ;;  %v16216_v29 = vld [vmem:[#allocation6 + $0x1260] sm:$0xf0] }
 0x4e7   :  { %10540 = vmatpush.bf16.msra.mxu1 %v15063_v2  ;;  %v18314_v2 = vld [vmem:[#allocation6 + $0xb34] sm:$0xf0] }
 0x4e8   :  { %10554 = vmatpush.bf16.msra.mxu2 %v15383_v41  ;;  %v16219_v41 = vor.u32 %v18538_v0, %v16216_v29  ;;  %v15303_v10 = vor.u32 %v18314_v2, %v15302_v32  ;;  %v18518_v0 = vld [vmem:[#allocation6 + $0x119c] sm:$0xf]  ;;  %v16136_v29 = vld [vmem:[#allocation6 + $0x11c0] sm:$0xf0]  ;;  %v15222_v32 = vld [vmem:[#allocation6 + $0xa70] sm:$0xf] }
 0x4e9   :  { %10458 = vmatpush.bf16.msra.mxu3 %v16259_v61  ;;  %v16179_v61 = vor.u32 %v18528_v63, %v16176_v50  ;;  %v14502_v2 = vld [vmem:[#allocation6 + $0x4d0] sm:$0xf]  ;;  %v18594_v50 = vld [vmem:[#allocation6 + $0x13f4] sm:$0xf0] }
 0x4ea   :  { %10527 = vmatpush.bf16.msra.mxu0 %v14703_v34  ;;  %v10211_v34 = vpop.f32.mrf.mxu1  ;;  %v16422_v63 = vld [vmem:[#allocation6 + $0x13d0] sm:$0xf] }
 0x4eb   :  { %10541 = vmatpush.bf16.msra.mxu1 %v15023_v19  ;;  %v15262_v19 = vld [vmem:[#allocation6 + $0xac0] sm:$0xf]  ;;  %v19833_v45 = vadd.f32 %v10211_v34, %v10198_v5  ;;  %v16102_v5 = vld [vmem:[#allocation6 + $0x1150] sm:$0xf]  ;;  %v18514_v34 = vld [vmem:[#allocation6 + $0x1174] sm:$0xf0] }
 0x4ec   :  { %10555 = vmatpush.bf16.msra.mxu2 %v15343_v7  ;;  %v15263_v7 = vor.u32 %v18304_v55, %v15262_v19  ;;  %v14543_v19 = vor.u32 %v18124_v13, %v14542_v30  ;;  %v14863_v55 = vor.u32 %v18204_v31, %v14862_v33  ;;  %v18094_v30 = vld [vmem:[#allocation6 + $0x454] sm:$0xf0]  ;;  %v16702_v13 = vld [vmem:[#allocation6 + $0x1600] sm:$0xf]  ;;  %v18664_v31 = vld [vmem:[#allocation6 + $0x1624] sm:$0xf0] }
 0x4ed   :  { %20145 = vst [vmem:[#allocation56_spill] sm:$0xff] %v19833_v45  ;;  %10459 = vmatpush.bf16.msra.mxu3 %v16219_v41  ;;  %v16139_v41 = vor.u32 %v18518_v0, %v16136_v29  ;;  %v18104_v45 = vld [vmem:[#allocation6 + $0x4a4] sm:$0xf0]  ;;  %v16062_v0 = vld [vmem:[#allocation6 + $0x1100] sm:$0xf] }
 0x4ee   :  { %10528 = vmatpush.bf16.msra.mxu0 %v14663_v37  ;;  %v14583_v37 = vor.u32 %v18134_v49, %v14582_v17  ;;  %v16103_v17 = vor.u32 %v18514_v34, %v16102_v5  ;;  %v16423_v49 = vor.u32 %v18594_v50, %v16422_v63  ;;  %v18504_v29 = vld [vmem:[#allocation6 + $0x1124] sm:$0xf0]  ;;  %v16022_v5 = vld [vmem:[#allocation6 + $0x10b0] sm:$0xf]  ;;  %v18574_v63 = vld [vmem:[#allocation6 + $0x1354] sm:$0xf0] }
 0x4ef   :  { %10542 = vmatpush.bf16.msra.mxu1 %v14983_v56  ;;  %v18114_v56 = vld [vmem:[#allocation6 + $0x4f4] sm:$0xf0]  ;;  %v16342_v34 = vld [vmem:[#allocation6 + $0x1330] sm:$0xf] }
 0x4f0   :  { %10556 = vmatpush.bf16.msra.mxu2 %v15303_v10  ;;  %v15223_v10 = vor.u32 %v18294_v43, %v15222_v32  ;;  %v14463_v43 = vor.u32 %v18104_v45, %v14462_v4  ;;  %v18564_v4 = vld [vmem:[#allocation6 + $0x1304] sm:$0xf0] }
 0x4f1   :  { %10460 = vmatpush.bf16.msra.mxu3 %v16179_v61  ;;  %v18674_v61 = vld [vmem:[#allocation6 + $0x1674] sm:$0xf0] }
 0x4f2   :  { %10529 = vmatpush.bf16.msra.mxu0 %v14623_v60  ;;  %v14503_v60 = vor.u32 %v18114_v56, %v14502_v2  ;;  %v16743_v2 = vor.u32 %v18674_v61, %v16742_v20  ;;  %v14422_v56 = vld [vmem:[#allocation6 + $0x430] sm:$0xf]  ;;  %v16703_v20 = vor.u32 %v18664_v31, %v16702_v13  ;;  %v18554_v13 = vld [vmem:[#allocation6 + $0x12b4] sm:$0xf0] }
 0x4f3   :  { %10543 = vmatpush.bf16.msra.mxu1 %v14943_v52  ;;  %v15182_v52 = vld [vmem:[#allocation6 + $0xa20] sm:$0xf]  ;;  %v14423_v45 = vor.u32 %v18094_v30, %v14422_v56  ;;  %v18474_v56 = vld [vmem:[#allocation6 + $0x1034] sm:$0xf0]  ;;  %v16262_v30 = vld [vmem:[#allocation6 + $0x1290] sm:$0xf] }
 0x4f4   :  { %10557 = vmatpush.bf16.msra.mxu2 %v15263_v7  ;;  %v16382_v7 = vld [vmem:[#allocation6 + $0x1380] sm:$0xf]  ;;  %v15183_v32 = vor.u32 %v18284_v8, %v15182_v52  ;;  %v18654_v52 = vld [vmem:[#allocation6 + $0x15d4] sm:$0xf0] }
 0x4f5   :  { %10461 = vmatpush.bf16.msra.mxu3 %v16139_v41  ;;  %v18494_v41 = vld [vmem:[#allocation6 + $0x10d4] sm:$0xf0]  ;;  %v15982_v8 = vld [vmem:[#allocation6 + $0x1060] sm:$0xf] }
 0x4f6   :  { %10530 = vmatpush.bf16.msra.mxu0 %v14583_v37  ;;  %v18584_v37 = vld [vmem:[#allocation6 + $0x13a4] sm:$0xf0]  ;;  %v16023_v50 = vor.u32 %v18494_v41, %v16022_v5  ;;  %v14302_v41 = vld [vmem:[#allocation6 + $0x340] sm:$0xf] }
 0x4f7   :  { %10544 = vmatpush.bf16.msra.mxu1 %v14903_v27  ;;  %v16063_v27 = vor.u32 %v18504_v29, %v16062_v0  ;;  %v16383_v33 = vor.u32 %v18584_v37, %v16382_v7  ;;  %v14342_v7 = vld [vmem:[#allocation6 + $0x390] sm:$0xf]  ;;  %v18074_v37 = vld [vmem:[#allocation6 + $0x3b4] sm:$0xf0] }
 0x4f8   :  { %10558 = vmatpush.bf16.msra.mxu2 %v15223_v10  ;;  %10462 = vmatmul.bf16.vlgmr.msra.gmra.mxu3 %v19521_v44  ;;  %v14382_v10 = vld [vmem:[#allocation6 + $0x3e0] sm:$0xf] }
 0x4f9   :  { %10510 = vmatpush.bf16.msrb.mxu3 %v14503_v60  ;;  %v18084_v60 = vld [vmem:[#allocation6 + $0x404] sm:$0xf0] }
 0x4fa   :  { %10531 = vmatpush.bf16.msra.mxu0 %v14543_v19  ;;  %v16662_v19 = vld [vmem:[#allocation6 + $0x15b0] sm:$0xf]  ;;  %v14383_v61 = vor.u32 %v18084_v60, %v14382_v10  ;;  %v18464_v10 = vld [vmem:[#allocation6 + $0xfe4] sm:$0xf0]  ;;  %v16222_v60 = vld [vmem:[#allocation6 + $0x1240] sm:$0xf] }
 0x4fb   :  { %10545 = vmatpush.bf16.msra.mxu1 %v14863_v55  ;;  %v16343_v55 = vor.u32 %v18574_v63, %v16342_v34  ;;  %v16663_v0 = vor.u32 %v18654_v52, %v16662_v19  ;;  %v18064_v34 = vld [vmem:[#allocation6 + $0x364] sm:$0xf0]  ;;  %v16582_v63 = vld [vmem:[#allocation6 + $0x1510] sm:$0xf] }
 0x4fc   :  { %10559 = vmatpush.bf16.msra.mxu2 %v15183_v32  ;;  %v16622_v32 = vld [vmem:[#allocation6 + $0x1560] sm:$0xf]  ;;  %v18544_v19 = vld [vmem:[#allocation6 + $0x1264] sm:$0xf0] }
 0x4fd   :  { %10532 = vmatmul.bf16.vlgmr.msra.gmra.mxu0 %v19468_v15  ;;  %10511 = vmatpush.bf16.msrb.mxu3 %v14463_v43 }
 0x4fe   :  { %10580 = vmatpush.bf16.msrb.mxu0 %v16103_v17  ;;  %10546 = vmatmul.bf16.vlgmr.msra.gmra.mxu1 %v19470_v38  ;;  %v18484_v17 = vld [vmem:[#allocation6 + $0x1084] sm:$0xf0] }
 0x4ff   :  { %10594 = vmatpush.bf16.msrb.mxu1 %v16423_v49  ;;  %10560 = vmatmul.bf16.vlgmr.msra.gmra.mxu2 %v19474_v12  ;;  %v16302_v49 = vld [vmem:[#allocation6 + $0x12e0] sm:$0xf]  ;;  %v15983_v29 = vor.u32 %v18484_v17, %v15982_v8  ;;  %v14262_v17 = vld [vmem:[#allocation6 + $0x2f0] sm:$0xf] }
 0x500   :  { %10608 = vmatpush.bf16.msrb.mxu2 %v16743_v2  ;;  %v16303_v43 = vor.u32 %v18564_v4, %v16302_v49  ;;  %v18644_v2 = vld [vmem:[#allocation6 + $0x1584] sm:$0xf0]  ;;  %v18054_v49 = vld [vmem:[#allocation6 + $0x314] sm:$0xf0]  ;;  %v16542_v4 = vld [vmem:[#allocation6 + $0x14c0] sm:$0xf] }
 0x501   :  { %10512 = vmatpush.bf16.msrb.mxu3 %v14423_v45  ;;  %v16623_v31 = vor.u32 %v18644_v2, %v16622_v32  ;;  %v16263_v45 = vor.u32 %v18554_v13, %v16262_v30  ;;  %v18534_v32 = vld [vmem:[#allocation6 + $0x1214] sm:$0xf0]  ;;  %v14222_v2 = vld [vmem:[#allocation6 + $0x2a0] sm:$0xf]  ;;  %v16502_v13 = vld [vmem:[#allocation6 + $0x1470] sm:$0xf] }
 0x502   :  { %10581 = vmatpush.bf16.msrb.mxu0 %v16063_v27  ;;  %v15942_v27 = vld [vmem:[#allocation6 + $0x1010] sm:$0xf] }
 0x503   :  { %10595 = vmatpush.bf16.msrb.mxu1 %v16383_v33  ;;  %v14343_v33 = vor.u32 %v18074_v37, %v14342_v7  ;;  %v15943_v5 = vor.u32 %v18474_v56, %v15942_v27  ;;  %v18454_v7 = vld [vmem:[#allocation6 + $0xf94] sm:$0xf0]  ;;  %v16182_v37 = vld [vmem:[#allocation6 + $0x11f0] sm:$0xf]  ;;  %v18044_v27 = vld [vmem:[#allocation6 + $0x2c4] sm:$0xf0] }
 0x504   :  { %10609 = vmatpush.bf16.msrb.mxu2 %v16703_v20  ;;  %v18634_v20 = vld [vmem:[#allocation6 + $0x1534] sm:$0xf0] }
 0x505   :  { %10513 = vmatpush.bf16.msrb.mxu3 %v14383_v61  ;;  %v16583_v52 = vor.u32 %v18634_v20, %v16582_v63  ;;  %v16223_v61 = vor.u32 %v18544_v19, %v16222_v60  ;;  %v18444_v63 = vld [vmem:[#allocation6 + $0xf44] sm:$0xf0]  ;;  %v14184_v60 = vld [vmem:[#allocation6 + $0x278] sm:$0xf0]  ;;  %v18109_v19 = vld [vmem:[#allocation6 + $0x4d4] sm:$0xf] }
 0x506   :  { %10582 = vmatpush.bf16.msrb.mxu0 %v16023_v50  ;;  %v15902_v50 = vld [vmem:[#allocation6 + $0xfc0] sm:$0xf]  ;;  %v18524_v20 = vld [vmem:[#allocation6 + $0x11c4] sm:$0xf0] }
 0x507   :  { %10596 = vmatpush.bf16.msrb.mxu1 %v16343_v55  ;;  %v14303_v55 = vor.u32 %v18064_v34, %v14302_v41  ;;  %v15903_v8 = vor.u32 %v18464_v10, %v15902_v50  ;;  %v18434_v41 = vld [vmem:[#allocation6 + $0xef4] sm:$0xf0]  ;;  %v15822_v34 = vld [vmem:[#allocation6 + $0xf20] sm:$0xf]  ;;  %v18029_v50 = vld [vmem:[#allocation6 + $0x254] sm:$0xf]  ;;  %v14223_v10 = vor.u32 %v18044_v27, %v14222_v2 }
 0x508   :  { %10610 = vmatpush.bf16.msrb.mxu2 %v16663_v0  ;;  %v18624_v0 = vld [vmem:[#allocation6 + $0x14e4] sm:$0xf0]  ;;  %v18019_v2 = vld [vmem:[#allocation6 + $0x204] sm:$0xf]  ;;  %v14144_v27 = vld [vmem:[#allocation6 + $0x228] sm:$0xf0] }
 0x509   :  { %10514 = vmatpush.bf16.msrb.mxu3 %v14343_v33  ;;  %v16543_v56 = vor.u32 %v18624_v0, %v16542_v4  ;;  %v18614_v33 = vld [vmem:[#allocation6 + $0x1494] sm:$0xf0]  ;;  %v16462_v4 = vld [vmem:[#allocation6 + $0x1420] sm:$0xf]  ;;  %v14187_v0 = vor.u32 %v18029_v50, %v14184_v60  ;;  %v18009_v50 = vld [vmem:[#allocation6 + $0x1b4] sm:$0xf] }
 0x50a   :  { %10583 = vmatpush.bf16.msrb.mxu0 %v15983_v29  ;;  %v15862_v29 = vld [vmem:[#allocation6 + $0xf70] sm:$0xf]  ;;  %v18089_v60 = vld [vmem:[#allocation6 + $0x434] sm:$0xf] }
 0x50b   :  { %10597 = vmatpush.bf16.msrb.mxu1 %v16303_v43  ;;  %v14263_v43 = vor.u32 %v18054_v49, %v14262_v17  ;;  %v15863_v30 = vor.u32 %v18454_v7, %v15862_v29  ;;  %v15823_v17 = vor.u32 %v18444_v63, %v15822_v34  ;;  %v15742_v7 = vld [vmem:[#allocation6 + $0xe80] sm:$0xf]  ;;  %v18414_v34 = vld [vmem:[#allocation6 + $0xe54] sm:$0xf0]  ;;  %v18179_v63 = vld [vmem:[#allocation6 + $0x704] sm:$0xf] }
 0x50c   :  { %10611 = vmatpush.bf16.msrb.mxu2 %v16623_v31  ;;  %v15782_v31 = vld [vmem:[#allocation6 + $0xed0] sm:$0xf] }
 0x50d   :  { %10515 = vmatpush.bf16.msrb.mxu3 %v14303_v55  ;;  %v14504_v55 = vld [vmem:[#allocation6 + $0x4f8] sm:$0xf0] }
 0x50e   :  { %10584 = vmatpush.bf16.msrb.mxu0 %v15943_v5  ;;  %v16183_v5 = vor.u32 %v18534_v32, %v16182_v37  ;;  %v14507_v29 = vor.u32 %v18109_v19, %v14504_v55  ;;  %v18424_v37 = vld [vmem:[#allocation6 + $0xea4] sm:$0xf0]  ;;  %v18189_v32 = vld [vmem:[#allocation6 + $0x754] sm:$0xf]  ;;  %v14424_v19 = vld [vmem:[#allocation6 + $0x458] sm:$0xf0] }
 0x50f   :  { %10598 = vmatpush.bf16.msrb.mxu1 %v16263_v45  ;;  %v16142_v45 = vld [vmem:[#allocation6 + $0x11a0] sm:$0xf] }
 0x510   :  { %10612 = vmatpush.bf16.msrb.mxu2 %v16583_v52  ;;  %v16503_v52 = vor.u32 %v18614_v33, %v16502_v13  ;;  %v16143_v49 = vor.u32 %v18524_v20, %v16142_v45  ;;  %v15743_v33 = vor.u32 %v18424_v37, %v15742_v7  ;;  %v14784_v20 = vld [vmem:[#allocation6 + $0x728] sm:$0xf0]  ;;  %v18079_v37 = vld [vmem:[#allocation6 + $0x3e4] sm:$0xf] }
 0x511   :  { %10516 = vmatpush.bf16.msrb.mxu3 %v14263_v43  ;;  %v14824_v43 = vld [vmem:[#allocation6 + $0x778] sm:$0xf0]  ;;  %v14064_v7 = vld [vmem:[#allocation6 + $0x188] sm:$0xf0] }
 0x512   :  { %10585 = vmatpush.bf16.msrb.mxu0 %v15903_v8  ;;  %v15783_v8 = vor.u32 %v18434_v41, %v15782_v31  ;;  %v14827_v31 = vor.u32 %v18189_v32, %v14824_v43  ;;  %v15702_v41 = vld [vmem:[#allocation6 + $0xe30] sm:$0xf]  ;;  %v14384_v32 = vld [vmem:[#allocation6 + $0x408] sm:$0xf0] }
 0x513   :  { %10599 = vmatpush.bf16.msrb.mxu1 %v16223_v61  ;;  %v18604_v61 = vld [vmem:[#allocation6 + $0x1444] sm:$0xf0]  ;;  %v15703_v55 = vor.u32 %v18414_v34, %v15702_v41  ;;  %v14024_v41 = vld [vmem:[#allocation6 + $0x138] sm:$0xf0]  ;;  %v18069_v34 = vld [vmem:[#allocation6 + $0x394] sm:$0xf] }
 0x514   :  { %10613 = vmatpush.bf16.msrb.mxu2 %v16543_v56  ;;  %v18099_v56 = vld [vmem:[#allocation6 + $0x484] sm:$0xf]  ;;  %v16463_v13 = vor.u32 %v18604_v61, %v16462_v4  ;;  %v18169_v4 = vld [vmem:[#allocation6 + $0x6b4] sm:$0xf]  ;;  %v14427_v61 = vor.u32 %v18089_v60, %v14424_v19  ;;  %v18384_v60 = vld [vmem:[#allocation6 + $0xd64] sm:$0xf0] }
 0x515   :  { %10517 = vmatpush.bf16.msrb.mxu3 %v14223_v10  ;;  %v14104_v10 = vld [vmem:[#allocation6 + $0x1d8] sm:$0xf0]  ;;  %v18149_v19 = vld [vmem:[#allocation6 + $0x614] sm:$0xf] }
 0x516   :  { %10586 = vmatpush.bf16.msrb.mxu0 %v15863_v30  ;;  %v14464_v30 = vld [vmem:[#allocation6 + $0x4a8] sm:$0xf0] }
 0x517   :  { %10600 = vmatpush.bf16.msrb.mxu1 %v16183_v5  ;;  %v14147_v5 = vor.u32 %v18019_v2, %v14144_v27  ;;  %v14467_v45 = vor.u32 %v18099_v56, %v14464_v30  ;;  %v15622_v56 = vld [vmem:[#allocation6 + $0xd90] sm:$0xf]  ;;  %v18394_v30 = vld [vmem:[#allocation6 + $0xdb4] sm:$0xf0] }
 0x518   :  { %10614 = vmatpush.bf16.msrb.mxu2 %v16503_v52  ;;  %10518 = vmatmul.bf16.vlgmr.msrb.gmra.mxu3 %v19402_v58  ;;  %v14787_v52 = vor.u32 %v18179_v63, %v14784_v20  ;;  %v14344_v63 = vld [vmem:[#allocation6 + $0x3b8] sm:$0xf0] }
 0x519   :  { %10566 = vmatpush.bf16.msra.mxu3 %v15783_v8  ;;  %v14107_v8 = vor.u32 %v18009_v50, %v14104_v10  ;;  %v15582_v10 = vld [vmem:[#allocation6 + $0xd40] sm:$0xf] }
 0x51a   :  { %10587 = vmatpush.bf16.msrb.mxu0 %v15823_v17  ;;  %v15662_v17 = vld [vmem:[#allocation6 + $0xde0] sm:$0xf] }
 0x51b   :  { %10601 = vmatpush.bf16.msrb.mxu1 %v16143_v49  ;;  %v18404_v49 = vld [vmem:[#allocation6 + $0xe04] sm:$0xf0] }
 0x51c   :  { %10615 = vmatpush.bf16.msrb.mxu2 %v16463_v13  ;;  %v15663_v43 = vor.u32 %v18404_v49, %v15662_v17  ;;  %v18159_v13 = vld [vmem:[#allocation6 + $0x664] sm:$0xf]  ;;  %v13984_v17 = vld [vmem:[#allocation6 + $0xe8] sm:$0xf0] }
 0x51d   :  { %10588 = vmatmul.bf16.vlgmr.msrb.gmra.mxu0 %v19519_v6  ;;  %10567 = vmatpush.bf16.msra.mxu3 %v15743_v33  ;;  %v14387_v33 = vor.u32 %v18079_v37, %v14384_v32  ;;  %v18059_v49 = vld [vmem:[#allocation6 + $0x344] sm:$0xf]  ;;  %v18374_v37 = vld [vmem:[#allocation6 + $0xd14] sm:$0xf0] }
 0x51e   :  { %10636 = vmatpush.bf16.msra.mxu0 %v14187_v0  ;;  %10602 = vmatmul.bf16.vlgmr.msrb.gmra.mxu1 %v19521_v44  ;;  %v14744_v0 = vld [vmem:[#allocation6 + $0x6d8] sm:$0xf0]  ;;  %v18139_v32 = vld [vmem:[#allocation6 + $0x5c4] sm:$0xf] }
 0x51f   :  { %10650 = vmatpush.bf16.msra.mxu1 %v14507_v29  ;;  %v17999_v29 = vld [vmem:[#allocation6 + $0x164] sm:$0xf]  ;;  %10616 = vmatmul.bf16.vlgmr.msrb.gmra.mxu2 %v19529_v51  ;;  %v14747_v2 = vor.u32 %v18169_v4, %v14744_v0  ;;  %v14304_v4 = vld [vmem:[#allocation6 + $0x368] sm:$0xf0] }
 0x520   :  { %10664 = vmatpush.bf16.msra.mxu2 %v14827_v31  ;;  %v14067_v27 = vor.u32 %v17999_v29, %v14064_v7  ;;  %v14704_v31 = vld [vmem:[#allocation6 + $0x688] sm:$0xf0]  ;;  %v15542_v7 = vld [vmem:[#allocation6 + $0xcf0] sm:$0xf] }
 0x521   :  { %10568 = vmatpush.bf16.msra.mxu3 %v15703_v55  ;;  %v14707_v20 = vor.u32 %v18159_v13, %v14704_v31  ;;  %v14347_v55 = vor.u32 %v18069_v34, %v14344_v63  ;;  %v14264_v13 = vld [vmem:[#allocation6 + $0x318] sm:$0xf0]  ;;  %v15502_v31 = vld [vmem:[#allocation6 + $0xca0] sm:$0xf]  ;;  %v18129_v63 = vld [vmem:[#allocation6 + $0x574] sm:$0xf] }
 0x522   :  { %10637 = vmatpush.bf16.msra.mxu0 %v14147_v5  ;;  %v17989_v5 = vld [vmem:[#allocation6 + $0x114] sm:$0xf] }
 0x523   :  { %10651 = vmatpush.bf16.msra.mxu1 %v14467_v45  ;;  %v15623_v45 = vor.u32 %v18394_v30, %v15622_v56  ;;  %v14027_v50 = vor.u32 %v17989_v5, %v14024_v41  ;;  %v13944_v56 = vld [vmem:[#allocation6 + $0x98] sm:$0xf0]  ;;  %v18049_v30 = vld [vmem:[#allocation6 + $0x2f4] sm:$0xf]  ;;  %v18364_v5 = vld [vmem:[#allocation6 + $0xcc4] sm:$0xf0] }
 0x524   :  { %10665 = vmatpush.bf16.msra.mxu2 %v14787_v52  ;;  %v14664_v52 = vld [vmem:[#allocation6 + $0x638] sm:$0xf0] }
 0x525   :  { %10569 = vmatpush.bf16.msra.mxu3 %v15663_v43  ;;  %v14667_v0 = vor.u32 %v18149_v19, %v14664_v52  ;;  %v14307_v43 = vor.u32 %v18059_v49, %v14304_v4  ;;  %v13904_v19 = vld [vmem:[#allocation6 + $0x48] sm:$0xf0]  ;;  %v15464_v49 = vld [vmem:[#allocation6 + $0xc78] sm:$0xf0]  ;;  %v18429_v4 = vld [vmem:[#allocation6 + $0xed4] sm:$0xf] }
 0x526   :  { %10638 = vmatpush.bf16.msra.mxu0 %v14107_v8  ;;  %v17979_v8 = vld [vmem:[#allocation6 + $0xc4] sm:$0xf]  ;;  %v14224_v52 = vld [vmem:[#allocation6 + $0x2c8] sm:$0xf0] }
 0x527   :  { %10652 = vmatpush.bf16.msra.mxu1 %v14427_v61  ;;  %v15583_v61 = vor.u32 %v18384_v60, %v15582_v10  ;;  %v13987_v29 = vor.u32 %v17979_v8, %v13984_v17  ;;  %v18754_v10 = vld [vmem:[#allocation6 + $0x18f4] sm:$0xf0]  ;;  %v17959_v60 = vld [vmem:[#allocation6 + $0x24] sm:$0xf]  ;;  %v18349_v8 = vld [vmem:[#allocation6 + $0xc54] sm:$0xf]  ;;  %v15503_v17 = vor.u32 %v18364_v5, %v15502_v31 }
 0x528   :  { %10666 = vmatpush.bf16.msra.mxu2 %v14747_v2  ;;  %v14624_v2 = vld [vmem:[#allocation6 + $0x5e8] sm:$0xf0]  ;;  %v18339_v31 = vld [vmem:[#allocation6 + $0xc04] sm:$0xf] }
 0x529   :  { %10570 = vmatpush.bf16.msra.mxu3 %v15623_v45  ;;  %v14627_v41 = vor.u32 %v18139_v32, %v14624_v2  ;;  %v14584_v45 = vld [vmem:[#allocation6 + $0x598] sm:$0xf0]  ;;  %v18119_v32 = vld [vmem:[#allocation6 + $0x524] sm:$0xf]  ;;  %v15467_v2 = vor.u32 %v18349_v8, %v15464_v49  ;;  %v15424_v5 = vld [vmem:[#allocation6 + $0xc28] sm:$0xf0] }
 0x52a   :  { %10639 = vmatpush.bf16.msra.mxu0 %v14067_v27  ;;  %v17969_v27 = vld [vmem:[#allocation6 + $0x74] sm:$0xf] }
 0x52b   :  { %10653 = vmatpush.bf16.msra.mxu1 %v14387_v33  ;;  %v15543_v33 = vor.u32 %v18374_v37, %v15542_v7  ;;  %v13947_v34 = vor.u32 %v17969_v27, %v13944_v56  ;;  %v13907_v7 = vor.u32 %v17959_v60, %v13904_v19  ;;  %v17022_v56 = vld [vmem:[#allocation6 + $0x1880] sm:$0xf]  ;;  %v18734_v60 = vld [vmem:[#allocation6 + $0x1854] sm:$0xf0]  ;;  %v18499_v19 = vld [vmem:[#allocation6 + $0x1104] sm:$0xf] }
 0x52c   :  { %10667 = vmatpush.bf16.msra.mxu2 %v14707_v20  ;;  %v17062_v20 = vld [vmem:[#allocation6 + $0x18d0] sm:$0xf]  ;;  %v18329_v8 = vld [vmem:[#allocation6 + $0xbb4] sm:$0xf] }
 0x52d   :  { %10571 = vmatpush.bf16.msra.mxu3 %v15583_v61  ;;  %v15784_v61 = vld [vmem:[#allocation6 + $0xef8] sm:$0xf0]  ;;  %v18409_v49 = vld [vmem:[#allocation6 + $0xe34] sm:$0xf] }
 0x52e   :  { %10640 = vmatpush.bf16.msra.mxu0 %v14027_v50  ;;  %v14267_v50 = vor.u32 %v18049_v30, %v14264_v13  ;;  %v15787_v27 = vor.u32 %v18429_v4, %v15784_v61  ;;  %v18744_v30 = vld [vmem:[#allocation6 + $0x18a4] sm:$0xf0]  ;;  %v18509_v13 = vld [vmem:[#allocation6 + $0x1154] sm:$0xf]  ;;  %v15704_v4 = vld [vmem:[#allocation6 + $0xe58] sm:$0xf0] }
 0x52f   :  { %10654 = vmatpush.bf16.msra.mxu1 %v14347_v55  ;;  %v18039_v55 = vld [vmem:[#allocation6 + $0x2a4] sm:$0xf] }
 0x530   :  { %10668 = vmatpush.bf16.msra.mxu2 %v14667_v0  ;;  %v14587_v0 = vor.u32 %v18129_v63, %v14584_v45  ;;  %v14227_v37 = vor.u32 %v18039_v55, %v14224_v52  ;;  %v17023_v45 = vor.u32 %v18744_v30, %v17022_v56  ;;  %v16064_v52 = vld [vmem:[#allocation6 + $0x1128] sm:$0xf0] }
 0x531   :  { %10572 = vmatpush.bf16.msra.mxu3 %v15543_v33  ;;  %v16104_v33 = vld [vmem:[#allocation6 + $0x1178] sm:$0xf0]  ;;  %v15344_v56 = vld [vmem:[#allocation6 + $0xb88] sm:$0xf0] }
 0x532   :  { %10641 = vmatpush.bf16.msra.mxu0 %v13987_v29  ;;  %v17063_v29 = vor.u32 %v18754_v10, %v17062_v20  ;;  %v16107_v20 = vor.u32 %v18509_v13, %v16104_v33  ;;  %v16982_v10 = vld [vmem:[#allocation6 + $0x1830] sm:$0xf] }
 0x533   :  { %10655 = vmatpush.bf16.msra.mxu1 %v14307_v43  ;;  %v14544_v43 = vld [vmem:[#allocation6 + $0x548] sm:$0xf0]  ;;  %v16983_v61 = vor.u32 %v18734_v60, %v16982_v10  ;;  %v18389_v10 = vld [vmem:[#allocation6 + $0xd94] sm:$0xf]  ;;  %v19849_v60 = vpop.f32.mrf.mxu3 }
 0x534   :  { %10669 = vmatpush.bf16.msra.mxu2 %v14627_v41  ;;  %v18419_v41 = vld [vmem:[#allocation6 + $0xe84] sm:$0xf]  ;;  %v14547_v63 = vor.u32 %v18119_v32, %v14544_v43  ;;  %v18489_v32 = vld [vmem:[#allocation6 + $0x10b4] sm:$0xf]  ;;  %v15707_v43 = vor.u32 %v18409_v49, %v15704_v4  ;;  %20146 = vst [vmem:[#allocation57_spill] sm:$0xff] %v19849_v60 }
 0x535   :  { %10573 = vmatpush.bf16.msra.mxu3 %v15503_v17  ;;  %v15384_v17 = vld [vmem:[#allocation6 + $0xbd8] sm:$0xf0]  ;;  %v18469_v49 = vld [vmem:[#allocation6 + $0x1014] sm:$0xf]  ;;  %v15104_v60 = vld [vmem:[#allocation6 + $0x9a8] sm:$0xf0] }
 0x536   :  { %10642 = vmatpush.bf16.msra.mxu0 %v13947_v34  ;;  %v15744_v34 = vld [vmem:[#allocation6 + $0xea8] sm:$0xf0] }
 0x537   :  { %10656 = vmatpush.bf16.msra.mxu1 %v14267_v50  ;;  %v15427_v50 = vor.u32 %v18339_v31, %v15424_v5  ;;  %v15747_v55 = vor.u32 %v18419_v41, %v15744_v34  ;;  %v16902_v31 = vld [vmem:[#allocation6 + $0x1790] sm:$0xf]  ;;  %v18714_v5 = vld [vmem:[#allocation6 + $0x17b4] sm:$0xf0]  ;;  %v18479_v41 = vld [vmem:[#allocation6 + $0x1064] sm:$0xf] }
 0x538   :  { %10670 = vmatpush.bf16.msra.mxu2 %v14587_v0  ;;  %10574 = vmatmul.bf16.vlgmr.msra.gmra.mxu3 %v19481_v54  ;;  %v16067_v0 = vor.u32 %v18499_v19, %v16064_v52  ;;  %v16903_v19 = vor.u32 %v18714_v5, %v16902_v31  ;;  %v15224_v31 = vld [vmem:[#allocation6 + $0xa98] sm:$0xf0] }
 0x539   :  { %10622 = vmatpush.bf16.msrb.mxu3 %v17063_v29  ;;  %v15387_v29 = vor.u32 %v18329_v8, %v15384_v17  ;;  %v16862_v8 = vld [vmem:[#allocation6 + $0x1740] sm:$0xf]  ;;  %v18704_v17 = vld [vmem:[#allocation6 + $0x1764] sm:$0xf0] }
 0x53a   :  { %10643 = vmatpush.bf16.msra.mxu0 %v13907_v7  ;;  %v16942_v7 = vld [vmem:[#allocation6 + $0x17e0] sm:$0xf] }
 0x53b   :  { %10657 = vmatpush.bf16.msra.mxu1 %v14227_v37  ;;  %v18724_v37 = vld [vmem:[#allocation6 + $0x1804] sm:$0xf0] }
 0x53c   :  { %10671 = vmatpush.bf16.msra.mxu2 %v14547_v63  ;;  %v16943_v30 = vor.u32 %v18724_v37, %v16942_v7  ;;  %v15984_v63 = vld [vmem:[#allocation6 + $0x1088] sm:$0xf0]  ;;  %v18379_v7 = vld [vmem:[#allocation6 + $0xd44] sm:$0xf] }
 0x53d   :  { %10644 = vmatmul.bf16.vlgmr.msra.gmra.mxu0 %v19386_v36  ;;  %10623 = vmatpush.bf16.msrb.mxu3 %v17023_v45  ;;  %v18399_v36 = vld [vmem:[#allocation6 + $0xde4] sm:$0xf]  ;;  %v18309_v45 = vld [vmem:[#allocation6 + $0xb14] sm:$0xf]  ;;  %v15584_v37 = vld [vmem:[#allocation6 + $0xd68] sm:$0xf0] }
 0x53e   :  { %10692 = vmatpush.bf16.msrb.mxu0 %v15467_v2  ;;  %10658 = vmatmul.bf16.vlgmr.msra.gmra.mxu1 %v19402_v58  ;;  %v16024_v2 = vld [vmem:[#allocation6 + $0x10d8] sm:$0xf0]  ;;  %v15664_v58 = vld [vmem:[#allocation6 + $0xe08] sm:$0xf0] }
 0x53f   :  { %10706 = vmatpush.bf16.msrb.mxu1 %v15787_v27  ;;  %v18319_v27 = vld [vmem:[#allocation6 + $0xb64] sm:$0xf]  ;;  %10672 = vmatmul.bf16.vlgmr.msra.gmra.mxu2 %v19468_v15  ;;  %v16027_v13 = vor.u32 %v18489_v32, %v16024_v2  ;;  %v15667_v34 = vor.u32 %v18399_v36, %v15664_v58  ;;  %v15624_v15 = vld [vmem:[#allocation6 + $0xdb8] sm:$0xf0]  ;;  %v16863_v32 = vor.u32 %v18704_v17, %v16862_v8  ;;  %v19851_v58 = vpop.f32.mrf.mxu0  ;;  %v18269_v8 = vld [vmem:[#allocation6 + $0x9d4] sm:$0xf]  ;;  %v19857_v17 = vpop.f32.mrf.mxu1 }
 0x540   :  { %10720 = vmatpush.bf16.msrb.mxu2 %v16107_v20  ;;  %v15347_v33 = vor.u32 %v18319_v27, %v15344_v56  ;;  %v15304_v20 = vld [vmem:[#allocation6 + $0xb38] sm:$0xf0]  ;;  %v15627_v4 = vor.u32 %v18389_v10, %v15624_v15  ;;  %v16822_v27 = vld [vmem:[#allocation6 + $0x16f0] sm:$0xf]  ;;  %v18694_v56 = vld [vmem:[#allocation6 + $0x1714] sm:$0xf0] }
 0x541   :  { %10624 = vmatpush.bf16.msrb.mxu3 %v16983_v61  ;;  %v15307_v52 = vor.u32 %v18309_v45, %v15304_v20  ;;  %v15944_v61 = vld [vmem:[#allocation6 + $0x1038] sm:$0xf0]  ;;  %v18459_v36 = vld [vmem:[#allocation6 + $0xfc4] sm:$0xf]  ;;  %20147 = vst [vmem:[#allocation58_spill] sm:$0xff] %v19851_v58  ;;  %v16823_v45 = vor.u32 %v18694_v56, %v16822_v27 }
 0x542   :  { %10693 = vmatpush.bf16.msrb.mxu0 %v15427_v50  ;;  %v19847_v50 = vpop.f32.mrf.mxu2  ;;  %v16782_v20 = vld [vmem:[#allocation6 + $0x16a0] sm:$0xf]  ;;  %v18684_v10 = vld [vmem:[#allocation6 + $0x16c4] sm:$0xf0]  ;;  %20148 = vst [vmem:[#allocation59_spill] sm:$0xff] %v19857_v17 }
 0x543   :  { %10707 = vmatpush.bf16.msrb.mxu1 %v15747_v55  ;;  %v15987_v55 = vor.u32 %v18479_v41, %v15984_v63  ;;  %v18369_v41 = vld [vmem:[#allocation6 + $0xcf4] sm:$0xf]  ;;  %v19855_v63 = vpop.f32.mrf.mxu3  ;;  %v16744_v27 = vld [vmem:[#allocation6 + $0x1678] sm:$0xf0]  ;;  %v15824_v17 = vld [vmem:[#allocation6 + $0xf48] sm:$0xf0] }
 0x544   :  { %10721 = vmatpush.bf16.msrb.mxu2 %v16067_v0  ;;  %v18299_v0 = vld [vmem:[#allocation6 + $0xac4] sm:$0xf] }
 0x545   :  { %10625 = vmatpush.bf16.msrb.mxu3 %v16943_v30  ;;  %v15587_v30 = vor.u32 %v18379_v7, %v15584_v37  ;;  %v15504_v7 = vld [vmem:[#allocation6 + $0xcc8] sm:$0xf0]  ;;  %v18669_v37 = vld [vmem:[#allocation6 + $0x1654] sm:$0xf]  ;;  %v18259_v58 = vld [vmem:[#allocation6 + $0x984] sm:$0xf] }
 0x546   :  { %10694 = vmatpush.bf16.msrb.mxu0 %v15387_v29  ;;  %v15264_v29 = vld [vmem:[#allocation6 + $0xae8] sm:$0xf0] }
 0x547   :  { %10708 = vmatpush.bf16.msrb.mxu1 %v15707_v43  ;;  %v15947_v43 = vor.u32 %v18469_v49, %v15944_v61  ;;  %v15267_v2 = vor.u32 %v18299_v0, %v15264_v29  ;;  %v18279_v61 = vld [vmem:[#allocation6 + $0xa24] sm:$0xf]  ;;  %v15184_v0 = vld [vmem:[#allocation6 + $0xa48] sm:$0xf0] }
 0x548   :  { %10722 = vmatpush.bf16.msrb.mxu2 %v16027_v13  ;;  %v15904_v13 = vld [vmem:[#allocation6 + $0xfe8] sm:$0xf0]  ;;  %v18359_v29 = vld [vmem:[#allocation6 + $0xca4] sm:$0xf] }
 0x549   :  { %10626 = vmatpush.bf16.msrb.mxu3 %v16903_v19  ;;  %v15907_v15 = vor.u32 %v18459_v36, %v15904_v13  ;;  %v19859_v13 = vpop.f32.mrf.mxu0 }
 0x54a   :  { %10695 = vmatpush.bf16.msrb.mxu0 %v15347_v33  ;;  %v18289_v33 = vld [vmem:[#allocation6 + $0xa74] sm:$0xf]  ;;  %v19853_v5 = vpop.f32.mrf.mxu2 }
 0x54b   :  { %10709 = vmatpush.bf16.msrb.mxu1 %v15667_v34  ;;  %v15544_v34 = vld [vmem:[#allocation6 + $0xd18] sm:$0xf0]  ;;  %v15227_v19 = vor.u32 %v18289_v33, %v15224_v31  ;;  %v15507_v33 = vor.u32 %v18359_v29, %v15504_v7  ;;  %v18439_v31 = vld [vmem:[#allocation6 + $0xf24] sm:$0xf]  ;;  %v18249_v7 = vld [vmem:[#allocation6 + $0x934] sm:$0xf] }
 0x54c   :  { %10723 = vmatpush.bf16.msrb.mxu2 %v15987_v55  ;;  %v18449_v55 = vld [vmem:[#allocation6 + $0xf74] sm:$0xf]  ;;  %v15547_v49 = vor.u32 %v18369_v41, %v15544_v34  ;;  %v16747_v41 = vor.u32 %v18669_v37, %v16744_v27  ;;  %v15064_v37 = vld [vmem:[#allocation6 + $0x958] sm:$0xf0] }
 0x54d   :  { %10627 = vmatpush.bf16.msrb.mxu3 %v16863_v32  ;;  %v16783_v32 = vor.u32 %v18684_v10, %v16782_v20  ;;  %v16704_v20 = vld [vmem:[#allocation6 + $0x1628] sm:$0xf0]  ;;  %v18649_v27 = vld [vmem:[#allocation6 + $0x15b4] sm:$0xf] }
 0x54e   :  { %10696 = vmatpush.bf16.msrb.mxu0 %v15307_v52  ;;  %v15864_v52 = vld [vmem:[#allocation6 + $0xf98] sm:$0xf0] }
 0x54f   :  { %10710 = vmatpush.bf16.msrb.mxu1 %v15627_v4  ;;  %v15144_v4 = vld [vmem:[#allocation6 + $0x9f8] sm:$0xf0]  ;;  %v15867_v56 = vor.u32 %v18449_v55, %v15864_v52  ;;  %v19863_v55 = vpop.f32.mrf.mxu1  ;;  %v19865_v52 = vpop.f32.mrf.mxu3 }
 0x550   :  { %10724 = vmatpush.bf16.msrb.mxu2 %v15947_v43  ;;  %v18749_v43 = vld [vmem:[#allocation6 + $0x18d4] sm:$0xf]  ;;  %v15147_v36 = vor.u32 %v18269_v8, %v15144_v4  ;;  %v15827_v8 = vor.u32 %v18439_v31, %v15824_v17  ;;  %v20149_v4 = vperm.slane %v19542_v35, 0 }
 0x551   :  { %10628 = vmatpush.bf16.msrb.mxu3 %v16823_v45  ;;  %v18659_v45 = vld [vmem:[#allocation6 + $0x1604] sm:$0xf] }
 0x552   :  { %10697 = vmatpush.bf16.msrb.mxu0 %v15267_v2  ;;  %v17064_v2 = vld [vmem:[#allocation6 + $0x18f8] sm:$0xf0]  ;;  %v19861_v10 = vpop.f32.mrf.mxu2  ;;  %v16707_v29 = vor.u32 %v18659_v45, %v16704_v20  ;;  %v18719_v45 = vld [vmem:[#allocation6 + $0x17e4] sm:$0xf] }
 0x553   :  { %10711 = vmatpush.bf16.msrb.mxu1 %v15587_v30  ;;  %v15187_v30 = vor.u32 %v18279_v61, %v15184_v0  ;;  %v17067_v34 = vor.u32 %v18749_v43, %v17064_v2  ;;  %v9388_v61 = vadd.f32 %v19555_v39, %v20149_v4  ;;  %v18762_v0 = vld [vmem:[#allocation9 + $0x38] sm:$0xff]  ;;  %v16664_v43 = vld [vmem:[#allocation6 + $0x15d8] sm:$0xf0]  ;;  %v15067_v39 = vor.u32 %v18249_v7, %v15064_v37  ;;  %v18709_v7 = vld [vmem:[#allocation6 + $0x1794] sm:$0xf] }
 0x554   :  { %10725 = vmatpush.bf16.msrb.mxu2 %v15907_v15  ;;  %v18739_v15 = vld [vmem:[#allocation6 + $0x1884] sm:$0xf]  ;;  %v18761_v2 = vld [vmem:[#allocation9 + $0x30] sm:$0xff] }
 0x555   :  { %10629 = vmatpush.bf16.msrb.mxu3 %v16783_v32  ;;  %v9402_v17 = vadd.f32 %v19557_v22, %v9388_v61  ;;  %v16944_v22 = vld [vmem:[#allocation6 + $0x1808] sm:$0xf0]  ;;  %v14984_v4 = vld [vmem:[#allocation6 + $0x8b8] sm:$0xf0] }
 0x556   :  { %10698 = vmatpush.bf16.msrb.mxu0 %v15227_v19  ;;  %v17024_v19 = vld [vmem:[#allocation6 + $0x18a8] sm:$0xf0]  ;;  %v16904_v37 = vld [vmem:[#allocation6 + $0x17b8] sm:$0xf0] }
 0x557   :  { %10712 = vmatpush.bf16.msrb.mxu1 %v15547_v49  ;;  %v15107_v49 = vor.u32 %v18259_v58, %v15104_v60  ;;  %v17027_v32 = vor.u32 %v18739_v15, %v17024_v19  ;;  %v18729_v60 = vld [vmem:[#allocation6 + $0x1834] sm:$0xf]  ;;  %v16984_v58 = vld [vmem:[#allocation6 + $0x1858] sm:$0xf0]  ;;  %v19880_v20 = vpop.f32.mrf.mxu3  ;;  %v19882_v61 = vpop.f32.mrf.mxu1 }
 0x558   :  { %10726 = vmatpush.bf16.msrb.mxu2 %v15867_v56  ;;  %10630 = vmatmul.bf16.vlgmr.msrb.gmra.mxu3 %v19549_v14  ;;  %v16667_v56 = vor.u32 %v18649_v27, %v16664_v43  ;;  %v16987_v31 = vor.u32 %v18729_v60, %v16984_v58  ;;  %v18760_v19 = vld [vmem:[#allocation9 + $0x28] sm:$0xff]  ;;  %v18759_v43 = vld [vmem:[#allocation9 + $0x20] sm:$0xff]  ;;  %v18219_v58 = vld [vmem:[#allocation6 + $0x844] sm:$0xf] }
 0x559   :  { %10678 = vmatpush.bf16.msra.mxu3 %v15147_v36  ;;  %v18239_v36 = vld [vmem:[#allocation6 + $0x8e4] sm:$0xf] }
 0x55a   :  { %10699 = vmatpush.bf16.msrb.mxu0 %v15187_v30  ;;  %v15024_v30 = vld [vmem:[#allocation6 + $0x908] sm:$0xf0] }
 0x55b   :  { %10713 = vmatpush.bf16.msrb.mxu1 %v15507_v33  ;;  %v19874_v33 = vpop.f32.mrf.mxu0  ;;  %v15027_v15 = vor.u32 %v18239_v36, %v15024_v30  ;;  %v16544_v36 = vld [vmem:[#allocation6 + $0x14e8] sm:$0xf0]  ;;  %v18699_v30 = vld [vmem:[#allocation6 + $0x1744] sm:$0xf] }
 0x55c   :  { %10727 = vmatpush.bf16.msrb.mxu2 %v15827_v8 }
 0x55d   :  { %10700 = vmatmul.bf16.vlgmr.msrb.gmra.mxu0 %v19474_v12  ;;  %10679 = vmatpush.bf16.msra.mxu3 %v15107_v49  ;;  %v18639_v12 = vld [vmem:[#allocation6 + $0x1564] sm:$0xf]  ;;  %v18229_v49 = vld [vmem:[#allocation6 + $0x894] sm:$0xf] }
 0x55e   :  { %10748 = vmatpush.bf16.msra.mxu0 %v16747_v41  ;;  %10714 = vmatmul.bf16.vlgmr.msrb.gmra.mxu1 %v19481_v54  ;;  %v16624_v41 = vld [vmem:[#allocation6 + $0x1588] sm:$0xf0]  ;;  %v9416_v54 = vadd.f32 %v19564_v53, %v9402_v17  ;;  %v16947_v53 = vor.u32 %v18719_v45, %v16944_v22  ;;  %v18209_v45 = vld [vmem:[#allocation6 + $0x7f4] sm:$0xf]  ;;  %v14904_v22 = vld [vmem:[#allocation6 + $0x818] sm:$0xf0] }
 0x55f   :  { %10762 = vmatpush.bf16.msra.mxu1 %v17067_v34  ;;  %v19877_v34 = vpop.f32.mrf.mxu2  ;;  %10728 = vmatmul.bf16.vlgmr.msrb.gmra.mxu2 %v19519_v6  ;;  %v16627_v8 = vor.u32 %v18639_v12, %v16624_v41 }
 0x560   :  { %11450 = vmatpush.bf16.msra.mxu2 %v18762_v0  ;;  %v18629_v0 = vld [vmem:[#allocation6 + $0x1514] sm:$0xf]  ;;  %v9430_v6 = vadd.f32 %v19568_v16, %v9416_v54  ;;  %v16864_v16 = vld [vmem:[#allocation6 + $0x1768] sm:$0xf0] }
 0x561   :  { %10680 = vmatpush.bf16.msra.mxu3 %v15067_v39  ;;  %v14944_v39 = vld [vmem:[#allocation6 + $0x868] sm:$0xf0] }
 0x562   :  { %10749 = vmatpush.bf16.msra.mxu0 %v16707_v29  ;;  %v16584_v29 = vld [vmem:[#allocation6 + $0x1538] sm:$0xf0]  ;;  %v9444_v27 = vadd.f32 %v19581_v40, %v9430_v6  ;;  %v18758_v40 = vld [vmem:[#allocation9 + $0x18] sm:$0xff] }
 0x563   :  { %10763 = vmatpush.bf16.msra.mxu1 %v17027_v32  ;;  %v14987_v32 = vor.u32 %v18229_v49, %v14984_v4  ;;  %v16587_v60 = vor.u32 %v18629_v0, %v16584_v29  ;;  %v19886_v17 = vpop.f32.mrf.mxu0  ;;  %v18609_v49 = vld [vmem:[#allocation6 + $0x1474] sm:$0xf]  ;;  %v16504_v4 = vld [vmem:[#allocation6 + $0x1498] sm:$0xf0]  ;;  %v14907_v29 = vor.u32 %v18209_v45, %v14904_v22 }
 0x564   :  { %11451 = vmatpush.bf16.msra.mxu2 %v18761_v2  ;;  %v16907_v2 = vor.u32 %v18709_v7, %v16904_v37  ;;  %v9458_v12 = vadd.f32 %v19601_v46, %v9444_v27  ;;  %v18689_v0 = vld [vmem:[#allocation6 + $0x16f4] sm:$0xf]  ;;  %v16824_v46 = vld [vmem:[#allocation6 + $0x1718] sm:$0xf0]  ;;  %v16507_v7 = vor.u32 %v18609_v49, %v16504_v4  ;;  %v18199_v37 = vld [vmem:[#allocation6 + $0x7a4] sm:$0xf] }
 0x565   :  { %10681 = vmatpush.bf16.msra.mxu3 %v15027_v15  ;;  %v19891_v15 = vpop.f32.mrf.mxu1  ;;  %v18757_v6 = vld [vmem:[#allocation9 + $0x10] sm:$0xff]  ;;  %v20150_v27 = vperm.slane %v19651_v26, 2  ;;  %v18778_v49 = vld [vmem:[#allocation9 + $0xb8] sm:$0xff] }
 0x566   :  { %10750 = vmatpush.bf16.msra.mxu0 %v16667_v56  ;;  %v18619_v56 = vld [vmem:[#allocation6 + $0x14c4] sm:$0xf] }
 0x567   :  { %10764 = vmatpush.bf16.msra.mxu1 %v16987_v31  ;;  %v14947_v31 = vor.u32 %v18219_v58, %v14944_v39  ;;  %v19889_v41 = vpop.f32.mrf.mxu2  ;;  %v16547_v54 = vor.u32 %v18619_v56, %v16544_v36  ;;  %v18589_v58 = vld [vmem:[#allocation6 + $0x13d4] sm:$0xf]  ;;  %v16424_v39 = vld [vmem:[#allocation6 + $0x13f8] sm:$0xf0]  ;;  %v20151_v56 = vperm.slane %v19651_v26, 3 }
 0x568   :  { %11452 = vmatpush.bf16.msra.mxu2 %v18760_v19  ;;  %v19893_v19 = vpop.f32.mrf.mxu3  ;;  %v16427_v22 = vor.u32 %v18589_v58, %v16424_v39  ;;  %v16344_v58 = vld [vmem:[#allocation6 + $0x1358] sm:$0xf0]  ;;  %v20153_v39 = vld [vmem:[#allocation23_spill] sm:$0xff] }
 0x569   :  { %10682 = vmatpush.bf16.msra.mxu3 %v14987_v32  ;;  %v14864_v32 = vld [vmem:[#allocation6 + $0x7c8] sm:$0xf0]  ;;  %v9808_v36 = vadd.f32 %v19710_v59, %v20151_v56 }
 0x56a   :  { %10751 = vmatpush.bf16.msra.mxu0 %v16627_v8  ;;  %v16867_v8 = vor.u32 %v18699_v30, %v16864_v16  ;;  %v16464_v30 = vld [vmem:[#allocation6 + $0x1448] sm:$0xf0]  ;;  %v18679_v16 = vld [vmem:[#allocation6 + $0x16a4] sm:$0xf] }
 0x56b   :  { %10765 = vmatpush.bf16.msra.mxu1 %v16947_v53  ;;  %v9472_v53 = vadd.f32 %v19574_v47, %v9458_v12  ;;  %v9822_v4 = vadd.f32 %v19713_v18, %v9808_v36  ;;  %v20155_v36 = vld [vmem:[#allocation43_spill] sm:$0xff] }
 0x56c   :  { %11453 = vmatpush.bf16.msra.mxu2 %v18759_v43  ;;  %v9668_v43 = vadd.f32 %v19644_v1, %v20150_v27  ;;  %v14867_v1 = vor.u32 %v18199_v37, %v14864_v32  ;;  %v18794_v27 = vld [vmem:[#allocation9 + $0x138] sm:$0xff] }
 0x56d   :  { %10683 = vmatpush.bf16.msra.mxu3 %v14947_v31  ;;  %v9486_v47 = vadd.f32 %v19579_v62, %v9472_v53  ;;  %v16784_v31 = vld [vmem:[#allocation6 + $0x16c8] sm:$0xf0]  ;;  %v18756_v62 = vld [vmem:[#allocation9 + $0x8] sm:$0xff]  ;;  %v20152_v53 = vperm.slane %v19753_v11, 4  ;;  %v9836_v37 = vadd.f32 %v19715_v25, %v9822_v4 }
 0x56e   :  { %10752 = vmatpush.bf16.msra.mxu0 %v16587_v60  ;;  %v16827_v60 = vor.u32 %v18689_v0, %v16824_v46  ;;  %v9682_v12 = vadd.f32 %v19681_v48, %v9668_v43  ;;  %v18786_v0 = vld [vmem:[#allocation9 + $0xf8] sm:$0xff] }
 0x56f   :  { %10766 = vmatpush.bf16.msra.mxu1 %v16907_v2  ;;  %v18599_v2 = vld [vmem:[#allocation6 + $0x1424] sm:$0xf]  ;;  %v19907_v45 = vpop.f32.mrf.mxu2  ;;  %v9850_v43 = vadd.f32 %v19723_v9, %v9836_v37  ;;  %v18775_v37 = vld [vmem:[#allocation9 + $0xa0] sm:$0xff] }
 0x570   :  { %11454 = vmatpush.bf16.msra.mxu2 %v18758_v40  ;;  %v19904_v40 = vpop.f32.mrf.mxu0  ;;  %v19909_v26 = vpop.f32.mrf.mxu3  ;;  %v16467_v59 = vor.u32 %v18599_v2, %v16464_v30  ;;  %v18579_v46 = vld [vmem:[#allocation6 + $0x1384] sm:$0xf] }
 0x571   :  { %10684 = vmatpush.bf16.msra.mxu3 %v14907_v29  ;;  %v16384_v29 = vld [vmem:[#allocation6 + $0x13a8] sm:$0xf0] }
 0x572   :  { %10753 = vmatpush.bf16.msra.mxu0 %v16547_v54  ;;  %v9500_v54 = vadd.f32 %v19592_v21, %v9486_v47  ;;  %v9948_v21 = vadd.f32 %v19746_v23, %v20152_v53  ;;  %v16387_v18 = vor.u32 %v18579_v46, %v16384_v29  ;;  %v20154_v47 = vld [vmem:[#allocation27_spill] sm:$0xff]  ;;  %v20159_v53 = vld [vmem:[#allocation24_spill] sm:$0xff] }
 0x573   :  { %10767 = vmatpush.bf16.msra.mxu1 %v16867_v8  ;;  %v16787_v8 = vor.u32 %v18679_v16, %v16784_v31  ;;  %v10776_v56 = vmax.f32 %v20154_v47, 0.0  ;;  %v18793_v16 = vld [vmem:[#allocation9 + $0x130] sm:$0xff]  ;;  %v18792_v46 = vld [vmem:[#allocation9 + $0x128] sm:$0xff]  ;;  %v20160_v29 = vld [vmem:[#allocation31_spill] sm:$0xff] }
 0x574   :  { %11455 = vmatpush.bf16.msra.mxu2 %v18757_v6  ;;  %v9514_v48 = vadd.f32 %v19612_v24, %v9500_v54  ;;  %v9696_v6 = vadd.f32 %v19657_v57, %v9682_v12  ;;  %v9962_v32 = vadd.f32 %v19783_v42, %v9948_v21  ;;  %v18755_v24 = vld [vmem:[#allocation9] sm:$0xff]  ;;  %v18777_v57 = vld [vmem:[#allocation9 + $0xb0] sm:$0xff] }
 0x575   :  { %10685 = vmatpush.bf16.msra.mxu3 %v14867_v1  ;;  %v18785_v42 = vld [vmem:[#allocation9 + $0xf0] sm:$0xff] }
 0x576   :  { %10754 = vmatpush.bf16.msra.mxu0 %v16507_v7  ;;  %v19917_v7 = vpop.f32.mrf.mxu1  ;;  %v10786_v23 = vmax.f32 %v9514_v48, 0.0  ;;  %v9710_v2 = vadd.f32 %v20153_v39, %v9696_v6  ;;  %v9976_v30 = vadd.f32 %v20155_v36, %v9962_v32  ;;  %v20156_v12 = vld [vmem:[#allocation17_spill] sm:$0xff]  ;;  %v20158_v48 = vld [vmem:[#allocation44_spill] sm:$0xff]  ;;  %v18774_v36 = vld [vmem:[#allocation9 + $0x98] sm:$0xff] }
 0x577   :  { %10768 = vmatpush.bf16.msra.mxu1 %v16827_v60  ;;  %v18569_v60 = vld [vmem:[#allocation6 + $0x1334] sm:$0xf]  ;;  %v9864_v1 = vadd.f32 %v20156_v12, %v9850_v43  ;;  %v19931_v54 = vpop.f32.mrf.mxu2  ;;  %v20162_v43 = vld [vmem:[#allocation19_spill] sm:$0xff]  ;;  %v20164_v12 = vld [vmem:[#allocation42_spill] sm:$0xff] }
 0x578   :  { %11456 = vmatpush.bf16.msra.mxu2 %v18756_v62  ;;  %v19923_v25 = vpop.f32.mrf.mxu0  ;;  %10686 = vmatmul.bf16.vlgmr.msra.gmra.mxu3 %v19470_v38  ;;  %v16347_v9 = vor.u32 %v18569_v60, %v16344_v58  ;;  %v10796_v31 = vpack.c.bf16 %v10786_v23, %v10776_v56  ;;  %v18776_v38 = vld [vmem:[#allocation9 + $0xa8] sm:$0xff]  ;;  %v18559_v62 = vld [vmem:[#allocation6 + $0x12e4] sm:$0xf]  ;;  %v9990_v4 = vadd.f32 %v20158_v48, %v9976_v30  ;;  %v18791_v39 = vld [vmem:[#allocation9 + $0x120] sm:$0xff] }
 0x579   :  { %10734 = vmatpush.bf16.msrb.mxu3 %v16427_v22  ;;  %v16304_v22 = vld [vmem:[#allocation6 + $0x1308] sm:$0xf0]  ;;  %v9878_v6 = vadd.f32 %v20160_v29, %v9864_v1  ;;  %v18549_v32 = vld [vmem:[#allocation6 + $0x1294] sm:$0xf]  ;;  %v18539_v30 = vld [vmem:[#allocation6 + $0x1244] sm:$0xf] }
 0x57a   :  { %10755 = vmatpush.bf16.msra.mxu0 %v16467_v59  ;;  %v20157_v59 = vld [vmem:[#allocation33_spill] sm:$0xff]  ;;  %v20168_v29 = vld [vmem:[#allocation30_spill] sm:$0xff] }
 0x57b   :  { %10769 = vmatpush.bf16.msra.mxu1 %v16787_v8  ;;  %v9724_v8 = vadd.f32 %v20157_v59, %v9710_v2  ;;  %v20163_v2 = vld [vmem:[#allocation25_spill] sm:$0xff] }
 0x57c   :  { %11457 = vmatpush.bf16.msra.mxu2 %v18755_v24  ;;  %v16264_v24 = vld [vmem:[#allocation6 + $0x12b8] sm:$0xf0] }
 0x57d   :  { %10756 = vmatmul.bf16.vlgmr.msra.gmra.mxu0 %v19529_v51  ;;  %10735 = vmatpush.bf16.msrb.mxu3 %v16387_v18  ;;  %v19936_v51 = vpop.f32.mrf.mxu3  ;;  %v9738_v21 = vadd.f32 %v20159_v53, %v9724_v8  ;;  %v18783_v18 = vld [vmem:[#allocation9 + $0xe0] sm:$0xff]  ;;  %v16267_v58 = vor.u32 %v18549_v32, %v16264_v24  ;;  %v18790_v8 = vld [vmem:[#allocation9 + $0x118] sm:$0xff]  ;;  %v18773_v48 = vld [vmem:[#allocation9 + $0x90] sm:$0xff] }
 0x57e   :  { %11478 = vmatpush.bf16.msrb.mxu0 %v18778_v49  ;;  %10770 = vmatmul.bf16.vlgmr.msra.gmra.mxu1 %v19549_v14  ;;  %v19934_v49 = vpop.f32.mrf.mxu1  ;;  %v18784_v14 = vld [vmem:[#allocation9 + $0xe8] sm:$0xff]  ;;  %v16184_v53 = vld [vmem:[#allocation6 + $0x1218] sm:$0xf0] }
 0x57f   :  { %11492 = vmatpush.bf16.msrb.mxu1 %v18786_v0  ;;  %11458 = vmatmul.bf16.vlgmr.msra.gmra.mxu2 %v10796_v31  ;;  %v16307_v0 = vor.u32 %v18559_v62, %v16304_v22  ;;  %v19945_v56 = vpop.f32.mrf.mxu2  ;;  %v18782_v31 = vld [vmem:[#allocation9 + $0xd8] sm:$0xff] }
 0x580   :  { %11506 = vmatpush.bf16.msrb.mxu2 %v18794_v27  ;;  %v20161_v27 = vld [vmem:[#allocation45_spill] sm:$0xff]  ;;  %v10367_v60 = vpop.f32.mrf.mxu0 }
 0x581   :  { %10736 = vmatpush.bf16.msrb.mxu3 %v16347_v9  ;;  %v10004_v23 = vadd.f32 %v20161_v27, %v9990_v4  ;;  %v16224_v9 = vld [vmem:[#allocation6 + $0x1268] sm:$0xf0]  ;;  %v18529_v4 = vld [vmem:[#allocation6 + $0x11f4] sm:$0xf]  ;;  %v18789_v27 = vld [vmem:[#allocation9 + $0x110] sm:$0xff] }
 0x582   :  { %11479 = vmatpush.bf16.msrb.mxu0 %v18777_v57  ;;  %v9752_v57 = vadd.f32 %v20162_v43, %v9738_v21  ;;  %v16227_v59 = vor.u32 %v18539_v30, %v16224_v9  ;;  %v18781_v21 = vld [vmem:[#allocation9 + $0xd0] sm:$0xff]  ;;  %v20170_v43 = vld [vmem:[#allocation36_spill] sm:$0xff] }
 0x583   :  { %11493 = vmatpush.bf16.msrb.mxu1 %v18785_v42  ;;  %v9892_v42 = vadd.f32 %v20163_v2, %v9878_v6  ;;  %v10018_v47 = vadd.f32 %v19801_v28, %v10004_v23  ;;  %v20166_v28 = vld [vmem:[#allocation46_spill] sm:$0xff]  ;;  %v20169_v23 = vperm.slane %v19542_v35, 1 }
 0x584   :  { %11507 = vmatpush.bf16.msrb.mxu2 %v18793_v16  ;;  %v20172_v30 = vld [vmem:[#allocation34_spill] sm:$0xff] }
 0x585   :  { %10737 = vmatpush.bf16.msrb.mxu3 %v16307_v0  ;;  %v19947_v16 = vpop.f32.mrf.mxu3  ;;  %v9906_v1 = vadd.f32 %v20164_v12, %v9892_v42  ;;  %v20167_v0 = vld [vmem:[#allocation32_spill] sm:$0xff] }
 0x586   :  { %11480 = vmatpush.bf16.msrb.mxu0 %v18776_v38  ;;  %v20165_v38 = vld [vmem:[#allocation26_spill] sm:$0xff]  ;;  %v10381_v22 = vpop.f32.mrf.mxu1  ;;  %v18772_v42 = vld [vmem:[#allocation9 + $0x88] sm:$0xff] }
 0x587   :  { %11494 = vmatpush.bf16.msrb.mxu1 %v18784_v14  ;;  %v9766_v62 = vadd.f32 %v20165_v38, %v9752_v57  ;;  %v10032_v14 = vadd.f32 %v20166_v28, %v10018_v47  ;;  %v9528_v57 = vadd.f32 %v20170_v43, %v20169_v23  ;;  %v18519_v47 = vld [vmem:[#allocation6 + $0x11a4] sm:$0xf]  ;;  %v18780_v12 = vld [vmem:[#allocation9 + $0xc8] sm:$0xff]  ;;  %v10395_v35 = vpop.f32.mrf.mxu2  ;;  %v20177_v23 = vld [vmem:[#allocation50_spill] sm:$0xff] }
 0x588   :  { %11508 = vmatpush.bf16.msrb.mxu2 %v18792_v46  ;;  %v9920_v46 = vadd.f32 %v20167_v0, %v9906_v1  ;;  %v19954_v24 = vpop.f32.mrf.mxu0  ;;  %v20173_v1 = vld [vmem:[#allocation21_spill] sm:$0xff]  ;;  %v20175_v0 = vld [vmem:[#allocation48_spill] sm:$0xff] }
 0x589   :  { %10738 = vmatpush.bf16.msrb.mxu3 %v16267_v58  ;;  %v9780_v6 = vadd.f32 %v20168_v29, %v9766_v62  ;;  %v20171_v58 = vld [vmem:[#allocation47_spill] sm:$0xff] }
 0x58a   :  { %11481 = vmatpush.bf16.msrb.mxu0 %v18775_v37  ;;  %v18850_v37 = vld [vmem:[#allocation7] sm:$0xff]  ;;  %v9934_v38 = vadd.f32 %v20173_v1, %v9920_v46  ;;  %v18787_v1 = vld [vmem:[#allocation9 + $0x100] sm:$0xff] }
 0x58b   :  { %11495 = vmatpush.bf16.msrb.mxu1 %v18783_v18  ;;  %v5362_v32 = vperm.slane %v18850_v37, 6  ;;  %v16187_v18 = vor.u32 %v18529_v4, %v16184_v53  ;;  %v5363_v2 = vperm.slane %v18850_v37, 7  ;;  %v9794_v9 = vadd.f32 %v20172_v30, %v9780_v6  ;;  %v20174_v4 = vld [vmem:[#allocation40_spill] sm:$0xff] }
 0x58c   :  { %11509 = vmatpush.bf16.msrb.mxu2 %v18791_v39  ;;  %v10046_v39 = vadd.f32 %v20171_v58, %v10032_v14  ;;  %v9542_v53 = vadd.f32 %v20174_v4, %v9528_v57  ;;  %v18779_v6 = vld [vmem:[#allocation9 + $0xc0] sm:$0xff]  ;;  %v18810_v58 = vld [vmem:[#allocation9 + $0x1b8] sm:$0xff] }
 0x58d   :  { %10739 = vmatpush.bf16.msrb.mxu3 %v16227_v59  ;;  %v10368_v62 = vadd.f32 %v10367_v60, %v5363_v2  ;;  %v10226_v59 = vadd.f32 %v19853_v5, %v5362_v32  ;;  %v18770_v60 = vld [vmem:[#allocation9 + $0x78] sm:$0xff]  ;;  %v10788_v46 = vmax.f32 %v9794_v9, 0.0  ;;  %v20176_v37 = vld [vmem:[#allocation16_spill] sm:$0xff] }
 0x58e   :  { %11482 = vmatpush.bf16.msrb.mxu0 %v18774_v36  ;;  %v16144_v36 = vld [vmem:[#allocation6 + $0x11c8] sm:$0xf0]  ;;  %v19965_v14 = vpop.f32.mrf.mxu1  ;;  %v10060_v29 = vadd.f32 %v20175_v0, %v10046_v39  ;;  %v18818_v39 = vld [vmem:[#allocation9 + $0x1f8] sm:$0xff] }
 0x58f   :  { %11496 = vmatpush.bf16.msrb.mxu1 %v18782_v31  ;;  %v10228_v31 = vadd.f32 %v19861_v10, %v5362_v32  ;;  %v10366_v10 = vadd.f32 %v19923_v25, %v5363_v2  ;;  %v10240_v5 = vadd.f32 %v19855_v63, %v10226_v59  ;;  %v9556_v32 = vadd.f32 %v20176_v37, %v9542_v53  ;;  %v20179_v2 = vld [vmem:[#allocation20_spill] sm:$0xff] }
 0x590   :  { %11510 = vmatpush.bf16.msrb.mxu2 %v18790_v8  ;;  %v10409_v8 = vpop.f32.mrf.mxu3  ;;  %v10074_v43 = vadd.f32 %v20177_v23, %v10060_v29  ;;  %v10382_v57 = vadd.f32 %v10381_v22, %v10368_v62  ;;  %v10423_v22 = vpop.f32.mrf.mxu0  ;;  %v20182_v29 = vld [vmem:[#allocation49_spill] sm:$0xff]  ;;  %v18767_v23 = vld [vmem:[#allocation9 + $0x60] sm:$0xff] }
 0x591   :  { %v10242_v28 = vadd.f32 %v19865_v52, %v10228_v31  ;;  %10740 = vmatpush.bf16.msrb.mxu3 %v16187_v18  ;;  %v18771_v52 = vld [vmem:[#allocation9 + $0x80] sm:$0xff]  ;;  %v10789_v18 = vmax.f32 %v9934_v38, 0.0  ;;  %v10380_v30 = vadd.f32 %v19934_v49, %v10366_v10  ;;  %v18769_v38 = vld [vmem:[#allocation9 + $0x70] sm:$0xff]  ;;  %v10780_v10 = vmax.f32 %v20182_v29, 0.0 }
 0x592   :  { %11483 = vmatpush.bf16.msrb.mxu0 %v18773_v48  ;;  %v16147_v48 = vor.u32 %v18519_v47, %v16144_v36  ;;  %v20178_v47 = vld [vmem:[#allocation39_spill] sm:$0xff]  ;;  %v10396_v9 = vadd.f32 %v10395_v35, %v10382_v57  ;;  %v18809_v49 = vld [vmem:[#allocation9 + $0x1b0] sm:$0xff] }
 0x593   :  { %11497 = vmatpush.bf16.msrb.mxu1 %v18781_v21  ;;  %v18788_v21 = vld [vmem:[#allocation9 + $0x108] sm:$0xff]  ;;  %v10778_v25 = vmax.f32 %v20178_v47, 0.0  ;;  %v20180_v36 = vld [vmem:[#allocation35_spill] sm:$0xff]  ;;  %v10394_v59 = vadd.f32 %v19945_v56, %v10380_v30  ;;  %v18817_v35 = vld [vmem:[#allocation9 + $0x1f0] sm:$0xff] }
 0x594   :  { %11511 = vmatpush.bf16.msrb.mxu2 %v18789_v27  ;;  %v10256_v27 = vadd.f32 %v19874_v33, %v10242_v28  ;;  %v10779_v63 = vmax.f32 %v20180_v36, 0.0  ;;  %v10790_v33 = vmax.f32 %v10074_v43, 0.0  ;;  %v10449_v28 = vpop.f32.mrf.mxu2  ;;  %v18807_v57 = vld [vmem:[#allocation9 + $0x1a0] sm:$0xff]  ;;  %v18806_v30 = vld [vmem:[#allocation9 + $0x198] sm:$0xff] }
 0x595   :  { %10741 = vmatpush.bf16.msrb.mxu3 %v16147_v48  ;;  %v10798_v31 = vpack.c.bf16 %v10788_v46, %v10778_v25  ;;  %v10410_v48 = vadd.f32 %v10409_v8, %v10396_v9  ;;  %v18814_v9 = vld [vmem:[#allocation9 + $0x1d8] sm:$0xff] }
 0x596   :  { %11484 = vmatpush.bf16.msrb.mxu0 %v18772_v42  ;;  %v9570_v42 = vadd.f32 %v20179_v2, %v9556_v32  ;;  %v10799_v62 = vpack.c.bf16 %v10789_v18, %v10779_v63  ;;  %v10270_v4 = vadd.f32 %v19882_v61, %v10256_v27  ;;  %v10437_v8 = vpop.f32.mrf.mxu1  ;;  %v10800_v46 = vpack.c.bf16 %v10790_v33, %v10780_v10  ;;  %v18808_v61 = vld [vmem:[#allocation9 + $0x1a8] sm:$0xff]  ;;  %v18813_v33 = vld [vmem:[#allocation9 + $0x1d0] sm:$0xff] }
 0x597   :  { %11498 = vmatpush.bf16.msrb.mxu1 %v18780_v12  ;;  %v10254_v12 = vadd.f32 %v19859_v13, %v10240_v5  ;;  %v20181_v13 = vld [vmem:[#allocation28_spill] sm:$0xff]  ;;  %v10424_v5 = vadd.f32 %v10423_v22, %v10410_v48 }
 0x598   :  { %11512 = vmatpush.bf16.msrb.mxu2 %v18788_v21  ;;  %v10463_v53 = vpop.f32.mrf.mxu3  ;;  %10742 = vmatmul.bf16.vlgmr.msrb.gmra.mxu3 %v19521_v44  ;;  %v9584_v0 = vadd.f32 %v20181_v13, %v9570_v42  ;;  %v10408_v21 = vadd.f32 %v19947_v16, %v10394_v59  ;;  %v18816_v44 = vld [vmem:[#allocation9 + $0x1e8] sm:$0xff]  ;;  %v10477_v18 = vpop.f32.mrf.mxu0  ;;  %v20185_v42 = vld [vmem:[#allocation38_spill] sm:$0xff] }
 0x599   :  { %11464 = vmatpush.bf16.msra.mxu3 %v18770_v60  ;;  %v10268_v56 = vadd.f32 %v19863_v55, %v10254_v12  ;;  %v18768_v60 = vld [vmem:[#allocation9 + $0x68] sm:$0xff]  ;;  %v10438_v43 = vadd.f32 %v10437_v8, %v10424_v5 }
 0x59a   :  { %11485 = vmatpush.bf16.msrb.mxu0 %v18771_v52  ;;  %v10284_v52 = vadd.f32 %v19889_v41, %v10270_v4  ;;  %v10422_v16 = vadd.f32 %v19954_v24, %v10408_v21  ;;  %v20184_v41 = vld [vmem:[#allocation41_spill] sm:$0xff] }
 0x59b   :  { %11499 = vmatpush.bf16.msrb.mxu1 %v18779_v6  ;;  %v20183_v6 = vld [vmem:[#allocation37_spill] sm:$0xff]  ;;  %v10282_v32 = vadd.f32 %v19877_v34, %v10268_v56 }
 0x59c   :  { %11513 = vmatpush.bf16.msrb.mxu2 %v18787_v1  ;;  %v9598_v37 = vadd.f32 %v20183_v6, %v9584_v0  ;;  %v10298_v55 = vadd.f32 %v19893_v19, %v10284_v52  ;;  %v10451_v25 = vpop.f32.mrf.mxu2  ;;  %v10436_v24 = vadd.f32 %v19965_v14, %v10422_v16  ;;  %v18766_v19 = vld [vmem:[#allocation9 + $0x58] sm:$0xff]  ;;  %v18765_v14 = vld [vmem:[#allocation9 + $0x50] sm:$0xff]  ;;  %v18812_v10 = vld [vmem:[#allocation9 + $0x1c8] sm:$0xff] }
 0x59d   :  { %11486 = vmatmul.bf16.vlgmr.msrb.gmra.mxu0 %v10798_v31  ;;  %11465 = vmatpush.bf16.msra.mxu3 %v18769_v38  ;;  %v10452_v63 = vadd.f32 %v10451_v25, %v10438_v43  ;;  %v20189_v13 = vld [vmem:[#allocation29_spill] sm:$0xff]  ;;  %v18803_v52 = vld [vmem:[#allocation9 + $0x180] sm:$0xff]  ;;  %v18826_v6 = vld [vmem:[#allocation9 + $0x238] sm:$0xff] }
 0x59e   :  { %11534 = vmatpush.bf16.msra.mxu0 %v18810_v58  ;;  %11500 = vmatmul.bf16.vlgmr.msrb.gmra.mxu1 %v10799_v62  ;;  %v18815_v58 = vld [vmem:[#allocation9 + $0x1e0] sm:$0xff]  ;;  %v9612_v47 = vadd.f32 %v20184_v41, %v9598_v37  ;;  %v10312_v27 = vadd.f32 %v19904_v40, %v10298_v55  ;;  %v10491_v34 = vpop.f32.mrf.mxu1  ;;  %v10450_v31 = vadd.f32 %v10449_v28, %v10436_v24  ;;  %v20186_v40 = vld [vmem:[#allocation18_spill] sm:$0xff]  ;;  %v20191_v37 = vld [vmem:[#allocation53_spill] sm:$0xff] }
 0x59f   :  { %11548 = vmatpush.bf16.msra.mxu1 %v18818_v39  ;;  %11514 = vmatmul.bf16.vlgmr.msrb.gmra.mxu2 %v10800_v46  ;;  %v10296_v39 = vadd.f32 %v19880_v20, %v10282_v32  ;;  %v18805_v62 = vld [vmem:[#allocation9 + $0x190] sm:$0xff]  ;;  %v18811_v32 = vld [vmem:[#allocation9 + $0x1c0] sm:$0xff]  ;;  %v18824_v25 = vld [vmem:[#allocation9 + $0x228] sm:$0xff] }
 0x5a0   :  { %v10465_v2 = vpop.f32.mrf.mxu3  ;;  %v9626_v36 = vadd.f32 %v20185_v42, %v9612_v47  ;;  %v10326_v22 = vadd.f32 %v19917_v7, %v10312_v27  ;;  %v10464_v38 = vadd.f32 %v10463_v53, %v10450_v31  ;;  %v10479_v48 = vpop.f32.mrf.mxu0  ;;  %v18764_v7 = vld [vmem:[#allocation9 + $0x48] sm:$0xff]  ;;  %11562 = vmatpush.bf16.msra.mxu2 %v18826_v6  ;;  %v18825_v43 = vld [vmem:[#allocation9 + $0x230] sm:$0xff]  ;;  %v18823_v42 = vld [vmem:[#allocation9 + $0x220] sm:$0xff] }
 0x5a1   :  { %11466 = vmatpush.bf16.msra.mxu3 %v18768_v60  ;;  %v10310_v20 = vadd.f32 %v19886_v17, %v10296_v39  ;;  %v10466_v12 = vadd.f32 %v10465_v2, %v10452_v63  ;;  %v20188_v17 = vld [vmem:[#allocation51_spill] sm:$0xff]  ;;  %v18804_v53 = vld [vmem:[#allocation9 + $0x188] sm:$0xff]  ;;  %v18801_v39 = vld [vmem:[#allocation9 + $0x170] sm:$0xff] }
 0x5a2   :  { %11535 = vmatpush.bf16.msra.mxu0 %v18809_v49  ;;  %v9640_v1 = vadd.f32 %v20186_v40, %v9626_v36  ;;  %v10340_v4 = vadd.f32 %v19931_v54, %v10326_v22  ;;  %v10478_v29 = vadd.f32 %v10477_v18, %v10464_v38  ;;  %v18763_v54 = vld [vmem:[#allocation9 + $0x40] sm:$0xff]  ;;  %v20193_v24 = vld [vmem:[#allocation54_spill] sm:$0xff]  ;;  %v20016_v22 = vld [vmem:[#allocation7 + $0x8] sm:$0x3] }
 0x5a3   :  { %11549 = vmatpush.bf16.msra.mxu1 %v18817_v35  ;;  %v10324_v59 = vadd.f32 %v19891_v15, %v10310_v20  ;;  %v10480_v49 = vadd.f32 %v10479_v48, %v10466_v12  ;;  %v20187_v35 = vperm.slane %v19753_v11, 5  ;;  %v20190_v11 = vld [vmem:[#allocation52_spill] sm:$0xff]  ;;  %v20194_v2 = vld [vmem:[#allocation55_spill] sm:$0xff]  ;;  %v20195_v20 = vld [vmem:[#allocation57_spill] sm:$0xff] }
 0x5a4   :  { %v9654_v0 = vadd.f32 %v20189_v13, %v9640_v1  ;;  %v10354_v15 = vadd.f32 %v19936_v51, %v10340_v4  ;;  %v20192_v51 = vld [vmem:[#allocation22_spill] sm:$0xff]  ;;  %11563 = vmatpush.bf16.msra.mxu2 %v18825_v43  ;;  %v18799_v63 = vld [vmem:[#allocation9 + $0x160] sm:$0xff]  ;;  %v18820_v4 = vld [vmem:[#allocation9 + $0x208] sm:$0xff] }
 0x5a5   :  { %11467 = vmatpush.bf16.msra.mxu3 %v18767_v23  ;;  %v10088_v28 = vadd.f32 %v20188_v17, %v20187_v35  ;;  %v10338_v21 = vadd.f32 %v19907_v45, %v10324_v59  ;;  %v10777_v55 = vmax.f32 %v20192_v51, 0.0  ;;  %v18822_v12 = vld [vmem:[#allocation9 + $0x218] sm:$0xff]  ;;  %v18797_v1 = vld [vmem:[#allocation9 + $0x150] sm:$0xff] }
 0x5a6   :  { %11536 = vmatpush.bf16.msra.mxu0 %v18808_v61  ;;  %v10493_v56 = vpop.f32.mrf.mxu1  ;;  %v10787_v5 = vmax.f32 %v9654_v0, 0.0  ;;  %v10492_v61 = vadd.f32 %v10491_v34, %v10478_v29  ;;  %v10792_v45 = vmax.f32 %v10354_v15, 0.0  ;;  %v10505_v34 = vpop.f32.mrf.mxu2  ;;  %v20196_v38 = vld [vmem:[#allocation58_spill] sm:$0xff]  ;;  %v20197_v35 = vld [vmem:[#allocation59_spill] sm:$0xff] }
 0x5a7   :  { %11550 = vmatpush.bf16.msra.mxu1 %v18816_v44  ;;  %v10494_v8 = vadd.f32 %v10493_v56, %v10480_v49  ;;  %v10102_v60 = vadd.f32 %v20190_v11, %v10088_v28  ;;  %v10352_v46 = vadd.f32 %v19909_v26, %v10338_v21  ;;  %v18802_v44 = vld [vmem:[#allocation9 + $0x178] sm:$0xff]  ;;  %v18821_v59 = vld [vmem:[#allocation9 + $0x210] sm:$0xff]  ;;  %v18819_v15 = vld [vmem:[#allocation9 + $0x200] sm:$0xff] }
 0x5a8   :  { %11564 = vmatpush.bf16.msra.mxu2 %v18824_v25  ;;  %v10519_v36 = vpop.f32.mrf.mxu3  ;;  %v10533_v40 = vpop.f32.mrf.mxu0 }
 0x5a9   :  { %11468 = vmatpush.bf16.msra.mxu3 %v18766_v19  ;;  %v10116_v16 = vadd.f32 %v20191_v37, %v10102_v60  ;;  %v10793_v18 = vmax.f32 %v10494_v8, 0.0  ;;  %v10782_v26 = vmax.f32 %v10352_v46, 0.0  ;;  %v20198_v8 = vld [vmem:[#allocation56_spill] sm:$0xff] }
 0x5aa   :  { %11537 = vmatpush.bf16.msra.mxu0 %v18807_v57  ;;  %v10797_v57 = vpack.c.bf16 %v10787_v5, %v10777_v55  ;;  %v10781_v11 = vmax.f32 %v20198_v8, 0.0 }
 0x5ab   :  { %11551 = vmatpush.bf16.msra.mxu1 %v18815_v58  ;;  %v10130_v23 = vadd.f32 %v19825_v3, %v10116_v16  ;;  %v10783_v58 = vmax.f32 %v10492_v61, 0.0  ;;  %v10802_v41 = vpack.c.bf16 %v10792_v45, %v10782_v26  ;;  %v18800_v3 = vld [vmem:[#allocation9 + $0x168] sm:$0xff] }
 0x5ac   :  { %11565 = vmatpush.bf16.msra.mxu2 %v18823_v42  ;;  %v18834_v42 = vld [vmem:[#allocation9 + $0x278] sm:$0xff] }
 0x5ad   :  { %11469 = vmatpush.bf16.msra.mxu3 %v18765_v14  ;;  %v10803_v47 = vpack.c.bf16 %v10793_v18, %v10783_v58  ;;  %v10144_v27 = vadd.f32 %v20193_v24, %v10130_v23 }
 0x5ae   :  { %11538 = vmatpush.bf16.msra.mxu0 %v18806_v30  ;;  %v10507_v14 = vpop.f32.mrf.mxu2  ;;  %v10547_v48 = vpop.f32.mrf.mxu1 }
 0x5af   :  { %11552 = vmatpush.bf16.msra.mxu1 %v18814_v9  ;;  %v10158_v19 = vadd.f32 %v20194_v2, %v10144_v27  ;;  %v18798_v9 = vld [vmem:[#allocation9 + $0x158] sm:$0xff] }
 0x5b0   :  { %11566 = vmatpush.bf16.msra.mxu2 %v18822_v12  ;;  %v10521_v49 = vpop.f32.mrf.mxu3  ;;  %v10535_v29 = vpop.f32.mrf.mxu0  ;;  %v18830_v12 = vld [vmem:[#allocation9 + $0x258] sm:$0xff] }
 0x5b1   :  { %11470 = vmatpush.bf16.msra.mxu3 %v18764_v7  ;;  %v10172_v30 = vadd.f32 %v19847_v50, %v10158_v19  ;;  %v18796_v50 = vld [vmem:[#allocation9 + $0x148] sm:$0xff] }
 0x5b2   :  { %11539 = vmatpush.bf16.msra.mxu0 %v18805_v62 }
 0x5b3   :  { %11553 = vmatpush.bf16.msra.mxu1 %v18813_v33  ;;  %v10186_v31 = vadd.f32 %v20195_v20, %v10172_v30  ;;  %v5364_v33 = vperm.slane %v20016_v22, 0  ;;  %v18832_v30 = vld [vmem:[#allocation9 + $0x268] sm:$0xff] }
 0x5b4   :  { %11567 = vmatpush.bf16.msra.mxu2 %v18821_v59 }
 0x5b5   :  { %11471 = vmatpush.bf16.msra.mxu3 %v18763_v54  ;;  %v10200_v62 = vadd.f32 %v20196_v38, %v10186_v31  ;;  %v10506_v28 = vadd.f32 %v10505_v34, %v5364_v33  ;;  %v10508_v13 = vadd.f32 %v10507_v14, %v5364_v33  ;;  %v18831_v31 = vld [vmem:[#allocation9 + $0x260] sm:$0xff]  ;;  %v5365_v38 = vperm.slane %v20016_v22, 1  ;;  %v18828_v33 = vld [vmem:[#allocation9 + $0x248] sm:$0xff] }
 0x5b6   :  { %11540 = vmatpush.bf16.msra.mxu0 %v18804_v53  ;;  %v10561_v7 = vpop.f32.mrf.mxu2  ;;  %v18795_v53 = vld [vmem:[#allocation9 + $0x140] sm:$0xff]  ;;  %v10549_v46 = vpop.f32.mrf.mxu1 }
 0x5b7   :  { %11554 = vmatpush.bf16.msra.mxu1 %v18812_v10  ;;  %v10214_v17 = vadd.f32 %v20197_v35, %v10200_v62  ;;  %v10520_v0 = vadd.f32 %v10519_v36, %v10506_v28  ;;  %v10522_v21 = vadd.f32 %v10521_v49, %v10508_v13 }
 0x5b8   :  { %11472 = vmatmul.bf16.vlgmr.msra.gmra.mxu3 %v10797_v57  ;;  %11568 = vmatpush.bf16.msra.mxu2 %v18820_v4 }
 0x5b9   :  { %11520 = vmatpush.bf16.msrb.mxu3 %v18802_v44  ;;  %v10791_v10 = vmax.f32 %v10214_v17, 0.0  ;;  %v10534_v60 = vadd.f32 %v10533_v40, %v10520_v0  ;;  %v10536_v5 = vadd.f32 %v10535_v29, %v10522_v21  ;;  %v18829_v40 = vld [vmem:[#allocation9 + $0x250] sm:$0xff] }
 0x5ba   :  { %11541 = vmatpush.bf16.msra.mxu0 %v18803_v52  ;;  %v10589_v52 = vpop.f32.mrf.mxu0 }
 0x5bb   :  { %11555 = vmatpush.bf16.msra.mxu1 %v18811_v32  ;;  %v10575_v56 = vpop.f32.mrf.mxu3  ;;  %v10801_v54 = vpack.c.bf16 %v10791_v10, %v10781_v11  ;;  %v10548_v61 = vadd.f32 %v10547_v48, %v10534_v60  ;;  %v10550_v6 = vadd.f32 %v10549_v46, %v10536_v5 }
 0x5bc   :  { %11569 = vmatpush.bf16.msra.mxu2 %v18819_v15 }
 0x5bd   :  { %11542 = vmatmul.bf16.vlgmr.msra.gmra.mxu0 %v10802_v41  ;;  %11521 = vmatpush.bf16.msrb.mxu3 %v18801_v39  ;;  %v10562_v37 = vadd.f32 %v10561_v7, %v10548_v61 }
 0x5be   :  { %11556 = vmatmul.bf16.vlgmr.msra.gmra.mxu1 %v10803_v47  ;;  %v10563_v44 = vpop.f32.mrf.mxu2  ;;  %v10603_v16 = vpop.f32.mrf.mxu1 }
 0x5bf   :  { %v10576_v32 = vadd.f32 %v10575_v56, %v10562_v37  ;;  %v10564_v51 = vadd.f32 %v10563_v44, %v10550_v6 }
 0x5c1   :  { %11522 = vmatpush.bf16.msrb.mxu3 %v18800_v3  ;;  %v10590_v23 = vadd.f32 %v10589_v52, %v10576_v32 }
 0x5c2   :  { %v10591_v26 = vpop.f32.mrf.mxu0 }
 0x5c3   :  { %v10577_v45 = vpop.f32.mrf.mxu3  ;;  %v10604_v58 = vadd.f32 %v10603_v16, %v10590_v23 }
 0x5c4   :  { %v10578_v55 = vadd.f32 %v10577_v45, %v10564_v51 }
 0x5c5   :  { %11523 = vmatpush.bf16.msrb.mxu3 %v18799_v63  ;;  %v18833_v63 = vld [vmem:[#allocation9 + $0x270] sm:$0xff] }
 0x5c6   :  { %v10617_v18 = vpop.f32.mrf.mxu2  ;;  %v10592_v43 = vadd.f32 %v10591_v26, %v10578_v55  ;;  %v10605_v39 = vpop.f32.mrf.mxu1 }
 0x5c7   :  { %v10618_v47 = vadd.f32 %v10617_v18, %v10604_v58 }
 0x5c8   :  { %v10606_v41 = vadd.f32 %v10605_v39, %v10592_v43 }
 0x5c9   :  { %11524 = vmatpush.bf16.msrb.mxu3 %v18798_v9 }
 0x5ca   :  { %v10645_v9 = vpop.f32.mrf.mxu0 }
 0x5cb   :  { %v10646_v59 = vadd.f32 %v10645_v9, %v5365_v38 }
 0x5cd   :  { %11525 = vmatpush.bf16.msrb.mxu3 %v18797_v1 }
 0x5ce   :  { %v10619_v25 = vpop.f32.mrf.mxu2  ;;  %v10659_v20 = vpop.f32.mrf.mxu1 }
 0x5cf   :  { %v10620_v27 = vadd.f32 %v10619_v25, %v10606_v41  ;;  %v10660_v17 = vadd.f32 %v10659_v20, %v10646_v59 }
 0x5d1   :  { %11526 = vmatpush.bf16.msrb.mxu3 %v18796_v50  ;;  %v18827_v50 = vld [vmem:[#allocation9 + $0x240] sm:$0xff] }
 0x5d2   :  { %v10647_v14 = vpop.f32.mrf.mxu0 }
 0x5d3   :  { %v10648_v28 = vadd.f32 %v10647_v14, %v5365_v38 }
 0x5d5   :  { %11527 = vmatpush.bf16.msrb.mxu3 %v18795_v53 }
 0x5d6   :  { %v10661_v1 = vpop.f32.mrf.mxu1  ;;  %v10673_v62 = vpop.f32.mrf.mxu2 }
 0x5d7   :  { %v10674_v4 = vadd.f32 %v10673_v62, %v10660_v17  ;;  %v10662_v0 = vadd.f32 %v10661_v1, %v10648_v28 }
 0x5d8   :  { %11528 = vmatmul.bf16.vlgmr.msrb.gmra.mxu3 %v10801_v54 }
 0x5d9   :  { %11576 = vmatpush.bf16.msra.mxu3 %v18834_v42 }
 0x5da   :  { %v10701_v48 = vpop.f32.mrf.mxu0 }
 0x5db   :  { %v10631_v57 = vpop.f32.mrf.mxu3 }
 0x5dc   :  { %v10632_v24 = vadd.f32 %v10631_v57, %v10618_v47  ;;  %v18845_v47 = vld [vmem:[#allocation10] ss:$0 sm:$0xff] }
 0x5dd   :  { %11577 = vmatpush.bf16.msra.mxu3 %v18833_v63 }
 0x5de   :  { %v10784_v2 = vmax.f32 %v10632_v24, 0.0  ;;  %v10715_v35 = vpop.f32.mrf.mxu1  ;;  %v10675_v7 = vpop.f32.mrf.mxu2 }
 0x5df   :  { %v10676_v10 = vadd.f32 %v10675_v7, %v10662_v0 }
 0x5e1   :  { %11578 = vmatpush.bf16.msra.mxu3 %v18832_v30 }
 0x5e2   :  { %v10703_v29 = vpop.f32.mrf.mxu0 }
 0x5e3   :  { %v10633_v34 = vpop.f32.mrf.mxu3 }
 0x5e4   :  { %v10634_v3 = vadd.f32 %v10633_v34, %v10620_v27 }
 0x5e5   :  { %11579 = vmatpush.bf16.msra.mxu3 %v18831_v31 }
 0x5e6   :  { %v10794_v19 = vmax.f32 %v10634_v3, 0.0  ;;  %v10717_v21 = vpop.f32.mrf.mxu1  ;;  %v10729_v56 = vpop.f32.mrf.mxu2 }
 0x5e8   :  { %v10804_v36 = vpack.c.bf16 %v10794_v19, %v10784_v2 }
 0x5e9   :  { %11580 = vmatpush.bf16.msra.mxu3 %v18830_v12 }
 0x5ea   :  { %11570 = vmatmul.bf16.vlgmr.msra.gmra.mxu2 %v10804_v36 }
 0x5ed   :  { %11581 = vmatpush.bf16.msra.mxu3 %v18829_v40 }
 0x5ee   :  { %v10731_v52 = vpop.f32.mrf.mxu2 }
 0x5f1   :  { %11582 = vmatpush.bf16.msra.mxu3 %v18828_v33 }
 0x5f5   :  { %11583 = vmatpush.bf16.msra.mxu3 %v18827_v50 }
 0x5fa   :  { %v10757_v60 = vpop.f32.mrf.mxu0 }
 0x5fb   :  { %v10687_v49 = vpop.f32.mrf.mxu3  ;;  %v10771_v5 = vpop.f32.mrf.mxu1 }
 0x5fc   :  { %v10688_v13 = vadd.f32 %v10687_v49, %v10674_v4 }
 0x5fe   :  { %v10702_v22 = vadd.f32 %v10701_v48, %v10688_v13 }
 0x600   :  { %v10716_v8 = vadd.f32 %v10715_v35, %v10702_v22 }
 0x602   :  { %v10730_v54 = vadd.f32 %v10729_v56, %v10716_v8  ;;  %v10759_v32 = vpop.f32.mrf.mxu0  ;;  %v11459_v58 = vpop.f32.mrf.mxu2 }
 0x603   :  { %v10689_v53 = vpop.f32.mrf.mxu3  ;;  %v10773_v18 = vpop.f32.mrf.mxu1  ;;  %v11460_v24 = vadd.f32 %v18845_v47, %v11459_v58 }
 0x604   :  { %v10690_v15 = vadd.f32 %v10689_v53, %v10676_v10 }
 0x606   :  { %v10704_v11 = vadd.f32 %v10703_v29, %v10690_v15 }
 0x608   :  { %v10718_v44 = vadd.f32 %v10717_v21, %v10704_v11 }
 0x60a   :  { %v10732_v37 = vadd.f32 %v10731_v52, %v10718_v44  ;;  %v11461_v41 = vpop.f32.mrf.mxu2 }
 0x60b   :  { %v11462_v42 = vadd.f32 %v18845_v47, %v11461_v41 }
 0x61a   :  { %v11487_v25 = vpop.f32.mrf.mxu0 }
 0x61b   :  { %v10743_v46 = vpop.f32.mrf.mxu3  ;;  %v11501_v3 = vpop.f32.mrf.mxu1 }
 0x61c   :  { %v10744_v61 = vadd.f32 %v10743_v46, %v10730_v54 }
 0x61e   :  { %v10758_v6 = vadd.f32 %v10757_v60, %v10744_v61 }
 0x620   :  { %v10772_v51 = vadd.f32 %v10771_v5, %v10758_v6 }
 0x622   :  { %v10785_v26 = vmax.f32 %v10772_v51, 0.0  ;;  %v11515_v2 = vpop.f32.mrf.mxu2  ;;  %v11489_v36 = vpop.f32.mrf.mxu0 }
 0x623   :  { %v10745_v16 = vpop.f32.mrf.mxu3  ;;  %v11503_v20 = vpop.f32.mrf.mxu1 }
 0x624   :  { %v10746_v45 = vadd.f32 %v10745_v16, %v10732_v37 }
 0x626   :  { %v10760_v55 = vadd.f32 %v10759_v32, %v10746_v45 }
 0x628   :  { %v10774_v23 = vadd.f32 %v10773_v18, %v10760_v55 }
 0x62a   :  { %v10795_v43 = vmax.f32 %v10774_v23, 0.0  ;;  %v11517_v31 = vpop.f32.mrf.mxu2 }
 0x62c   :  { %v10805_v57 = vpack.c.bf16 %v10795_v43, %v10785_v26 }
 0x62e   :  { %11584 = vmatmul.bf16.vlgmr.msra.gmra.mxu3 %v10805_v57 }
 0x63a   :  { %v11543_v1 = vpop.f32.mrf.mxu0 }
 0x63b   :  { %v11473_v39 = vpop.f32.mrf.mxu3  ;;  %v11557_v59 = vpop.f32.mrf.mxu1 }
 0x63c   :  { %v11474_v34 = vadd.f32 %v11473_v39, %v11460_v24 }
 0x63e   :  { %v11488_v19 = vadd.f32 %v11487_v25, %v11474_v34 }
 0x640   :  { %v11502_v9 = vadd.f32 %v11501_v3, %v11488_v19 }
 0x642   :  { %v11516_v14 = vadd.f32 %v11515_v2, %v11502_v9  ;;  %v11545_v28 = vpop.f32.mrf.mxu0 }
 0x643   :  { %v11475_v27 = vpop.f32.mrf.mxu3  ;;  %v11559_v0 = vpop.f32.mrf.mxu1 }
 0x644   :  { %v11476_v30 = vadd.f32 %v11475_v27, %v11462_v42 }
 0x646   :  { %v11490_v12 = vadd.f32 %v11489_v36, %v11476_v30 }
 0x648   :  { %v11504_v38 = vadd.f32 %v11503_v20, %v11490_v12 }
 0x64a   :  { %v11518_v49 = vadd.f32 %v11517_v31, %v11504_v38 }
 0x65b   :  { %v11529_v63 = vpop.f32.mrf.mxu3 }
 0x65c   :  { %v11530_v40 = vadd.f32 %v11529_v63, %v11516_v14 }
 0x65e   :  { %v11544_v33 = vadd.f32 %v11543_v1, %v11530_v40 }
 0x660   :  { %v11558_v35 = vadd.f32 %v11557_v59, %v11544_v33 }
 0x663   :  { %v11531_v62 = vpop.f32.mrf.mxu3 }
 0x664   :  { %v11532_v50 = vadd.f32 %v11531_v62, %v11518_v49 }
 0x666   :  { %v11546_v7 = vadd.f32 %v11545_v28, %v11532_v50 }
 0x668   :  { %v11560_v53 = vadd.f32 %v11559_v0, %v11546_v7 }
 0x66d   :  { %v11571_v48 = vpop.f32.mrf.mxu2 }
 0x66e   :  { %v11572_v17 = vadd.f32 %v11571_v48, %v11558_v35 }
 0x675   :  { %v11573_v29 = vpop.f32.mrf.mxu2 }
 0x676   :  { %v11574_v10 = vadd.f32 %v11573_v29, %v11560_v53 }
 0x6b1   :  { %v11585_v4 = vpop.f32.mrf.mxu3 }
 0x6b2   :  { %v11586_v13 = vadd.f32 %v11585_v4, %v11572_v17 }
 0x6b4   :  { %11590 = vst [vmem:[%s20036_s7] sm:$0xff] %v11586_v13 }
 0x6b9   :  { %v11587_v22 = vpop.f32.mrf.mxu3 }
 0x6ba   :  { %v11588_v21 = vadd.f32 %v11587_v22, %v11574_v10 }
 0x6bc   :  { %11591 = vst [vmem:[%s20036_s7 + $0x8] sm:$0xff] %v11588_v21 }
 0x6bd   :  { %11596 = vsyncpa [#allocation3], 1 }
 0x6be   :  { %11597 = vsyncpa [#allocation5], 1 }
 0x6bf   :  { %11598 = vsyncpa [#allocation8], 1 }
 0x6c0   :  { %11599 = vsyncpa [#allocation11], 1 }

</bundles_post_ra>
